<compile_context>
chip_gen: v7x
topology: tpu7x:2x2x1
jax: 0.10.0
libtpu: 0.0.40
codegen_flags: <defaults>
</compile_context>

<pallas_src>
import functools

import jax
import jax.numpy as jnp
from jax import lax
from jax.experimental import pallas as pl
from jax.experimental.pallas import tpu as pltpu

_NEG = -1.0e30  # pool padding sentinel; never selected because the window center is real


def _roll0(x, s):
    return x if s == 0 else pltpu.roll(x, shift=s, axis=0)


def _build_shift_masks(rows, radius, w_dim):
    """Shift/mask tables for separable 'same' max pooling on a flattened (H*W, C) map.

    rows: (H*W, 1) f32 row index of every flattened position.
    Returns (w_shifts, h_shifts): lists of (static_shift, mask), ordered by distance d,
    two entries (both rotate directions) per d. Masks are computed from the *rolled*
    row ids, so correctness does not depend on the rotate direction convention.
    """
    hw = rows.shape[0]
    w_shifts, h_shifts = [], []
    for d in range(1, radius + 1):
        for s in (d % hw, (hw - d) % hw):                     # neighbours at col +/- d
            rr = _roll0(rows, s)
            w_shifts.append((s, rr == rows))                  # same row, wrap excluded
        for s in ((d * w_dim) % hw, (hw - d * w_dim) % hw):   # neighbours at row +/- d
            rr = _roll0(rows, s)
            h_shifts.append((s, jnp.abs(rr - rows) == jnp.float32(d)))
    return w_shifts, h_shifts


def _maxpool_same(x, w_shifts, h_shifts):
    """Separable stride-1 'same' max pool of x (H*W, C) given shift/mask tables."""
    acc = x
    for s, m in w_shifts:                                     # pass along W
        acc = jnp.maximum(acc, jnp.where(m, _roll0(x, s), _NEG))
    x = acc
    acc = x
    for s, m in h_shifts:                                     # pass along H
        acc = jnp.maximum(acc, jnp.where(m, _roll0(x, s), _NEG))
    return acc


def spp_kernel(x_ref, rows_ref, w1_ref, s1_ref, b1_ref, w2_ref, s2_ref, b2_ref,
               o_ref, *, w_dim, chain, r_max):
    x2d = x_ref[0]                        # (HW, C1) f32
    rows = rows_ref[...]                  # (HW, 1) f32 row ids

    # cv1: 1x1 conv (bf16 MXU matmul) + folded BN + SiLU, epilogue in f32.
    y = jnp.dot(x2d.astype(w1_ref.dtype), w1_ref[...],
                preferred_element_type=jnp.float32)
    y = y * s1_ref[...] + b1_ref[...]
    y = y * jax.nn.sigmoid(y)             # (HW, C_) f32

    # Shift/mask tables shared by all chained pools (built once per grid step).
    w_shifts, h_shifts = _build_shift_masks(rows, r_max, w_dim)

    # cv2 accumulated per pyramid level (identity, pool5, pool9, pool13):
    # the (HW, 4*C_) concat is never materialized.
    acc = jnp.dot(y.astype(w2_ref.dtype), w2_ref[0],
                  preferred_element_type=jnp.float32)
    p = y
    for lvl, k in enumerate(chain, start=1):
        r = k // 2
        p = _maxpool_same(p, w_shifts[:2 * r], h_shifts[:2 * r])
        acc = acc + jnp.dot(p.astype(w2_ref.dtype), w2_ref[lvl],
                            preferred_element_type=jnp.float32)

    # cv2 folded BN + SiLU, once, in f32.
    z = acc * s2_ref[...] + b2_ref[...]
    z = z * jax.nn.sigmoid(z)
    o_ref[0] = z.astype(o_ref.dtype)


def spp_forward(x, w1, s1, b1, w2, s2, b2, ks=(5, 9, 13), matmul_dtype=jnp.bfloat16):
    """SPP forward.  x: (N, C1, H, W) NCHW; w1: (C_, C1); w2: (C2, C_*(len(ks)+1));
    s*/b*: folded BatchNorm per-channel scale / bias (1D)."""
    n, c1, h, w = x.shape
    c_mid = w1.shape[0]
    c2 = w2.shape[0]
    nlvl = len(ks) + 1
    assert w2.shape[1] == c_mid * nlvl

    # Chained ("SPPF") kernel sizes: applying chain[i] to the previous pyramid level
    # reproduces the k=ks[i] stride-1 'same' max pool exactly.
    chain = [ks[0]] + [ks[i] - ks[i - 1] + 1 for i in range(1, len(ks))]
    assert all(k % 2 == 1 and k >= 1 for k in chain)
    r_max = max(chain) // 2
    assert h > 2 * r_max, "row-mask wrap exclusion needs H > 2*r"

    hw = h * w

    # Channels-last, flattened-spatial (lane-dense) layout: (N, H*W, C).
    x2d = jnp.transpose(x, (0, 2, 3, 1)).reshape(n, hw, c1)
    rows = (jnp.arange(hw, dtype=jnp.int32) // w).astype(jnp.float32).reshape(hw, 1)

    w1t = jnp.transpose(w1, (1, 0)).astype(matmul_dtype)             # (C1, C_)
    w2t = jnp.transpose(w2, (1, 0)).astype(matmul_dtype)             # (C_cat, C2)
    w2t = w2t.reshape(nlvl, c_mid, c2)                               # per pyramid level
    s1r = s1.reshape(1, c_mid).astype(jnp.float32)
    b1r = b1.reshape(1, c_mid).astype(jnp.float32)
    s2r = s2.reshape(1, c2).astype(jnp.float32)
    b2r = b2.reshape(1, c2).astype(jnp.float32)

    # Rough per-step VMEM budget; only raise the scoped limit when needed.
    est = (2 * hw * c1 * 4 + 2 * hw * c2 * 4 + (nlvl + 2) * hw * c_mid * 4
           + hw * c2 * 4 + w1t.size * w1t.dtype.itemsize
           + w2t.size * w2t.dtype.itemsize + (4 * r_max + 1) * hw * 4)
    cp_kwargs = dict(dimension_semantics=("parallel",))
    if est > 32 * 1024 * 1024:
        # TODO(synk): on v7x (64 MiB VMEM, 2 TCs) very large feature maps should also
        # be spatially tiled with a 2*r_max-row halo per block instead of whole-map blocks.
        cp_kwargs["vmem_limit_bytes"] = min(int(est * 3 // 2), 100 * 1024 * 1024)

    kern = functools.partial(spp_kernel, w_dim=w, chain=tuple(chain), r_max=r_max)
    out2d = pl.pallas_call(
        kern,
        out_shape=jax.ShapeDtypeStruct((n, hw, c2), x.dtype),
        grid_spec=pltpu.PrefetchScalarGridSpec(
            num_scalar_prefetch=0,
            grid=(n,),
            in_specs=[
                pl.BlockSpec((1, hw, c1), lambda i: (i, 0, 0)),
                pl.BlockSpec((hw, 1), lambda i: (0, 0)),
                pl.BlockSpec((c1, c_mid), lambda i: (0, 0)),
                pl.BlockSpec((1, c_mid), lambda i: (0, 0)),
                pl.BlockSpec((1, c_mid), lambda i: (0, 0)),
                pl.BlockSpec((nlvl, c_mid, c2), lambda i: (0, 0, 0)),
                pl.BlockSpec((1, c2), lambda i: (0, 0)),
                pl.BlockSpec((1, c2), lambda i: (0, 0)),
            ],
            out_specs=pl.BlockSpec((1, hw, c2), lambda i: (i, 0, 0)),
        ),
        compiler_params=pltpu.CompilerParams(**cp_kwargs),
    )(x2d, rows, w1t, s1r, b1r, w2t, s2r, b2r)

    return jnp.transpose(out2d.reshape(n, h, w, c2), (0, 3, 1, 2))


def _fold_bn(gamma, beta, mean, var, eps=1e-3):
    scale = gamma / jnp.sqrt(var + eps)
    bias = beta - mean * scale
    return scale, bias


def _ref_spp(x, w1, s1, b1, w2, s2, b2, ks, matmul_dtype=jnp.float32):
    """Pure-JAX NCHW reference. matmul_dtype=bf16 mirrors the kernel's rounding points."""
    def pw(xx, wt, s, b):
        y = jnp.einsum('oc,nchw->nohw', wt.astype(matmul_dtype), xx.astype(matmul_dtype),
                       preferred_element_type=jnp.float32)
        y = y * s.reshape(1, -1, 1, 1) + b.reshape(1, -1, 1, 1)
        return y * jax.nn.sigmoid(y)

    y = pw(x, w1, s1, b1)
    pools = [y]
    for k in ks:
        p = k // 2
        pools.append(lax.reduce_window(
            y, -jnp.inf, lax.max,
            (1, 1, k, k), (1, 1, 1, 1),
            [(0, 0), (0, 0), (p, p), (p, p)]))
    return pw(jnp.concatenate(pools, axis=1), w2, s2, b2)


if __name__ == "__main__":
    # SPP(c1=4, c2=8), k=(5, 9, 13)  ->  c_ = 2, concat channels = 8
    N, C1, H, W = 2, 4, 16, 16
    C2 = 8
    KS = (5, 9, 13)
    C_ = C1 // 2
    C_CAT = C_ * (len(KS) + 1)

    key = jax.random.PRNGKey(0)
    keys = jax.random.split(key, 11)
    x = jax.random.normal(keys[0], (N, C1, H, W), jnp.float32)

    # cv1 params: 1x1 conv weight (C_, C1) + BN (gamma, beta, mean, var)
    w1 = jax.random.normal(keys[1], (C_, C1), jnp.float32) * 0.3
    g1 = 1.0 + 0.1 * jax.random.normal(keys[2], (C_,), jnp.float32)
    be1 = 0.1 * jax.random.normal(keys[3], (C_,), jnp.float32)
    m1 = 0.1 * jax.random.normal(keys[4], (C_,), jnp.float32)
    v1 = jnp.abs(jax.random.normal(keys[5], (C_,), jnp.float32)) + 0.5
    s1, b1 = _fold_bn(g1, be1, m1, v1)

    # cv2 params: 1x1 conv weight (C2, C_CAT) + BN
    w2 = jax.random.normal(keys[6], (C2, C_CAT), jnp.float32) * 0.3
    g2 = 1.0 + 0.1 * jax.random.normal(keys[7], (C2,), jnp.float32)
    be2 = 0.1 * jax.random.normal(keys[8], (C2,), jnp.float32)
    m2 = 0.1 * jax.random.normal(keys[9], (C2,), jnp.float32)
    v2 = jnp.abs(jax.random.normal(keys[10], (C2,), jnp.float32)) + 0.5
    s2, b2 = _fold_bn(g2, be2, m2, v2)

    out = spp_forward(x, w1, s1, b1, w2, s2, b2, ks=KS)
    out = jax.block_until_ready(out)
    assert out.shape == (N, C2, H, W)

    # Precision-matched reference (same bf16 rounding points as the kernel).
    ref_bf16 = _ref_spp(x, w1, s1, b1, w2, s2, b2, KS, matmul_dtype=jnp.bfloat16)
    err_m = float(jnp.max(jnp.abs(out - ref_bf16)))
    assert jnp.allclose(out, ref_bf16, atol=1e-3, rtol=1e-3), err_m

    # Full-f32 module reference (loosened tolerance: matmul inputs run in bf16 on MXU).
    ref_f32 = _ref_spp(x, w1, s1, b1, w2, s2, b2, KS, matmul_dtype=jnp.float32)
    err_f = float(jnp.max(jnp.abs(out - ref_f32)))
    assert jnp.allclose(out, ref_f32, atol=6e-2, rtol=6e-2), err_f

    print("KERNEL_OK")
</pallas_src>

<mosaic_0001>
module attributes {stable_mosaic.version = 11 : i64} {
  func.func @spp_kernel(%arg0: i32, %arg1: memref<1x256x4xf32, #tpu.memory_space<vmem>>, %arg2: memref<256x1xf32, #tpu.memory_space<vmem>>, %arg3: memref<4x2xbf16, #tpu.memory_space<vmem>>, %arg4: memref<1x2xf32, #tpu.memory_space<vmem>>, %arg5: memref<1x2xf32, #tpu.memory_space<vmem>>, %arg6: memref<4x2x8xbf16, #tpu.memory_space<vmem>>, %arg7: memref<1x8xf32, #tpu.memory_space<vmem>>, %arg8: memref<1x8xf32, #tpu.memory_space<vmem>>, %arg9: memref<1x256x8xf32, #tpu.memory_space<vmem>>) attributes {dimension_semantics = [#tpu.dimension_semantics<parallel>], iteration_bounds = array<i64: 2>, scalar_prefetch = 0 : i64, scratch_operands = 0 : i64, tpu.core_type = #tpu.core_type<tc>, window_params = [{transform_indices = @transform_0, window_bounds = array<i64: 1, 256, 4>}, {pipeline_mode = #tpu.pipeline_mode<synchronous>, transform_indices = @transform_1, window_bounds = array<i64: 256, 1>}, {pipeline_mode = #tpu.pipeline_mode<synchronous>, transform_indices = @transform_2, window_bounds = array<i64: 4, 2>}, {pipeline_mode = #tpu.pipeline_mode<synchronous>, transform_indices = @transform_3, window_bounds = array<i64: 1, 2>}, {pipeline_mode = #tpu.pipeline_mode<synchronous>, transform_indices = @transform_4, window_bounds = array<i64: 1, 2>}, {pipeline_mode = #tpu.pipeline_mode<synchronous>, transform_indices = @transform_5, window_bounds = array<i64: 4, 2, 8>}, {pipeline_mode = #tpu.pipeline_mode<synchronous>, transform_indices = @transform_6, window_bounds = array<i64: 1, 8>}, {pipeline_mode = #tpu.pipeline_mode<synchronous>, transform_indices = @transform_7, window_bounds = array<i64: 1, 8>}, {transform_indices = @transform_8, window_bounds = array<i64: 1, 256, 8>}]} {
    %c0 = arith.constant 0 : index
    %c0_0 = arith.constant 0 : index
    %c0_1 = arith.constant 0 : index
    %0 = vector.load %arg1[%c0, %c0_0, %c0_1] : memref<1x256x4xf32, #tpu.memory_space<vmem>>, vector<1x256x4xf32>
    %1 = vector.shape_cast %0 : vector<1x256x4xf32> to vector<256x4xf32>
    %c0_2 = arith.constant 0 : index
    %c0_3 = arith.constant 0 : index
    %2 = vector.load %arg2[%c0_2, %c0_3] : memref<256x1xf32, #tpu.memory_space<vmem>>, vector<256x1xf32>
    %3 = arith.truncf %1 : vector<256x4xf32> to vector<256x4xbf16>
    %c0_4 = arith.constant 0 : index
    %c0_5 = arith.constant 0 : index
    %4 = vector.load %arg3[%c0_4, %c0_5] : memref<4x2xbf16, #tpu.memory_space<vmem>>, vector<4x2xbf16>
    %cst = arith.constant dense<0.000000e+00> : vector<256x2xf32>
    %5 = tpu.matmul %3, %4, %cst {dimension_numbers = #tpu.dot_dimension_numbers<[1], [0], [0], [1], [0, 0, 1, 1], [], []>} : vector<256x4xbf16>, vector<4x2xbf16>, vector<256x2xf32> -> vector<256x2xf32>
    %c0_6 = arith.constant 0 : index
    %c0_7 = arith.constant 0 : index
    %6 = vector.load %arg4[%c0_6, %c0_7] : memref<1x2xf32, #tpu.memory_space<vmem>>, vector<1x2xf32>
    %7 = vector.broadcast %6 : vector<1x2xf32> to vector<256x2xf32>
    %8 = arith.mulf %5, %7 : vector<256x2xf32>
    %c0_8 = arith.constant 0 : index
    %c0_9 = arith.constant 0 : index
    %9 = vector.load %arg5[%c0_8, %c0_9] : memref<1x2xf32, #tpu.memory_space<vmem>>, vector<1x2xf32>
    %10 = vector.broadcast %9 : vector<1x2xf32> to vector<256x2xf32>
    %11 = arith.addf %8, %10 : vector<256x2xf32>
    %12 = arith.negf %11 : vector<256x2xf32>
    %13 = math.exp %12 : vector<256x2xf32>
    %cst_10 = arith.constant 1.000000e+00 : f32
    %14 = vector.broadcast %cst_10 : f32 to vector<256x2xf32>
    %15 = arith.addf %14, %13 : vector<256x2xf32>
    %16 = arith.divf %14, %15 : vector<256x2xf32>
    %17 = arith.mulf %11, %16 : vector<256x2xf32>
    %c1_i32 = arith.constant 1 : i32
    %18 = tpu.dynamic_rotate %2 by %c1_i32 dim 0 : vector<256x1xf32>, i32 -> vector<256x1xf32>
    %19 = arith.cmpf oeq, %18, %2 : vector<256x1xf32>
    %c255_i32 = arith.constant 255 : i32
    %20 = tpu.dynamic_rotate %2 by %c255_i32 dim 0 : vector<256x1xf32>, i32 -> vector<256x1xf32>
    %21 = arith.cmpf oeq, %20, %2 : vector<256x1xf32>
    %c16_i32 = arith.constant 16 : i32
    %22 = tpu.dynamic_rotate %2 by %c16_i32 dim 0 : vector<256x1xf32>, i32 -> vector<256x1xf32>
    %23 = arith.subf %22, %2 : vector<256x1xf32>
    %24 = math.absf %23 : vector<256x1xf32>
    %cst_11 = arith.constant 1.000000e+00 : f32
    %25 = vector.broadcast %cst_11 : f32 to vector<256x1xf32>
    %26 = arith.cmpf oeq, %24, %25 : vector<256x1xf32>
    %c240_i32 = arith.constant 240 : i32
    %27 = tpu.dynamic_rotate %2 by %c240_i32 dim 0 : vector<256x1xf32>, i32 -> vector<256x1xf32>
    %28 = arith.subf %27, %2 : vector<256x1xf32>
    %29 = math.absf %28 : vector<256x1xf32>
    %cst_12 = arith.constant 1.000000e+00 : f32
    %30 = vector.broadcast %cst_12 : f32 to vector<256x1xf32>
    %31 = arith.cmpf oeq, %29, %30 : vector<256x1xf32>
    %c2_i32 = arith.constant 2 : i32
    %32 = tpu.dynamic_rotate %2 by %c2_i32 dim 0 : vector<256x1xf32>, i32 -> vector<256x1xf32>
    %33 = arith.cmpf oeq, %32, %2 : vector<256x1xf32>
    %c254_i32 = arith.constant 254 : i32
    %34 = tpu.dynamic_rotate %2 by %c254_i32 dim 0 : vector<256x1xf32>, i32 -> vector<256x1xf32>
    %35 = arith.cmpf oeq, %34, %2 : vector<256x1xf32>
    %c32_i32 = arith.constant 32 : i32
    %36 = tpu.dynamic_rotate %2 by %c32_i32 dim 0 : vector<256x1xf32>, i32 -> vector<256x1xf32>
    %37 = arith.subf %36, %2 : vector<256x1xf32>
    %38 = math.absf %37 : vector<256x1xf32>
    %cst_13 = arith.constant 2.000000e+00 : f32
    %39 = vector.broadcast %cst_13 : f32 to vector<256x1xf32>
    %40 = arith.cmpf oeq, %38, %39 : vector<256x1xf32>
    %c224_i32 = arith.constant 224 : i32
    %41 = tpu.dynamic_rotate %2 by %c224_i32 dim 0 : vector<256x1xf32>, i32 -> vector<256x1xf32>
    %42 = arith.subf %41, %2 : vector<256x1xf32>
    %43 = math.absf %42 : vector<256x1xf32>
    %cst_14 = arith.constant 2.000000e+00 : f32
    %44 = vector.broadcast %cst_14 : f32 to vector<256x1xf32>
    %45 = arith.cmpf oeq, %43, %44 : vector<256x1xf32>
    %46 = arith.truncf %17 : vector<256x2xf32> to vector<256x2xbf16>
    %c0_15 = arith.constant 0 : index
    %c0_16 = arith.constant 0 : index
    %c0_17 = arith.constant 0 : index
    %47 = vector.load %arg6[%c0_15, %c0_16, %c0_17] : memref<4x2x8xbf16, #tpu.memory_space<vmem>>, vector<1x2x8xbf16>
    %48 = vector.shape_cast %47 : vector<1x2x8xbf16> to vector<2x8xbf16>
    %cst_18 = arith.constant dense<0.000000e+00> : vector<256x8xf32>
    %49 = tpu.matmul %46, %48, %cst_18 {dimension_numbers = #tpu.dot_dimension_numbers<[1], [0], [0], [1], [0, 0, 1, 1], [], []>} : vector<256x2xbf16>, vector<2x8xbf16>, vector<256x8xf32> -> vector<256x8xf32>
    %c1_i32_19 = arith.constant 1 : i32
    %50 = tpu.dynamic_rotate %17 by %c1_i32_19 dim 0 : vector<256x2xf32>, i32 -> vector<256x2xf32>
    %cst_20 = arith.constant -1.000000e+30 : f32
    %51 = vector.shape_cast %19 : vector<256x1xi1> to vector<256x1xi1>
    %52 = vector.broadcast %51 : vector<256x1xi1> to vector<256x2xi1>
    %53 = vector.broadcast %cst_20 : f32 to vector<256x2xf32>
    %54 = arith.select %52, %50, %53 : vector<256x2xi1>, vector<256x2xf32>
    %55 = arith.maximumf %17, %54 : vector<256x2xf32>
    %c255_i32_21 = arith.constant 255 : i32
    %56 = tpu.dynamic_rotate %17 by %c255_i32_21 dim 0 : vector<256x2xf32>, i32 -> vector<256x2xf32>
    %cst_22 = arith.constant -1.000000e+30 : f32
    %57 = vector.shape_cast %21 : vector<256x1xi1> to vector<256x1xi1>
    %58 = vector.broadcast %57 : vector<256x1xi1> to vector<256x2xi1>
    %59 = vector.broadcast %cst_22 : f32 to vector<256x2xf32>
    %60 = arith.select %58, %56, %59 : vector<256x2xi1>, vector<256x2xf32>
    %61 = arith.maximumf %55, %60 : vector<256x2xf32>
    %c2_i32_23 = arith.constant 2 : i32
    %62 = tpu.dynamic_rotate %17 by %c2_i32_23 dim 0 : vector<256x2xf32>, i32 -> vector<256x2xf32>
    %cst_24 = arith.constant -1.000000e+30 : f32
    %63 = vector.shape_cast %33 : vector<256x1xi1> to vector<256x1xi1>
    %64 = vector.broadcast %63 : vector<256x1xi1> to vector<256x2xi1>
    %65 = vector.broadcast %cst_24 : f32 to vector<256x2xf32>
    %66 = arith.select %64, %62, %65 : vector<256x2xi1>, vector<256x2xf32>
    %67 = arith.maximumf %61, %66 : vector<256x2xf32>
    %c254_i32_25 = arith.constant 254 : i32
    %68 = tpu.dynamic_rotate %17 by %c254_i32_25 dim 0 : vector<256x2xf32>, i32 -> vector<256x2xf32>
    %cst_26 = arith.constant -1.000000e+30 : f32
    %69 = vector.shape_cast %35 : vector<256x1xi1> to vector<256x1xi1>
    %70 = vector.broadcast %69 : vector<256x1xi1> to vector<256x2xi1>
    %71 = vector.broadcast %cst_26 : f32 to vector<256x2xf32>
    %72 = arith.select %70, %68, %71 : vector<256x2xi1>, vector<256x2xf32>
    %73 = arith.maximumf %67, %72 : vector<256x2xf32>
    %c16_i32_27 = arith.constant 16 : i32
    %74 = tpu.dynamic_rotate %73 by %c16_i32_27 dim 0 : vector<256x2xf32>, i32 -> vector<256x2xf32>
    %cst_28 = arith.constant -1.000000e+30 : f32
    %75 = vector.shape_cast %26 : vector<256x1xi1> to vector<256x1xi1>
    %76 = vector.broadcast %75 : vector<256x1xi1> to vector<256x2xi1>
    %77 = vector.broadcast %cst_28 : f32 to vector<256x2xf32>
    %78 = arith.select %76, %74, %77 : vector<256x2xi1>, vector<256x2xf32>
    %79 = arith.maximumf %73, %78 : vector<256x2xf32>
    %c240_i32_29 = arith.constant 240 : i32
    %80 = tpu.dynamic_rotate %73 by %c240_i32_29 dim 0 : vector<256x2xf32>, i32 -> vector<256x2xf32>
    %cst_30 = arith.constant -1.000000e+30 : f32
    %81 = vector.shape_cast %31 : vector<256x1xi1> to vector<256x1xi1>
    %82 = vector.broadcast %81 : vector<256x1xi1> to vector<256x2xi1>
    %83 = vector.broadcast %cst_30 : f32 to vector<256x2xf32>
    %84 = arith.select %82, %80, %83 : vector<256x2xi1>, vector<256x2xf32>
    %85 = arith.maximumf %79, %84 : vector<256x2xf32>
    %c32_i32_31 = arith.constant 32 : i32
    %86 = tpu.dynamic_rotate %73 by %c32_i32_31 dim 0 : vector<256x2xf32>, i32 -> vector<256x2xf32>
    %cst_32 = arith.constant -1.000000e+30 : f32
    %87 = vector.shape_cast %40 : vector<256x1xi1> to vector<256x1xi1>
    %88 = vector.broadcast %87 : vector<256x1xi1> to vector<256x2xi1>
    %89 = vector.broadcast %cst_32 : f32 to vector<256x2xf32>
    %90 = arith.select %88, %86, %89 : vector<256x2xi1>, vector<256x2xf32>
    %91 = arith.maximumf %85, %90 : vector<256x2xf32>
    %c224_i32_33 = arith.constant 224 : i32
    %92 = tpu.dynamic_rotate %73 by %c224_i32_33 dim 0 : vector<256x2xf32>, i32 -> vector<256x2xf32>
    %cst_34 = arith.constant -1.000000e+30 : f32
    %93 = vector.shape_cast %45 : vector<256x1xi1> to vector<256x1xi1>
    %94 = vector.broadcast %93 : vector<256x1xi1> to vector<256x2xi1>
    %95 = vector.broadcast %cst_34 : f32 to vector<256x2xf32>
    %96 = arith.select %94, %92, %95 : vector<256x2xi1>, vector<256x2xf32>
    %97 = arith.maximumf %91, %96 : vector<256x2xf32>
    %98 = arith.truncf %97 : vector<256x2xf32> to vector<256x2xbf16>
    %c1 = arith.constant 1 : index
    %c0_35 = arith.constant 0 : index
    %c0_36 = arith.constant 0 : index
    %99 = vector.load %arg6[%c1, %c0_35, %c0_36] : memref<4x2x8xbf16, #tpu.memory_space<vmem>>, vector<1x2x8xbf16>
    %100 = vector.shape_cast %99 : vector<1x2x8xbf16> to vector<2x8xbf16>
    %cst_37 = arith.constant dense<0.000000e+00> : vector<256x8xf32>
    %101 = tpu.matmul %98, %100, %cst_37 {dimension_numbers = #tpu.dot_dimension_numbers<[1], [0], [0], [1], [0, 0, 1, 1], [], []>} : vector<256x2xbf16>, vector<2x8xbf16>, vector<256x8xf32> -> vector<256x8xf32>
    %102 = arith.addf %49, %101 : vector<256x8xf32>
    %c1_i32_38 = arith.constant 1 : i32
    %103 = tpu.dynamic_rotate %97 by %c1_i32_38 dim 0 : vector<256x2xf32>, i32 -> vector<256x2xf32>
    %cst_39 = arith.constant -1.000000e+30 : f32
    %104 = vector.shape_cast %19 : vector<256x1xi1> to vector<256x1xi1>
    %105 = vector.broadcast %104 : vector<256x1xi1> to vector<256x2xi1>
    %106 = vector.broadcast %cst_39 : f32 to vector<256x2xf32>
    %107 = arith.select %105, %103, %106 : vector<256x2xi1>, vector<256x2xf32>
    %108 = arith.maximumf %97, %107 : vector<256x2xf32>
    %c255_i32_40 = arith.constant 255 : i32
    %109 = tpu.dynamic_rotate %97 by %c255_i32_40 dim 0 : vector<256x2xf32>, i32 -> vector<256x2xf32>
    %cst_41 = arith.constant -1.000000e+30 : f32
    %110 = vector.shape_cast %21 : vector<256x1xi1> to vector<256x1xi1>
    %111 = vector.broadcast %110 : vector<256x1xi1> to vector<256x2xi1>
    %112 = vector.broadcast %cst_41 : f32 to vector<256x2xf32>
    %113 = arith.select %111, %109, %112 : vector<256x2xi1>, vector<256x2xf32>
    %114 = arith.maximumf %108, %113 : vector<256x2xf32>
    %c2_i32_42 = arith.constant 2 : i32
    %115 = tpu.dynamic_rotate %97 by %c2_i32_42 dim 0 : vector<256x2xf32>, i32 -> vector<256x2xf32>
    %cst_43 = arith.constant -1.000000e+30 : f32
    %116 = vector.shape_cast %33 : vector<256x1xi1> to vector<256x1xi1>
    %117 = vector.broadcast %116 : vector<256x1xi1> to vector<256x2xi1>
    %118 = vector.broadcast %cst_43 : f32 to vector<256x2xf32>
    %119 = arith.select %117, %115, %118 : vector<256x2xi1>, vector<256x2xf32>
    %120 = arith.maximumf %114, %119 : vector<256x2xf32>
    %c254_i32_44 = arith.constant 254 : i32
    %121 = tpu.dynamic_rotate %97 by %c254_i32_44 dim 0 : vector<256x2xf32>, i32 -> vector<256x2xf32>
    %cst_45 = arith.constant -1.000000e+30 : f32
    %122 = vector.shape_cast %35 : vector<256x1xi1> to vector<256x1xi1>
    %123 = vector.broadcast %122 : vector<256x1xi1> to vector<256x2xi1>
    %124 = vector.broadcast %cst_45 : f32 to vector<256x2xf32>
    %125 = arith.select %123, %121, %124 : vector<256x2xi1>, vector<256x2xf32>
    %126 = arith.maximumf %120, %125 : vector<256x2xf32>
    %c16_i32_46 = arith.constant 16 : i32
    %127 = tpu.dynamic_rotate %126 by %c16_i32_46 dim 0 : vector<256x2xf32>, i32 -> vector<256x2xf32>
    %cst_47 = arith.constant -1.000000e+30 : f32
    %128 = vector.shape_cast %26 : vector<256x1xi1> to vector<256x1xi1>
    %129 = vector.broadcast %128 : vector<256x1xi1> to vector<256x2xi1>
    %130 = vector.broadcast %cst_47 : f32 to vector<256x2xf32>
    %131 = arith.select %129, %127, %130 : vector<256x2xi1>, vector<256x2xf32>
    %132 = arith.maximumf %126, %131 : vector<256x2xf32>
    %c240_i32_48 = arith.constant 240 : i32
    %133 = tpu.dynamic_rotate %126 by %c240_i32_48 dim 0 : vector<256x2xf32>, i32 -> vector<256x2xf32>
    %cst_49 = arith.constant -1.000000e+30 : f32
    %134 = vector.shape_cast %31 : vector<256x1xi1> to vector<256x1xi1>
    %135 = vector.broadcast %134 : vector<256x1xi1> to vector<256x2xi1>
    %136 = vector.broadcast %cst_49 : f32 to vector<256x2xf32>
    %137 = arith.select %135, %133, %136 : vector<256x2xi1>, vector<256x2xf32>
    %138 = arith.maximumf %132, %137 : vector<256x2xf32>
    %c32_i32_50 = arith.constant 32 : i32
    %139 = tpu.dynamic_rotate %126 by %c32_i32_50 dim 0 : vector<256x2xf32>, i32 -> vector<256x2xf32>
    %cst_51 = arith.constant -1.000000e+30 : f32
    %140 = vector.shape_cast %40 : vector<256x1xi1> to vector<256x1xi1>
    %141 = vector.broadcast %140 : vector<256x1xi1> to vector<256x2xi1>
    %142 = vector.broadcast %cst_51 : f32 to vector<256x2xf32>
    %143 = arith.select %141, %139, %142 : vector<256x2xi1>, vector<256x2xf32>
    %144 = arith.maximumf %138, %143 : vector<256x2xf32>
    %c224_i32_52 = arith.constant 224 : i32
    %145 = tpu.dynamic_rotate %126 by %c224_i32_52 dim 0 : vector<256x2xf32>, i32 -> vector<256x2xf32>
    %cst_53 = arith.constant -1.000000e+30 : f32
    %146 = vector.shape_cast %45 : vector<256x1xi1> to vector<256x1xi1>
    %147 = vector.broadcast %146 : vector<256x1xi1> to vector<256x2xi1>
    %148 = vector.broadcast %cst_53 : f32 to vector<256x2xf32>
    %149 = arith.select %147, %145, %148 : vector<256x2xi1>, vector<256x2xf32>
    %150 = arith.maximumf %144, %149 : vector<256x2xf32>
    %151 = arith.truncf %150 : vector<256x2xf32> to vector<256x2xbf16>
    %c2 = arith.constant 2 : index
    %c0_54 = arith.constant 0 : index
    %c0_55 = arith.constant 0 : index
    %152 = vector.load %arg6[%c2, %c0_54, %c0_55] : memref<4x2x8xbf16, #tpu.memory_space<vmem>>, vector<1x2x8xbf16>
    %153 = vector.shape_cast %152 : vector<1x2x8xbf16> to vector<2x8xbf16>
    %cst_56 = arith.constant dense<0.000000e+00> : vector<256x8xf32>
    %154 = tpu.matmul %151, %153, %cst_56 {dimension_numbers = #tpu.dot_dimension_numbers<[1], [0], [0], [1], [0, 0, 1, 1], [], []>} : vector<256x2xbf16>, vector<2x8xbf16>, vector<256x8xf32> -> vector<256x8xf32>
    %155 = arith.addf %102, %154 : vector<256x8xf32>
    %c1_i32_57 = arith.constant 1 : i32
    %156 = tpu.dynamic_rotate %150 by %c1_i32_57 dim 0 : vector<256x2xf32>, i32 -> vector<256x2xf32>
    %cst_58 = arith.constant -1.000000e+30 : f32
    %157 = vector.shape_cast %19 : vector<256x1xi1> to vector<256x1xi1>
    %158 = vector.broadcast %157 : vector<256x1xi1> to vector<256x2xi1>
    %159 = vector.broadcast %cst_58 : f32 to vector<256x2xf32>
    %160 = arith.select %158, %156, %159 : vector<256x2xi1>, vector<256x2xf32>
    %161 = arith.maximumf %150, %160 : vector<256x2xf32>
    %c255_i32_59 = arith.constant 255 : i32
    %162 = tpu.dynamic_rotate %150 by %c255_i32_59 dim 0 : vector<256x2xf32>, i32 -> vector<256x2xf32>
    %cst_60 = arith.constant -1.000000e+30 : f32
    %163 = vector.shape_cast %21 : vector<256x1xi1> to vector<256x1xi1>
    %164 = vector.broadcast %163 : vector<256x1xi1> to vector<256x2xi1>
    %165 = vector.broadcast %cst_60 : f32 to vector<256x2xf32>
    %166 = arith.select %164, %162, %165 : vector<256x2xi1>, vector<256x2xf32>
    %167 = arith.maximumf %161, %166 : vector<256x2xf32>
    %c2_i32_61 = arith.constant 2 : i32
    %168 = tpu.dynamic_rotate %150 by %c2_i32_61 dim 0 : vector<256x2xf32>, i32 -> vector<256x2xf32>
    %cst_62 = arith.constant -1.000000e+30 : f32
    %169 = vector.shape_cast %33 : vector<256x1xi1> to vector<256x1xi1>
    %170 = vector.broadcast %169 : vector<256x1xi1> to vector<256x2xi1>
    %171 = vector.broadcast %cst_62 : f32 to vector<256x2xf32>
    %172 = arith.select %170, %168, %171 : vector<256x2xi1>, vector<256x2xf32>
    %173 = arith.maximumf %167, %172 : vector<256x2xf32>
    %c254_i32_63 = arith.constant 254 : i32
    %174 = tpu.dynamic_rotate %150 by %c254_i32_63 dim 0 : vector<256x2xf32>, i32 -> vector<256x2xf32>
    %cst_64 = arith.constant -1.000000e+30 : f32
    %175 = vector.shape_cast %35 : vector<256x1xi1> to vector<256x1xi1>
    %176 = vector.broadcast %175 : vector<256x1xi1> to vector<256x2xi1>
    %177 = vector.broadcast %cst_64 : f32 to vector<256x2xf32>
    %178 = arith.select %176, %174, %177 : vector<256x2xi1>, vector<256x2xf32>
    %179 = arith.maximumf %173, %178 : vector<256x2xf32>
    %c16_i32_65 = arith.constant 16 : i32
    %180 = tpu.dynamic_rotate %179 by %c16_i32_65 dim 0 : vector<256x2xf32>, i32 -> vector<256x2xf32>
    %cst_66 = arith.constant -1.000000e+30 : f32
    %181 = vector.shape_cast %26 : vector<256x1xi1> to vector<256x1xi1>
    %182 = vector.broadcast %181 : vector<256x1xi1> to vector<256x2xi1>
    %183 = vector.broadcast %cst_66 : f32 to vector<256x2xf32>
    %184 = arith.select %182, %180, %183 : vector<256x2xi1>, vector<256x2xf32>
    %185 = arith.maximumf %179, %184 : vector<256x2xf32>
    %c240_i32_67 = arith.constant 240 : i32
    %186 = tpu.dynamic_rotate %179 by %c240_i32_67 dim 0 : vector<256x2xf32>, i32 -> vector<256x2xf32>
    %cst_68 = arith.constant -1.000000e+30 : f32
    %187 = vector.shape_cast %31 : vector<256x1xi1> to vector<256x1xi1>
    %188 = vector.broadcast %187 : vector<256x1xi1> to vector<256x2xi1>
    %189 = vector.broadcast %cst_68 : f32 to vector<256x2xf32>
    %190 = arith.select %188, %186, %189 : vector<256x2xi1>, vector<256x2xf32>
    %191 = arith.maximumf %185, %190 : vector<256x2xf32>
    %c32_i32_69 = arith.constant 32 : i32
    %192 = tpu.dynamic_rotate %179 by %c32_i32_69 dim 0 : vector<256x2xf32>, i32 -> vector<256x2xf32>
    %cst_70 = arith.constant -1.000000e+30 : f32
    %193 = vector.shape_cast %40 : vector<256x1xi1> to vector<256x1xi1>
    %194 = vector.broadcast %193 : vector<256x1xi1> to vector<256x2xi1>
    %195 = vector.broadcast %cst_70 : f32 to vector<256x2xf32>
    %196 = arith.select %194, %192, %195 : vector<256x2xi1>, vector<256x2xf32>
    %197 = arith.maximumf %191, %196 : vector<256x2xf32>
    %c224_i32_71 = arith.constant 224 : i32
    %198 = tpu.dynamic_rotate %179 by %c224_i32_71 dim 0 : vector<256x2xf32>, i32 -> vector<256x2xf32>
    %cst_72 = arith.constant -1.000000e+30 : f32
    %199 = vector.shape_cast %45 : vector<256x1xi1> to vector<256x1xi1>
    %200 = vector.broadcast %199 : vector<256x1xi1> to vector<256x2xi1>
    %201 = vector.broadcast %cst_72 : f32 to vector<256x2xf32>
    %202 = arith.select %200, %198, %201 : vector<256x2xi1>, vector<256x2xf32>
    %203 = arith.maximumf %197, %202 : vector<256x2xf32>
    %204 = arith.truncf %203 : vector<256x2xf32> to vector<256x2xbf16>
    %c3 = arith.constant 3 : index
    %c0_73 = arith.constant 0 : index
    %c0_74 = arith.constant 0 : index
    %205 = vector.load %arg6[%c3, %c0_73, %c0_74] : memref<4x2x8xbf16, #tpu.memory_space<vmem>>, vector<1x2x8xbf16>
    %206 = vector.shape_cast %205 : vector<1x2x8xbf16> to vector<2x8xbf16>
    %cst_75 = arith.constant dense<0.000000e+00> : vector<256x8xf32>
    %207 = tpu.matmul %204, %206, %cst_75 {dimension_numbers = #tpu.dot_dimension_numbers<[1], [0], [0], [1], [0, 0, 1, 1], [], []>} : vector<256x2xbf16>, vector<2x8xbf16>, vector<256x8xf32> -> vector<256x8xf32>
    %208 = arith.addf %155, %207 : vector<256x8xf32>
    %c0_76 = arith.constant 0 : index
    %c0_77 = arith.constant 0 : index
    %209 = vector.load %arg7[%c0_76, %c0_77] : memref<1x8xf32, #tpu.memory_space<vmem>>, vector<1x8xf32>
    %210 = vector.broadcast %209 : vector<1x8xf32> to vector<256x8xf32>
    %211 = arith.mulf %208, %210 : vector<256x8xf32>
    %c0_78 = arith.constant 0 : index
    %c0_79 = arith.constant 0 : index
    %212 = vector.load %arg8[%c0_78, %c0_79] : memref<1x8xf32, #tpu.memory_space<vmem>>, vector<1x8xf32>
    %213 = vector.broadcast %212 : vector<1x8xf32> to vector<256x8xf32>
    %214 = arith.addf %211, %213 : vector<256x8xf32>
    %215 = arith.negf %214 : vector<256x8xf32>
    %216 = math.exp %215 : vector<256x8xf32>
    %cst_80 = arith.constant 1.000000e+00 : f32
    %217 = vector.broadcast %cst_80 : f32 to vector<256x8xf32>
    %218 = arith.addf %217, %216 : vector<256x8xf32>
    %219 = arith.divf %217, %218 : vector<256x8xf32>
    %220 = arith.mulf %214, %219 : vector<256x8xf32>
    %c0_81 = arith.constant 0 : index
    %c0_82 = arith.constant 0 : index
    %c0_83 = arith.constant 0 : index
    %221 = vector.load %arg9[%c0_81, %c0_82, %c0_83] : memref<1x256x8xf32, #tpu.memory_space<vmem>>, vector<1x256x8xf32>
    %222 = vector.shape_cast %221 : vector<1x256x8xf32> to vector<256x8xf32>
    %223 = vector.shape_cast %220 : vector<256x8xf32> to vector<1x256x8xf32>
    tpu.vector_store %arg9[%c0_81, %c0_82, %c0_83], %223 {strides = array<i32>} : memref<1x256x8xf32, #tpu.memory_space<vmem>>, vector<1x256x8xf32>,
    return
  }
  func.func @transform_0(%arg0: i32) -> (i32, i32, i32) {
    %c0_i32 = arith.constant 0 : i32
    %c0_i32_0 = arith.constant 0 : i32
    %c0_i32_1 = arith.constant 0 : i32
    return %arg0, %c0_i32, %c0_i32_0 : i32, i32, i32
  }
  func.func @transform_1(%arg0: i32) -> (i32, i32) {
    %c0_i32 = arith.constant 0 : i32
    %c0_i32_0 = arith.constant 0 : i32
    %c0_i32_1 = arith.constant 0 : i32
    return %c0_i32, %c0_i32_0 : i32, i32
  }
  func.func @transform_2(%arg0: i32) -> (i32, i32) {
    %c0_i32 = arith.constant 0 : i32
    %c0_i32_0 = arith.constant 0 : i32
    %c0_i32_1 = arith.constant 0 : i32
    return %c0_i32, %c0_i32_0 : i32, i32
  }
  func.func @transform_3(%arg0: i32) -> (i32, i32) {
    %c0_i32 = arith.constant 0 : i32
    %c0_i32_0 = arith.constant 0 : i32
    %c0_i32_1 = arith.constant 0 : i32
    return %c0_i32, %c0_i32_0 : i32, i32
  }
  func.func @transform_4(%arg0: i32) -> (i32, i32) {
    %c0_i32 = arith.constant 0 : i32
    %c0_i32_0 = arith.constant 0 : i32
    %c0_i32_1 = arith.constant 0 : i32
    return %c0_i32, %c0_i32_0 : i32, i32
  }
  func.func @transform_5(%arg0: i32) -> (i32, i32, i32) {
    %c0_i32 = arith.constant 0 : i32
    %c0_i32_0 = arith.constant 0 : i32
    %c0_i32_1 = arith.constant 0 : i32
    %c0_i32_2 = arith.constant 0 : i32
    return %c0_i32, %c0_i32_0, %c0_i32_1 : i32, i32, i32
  }
  func.func @transform_6(%arg0: i32) -> (i32, i32) {
    %c0_i32 = arith.constant 0 : i32
    %c0_i32_0 = arith.constant 0 : i32
    %c0_i32_1 = arith.constant 0 : i32
    return %c0_i32, %c0_i32_0 : i32, i32
  }
  func.func @transform_7(%arg0: i32) -> (i32, i32) {
    %c0_i32 = arith.constant 0 : i32
    %c0_i32_0 = arith.constant 0 : i32
    %c0_i32_1 = arith.constant 0 : i32
    return %c0_i32, %c0_i32_0 : i32, i32
  }
  func.func @transform_8(%arg0: i32) -> (i32, i32, i32) {
    %c0_i32 = arith.constant 0 : i32
    %c0_i32_0 = arith.constant 0 : i32
    %c0_i32_1 = arith.constant 0 : i32
    return %arg0, %c0_i32, %c0_i32_0 : i32, i32, i32
  }
}

</mosaic_0001>

<bundles_post_ra>
// kernel: tpu_custom_call.1
= control target key start
LH: loop header
LB: loop body
LE: loop exit
PB: predicated region body
PF: predicated region fallthrough
CT: control target
= control target key end

     0   :  { %s7555_s27 = smov 0   ;;  %s16150_s0 = inlined_call_operand.vmem [shape: f32[2,256,4], index: 0, kind: input, shape index: {}]   ;;  %s16151_s1 = inlined_call_operand.vmem [shape: f32[256,1], index: 1, kind: input, shape index: {}]   ;;  %s16152_s2 = inlined_call_operand.vmem [shape: bf16[4,2], index: 2, kind: input, shape index: {}]   ;;  %s16153_s3 = inlined_call_operand.vmem [shape: f32[1,2], index: 3, kind: input, shape index: {}]   ;;  %s16154_s4 = inlined_call_operand.vmem [shape: f32[1,2], index: 4, kind: input, shape index: {}]   ;;  %s16155_s5 = inlined_call_operand.vmem [shape: bf16[4,2,8], index: 5, kind: input, shape index: {}]   ;;  %s16156_s6 = inlined_call_operand.vmem [shape: f32[1,8], index: 6, kind: input, shape index: {}]   ;;  %s16157_s7 = inlined_call_operand.vmem [shape: f32[1,8], index: 7, kind: input, shape index: {}]   ;;  %s16158_s8 = inlined_call_operand.vmem [shape: f32[2,256,8], index: 8, kind: output, shape index: {}]  }
   0x1 LB: > { %s6637_s28 = sadd.s32 4294967295, %s7507_s27   ;;  %p6641_p0 = scmp.ge.s32.totalorder %s7507_s27, 1  ;;  %s7507_s27 = sphi %s7555_s27, %s18_s27  }
   0x2   : > { %p262_p1 = scmp.lt.s32.totalorder %s7507_s27, 3 }
   0x4   : > { %p263_p2 = pnand %p6641_p0, %p262_p1 }
   0x6   : > { %266 = sbr.rel (%p263_p2) target bundleno = 1490 (0x5d2), region = 52 }
   0xd   : > { %v387_v0 = vld [vmem:[%s16152_s2] sm:$0x3]  ;;  %vm437_vm0 = vcmask 1041408   ;;  %v7569_v1 = vld [vmem:[%s16151_s1 + $0x8] sm:$0xff]  ;;  %v7574_v2 = vld [vmem:[%s16151_s1 + $0x10] sm:$0xff]  ;;  %v936_v3 = vlaneseq  ;;  %v16162_v4 = vmov 0  }
   0xe   : > { %7154 = vmatprep.subr.msk.bf16.mxu0 %vm437_vm0, %v387_v0  ;;  %7170 = vset.pattern.permute.xlu1 %v16162_v4  ;;  %v439_v5 = vsel %vm437_vm0, %v387_v0, 0  ;;  %v905_v6 = vrot.slane %v7569_v1, 7  ;;  %v906_v7 = vrot.slane %v7574_v2, 7  ;;  %v7582_v8 = vld [vmem:[%s16151_s1] sm:$0xff]  ;;  %v7587_v9 = vld [vmem:[%s16151_s1 + $0xf8] sm:$0xff]  ;;  %p296_p3 = scmp.lt.s32.totalorder %s6637_s28, 1 }
   0xf   : > { %7169 = vset.pattern.permute.xlu0 %v16162_v4  ;;  %6887 = vmatpush3.bf16.msra.mxu0 %v439_v5  ;;  %v7590_v10 = vshrl.u32 %v936_v3, 7  ;;  %v904_v11 = vrot.slane %v7582_v8, 7  ;;  %v935_v12 = vrot.slane %v7587_v9, 7  ;;  %v7597_v13 = vld [vmem:[%s16151_s1 + $0x18] sm:$0xff]  ;;  %v7602_v14 = vld [vmem:[%s16151_s1 + $0x20] sm:$0xff]  ;;  %v7610_v16 = vld [vmem:[%s16151_s1 + $0x28] sm:$0xff] }
  0x10   : > { %s19195_s28 = smov (!%p296_p3, %s6637_s28), 1  ;;  %v907_v15 = vrot.slane %v7597_v13, 7  ;;  %v908_v17 = vrot.slane %v7602_v14, 7  ;;  %v7616_v18 = vld [vmem:[%s16151_s1 + $0x30] sm:$0xff]  ;;  %vm388_vm2 = vcmask 31744   ;;  %v909_v19 = vrot.slane %v7610_v16, 7 }
  0x11   : > { %vm17122_vm1 = vcmp.lt.s32.totalorder %v7590_v10, 1  ;;  %v7623_v20 = vld [vmem:[%s16151_s1 + $0x38] sm:$0xff]  ;;  %v910_v21 = vrot.slane %v7616_v18, 7  ;;  %s6799_s29 = sshll.u32 %s19195_s28, 8  ;;  %v7651_v26 = vld [vmem:[%s16151_s1 + $0x40] sm:$0xff]  ;;  %v7656_v27 = vld [vmem:[%s16151_s1 + $0x48] sm:$0xff] }
  0x12   : > { %v968_v22 = vsel %vm17122_vm1, %v905_v6, %v906_v7  ;;  %v970_v23 = vsel %vm17122_vm1, %v935_v12, %v904_v11  ;;  %v967_v24 = vsel %vm17122_vm1, %v906_v7, %v907_v15  ;;  %v969_v25 = vsel %vm17122_vm1, %v904_v11, %v905_v6  ;;  %s7644_s10 = scalar_lea.vmem %s16150_s0, %s6799_s29  ;;  %v7692_v50 = vld [vmem:[%s16151_s1 + $0x50] sm:$0xff]  ;;  %v7697_v51 = vld [vmem:[%s16151_s1 + $0x58] sm:$0xff]  ;;  %v7715_v61 = vld [vmem:[%s16151_s1 + $0x60] sm:$0xff]  ;;  %s15916_s16 = scalar_lea.vmem %s16158_s8, %s6799_s29 }
  0x13   : > { %vm973_vm3 = vcmp.eq.f32.partialorder %v968_v22, %v7574_v2  ;;  %vm971_vm4 = vcmp.eq.f32.partialorder %v970_v23, %v7582_v8  ;;  %vm974_vm5 = vcmp.eq.f32.partialorder %v967_v24, %v7597_v13  ;;  %vm972_vm6 = vcmp.eq.f32.partialorder %v969_v25, %v7569_v1  ;;  %v307_v30 = vld [vmem:[%s7644_s10] sm:$0xff]  ;;  %v308_v31 = vld [vmem:[%s7644_s10 + $0x8] sm:$0xff]  ;;  %v309_v32 = vld [vmem:[%s7644_s10 + $0x10] sm:$0xff] }
  0x14   : > { %v1761_v28 = vsel %vm973_vm3, 1, %v16162_v4  ;;  %v1759_v29 = vsel %vm971_vm4, 1, %v16162_v4  ;;  %v965_v33 = vsel %vm17122_vm1, %v908_v17, %v909_v19  ;;  %v911_v34 = vrot.slane %v7623_v20, 7  ;;  %v310_v36 = vld [vmem:[%s7644_s10 + $0x18] sm:$0xff]  ;;  %v311_v38 = vld [vmem:[%s7644_s10 + $0x20] sm:$0xff]  ;;  %v312_v39 = vld [vmem:[%s7644_s10 + $0x28] sm:$0xff] }
  0x15   : > { %1798 = vperm.xlu1 %7170, %v1761_v28   ;;  %1792 = vperm.xlu0 %7169, %v1759_v29   ;;  %v371_v35 = vpack.c.bf16 %v308_v31, %v307_v30  ;;  %v966_v37 = vsel %vm17122_vm1, %v907_v15, %v908_v17  ;;  %v372_v40 = vpack.c.bf16 %v310_v36, %v309_v32  ;;  %v1762_v41 = vsel %vm974_vm5, 1, %v16162_v4  ;;  %v313_v44 = vld [vmem:[%s7644_s10 + $0x30] sm:$0xff]  ;;  %v314_v45 = vld [vmem:[%s7644_s10 + $0x38] sm:$0xff]  ;;  %v315_v55 = vld [vmem:[%s7644_s10 + $0x40] sm:$0xff] }
  0x16   : > { %v1760_v42 = vsel %vm972_vm6, 1, %v16162_v4  ;;  %v373_v43 = vpack.c.bf16 %v312_v39, %v311_v38  ;;  %vm976_vm7 = vcmp.eq.f32.partialorder %v965_v33, %v7610_v16  ;;  %vm975_vm8 = vcmp.eq.f32.partialorder %v966_v37, %v7602_v14  ;;  %v316_v56 = vld [vmem:[%s7644_s10 + $0x48] sm:$0xff]  ;;  %v317_v5 = vld [vmem:[%s7644_s10 + $0x50] sm:$0xff]  ;;  %v318_v6 = vld [vmem:[%s7644_s10 + $0x58] sm:$0xff] }
  0x17   : > { %6888 = vmatprep.mubr.msk.bf16.mxu0 %vm388_vm2, %v371_v35  ;;  %v963_v46 = vsel %vm17122_vm1, %v910_v21, %v911_v34  ;;  %v964_v47 = vsel %vm17122_vm1, %v909_v19, %v910_v21  ;;  %v912_v48 = vrot.slane %v7651_v26, 7  ;;  %v913_v49 = vrot.slane %v7656_v27, 7  ;;  %v7720_v62 = vld [vmem:[%s16151_s1 + $0x68] sm:$0xff]  ;;  %v7738_v19 = vld [vmem:[%s16151_s1 + $0x70] sm:$0xff]  ;;  %v7743_v21 = vld [vmem:[%s16151_s1 + $0x78] sm:$0xff] }
  0x18   : > { %6889 = vmatmul.mubr.msk.bf16.vlgmr.msra.gmra.mrb[0].mxu0 %vm388_vm2, %v372_v40  ;;  %v1764_v52 = vsel %vm976_vm7, 1, %v16162_v4  ;;  %v1763_v53 = vsel %vm975_vm8, 1, %v16162_v4  ;;  %v374_v54 = vpack.c.bf16 %v314_v45, %v313_v44  ;;  %vm978_vm9 = vcmp.eq.f32.partialorder %v963_v46, %v7623_v20  ;;  %v319_v25 = vld [vmem:[%s7644_s10 + $0x60] sm:$0xff]  ;;  %v320_v28 = vld [vmem:[%s7644_s10 + $0x68] sm:$0xff]  ;;  %v321_v38 = vld [vmem:[%s7644_s10 + $0x70] sm:$0xff] }
  0x19   : > { %1801 = vperm.xlu1 %7170, %v1762_v41   ;;  %1795 = vperm.xlu0 %7169, %v1760_v42   ;;  %vm977_vm10 = vcmp.eq.f32.partialorder %v964_v47, %v7616_v18  ;;  %v961_v57 = vsel %vm17122_vm1, %v912_v48, %v913_v49  ;;  %v962_v58 = vsel %vm17122_vm1, %v911_v34, %v912_v48  ;;  %v914_v59 = vrot.slane %v7692_v50, 7  ;;  %v7761_v33 = vld [vmem:[%s16151_s1 + $0x80] sm:$0xff]  ;;  %v7766_v34 = vld [vmem:[%s16151_s1 + $0x88] sm:$0xff]  ;;  %v322_v39 = vld [vmem:[%s7644_s10 + $0x78] sm:$0xff] }
  0x1a   : > { %6892 = vmatprep.mubr.msk.bf16.mxu0 %vm388_vm2, %v373_v43  ;;  %v915_v60 = vrot.slane %v7697_v51, 7  ;;  %v1766_v63 = vsel %vm978_vm9, 1, %v16162_v4  ;;  %v1765_v0 = vsel %vm977_vm10, 1, %v16162_v4  ;;  %v375_v3 = vpack.c.bf16 %v316_v56, %v315_v55  ;;  %v7784_v44 = vld [vmem:[%s16151_s1 + $0x90] sm:$0xff]  ;;  %v7789_v45 = vld [vmem:[%s16151_s1 + $0x98] sm:$0xff] }
  0x1b   : > { %vm980_vm11 = vcmp.eq.f32.partialorder %v961_v57, %v7656_v27  ;;  %vm979_vm12 = vcmp.eq.f32.partialorder %v962_v58, %v7651_v26  ;;  %v960_v11 = vsel %vm17122_vm1, %v913_v49, %v914_v59  ;;  %v916_v15 = vrot.slane %v7715_v61, 7  ;;  %v323_v49 = vld [vmem:[%s7644_s10 + $0x80] sm:$0xff]  ;;  %v7812_v58 = vld [vmem:[%s16151_s1 + $0xa8] sm:$0xff] }
  0x1c   : > { %v959_v7 = vsel %vm17122_vm1, %v914_v59, %v915_v60  ;;  %v917_v17 = vrot.slane %v7720_v62, 7  ;;  %v1768_v22 = vsel %vm980_vm11, 1, %v16162_v4  ;;  %v1767_v23 = vsel %vm979_vm12, 1, %v16162_v4  ;;  %v7807_v57 = vld [vmem:[%s16151_s1 + $0xa0] sm:$0xff] }
  0x1d   : > { %1807 = vperm.xlu1 %7170, %v1764_v52   ;;  %1804 = vperm.xlu0 %7169, %v1763_v53   ;;  %v376_v24 = vpack.c.bf16 %v318_v6, %v317_v5  ;;  %vm982_vm13 = vcmp.eq.f32.partialorder %v959_v7, %v7697_v51  ;;  %vm981_vm14 = vcmp.eq.f32.partialorder %v960_v11, %v7692_v50  ;;  %v918_v31 = vrot.slane %v7738_v19, 7  ;;  %v324_v52 = vld [vmem:[%s7644_s10 + $0x88] sm:$0xff] }
  0x1e   : > { %v957_v29 = vsel %vm17122_vm1, %v916_v15, %v917_v17  ;;  %v958_v30 = vsel %vm17122_vm1, %v915_v60, %v916_v15  ;;  %v919_v32 = vrot.slane %v7743_v21, 7  ;;  %v1770_v35 = vsel %vm982_vm13, 1, %v16162_v4  ;;  %v7830_v15 = vld [vmem:[%s16151_s1 + $0xb0] sm:$0xff] }
  0x1f   : > { %v1769_v36 = vsel %vm981_vm14, 1, %v16162_v4  ;;  %v377_v37 = vpack.c.bf16 %v320_v28, %v319_v25  ;;  %vm984_vm15 = vcmp.eq.f32.partialorder %v957_v29, %v7720_v62  ;;  %vm983_vm0 = vcmp.eq.f32.partialorder %v958_v30, %v7715_v61  ;;  %v327_v25 = vld [vmem:[%s7644_s10 + $0xa0] sm:$0xff]  ;;  %v328_v28 = vld [vmem:[%s7644_s10 + $0xa8] sm:$0xff] }
  0x20   : > { %6893 = vmatmul.mubr.msk.bf16.gmra.mrb[4].mxu0 %vm388_vm2, %v374_v54  ;;  %v955_v40 = vsel %vm17122_vm1, %v918_v31, %v919_v32  ;;  %v956_v41 = vsel %vm17122_vm1, %v917_v17, %v918_v31  ;;  %v920_v42 = vrot.slane %v7761_v33, 7  ;;  %v921_v43 = vrot.slane %v7766_v34, 7  ;;  %v7835_v17 = vld [vmem:[%s16151_s1 + $0xb8] sm:$0xff] }
  0x21   : > { %1813 = vperm.xlu1 %7170, %v1766_v63   ;;  %1810 = vperm.xlu0 %7169, %v1765_v0   ;;  %v1772_v46 = vsel %vm984_vm15, 1, %v16162_v4  ;;  %v1771_v47 = vsel %vm983_vm0, 1, %v16162_v4  ;;  %v378_v48 = vpack.c.bf16 %v322_v39, %v321_v38  ;;  %vm986_vm3 = vcmp.eq.f32.partialorder %v955_v40, %v7743_v21  ;;  %v325_v0 = vld [vmem:[%s7644_s10 + $0x90] sm:$0xff] }
  0x22   : > { %6896 = vmatprep.mubr.msk.bf16.mxu0 %vm388_vm2, %v375_v3  ;;  %vm985_vm4 = vcmp.eq.f32.partialorder %v956_v41, %v7738_v19  ;;  %v953_v53 = vsel %vm17122_vm1, %v920_v42, %v921_v43  ;;  %v954_v54 = vsel %vm17122_vm1, %v919_v32, %v920_v42  ;;  %v922_v55 = vrot.slane %v7784_v44, 7  ;;  %v326_v3 = vld [vmem:[%s7644_s10 + $0x98] sm:$0xff]  ;;  %v329_v40 = vld [vmem:[%s7644_s10 + $0xb0] sm:$0xff] }
  0x23   : > { %v923_v56 = vrot.slane %v7789_v45, 7  ;;  %v1774_v59 = vsel %vm986_vm3, 1, %v16162_v4  ;;  %v1773_v60 = vsel %vm985_vm4, 1, %v16162_v4  ;;  %v379_v63 = vpack.c.bf16 %v324_v52, %v323_v49  ;;  %v330_v41 = vld [vmem:[%s7644_s10 + $0xb8] sm:$0xff] }
  0x24   : > { %vm988_vm5 = vcmp.eq.f32.partialorder %v953_v53, %v7766_v34  ;;  %vm987_vm6 = vcmp.eq.f32.partialorder %v954_v54, %v7761_v33  ;;  %v952_v6 = vsel %vm17122_vm1, %v921_v43, %v922_v55  ;;  %v924_v7 = vrot.slane %v7807_v57, 7  ;;  %v7881_v49 = vld [vmem:[%s16151_s1 + $0xd8] sm:$0xff] }
  0x25   : > { %1819 = vperm.xlu1 %7170, %v1768_v22   ;;  %1816 = vperm.xlu0 %7169, %v1767_v23   ;;  %v951_v5 = vsel %vm17122_vm1, %v922_v55, %v923_v56  ;;  %v925_v11 = vrot.slane %v7812_v58, 7  ;;  %v1776_v22 = vsel %vm988_vm5, 1, %v16162_v4  ;;  %v1775_v23 = vsel %vm987_vm6, 1, %v16162_v4  ;;  %v331_v55 = vld [vmem:[%s7644_s10 + $0xc0] sm:$0xff] }
  0x26   : > { %vm990_vm7 = vcmp.eq.f32.partialorder %v951_v5, %v7789_v45  ;;  %vm989_vm8 = vcmp.eq.f32.partialorder %v952_v6, %v7784_v44  ;;  %v950_v30 = vsel %vm17122_vm1, %v923_v56, %v924_v7  ;;  %v926_v31 = vrot.slane %v7830_v15, 7  ;;  %v332_v56 = vld [vmem:[%s7644_s10 + $0xc8] sm:$0xff] }
  0x27   : > { %v949_v29 = vsel %vm17122_vm1, %v924_v7, %v925_v11  ;;  %v927_v32 = vrot.slane %v7835_v17, 7  ;;  %v1777_v38 = vsel %vm989_vm8, 1, %v16162_v4  ;;  %v381_v39 = vpack.c.bf16 %v328_v28, %v327_v25  ;;  %v7904_v5 = vld [vmem:[%s16151_s1 + $0xe8] sm:$0xff]  ;;  %v333_v28 = vld [vmem:[%s7644_s10 + $0xd0] sm:$0xff] }
  0x28   : > { %6897 = vmatmul.mubr.msk.bf16.gmra.mrb[8].mxu0 %vm388_vm2, %v376_v24  ;;  %v380_v24 = vpack.c.bf16 %v326_v3, %v325_v0  ;;  %vm992_vm9 = vcmp.eq.f32.partialorder %v949_v29, %v7812_v58  ;;  %vm991_vm10 = vcmp.eq.f32.partialorder %v950_v30, %v7807_v57  ;;  %v948_v43 = vsel %vm17122_vm1, %v925_v11, %v926_v31  ;;  %v7899_v3 = vld [vmem:[%s16151_s1 + $0xe0] sm:$0xff]  ;;  %v334_v29 = vld [vmem:[%s7644_s10 + $0xd8] sm:$0xff]  ;;  %v7922_v30 = vld [vmem:[%s16151_s1 + $0xf0] sm:$0xff] }
  0x29   : > { %1825 = vperm.xlu1 %7170, %v1770_v35   ;;  %1822 = vperm.xlu0 %7169, %v1769_v36   ;;  %v7853_v35 = vld [vmem:[%s16151_s1 + $0xc0] sm:$0xff]  ;;  %v7858_v36 = vld [vmem:[%s16151_s1 + $0xc8] sm:$0xff]  ;;  %v947_v42 = vsel %vm17122_vm1, %v926_v31, %v927_v32  ;;  %v1780_v52 = vsel %vm992_vm9, 1, %v16162_v4  ;;  %v1779_v53 = vsel %vm991_vm10, 1, %v16162_v4  ;;  %v382_v54 = vpack.c.bf16 %v330_v41, %v329_v40 }
  0x2a   : > { %6900 = vmatprep.mubr.msk.bf16.mxu0 %vm388_vm2, %v377_v37  ;;  %v1778_v37 = vsel %vm990_vm7, 1, %v16162_v4  ;;  %vm994_vm11 = vcmp.eq.f32.partialorder %v947_v42, %v7835_v17  ;;  %vm993_vm12 = vcmp.eq.f32.partialorder %v948_v43, %v7830_v15  ;;  %v931_v0 = vrot.slane %v7881_v49, 7 }
  0x2b   : > { %v1782_v6 = vsel %vm994_vm11, 1, %v16162_v4  ;;  %v1781_v7 = vsel %vm993_vm12, 1, %v16162_v4  ;;  %v383_v11 = vpack.c.bf16 %v332_v56, %v331_v55  ;;  %v933_v25 = vrot.slane %v7904_v5, 7 }
  0x2c   : > { %v934_v42 = vrot.slane %v7922_v30, 7  ;;  %vm1035_vm5 = vcmp.lt.s32.totalorder %v7590_v10, 7 }
  0x2d   : > { %1831 = vperm.xlu1 %7170, %v1772_v46   ;;  %1828 = vperm.xlu0 %7169, %v1771_v47   ;;  %v928_v46 = vrot.slane %v7853_v35, 7  ;;  %v929_v47 = vrot.slane %v7858_v36, 7 }
  0x2e   : > { %v939_v55 = vsel %vm17122_vm1, %v934_v42, %v935_v12  ;;  %v940_v56 = vsel %vm17122_vm1, %v933_v25, %v934_v42 }
  0x2f   : > { %vm1002_vm6 = vcmp.eq.f32.partialorder %v939_v55, %v7587_v9  ;;  %vm1001_vm7 = vcmp.eq.f32.partialorder %v940_v56, %v7922_v30 }
  0x30   : > { %6901 = vmatmul.mubr.msk.bf16.gmra.mrb[12].mxu0 %vm388_vm2, %v378_v48  ;;  %v7876_v48 = vld [vmem:[%s16151_s1 + $0xd0] sm:$0xff] }
  0x31   : > { %1837 = vperm.xlu1 %7170, %v1774_v59   ;;  %1834 = vperm.xlu0 %7169, %v1773_v60   ;;  %v945_v59 = vsel %vm17122_vm1, %v928_v46, %v929_v47  ;;  %v946_v60 = vsel %vm17122_vm1, %v927_v32, %v928_v46 }
  0x32   : > { %6904 = vmatprep.mubr.msk.bf16.mxu0 %vm388_vm2, %v379_v63  ;;  %v930_v63 = vrot.slane %v7876_v48, 7  ;;  %vm996_vm13 = vcmp.eq.f32.partialorder %v945_v59, %v7858_v36  ;;  %vm995_vm14 = vcmp.eq.f32.partialorder %v946_v60, %v7853_v35  ;;  %v1005_v59 = vrot.slane %v7574_v2, 1 }
  0x33   : > { %v1784_v31 = vsel %vm996_vm13, 1, %v16162_v4  ;;  %v1783_v32 = vsel %vm995_vm14, 1, %v16162_v4  ;;  %v1003_v60 = vrot.slane %v7582_v8, 1 }
  0x35   : > { %1843 = vperm.xlu1 %7170, %v1776_v22   ;;  %1840 = vperm.xlu0 %7169, %v1775_v23   ;;  %v943_v22 = vsel %vm17122_vm1, %v930_v63, %v931_v0  ;;  %v944_v23 = vsel %vm17122_vm1, %v929_v47, %v930_v63 }
  0x36   : > { %vm998_vm15 = vcmp.eq.f32.partialorder %v943_v22, %v7881_v49  ;;  %vm997_vm0 = vcmp.eq.f32.partialorder %v944_v23, %v7876_v48  ;;  %v1007_v22 = vrot.slane %v7602_v14, 1  ;;  %v1790_v23 = vsel %vm1002_vm6, 1, %v16162_v4 }
  0x37   : > { %v1786_v43 = vsel %vm998_vm15, 1, %v16162_v4  ;;  %v1785_v46 = vsel %vm997_vm0, 1, %v16162_v4 }
  0x38   : > { %6905 = vmatmul.mubr.msk.bf16.gmra.mrb[16].mxu0 %vm388_vm2, %v380_v24  ;;  %v932_v24 = vrot.slane %v7899_v3, 7 }
  0x39   : > { %1849 = vperm.xlu1 %7170, %v1778_v37   ;;  %1846 = vperm.xlu0 %7169, %v1777_v38   ;;  %v335_v37 = vld [vmem:[%s7644_s10 + $0xe0] sm:$0xff]  ;;  %v336_v38 = vld [vmem:[%s7644_s10 + $0xe8] sm:$0xff] }
  0x3a   : > { %6908 = vmatprep.mubr.msk.bf16.mxu0 %vm388_vm2, %v381_v39  ;;  %v384_v39 = vpack.c.bf16 %v334_v29, %v333_v28  ;;  %v941_v40 = vsel %vm17122_vm1, %v932_v24, %v933_v25  ;;  %v942_v41 = vsel %vm17122_vm1, %v931_v0, %v932_v24  ;;  %v385_v47 = vpack.c.bf16 %v336_v38, %v335_v37 }
  0x3b   : > { %vm1000_vm3 = vcmp.eq.f32.partialorder %v941_v40, %v7904_v5  ;;  %vm999_vm4 = vcmp.eq.f32.partialorder %v942_v41, %v7899_v3  ;;  %v1789_v24 = vsel %vm1001_vm7, 1, %v16162_v4  ;;  %v1008_v29 = vrot.slane %v7610_v16, 1 }
  0x3c   : > { %v1788_v63 = vsel %vm1000_vm3, 1, %v16162_v4  ;;  %v1787_v0 = vsel %vm999_vm4, 1, %v16162_v4  ;;  %v1010_v40 = vrot.slane %v7623_v20, 1  ;;  %v1011_v41 = vrot.slane %v7651_v26, 1 }
  0x3d   : > { %1855 = vperm.xlu1 %7170, %v1780_v52   ;;  %1852 = vperm.xlu0 %7169, %v1779_v53   ;;  %v1004_v52 = vrot.slane %v7569_v1, 1  ;;  %v337_v53 = vld [vmem:[%s7644_s10 + $0xf0] sm:$0xff] }
  0x3f   : > { %v1065_v12 = vsel %vm1035_vm5, %v1004_v52, %v1005_v59 }
  0x40   : > { %6909 = vmatmul.mubr.msk.bf16.gmra.mrb[20].mxu0 %vm388_vm2, %v382_v54  ;;  %v338_v54 = vld [vmem:[%s7644_s10 + $0xf8] sm:$0xff]  ;;  %vm1069_vm8 = vcmp.eq.f32.partialorder %v1065_v12, %v7569_v1 }
  0x41   : > { %1861 = vperm.xlu1 %7170, %v1782_v6   ;;  %1858 = vperm.xlu0 %7169, %v1781_v7   ;;  %v386_v6 = vpack.c.bf16 %v338_v54, %v337_v53  ;;  %v1066_v7 = vsel %vm1035_vm5, %v1003_v60, %v1004_v52  ;;  %v1012_v52 = vrot.slane %v7656_v27, 1  ;;  %v1013_v53 = vrot.slane %v7692_v50, 1 }
  0x42   : > { %6912 = vmatprep.mubr.msk.bf16.mxu0 %vm388_vm2, %v383_v11  ;;  %v1006_v11 = vrot.slane %v7597_v13, 1  ;;  %vm1068_vm9 = vcmp.eq.f32.partialorder %v1066_v7, %v7582_v8 }
  0x43   : > { %v2047_v37 = vsel %vm1068_vm9, 1, %v16162_v4  ;;  %v1057_v56 = vsel %vm1035_vm5, %v1012_v52, %v1013_v53 }
  0x44   : > { %v1063_v25 = vsel %vm1035_vm5, %v1006_v11, %v1007_v22  ;;  %v1064_v28 = vsel %vm1035_vm5, %v1005_v59, %v1006_v11  ;;  %v1058_v59 = vsel %vm1035_vm5, %v1011_v41, %v1012_v52  ;;  %vm1077_vm15 = vcmp.eq.f32.partialorder %v1057_v56, %v7656_v27 }
  0x45   : > { %1867 = vperm.xlu1 %7170, %v1784_v31   ;;  %1864 = vperm.xlu0 %7169, %v1783_v32   ;;  %v1009_v31 = vrot.slane %v7616_v18, 1  ;;  %v2048_v32 = vsel %vm1069_vm8, 1, %v16162_v4  ;;  %vm1071_vm10 = vcmp.eq.f32.partialorder %v1063_v25, %v7597_v13  ;;  %vm1076_vm0 = vcmp.eq.f32.partialorder %v1058_v59, %v7651_v26 }
  0x46   : > { %v2050_v42 = vsel %vm1071_vm10, 1, %v16162_v4  ;;  %v2055_v25 = vsel %vm1076_vm0, 1, %v16162_v4 }
  0x47   : > { %v1061_v38 = vsel %vm1035_vm5, %v1008_v29, %v1009_v31 }
  0x48   : > { %6913 = vmatmul.mubr.msk.bf16.gmra.mrb[24].mxu0 %vm388_vm2, %v384_v39  ;;  %v1062_v39 = vsel %vm1035_vm5, %v1007_v22, %v1008_v29  ;;  %vm1073_vm11 = vcmp.eq.f32.partialorder %v1061_v38, %v7610_v16  ;;  %v1016_v22 = vrot.slane %v7720_v62, 1 }
  0x49   : > { %1873 = vperm.xlu1 %7170, %v1786_v43   ;;  %1870 = vperm.xlu0 %7169, %v1785_v46   ;;  %vm1072_vm12 = vcmp.eq.f32.partialorder %v1062_v39, %v7602_v14  ;;  %v1059_v46 = vsel %vm1035_vm5, %v1010_v40, %v1011_v41  ;;  %v2052_v54 = vsel %vm1073_vm11, 1, %v16162_v4  ;;  %v1020_v41 = vrot.slane %v7766_v34, 1 }
  0x4a   : > { %6916 = vmatprep.mubr.msk.bf16.mxu0 %vm388_vm2, %v385_v47  ;;  %v1060_v47 = vsel %vm1035_vm5, %v1009_v31, %v1010_v40  ;;  %v2051_v55 = vsel %vm1072_vm12, 1, %v16162_v4  ;;  %vm1075_vm13 = vcmp.eq.f32.partialorder %v1059_v46, %v7623_v20  ;;  %v1018_v31 = vrot.slane %v7743_v21, 1 }
  0x4b   : > { %vm1074_vm14 = vcmp.eq.f32.partialorder %v1060_v47, %v7616_v18 }
  0x4c   : > { %v2053_v12 = vsel %vm1074_vm14, 1, %v16162_v4 }
  0x4d   : > { %1879 = vperm.xlu1 %7170, %v1788_v63   ;;  %1876 = vperm.xlu0 %7169, %v1787_v0   ;;  %v1014_v63 = vrot.slane %v7697_v51, 1  ;;  %v1015_v0 = vrot.slane %v7715_v61, 1 }
  0x4f   : > { %v1055_v7 = vsel %vm1035_vm5, %v1014_v63, %v1015_v0  ;;  %v1056_v11 = vsel %vm1035_vm5, %v1013_v53, %v1014_v63  ;;  %v1054_v29 = vsel %vm1035_vm5, %v1015_v0, %v1016_v22  ;;  %v1022_v53 = vrot.slane %v7789_v45, 1 }
  0x50   : > { %6917 = vmatmul.mubr.msk.bf16.gmra.mrb[28].mxu0 %vm388_vm2, %v386_v6  ;;  %vm1070_vm2 = vcmp.eq.f32.partialorder %v1064_v28, %v7574_v2  ;;  %v2054_v6 = vsel %vm1075_vm13, 1, %v16162_v4  ;;  %vm1079_vm3 = vcmp.eq.f32.partialorder %v1055_v7, %v7697_v51  ;;  %vm1078_vm4 = vcmp.eq.f32.partialorder %v1056_v11, %v7692_v50 }
  0x51   : > { %1885 = vperm.xlu1 %7170, %v1790_v23   ;;  %1882 = vperm.xlu0 %7169, %v1789_v24   ;;  %v2049_v43 = vsel %vm1070_vm2, 1, %v16162_v4  ;;  %v1017_v23 = vrot.slane %v7738_v19, 1  ;;  %v2056_v24 = vsel %vm1077_vm15, 1, %v16162_v4  ;;  %v2057_v38 = vsel %vm1078_vm4, 1, %v16162_v4 }
  0x52   : > { %vm1080_vm7 = vcmp.eq.f32.partialorder %v1054_v29, %v7715_v61  ;;  %v1024_v0 = vrot.slane %v7812_v58, 1 }
  0x53   : > { %v1053_v28 = vsel %vm1035_vm5, %v1016_v22, %v1017_v23  ;;  %v1052_v40 = vsel %vm1035_vm5, %v1017_v23, %v1018_v31  ;;  %v2059_v46 = vsel %vm1080_vm7, 1, %v16162_v4  ;;  %v1026_v23 = vrot.slane %v7835_v17, 1 }
  0x54   : > { %vm1081_vm6 = vcmp.eq.f32.partialorder %v1053_v28, %v7720_v62  ;;  %vm1082_vm9 = vcmp.eq.f32.partialorder %v1052_v40, %v7738_v19 }
  0x55   : > { %2083 = vperm.xlu1 %7170, %v2048_v32   ;;  %2080 = vperm.xlu0 %7169, %v2047_v37   ;;  %v1019_v32 = vrot.slane %v7761_v33, 1  ;;  %v2058_v37 = vsel %vm1079_vm3, 1, %v16162_v4  ;;  %v2061_v56 = vsel %vm1082_vm9, 1, %v16162_v4 }
  0x57   : > { %v1051_v39 = vsel %vm1035_vm5, %v1018_v31, %v1019_v32  ;;  %v1050_v52 = vsel %vm1035_vm5, %v1019_v32, %v1020_v41  ;;  %v1028_v32 = vrot.slane %v7858_v36, 1 }
  0x58   : > { %vm1083_vm8 = vcmp.eq.f32.partialorder %v1051_v39, %v7743_v21  ;;  %vm1084_vm2 = vcmp.eq.f32.partialorder %v1050_v52, %v7761_v33 }
  0x59   : > { %2089 = vperm.xlu1 %7170, %v2050_v42   ;;  %2086 = vperm.xlu0 %7169, %v2049_v43   ;;  %v1021_v42 = vrot.slane %v7784_v44, 1  ;;  %v2060_v43 = vsel %vm1081_vm6, 1, %v16162_v4  ;;  %v2063_v7 = vsel %vm1084_vm2, 1, %v16162_v4 }
  0x5b   : > { %v1049_v47 = vsel %vm1035_vm5, %v1020_v41, %v1021_v42  ;;  %v1048_v63 = vsel %vm1035_vm5, %v1021_v42, %v1022_v53  ;;  %v1030_v42 = vrot.slane %v7881_v49, 1 }
  0x5c   : > { %vm1085_vm10 = vcmp.eq.f32.partialorder %v1049_v47, %v7766_v34  ;;  %vm1086_vm12 = vcmp.eq.f32.partialorder %v1048_v63, %v7784_v44 }
  0x5d   : > { %2095 = vperm.xlu1 %7170, %v2052_v54   ;;  %2092 = vperm.xlu0 %7169, %v2051_v55   ;;  %v1023_v54 = vrot.slane %v7807_v57, 1  ;;  %v2062_v55 = vsel %vm1083_vm8, 1, %v16162_v4  ;;  %v2065_v28 = vsel %vm1086_vm12, 1, %v16162_v4 }
  0x5f   : > { %v1047_v59 = vsel %vm1035_vm5, %v1022_v53, %v1023_v54  ;;  %v1046_v22 = vsel %vm1035_vm5, %v1023_v54, %v1024_v0  ;;  %v1032_v54 = vrot.slane %v7904_v5, 1 }
  0x60   : > { %vm1087_vm11 = vcmp.eq.f32.partialorder %v1047_v59, %v7789_v45  ;;  %vm1088_vm14 = vcmp.eq.f32.partialorder %v1046_v22, %v7807_v57 }
  0x61   : > { %2101 = vperm.xlu1 %7170, %v2054_v6   ;;  %2098 = vperm.xlu0 %7169, %v2053_v12   ;;  %v1025_v6 = vrot.slane %v7830_v15, 1  ;;  %v2064_v12 = vsel %vm1085_vm10, 1, %v16162_v4  ;;  %v2067_v39 = vsel %vm1088_vm14, 1, %v16162_v4  ;;  %vm1324_vm10 = vcmp.lt.s32.totalorder %v7590_v10, 2 }
  0x63   : > { %v1045_v11 = vsel %vm1035_vm5, %v1024_v0, %v1025_v6  ;;  %v1044_v31 = vsel %vm1035_vm5, %v1025_v6, %v1026_v23  ;;  %v1034_v6 = vrot.slane %v7587_v9, 1 }
  0x64   : > { %vm1089_vm13 = vcmp.eq.f32.partialorder %v1045_v11, %v7812_v58  ;;  %vm1090_vm0 = vcmp.eq.f32.partialorder %v1044_v31, %v7830_v15  ;;  %v1292_v11 = vrot.slane %v7582_v8, 6 }
  0x65   : > { %2107 = vperm.xlu1 %7170, %v2056_v24   ;;  %2104 = vperm.xlu0 %7169, %v2055_v25   ;;  %v1027_v24 = vrot.slane %v7853_v35, 1  ;;  %v2066_v25 = vsel %vm1087_vm11, 1, %v16162_v4  ;;  %v2069_v47 = vsel %vm1090_vm0, 1, %v16162_v4  ;;  %v1067_v22 = vsel %vm1035_vm5, %v1034_v6, %v1003_v60 }
  0x66   : > { %vm1099_vm2 = vcmp.eq.f32.partialorder %v1067_v22, %v7587_v9 }
  0x67   : > { %v1043_v29 = vsel %vm1035_vm5, %v1026_v23, %v1027_v24  ;;  %v1042_v41 = vsel %vm1035_vm5, %v1027_v24, %v1028_v32  ;;  %v1293_v24 = vrot.slane %v7569_v1, 6 }
  0x68   : > { %vm1091_vm15 = vcmp.eq.f32.partialorder %v1043_v29, %v7835_v17  ;;  %vm1092_vm4 = vcmp.eq.f32.partialorder %v1042_v41, %v7853_v35 }
  0x69   : > { %2113 = vperm.xlu1 %7170, %v2058_v37   ;;  %2110 = vperm.xlu0 %7169, %v2057_v38   ;;  %v1029_v37 = vrot.slane %v7876_v48, 1  ;;  %v2068_v38 = vsel %vm1089_vm13, 1, %v16162_v4  ;;  %v2071_v59 = vsel %vm1092_vm4, 1, %v16162_v4  ;;  %v1355_v60 = vsel %vm1324_vm10, %v1292_v11, %v1293_v24 }
  0x6a   : > { %vm1358_vm12 = vcmp.eq.f32.partialorder %v1355_v60, %v7569_v1  ;;  %v1304_v60 = vrot.slane %v7715_v61, 6 }
  0x6b   : > { %v1041_v40 = vsel %vm1035_vm5, %v1028_v32, %v1029_v37  ;;  %v1040_v53 = vsel %vm1035_vm5, %v1029_v37, %v1030_v42  ;;  %v1294_v32 = vrot.slane %v7574_v2, 6  ;;  %v1295_v37 = vrot.slane %v7597_v13, 6 }
  0x6c   : > { %vm1093_vm3 = vcmp.eq.f32.partialorder %v1041_v40, %v7858_v36  ;;  %vm1094_vm7 = vcmp.eq.f32.partialorder %v1040_v53, %v7876_v48 }
  0x6d   : > { %2119 = vperm.xlu1 %7170, %v2060_v43   ;;  %2116 = vperm.xlu0 %7169, %v2059_v46   ;;  %v1031_v43 = vrot.slane %v7899_v3, 1  ;;  %v2070_v46 = vsel %vm1091_vm15, 1, %v16162_v4  ;;  %v1353_v40 = vsel %vm1324_vm10, %v1294_v32, %v1295_v37  ;;  %v1354_v41 = vsel %vm1324_vm10, %v1293_v24, %v1294_v32 }
  0x6e   : > { %vm1360_vm14 = vcmp.eq.f32.partialorder %v1353_v40, %v7597_v13  ;;  %vm1359_vm15 = vcmp.eq.f32.partialorder %v1354_v41, %v7574_v2  ;;  %v1306_v40 = vrot.slane %v7738_v19, 6  ;;  %v1307_v41 = vrot.slane %v7743_v21, 6 }
  0x6f   : > { %v1039_v52 = vsel %vm1035_vm5, %v1030_v42, %v1031_v43  ;;  %v1038_v0 = vsel %vm1035_vm5, %v1031_v43, %v1032_v54  ;;  %v1296_v42 = vrot.slane %v7602_v14, 6  ;;  %v1297_v43 = vrot.slane %v7610_v16, 6 }
  0x70   : > { %vm1095_vm6 = vcmp.eq.f32.partialorder %v1039_v52, %v7881_v49  ;;  %vm1096_vm9 = vcmp.eq.f32.partialorder %v1038_v0, %v7899_v3  ;;  %v2338_v13 = vsel %vm1360_vm14, 1, %v16162_v4  ;;  %v2337_v2 = vsel %vm1359_vm15, 1, %v16162_v4 }
  0x71   : > { %2125 = vperm.xlu1 %7170, %v2062_v55   ;;  %2122 = vperm.xlu0 %7169, %v2061_v56   ;;  %v1033_v55 = vrot.slane %v7922_v30, 1  ;;  %v2072_v56 = vsel %vm1093_vm3, 1, %v16162_v4  ;;  %v2075_v29 = vsel %vm1096_vm9, 1, %v16162_v4  ;;  %v1351_v52 = vsel %vm1324_vm10, %v1296_v42, %v1297_v43 }
  0x72   : > { %v1352_v53 = vsel %vm1324_vm10, %v1295_v37, %v1296_v42  ;;  %vm1362_vm0 = vcmp.eq.f32.partialorder %v1351_v52, %v7610_v16  ;;  %v1341_v52 = vsel %vm1324_vm10, %v1306_v40, %v1307_v41 }
  0x73   : > { %v1037_v63 = vsel %vm1035_vm5, %v1032_v54, %v1033_v55  ;;  %v1036_v23 = vsel %vm1035_vm5, %v1033_v55, %v1034_v6  ;;  %v1298_v54 = vrot.slane %v7616_v18, 6  ;;  %v1299_v55 = vrot.slane %v7623_v20, 6 }
  0x74   : > { %vm1097_vm8 = vcmp.eq.f32.partialorder %v1037_v63, %v7904_v5  ;;  %vm1098_vm11 = vcmp.eq.f32.partialorder %v1036_v23, %v7922_v30  ;;  %vm1361_vm3 = vcmp.eq.f32.partialorder %v1352_v53, %v7602_v14  ;;  %v1300_v6 = vrot.slane %v7651_v26, 6 }
  0x75   : > { %2131 = vperm.xlu1 %7170, %v2064_v12   ;;  %2128 = vperm.xlu0 %7169, %v2063_v7   ;;  %v2074_v12 = vsel %vm1095_vm6, 1, %v16162_v4  ;;  %v2073_v7 = vsel %vm1094_vm7, 1, %v16162_v4  ;;  %v1349_v63 = vsel %vm1324_vm10, %v1298_v54, %v1299_v55  ;;  %v1350_v0 = vsel %vm1324_vm10, %v1297_v43, %v1298_v54 }
  0x76   : > { %v2340_v16 = vsel %vm1362_vm0, 1, %v16162_v4  ;;  %v2339_v14 = vsel %vm1361_vm3, 1, %v16162_v4  ;;  %vm1364_vm4 = vcmp.eq.f32.partialorder %v1349_v63, %v7623_v20  ;;  %vm1363_vm6 = vcmp.eq.f32.partialorder %v1350_v0, %v7616_v18 }
  0x77   : > { %v2342_v20 = vsel %vm1364_vm4, 1, %v16162_v4  ;;  %v2341_v18 = vsel %vm1363_vm6, 1, %v16162_v4  ;;  %v1309_v54 = vrot.slane %v7766_v34, 6 }
  0x79   : > { %2137 = vperm.xlu1 %7170, %v2066_v25   ;;  %2134 = vperm.xlu0 %7169, %v2065_v28   ;;  %v1323_v25 = vrot.slane %v7587_v9, 6  ;;  %v2076_v28 = vsel %vm1097_vm8, 1, %v16162_v4 }
  0x7b   : > { %v1356_v31 = vsel %vm1324_vm10, %v1323_v25, %v1292_v11  ;;  %v1303_v11 = vrot.slane %v7697_v51, 6 }
  0x7c   : > { %vm1357_vm13 = vcmp.eq.f32.partialorder %v1356_v31, %v7582_v8 }
  0x7d   : > { %2143 = vperm.xlu1 %7170, %v2068_v38   ;;  %2140 = vperm.xlu0 %7169, %v2067_v39   ;;  %v2078_v38 = vsel %vm1099_vm2, 1, %v16162_v4  ;;  %v2077_v39 = vsel %vm1098_vm11, 1, %v16162_v4 }
  0x81   : > { %2149 = vperm.xlu1 %7170, %v2070_v46   ;;  %2146 = vperm.xlu0 %7169, %v2069_v47   ;;  %v2336_v46 = vsel %vm1358_vm12, 1, %v16162_v4  ;;  %v2335_v47 = vsel %vm1357_vm13, 1, %v16162_v4  ;;  %vm1372_vm13 = vcmp.eq.f32.partialorder %v1341_v52, %v7743_v21  ;;  %v1319_v52 = vrot.slane %v7881_v49, 6 }
  0x82   : > { %v2350_v21 = vsel %vm1372_vm13, 1, %v16162_v4 }
  0x85   : > { %2155 = vperm.xlu1 %7170, %v2072_v56   ;;  %2152 = vperm.xlu0 %7169, %v2071_v59  }
  0x89   : > { %2161 = vperm.xlu1 %7170, %v2074_v12   ;;  %2158 = vperm.xlu0 %7169, %v2073_v7   ;;  %v1301_v12 = vrot.slane %v7656_v27, 6  ;;  %v1302_v7 = vrot.slane %v7692_v50, 6 }
  0x8b   : > { %v1347_v24 = vsel %vm1324_vm10, %v1300_v6, %v1301_v12  ;;  %v1346_v37 = vsel %vm1324_vm10, %v1301_v12, %v1302_v7  ;;  %v1310_v12 = vrot.slane %v7784_v44, 6 }
  0x8c   : > { %vm1366_vm7 = vcmp.eq.f32.partialorder %v1347_v24, %v7656_v27  ;;  %vm1367_vm2 = vcmp.eq.f32.partialorder %v1346_v37, %v7692_v50  ;;  %v1315_v37 = vrot.slane %v7835_v17, 6 }
  0x8d   : > { %2167 = vperm.xlu1 %7170, %v2076_v28   ;;  %2164 = vperm.xlu0 %7169, %v2075_v29   ;;  %v1348_v28 = vsel %vm1324_vm10, %v1299_v55, %v1300_v6  ;;  %v1345_v29 = vsel %vm1324_vm10, %v1302_v7, %v1303_v11  ;;  %v2344_v27 = vsel %vm1366_vm7, 1, %v16162_v4  ;;  %v2345_v50 = vsel %vm1367_vm2, 1, %v16162_v4 }
  0x8e   : > { %vm1365_vm8 = vcmp.eq.f32.partialorder %v1348_v28, %v7651_v26  ;;  %vm1368_vm9 = vcmp.eq.f32.partialorder %v1345_v29, %v7697_v51  ;;  %v1313_v7 = vrot.slane %v7812_v58, 6 }
  0x8f   : > { %v2343_v26 = vsel %vm1365_vm8, 1, %v16162_v4  ;;  %v2346_v51 = vsel %vm1368_vm9, 1, %v16162_v4 }
  0x91   : > { %2173 = vperm.xlu1 %7170, %v2078_v38   ;;  %2170 = vperm.xlu0 %7169, %v2077_v39   ;;  %v1305_v38 = vrot.slane %v7720_v62, 6  ;;  %v1344_v39 = vsel %vm1324_vm10, %v1303_v11, %v1304_v60 }
  0x92   : > { %vm1369_vm11 = vcmp.eq.f32.partialorder %v1344_v39, %v7715_v61 }
  0x93   : > { %v1342_v53 = vsel %vm1324_vm10, %v1305_v38, %v1306_v40 }
  0x94   : > { %v8146_v1 = vpop.permute.xlu1 %1798  ;;  %v8148_v8 = vpop.permute.xlu0 %1792  ;;  %vm1371_vm14 = vcmp.eq.f32.partialorder %v1342_v53, %v7738_v19  ;;  %v1320_v53 = vrot.slane %v7899_v3, 6 }
  0x95   : > { %17149 = vst [vmem:[#allocation2_spill] sm:$0xff] %v8146_v1  ;;  %17150 = vst [vmem:[#allocation3_spill] sm:$0xff] %v8148_v8  ;;  %2371 = vperm.xlu1 %7170, %v2336_v46   ;;  %2368 = vperm.xlu0 %7169, %v2335_v47   ;;  %v1343_v46 = vsel %vm1324_vm10, %v1304_v60, %v1305_v38  ;;  %v1308_v47 = vrot.slane %v7761_v33, 6  ;;  %v2349_v19 = vsel %vm1371_vm14, 1, %v16162_v4  ;;  %v1314_v60 = vrot.slane %v7830_v15, 6 }
  0x96   : > { %vm1370_vm12 = vcmp.eq.f32.partialorder %v1343_v46, %v7720_v62  ;;  %vm1421_vm14 = vcmp.lt.s32.totalorder %v7590_v10, 6 }
  0x97   : > { %v2348_v61 = vsel %vm1370_vm12, 1, %v16162_v4  ;;  %v1339_v62 = vsel %vm1324_vm10, %v1308_v47, %v1309_v54  ;;  %v1340_v63 = vsel %vm1324_vm10, %v1307_v41, %v1308_v47  ;;  %v1317_v41 = vrot.slane %v7858_v36, 6 }
  0x98   : > { %v8160_v56 = vpop.permute.xlu1 %1801  ;;  %v8162_v59 = vpop.permute.xlu0 %1795  ;;  %vm1374_vm15 = vcmp.eq.f32.partialorder %v1339_v62, %v7766_v34  ;;  %vm1373_vm0 = vcmp.eq.f32.partialorder %v1340_v63, %v7761_v33  ;;  %v1318_v47 = vrot.slane %v7876_v48, 6 }
  0x99   : > { %17151 = vst [vmem:[#allocation4_spill] sm:$0xff] %v8160_v56  ;;  %17152 = vst [vmem:[#allocation5_spill] sm:$0xff] %v8162_v59  ;;  %2377 = vperm.xlu1 %7170, %v2338_v13   ;;  %2374 = vperm.xlu0 %7169, %v2337_v2   ;;  %v2347_v2 = vsel %vm1369_vm11, 1, %v16162_v4  ;;  %v2352_v34 = vsel %vm1374_vm15, 1, %v16162_v4  ;;  %v2351_v33 = vsel %vm1373_vm0, 1, %v16162_v4 }
  0x9c   : > { %v8176_v22 = vpop.permute.xlu1 %1807  ;;  %v8178_v23 = vpop.permute.xlu0 %1804 }
  0x9d   : > { %17153 = vst [vmem:[#allocation6_spill] sm:$0xff] %v8176_v22  ;;  %17154 = vst [vmem:[#allocation7_spill] sm:$0xff] %v8178_v23  ;;  %2383 = vperm.xlu1 %7170, %v2340_v16   ;;  %2380 = vperm.xlu0 %7169, %v2339_v14   ;;  %v1311_v16 = vrot.slane %v7789_v45, 6  ;;  %v1312_v14 = vrot.slane %v7807_v57, 6 }
  0x9f   : > { %v1337_v28 = vsel %vm1324_vm10, %v1310_v12, %v1311_v16  ;;  %v1336_v29 = vsel %vm1324_vm10, %v1311_v16, %v1312_v14  ;;  %v1330_v16 = vsel %vm1324_vm10, %v1317_v41, %v1318_v47 }
  0xa0   : > { %v8191_v31 = vpop.permute.xlu1 %1813  ;;  %v8193_v32 = vpop.permute.xlu0 %1810  ;;  %vm1376_vm3 = vcmp.eq.f32.partialorder %v1337_v28, %v7789_v45  ;;  %vm1377_vm7 = vcmp.eq.f32.partialorder %v1336_v29, %v7807_v57  ;;  %v1333_v45 = vsel %vm1324_vm10, %v1314_v60, %v1315_v37  ;;  %vm1383_vm13 = vcmp.eq.f32.partialorder %v1330_v16, %v7876_v48  ;;  %v8340_v29 = vld [vmem:[%s16151_s1] sm:$0xff] }
  0xa1   : > { %17155 = vst [vmem:[#allocation8_spill] sm:$0xff] %v8191_v31  ;;  %17156 = vst [vmem:[#allocation9_spill] sm:$0xff] %v8193_v32  ;;  %2389 = vperm.xlu1 %7170, %v2342_v20   ;;  %2386 = vperm.xlu0 %7169, %v2341_v18   ;;  %v1338_v20 = vsel %vm1324_vm10, %v1309_v54, %v1310_v12  ;;  %v1335_v18 = vsel %vm1324_vm10, %v1312_v14, %v1313_v7  ;;  %v2354_v39 = vsel %vm1376_vm3, 1, %v16162_v4 }
  0xa2   : > { %vm1375_vm4 = vcmp.eq.f32.partialorder %v1338_v20, %v7784_v44  ;;  %vm1378_vm6 = vcmp.eq.f32.partialorder %v1335_v18, %v7812_v58  ;;  %v1334_v44 = vsel %vm1324_vm10, %v1313_v7, %v1314_v60  ;;  %v2355_v58 = vsel %vm1377_vm7, 1, %v16162_v4  ;;  %v8321_v20 = vld [vmem:[%s16151_s1 + $0x8] sm:$0xff] }
  0xa3   : > { %v2353_v40 = vsel %vm1375_vm4, 1, %v16162_v4  ;;  %v2356_v57 = vsel %vm1378_vm6, 1, %v16162_v4  ;;  %vm1380_vm8 = vcmp.eq.f32.partialorder %v1333_v45, %v7835_v17  ;;  %vm1379_vm9 = vcmp.eq.f32.partialorder %v1334_v44, %v7830_v15  ;;  %v8370_v44 = vld [vmem:[%s16151_s1 + $0x28] sm:$0xff] }
  0xa4   : > { %v8206_v42 = vpop.permute.xlu1 %1819  ;;  %v8208_v43 = vpop.permute.xlu0 %1816  ;;  %v1321_v54 = vrot.slane %v7904_v5, 6  ;;  %v2358_v63 = vsel %vm1380_vm8, 1, %v16162_v4  ;;  %v2357_v15 = vsel %vm1379_vm9, 1, %v16162_v4  ;;  %v1329_v12 = vsel %vm1324_vm10, %v1318_v47, %v1319_v52  ;;  %17174 = vst [vmem:[#allocation27_spill] sm:$0xff] %v8370_v44  ;;  %v8384_v47 = vld [vmem:[%s16151_s1 + $0x38] sm:$0xff] }
  0xa5   : > { %17157 = vst [vmem:[#allocation10_spill] sm:$0xff] %v8206_v42  ;;  %17158 = vst [vmem:[#allocation11_spill] sm:$0xff] %v8208_v43  ;;  %2395 = vperm.xlu1 %7170, %v2344_v27   ;;  %2392 = vperm.xlu0 %7169, %v2343_v26   ;;  %v1316_v26 = vrot.slane %v7853_v35, 6  ;;  %vm1384_vm12 = vcmp.eq.f32.partialorder %v1329_v12, %v7881_v49  ;;  %v16161_v60 = vrot.slane %v8340_v29, 2  ;;  %v8421_v12 = vld [vmem:[%s16151_s1 + $0x48] sm:$0xff]  ;;  %v1413_v43 = vrot.slane %v7853_v35, 2 }
  0xa6   : > { %v1398_v16 = vrot.slane %v8421_v12, 2 }
  0xa8   : > { %v8222_v55 = vpop.permute.xlu1 %1825  ;;  %v8224_v13 = vpop.permute.xlu0 %1822 }
  0xa9   : > { %17159 = vst [vmem:[#allocation12_spill] sm:$0xff] %v8222_v55  ;;  %17160 = vst [vmem:[#allocation13_spill] sm:$0xff] %v8224_v13  ;;  %2401 = vperm.xlu1 %7170, %v2346_v51   ;;  %2398 = vperm.xlu0 %7169, %v2345_v50   ;;  %v1332_v50 = vsel %vm1324_vm10, %v1315_v37, %v1316_v26 }
  0xaa   : > { %vm1381_vm2 = vcmp.eq.f32.partialorder %v1332_v50, %v7853_v35 }
  0xab   : > { %v2359_v7 = vsel %vm1381_vm2, 1, %v16162_v4 }
  0xac   : > { %v8234_v0 = vpop.permute.xlu1 %1831  ;;  %v8236_v6 = vpop.permute.xlu0 %1828 }
  0xad   : > { %17161 = vst [vmem:[#allocation14_spill] sm:$0xff] %v8234_v0  ;;  %17162 = vst [vmem:[#allocation15_spill] sm:$0xff] %v8236_v6  ;;  %2407 = vperm.xlu1 %7170, %v2348_v61   ;;  %2404 = vperm.xlu0 %7169, %v2347_v2   ;;  %v1322_v61 = vrot.slane %v7922_v30, 6  ;;  %v1331_v2 = vsel %vm1324_vm10, %v1316_v26, %v1317_v41  ;;  %v8351_v26 = vld [vmem:[%s16151_s1 + $0xf8] sm:$0xff]  ;;  %v1394_v41 = vrot.slane %v8370_v44, 2  ;;  %v7450_v6 = vld [vmem:[%s16151_s1 + $0xb0] sm:$0xff] }
  0xae   : > { %vm1382_vm11 = vcmp.eq.f32.partialorder %v1331_v2, %v7858_v36  ;;  %v1411_v0 = vrot.slane %v7450_v6, 2 }
  0xaf   : > { %v1325_v14 = vsel %vm1324_vm10, %v1322_v61, %v1323_v25  ;;  %v1326_v28 = vsel %vm1324_vm10, %v1321_v54, %v1322_v61  ;;  %v2360_v37 = vsel %vm1382_vm11, 1, %v16162_v4 }
  0xb0   : > { %v8246_v11 = vpop.permute.xlu1 %1837  ;;  %v8248_v24 = vpop.permute.xlu0 %1834  ;;  %vm1388_vm3 = vcmp.eq.f32.partialorder %v1325_v14, %v8351_v26  ;;  %vm1387_vm4 = vcmp.eq.f32.partialorder %v1326_v28, %v7922_v30 }
  0xb1   : > { %17163 = vst [vmem:[#allocation16_spill] sm:$0xff] %v8246_v11  ;;  %17164 = vst [vmem:[#allocation17_spill] sm:$0xff] %v8248_v24  ;;  %2413 = vperm.xlu1 %7170, %v2350_v21   ;;  %2410 = vperm.xlu0 %7169, %v2349_v19   ;;  %v1327_v21 = vsel %vm1324_vm10, %v1320_v53, %v1321_v54  ;;  %v1328_v19 = vsel %vm1324_vm10, %v1319_v52, %v1320_v53  ;;  %v1396_v52 = vrot.slane %v8384_v47, 2  ;;  %v8390_v53 = vld [vmem:[%s16151_s1 + $0x40] sm:$0xff] }
  0xb2   : > { %vm1386_vm15 = vcmp.eq.f32.partialorder %v1327_v21, %v7904_v5  ;;  %vm1385_vm0 = vcmp.eq.f32.partialorder %v1328_v19, %v7899_v3  ;;  %v1397_v54 = vrot.slane %v8390_v53, 2  ;;  %v8416_v48 = vsel %vm1388_vm3, 1, %v16162_v4 }
  0xb3   : > { %v2363_v49 = vsel %vm1385_vm0, 1, %v16162_v4  ;;  %v2365_v5 = vsel %vm1387_vm4, 1, %v16162_v4 }
  0xb4   : > { %v8264_v38 = vpop.permute.xlu1 %1843  ;;  %v8266_v27 = vpop.permute.xlu0 %1840  ;;  %v1445_v28 = vsel %vm1421_vm14, %v1396_v52, %v1397_v54 }
  0xb5   : > { %17165 = vst [vmem:[#allocation18_spill] sm:$0xff] %v8264_v38  ;;  %17166 = vst [vmem:[#allocation19_spill] sm:$0xff] %v8266_v27  ;;  %2419 = vperm.xlu1 %7170, %v2352_v34   ;;  %2416 = vperm.xlu0 %7169, %v2351_v33   ;;  %v1390_v34 = vrot.slane %v8321_v20, 2  ;;  %v8327_v33 = vld [vmem:[%s16151_s1 + $0x10] sm:$0xff] }
  0xb6   : > { %v1391_v9 = vrot.slane %v8327_v33, 2 }
  0xb7   : > { %v1452_v8 = vsel %vm1421_vm14, %v16161_v60, %v1390_v34 }
  0xb8   : > { %v8278_v46 = vpop.permute.xlu1 %1849  ;;  %v8280_v51 = vpop.permute.xlu0 %1846  ;;  %vm1454_vm7 = vcmp.eq.f32.partialorder %v1452_v8, %v8340_v29 }
  0xb9   : > { %17167 = vst [vmem:[#allocation20_spill] sm:$0xff] %v8278_v46  ;;  %17168 = vst [vmem:[#allocation21_spill] sm:$0xff] %v8280_v51  ;;  %2425 = vperm.xlu1 %7170, %v2354_v39   ;;  %2422 = vperm.xlu0 %7169, %v2353_v40   ;;  %v8358_v39 = vld [vmem:[%s16151_s1 + $0x18] sm:$0xff]  ;;  %v8364_v40 = vld [vmem:[%s16151_s1 + $0x20] sm:$0xff] }
  0xba   : > { %17173 = vst [vmem:[#allocation26_spill] sm:$0xff] %v8358_v39  ;;  %v1392_v36 = vrot.slane %v8358_v39, 2  ;;  %v1393_v45 = vrot.slane %v8364_v40, 2  ;;  %v8511_v46 = vld [vmem:[%s16151_s1 + $0x80] sm:$0xff] }
  0xbb   : > { %v1405_v27 = vrot.slane %v8511_v46, 2 }
  0xbc   : > { %v8295_v62 = vpop.permute.xlu1 %1855  ;;  %v8297_v17 = vpop.permute.xlu0 %1852  ;;  %v1449_v21 = vsel %vm1421_vm14, %v1392_v36, %v1393_v45  ;;  %v1450_v19 = vsel %vm1421_vm14, %v1391_v9, %v1392_v36 }
  0xbd   : > { %17169 = vst [vmem:[#allocation22_spill] sm:$0xff] %v8295_v62  ;;  %17170 = vst [vmem:[#allocation23_spill] sm:$0xff] %v8297_v17  ;;  %2431 = vperm.xlu1 %7170, %v2356_v57   ;;  %2428 = vperm.xlu0 %7169, %v2355_v58   ;;  %v1451_v57 = vsel %vm1421_vm14, %v1390_v34, %v1391_v9  ;;  %v8378_v58 = vld [vmem:[%s16151_s1 + $0x30] sm:$0xff]  ;;  %vm1457_vm8 = vcmp.eq.f32.partialorder %v1449_v21, %v8358_v39 }
  0xbe   : > { %v1395_v50 = vrot.slane %v8378_v58, 2  ;;  %vm1455_vm6 = vcmp.eq.f32.partialorder %v1451_v57, %v8321_v20  ;;  %v8448_v9 = vld [vmem:[%s16151_s1 + $0x50] sm:$0xff]  ;;  %vm1456_vm9 = vcmp.eq.f32.partialorder %v1450_v19, %v8327_v33 }
  0xbf   : > { %v1399_v36 = vrot.slane %v8448_v9, 2 }
  0xc0   : > { %v8330_v25 = vpop.permute.xlu1 %1861  ;;  %v8332_v18 = vpop.permute.xlu0 %1858  ;;  %v1447_v14 = vsel %vm1421_vm14, %v1394_v41, %v1395_v50  ;;  %v1446_v60 = vsel %vm1421_vm14, %v1395_v50, %v1396_v52  ;;  %v17179_v52 = vmov 0  }
  0xc1   : > { %17171 = vst [vmem:[#allocation24_spill] sm:$0xff] %v8330_v25  ;;  %17172 = vst [vmem:[#allocation25_spill] sm:$0xff] %v8332_v18  ;;  %2437 = vperm.xlu1 %7170, %v2358_v63   ;;  %2434 = vperm.xlu0 %7169, %v2357_v15   ;;  %v2362_v63 = vsel %vm1384_vm12, 1, %v16162_v4  ;;  %v2361_v15 = vsel %vm1383_vm13, 1, %v16162_v4  ;;  %v8485_v57 = vsel %vm1454_vm7, 1, %v17179_v52  ;;  %vm1459_vm2 = vcmp.eq.f32.partialorder %v1447_v14, %v8370_v44 }
  0xc2   : > { %vm1461_vm12 = vcmp.eq.f32.partialorder %v1445_v28, %v8384_v47  ;;  %vm1460_vm13 = vcmp.eq.f32.partialorder %v1446_v60, %v8378_v58  ;;  %v1443_v62 = vsel %vm1421_vm14, %v1398_v16, %v1399_v36 }
  0xc3   : > { %v8541_v21 = vsel %vm1461_vm12, 1, %v17179_v52  ;;  %v8546_v19 = vsel %vm1460_vm13, 1, %v17179_v52  ;;  %vm1463_vm0 = vcmp.eq.f32.partialorder %v1443_v62, %v8421_v12  ;;  %v7451_v62 = vld [vmem:[%s16151_s1 + $0xb8] sm:$0xff] }
  0xc4   : > { %v8393_v61 = vpop.permute.xlu1 %1867  ;;  %v8395_v2 = vpop.permute.xlu0 %1864  ;;  %v1412_v55 = vrot.slane %v7451_v62, 2 }
  0xc5   : > { %17175 = vst [vmem:[#allocation28_spill] sm:$0xff] %v8393_v61  ;;  %17176 = vst [vmem:[#allocation29_spill] sm:$0xff] %v8395_v2  ;;  %2443 = vperm.xlu1 %7170, %v2360_v37   ;;  %2440 = vperm.xlu0 %7169, %v2359_v7   ;;  %v2364_v61 = vsel %vm1386_vm15, 1, %v16162_v4  ;;  %v1448_v7 = vsel %vm1421_vm14, %v1393_v45, %v1394_v41  ;;  %v8454_v45 = vld [vmem:[%s16151_s1 + $0x58] sm:$0xff]  ;;  %v8460_v4 = vld [vmem:[%s16151_s1 + $0x60] sm:$0xff] }
  0xc6   : > { %v1400_v41 = vrot.slane %v8454_v45, 2  ;;  %v1401_v50 = vrot.slane %v8460_v4, 2  ;;  %v8473_v2 = vld [vmem:[%s16151_s1 + $0x68] sm:$0xff]  ;;  %vm1458_vm11 = vcmp.eq.f32.partialorder %v1448_v7, %v8364_v40 }
  0xc7   : > { %v1402_v18 = vrot.slane %v8473_v2, 2 }
  0xc8   : > { %v8439_v34 = vpop.permute.xlu1 %1873  ;;  %v8441_v37 = vpop.permute.xlu0 %1870  ;;  %v1441_v51 = vsel %vm1421_vm14, %v1400_v41, %v1401_v50 }
  0xc9   : > { %17177 = vst [vmem:[#allocation30_spill] sm:$0xff] %v8439_v34  ;;  %17178 = vst [vmem:[#allocation31_spill] sm:$0xff] %v8441_v37  ;;  %2449 = vperm.xlu1 %7170, %v2362_v63   ;;  %2446 = vperm.xlu0 %7169, %v2361_v15   ;;  %v8466_v37 = vsel %vm1455_vm6, 1, %v17179_v52  ;;  %v1444_v34 = vsel %vm1421_vm14, %v1397_v54, %v1398_v16  ;;  %v8479_v63 = vld [vmem:[%s16151_s1 + $0x70] sm:$0xff]  ;;  %v8496_v54 = vld [vmem:[%s16151_s1 + $0x78] sm:$0xff]  ;;  %v8522_v16 = vsel %vm1456_vm9, 1, %v17179_v52 }
  0xca   : > { %v1403_v15 = vrot.slane %v8479_v63, 2  ;;  %v1404_v8 = vrot.slane %v8496_v54, 2  ;;  %vm1462_vm15 = vcmp.eq.f32.partialorder %v1444_v34, %v8390_v53  ;;  %v1442_v34 = vsel %vm1421_vm14, %v1399_v36, %v1400_v41  ;;  %v7445_v41 = vld [vmem:[%s16151_s1 + $0x88] sm:$0xff] }
  0xcb   : > { %v8550_v14 = vsel %vm1462_vm15, 1, %v17179_v52  ;;  %vm1465_vm3 = vcmp.eq.f32.partialorder %v1441_v51, %v8454_v45  ;;  %v1440_v7 = vsel %vm1421_vm14, %v1401_v50, %v1402_v18  ;;  %vm1464_vm4 = vcmp.eq.f32.partialorder %v1442_v34, %v8448_v9  ;;  %v8572_v50 = vld [vmem:[%s16151_s1 + $0x90] sm:$0xff] }
  0xcc   : > { %v8499_v25 = vpop.permute.xlu1 %1879  ;;  %v8501_v17 = vpop.permute.xlu0 %1876  ;;  %v1437_v60 = vsel %vm1421_vm14, %v1404_v8, %v1405_v27  ;;  %v1406_v38 = vrot.slane %v7445_v41, 2  ;;  %vm1466_vm7 = vcmp.eq.f32.partialorder %v1440_v7, %v8460_v4  ;;  %v8599_v13 = vsel %vm1465_vm3, 1, %v17179_v52  ;;  %v8659_v7 = vld [vmem:[%s16151_s1 + $0xd0] sm:$0xff] }
  0xcd   : > { %17180 = vst [vmem:[#allocation32_spill] sm:$0xff] %v8499_v25  ;;  %17181 = vst [vmem:[#allocation33_spill] sm:$0xff] %v8501_v17  ;;  %2455 = vperm.xlu1 %7170, %v2364_v61   ;;  %2452 = vperm.xlu0 %7169, %v2363_v49   ;;  %v8517_v17 = vsel %vm1457_vm8, 1, %v17179_v52  ;;  %v1439_v25 = vsel %vm1421_vm14, %v1402_v18, %v1403_v15  ;;  %v8531_v61 = vsel %vm1459_vm2, 1, %v17179_v52  ;;  %v8536_v49 = vsel %vm1458_vm11, 1, %v17179_v52 }
  0xce   : > { %vm1467_vm6 = vcmp.eq.f32.partialorder %v1439_v25, %v8473_v2  ;;  %v1438_v18 = vsel %vm1421_vm14, %v1403_v15, %v1404_v8  ;;  %v8587_v15 = vsel %vm1463_vm0, 1, %v17179_v52  ;;  %v7449_v8 = vld [vmem:[%s16151_s1 + $0xa8] sm:$0xff]  ;;  %vm1469_vm8 = vcmp.eq.f32.partialorder %v1437_v60, %v8496_v54 }
  0xcf   : > { %v1410_v11 = vrot.slane %v7449_v8, 2  ;;  %v8613_v31 = vsel %vm1464_vm4, 1, %v17179_v52  ;;  %v8618_v51 = vsel %vm1467_vm6, 1, %v17179_v52  ;;  %vm1468_vm9 = vcmp.eq.f32.partialorder %v1438_v18, %v8479_v63 }
  0xd0   : > { %v8555_v36 = vpop.permute.xlu1 %1885  ;;  %v8557_v28 = vpop.permute.xlu0 %1882  ;;  %v1436_v45 = vsel %vm1421_vm14, %v1405_v27, %v1406_v38  ;;  %v8628_v35 = vsel %vm1466_vm7, 1, %v17179_v52  ;;  %v8639_v27 = vsel %vm1469_vm8, 1, %v17179_v52  ;;  %v1430_v54 = vsel %vm1421_vm14, %v1411_v0, %v1412_v55 }
  0xd1   : > { %17182 = vst [vmem:[#allocation34_spill] sm:$0xff] %v8555_v36  ;;  %17183 = vst [vmem:[#allocation35_spill] sm:$0xff] %v8557_v28  ;;  %2461 = vperm.xlu1 %7170, %v8416_v48   ;;  %2458 = vperm.xlu0 %7169, %v2365_v5   ;;  %v1407_v28 = vrot.slane %v8572_v50, 2  ;;  %v7447_v36 = vld [vmem:[%s16151_s1 + $0x98] sm:$0xff]  ;;  %v8581_v48 = vld [vmem:[%s16151_s1 + $0xa0] sm:$0xff]  ;;  %vm1470_vm2 = vcmp.eq.f32.partialorder %v1436_v45, %v8511_v46  ;;  %v1417_v63 = vrot.slane %v7899_v3, 2 }
  0xd2   : > { %v1408_v24 = vrot.slane %v7447_v36, 2  ;;  %v1409_v5 = vrot.slane %v8581_v48, 2  ;;  %vm1476_vm4 = vcmp.eq.f32.partialorder %v1430_v54, %v7450_v6  ;;  %v8697_v3 = vld [vmem:[%s16151_s1 + $0xe8] sm:$0xff]  ;;  %v1419_v45 = vrot.slane %v7922_v30, 2 }
  0xd3   : > { %v1435_v34 = vsel %vm1421_vm14, %v1406_v38, %v1407_v28  ;;  %v8648_v38 = vld [vmem:[%s16151_s1 + $0xc8] sm:$0xff]  ;;  %v1418_v46 = vrot.slane %v8697_v3, 2  ;;  %v1101_v6 = vsub.f32 %v8351_v26, %v8321_v20 }
  0xd4   : > { %v8606_v42 = vpop.permute.xlu1 %2083  ;;  %v8608_v32 = vpop.permute.xlu0 %2080  ;;  %v1433_v25 = vsel %vm1421_vm14, %v1408_v24, %v1409_v5  ;;  %v1434_v2 = vsel %vm1421_vm14, %v1407_v28, %v1408_v24  ;;  %v1432_v4 = vsel %vm1421_vm14, %v1409_v5, %v1410_v11  ;;  %v1429_v24 = vsel %vm1421_vm14, %v1412_v55, %v1413_v43  ;;  %v8678_v55 = vld [vmem:[%s16151_s1 + $0xd8] sm:$0xff] }
  0xd5   : > { %17184 = vst [vmem:[#allocation36_spill] sm:$0xff] %v8606_v42  ;;  %17185 = vst [vmem:[#allocation37_spill] sm:$0xff] %v8608_v32  ;;  %2659 = vperm.xlu1 %7170, %v8466_v37   ;;  %2656 = vperm.xlu0 %7169, %v8485_v57   ;;  %v1431_v37 = vsel %vm1421_vm14, %v1410_v11, %v1411_v0  ;;  %v1414_v57 = vrot.slane %v8648_v38, 2  ;;  %v1415_v11 = vrot.slane %v8659_v7, 2  ;;  %v8669_v5 = vsel %vm1468_vm9, 1, %v17179_v52 }
  0xd6   : > { %vm1471_vm11 = vcmp.eq.f32.partialorder %v1435_v34, %v7445_v41  ;;  %vm1473_vm12 = vcmp.eq.f32.partialorder %v1433_v25, %v7447_v36  ;;  %vm1472_vm13 = vcmp.eq.f32.partialorder %v1434_v2, %v8572_v50  ;;  %vm1475_vm15 = vcmp.eq.f32.partialorder %v1431_v37, %v7449_v8  ;;  %v7456_v8 = vld [vmem:[%s16151_s1 + $0xc0] sm:$0xff]  ;;  %v8751_v2 = vld [vmem:[%s16151_s1 + $0xf0] sm:$0xff] }
  0xd7   : > { %vm1474_vm0 = vcmp.eq.f32.partialorder %v1432_v4, %v8581_v48  ;;  %v1416_v0 = vrot.slane %v8678_v55, 2  ;;  %v8685_v41 = vsel %vm1470_vm2, 1, %v17179_v52  ;;  %vm1477_vm3 = vcmp.eq.f32.partialorder %v1429_v24, %v7451_v62 }
  0xd8   : > { %v8662_v28 = vpop.permute.xlu1 %2089  ;;  %v8664_v60 = vpop.permute.xlu0 %2086  ;;  %v1427_v18 = vsel %vm1421_vm14, %v1414_v57, %v1415_v11  ;;  %v8716_v23 = vsel %vm1475_vm15, 1, %v17179_v52  ;;  %v8721_v30 = vsel %vm1474_vm0, 1, %v17179_v52  ;;  %v8727_v36 = vsel %vm1477_vm3, 1, %v17179_v52 }
  0xd9   : > { %17186 = vst [vmem:[#allocation38_spill] sm:$0xff] %v8662_v28  ;;  %17187 = vst [vmem:[#allocation39_spill] sm:$0xff] %v8664_v60  ;;  %2665 = vperm.xlu1 %7170, %v8517_v17   ;;  %2662 = vperm.xlu0 %7169, %v8522_v16   ;;  %v1428_v17 = vsel %vm1421_vm14, %v1413_v43, %v1414_v57  ;;  %v8690_v16 = vsel %vm1471_vm11, 1, %v17179_v52  ;;  %v8707_v43 = vsel %vm1473_vm12, 1, %v17179_v52  ;;  %v8712_v57 = vsel %vm1472_vm13, 1, %v17179_v52 }
  0xda   : > { %v8731_v50 = vsel %vm1476_vm4, 1, %v17179_v52  ;;  %vm1478_vm6 = vcmp.eq.f32.partialorder %v1428_v17, %v7456_v8  ;;  %v1425_v48 = vsel %vm1421_vm14, %v1416_v0, %v1417_v63  ;;  %vm1479_vm7 = vcmp.eq.f32.partialorder %v1427_v18, %v8648_v38 }
  0xdb   : > { %v1423_v62 = vsel %vm1421_vm14, %v1418_v46, %v1419_v45  ;;  %v1424_v25 = vsel %vm1421_vm14, %v1417_v63, %v1418_v46  ;;  %v1100_v37 = vsub.f32 %v8751_v2, %v8340_v29  ;;  %v1103_v4 = vsub.f32 %v8321_v20, %v8358_v39 }
  0xdc   : > { %v8701_v34 = vpop.permute.xlu1 %2095  ;;  %v8703_v32 = vpop.permute.xlu0 %2092  ;;  %vm1481_vm8 = vcmp.eq.f32.partialorder %v1425_v48, %v8678_v55  ;;  %v1105_v63 = vsub.f32 %v8358_v39, %v8370_v44  ;;  %v8774_v17 = vsel %vm1479_vm7, 1, %v17179_v52  ;;  %v1104_v46 = vsub.f32 %v8327_v33, %v8364_v40 }
  0xdd   : > { %17188 = vst [vmem:[#allocation40_spill] sm:$0xff] %v8701_v34  ;;  %17189 = vst [vmem:[#allocation41_spill] sm:$0xff] %v8703_v32  ;;  %2671 = vperm.xlu1 %7170, %v8531_v61   ;;  %2668 = vperm.xlu0 %7169, %v8536_v49   ;;  %v1426_v61 = vsel %vm1421_vm14, %v1415_v11, %v1416_v0  ;;  %v1420_v49 = vrot.slane %v8351_v26, 2  ;;  %v8762_v11 = vsel %vm1478_vm6, 1, %v17179_v52  ;;  %v1135_v32 = vand.u32 2147483647, %v1103_v4 }
  0xde   : > { %v1102_v0 = vsub.f32 %v8340_v29, %v8327_v33  ;;  %vm1480_vm9 = vcmp.eq.f32.partialorder %v1426_v61, %v8659_v7  ;;  %v1107_v8 = vsub.f32 %v8370_v44, %v8384_v47  ;;  %vm1483_vm2 = vcmp.eq.f32.partialorder %v1423_v62, %v8697_v3 }
  0xdf   : > { %v1133_v61 = vand.u32 2147483647, %v1101_v6  ;;  %v1106_v34 = vsub.f32 %v8364_v40, %v8378_v58  ;;  %v8803_v1 = vsel %vm1481_vm8, 1, %v17179_v52  ;;  %v1137_v28 = vand.u32 2147483647, %v1105_v63 }
  0xe0   : > { %v8757_v24 = vpop.permute.xlu1 %2101  ;;  %v8759_v54 = vpop.permute.xlu0 %2098  ;;  %v1134_v6 = vand.u32 2147483647, %v1102_v0  ;;  %v8816_v48 = vsel %vm1483_vm2, 1, %v17179_v52  ;;  %vm1167_vm3 = vcmp.eq.f32.partialorder %v1135_v32, 1.0  ;;  %v1110_v0 = vsub.f32 %v8390_v53, %v8448_v9  ;;  %v8847_v63 = vld [vmem:[%s16154_s4] ss:$0 sm:$0xff] }
  0xe1   : > { %17190 = vst [vmem:[#allocation42_spill] sm:$0xff] %v8757_v24  ;;  %17191 = vst [vmem:[#allocation43_spill] sm:$0xff] %v8759_v54  ;;  %2677 = vperm.xlu1 %7170, %v8541_v21   ;;  %2674 = vperm.xlu0 %7169, %v8546_v19   ;;  %v8785_v21 = vld [vmem:[%s16151_s1 + $0xe0] sm:$0xff]  ;;  %v17192_v19 = vrot.slane %v8340_v29, 2  ;;  %v1422_v54 = vsel %vm1421_vm14, %v1419_v45, %v1420_v49  ;;  %v1132_v24 = vand.u32 2147483647, %v1100_v37 }
  0xe2   : > { %vm1482_vm11 = vcmp.eq.f32.partialorder %v1424_v25, %v8785_v21  ;;  %v1136_v45 = vand.u32 2147483647, %v1104_v46  ;;  %v1109_v37 = vsub.f32 %v8384_v47, %v8421_v12  ;;  %vm1484_vm13 = vcmp.eq.f32.partialorder %v1422_v54, %v8751_v2 }
  0xe3   : > { %v1453_v18 = vsel %vm1421_vm14, %v1420_v49, %v17192_v19  ;;  %v8806_v19 = vsel %vm1480_vm9, 1, %v17179_v52  ;;  %v1139_v49 = vand.u32 2147483647, %v1107_v8  ;;  %v8821_v4 = vsel %vm1482_vm11, 1, %v17179_v52 }
  0xe4   : > { %v8796_v22 = vpop.permute.xlu1 %2107  ;;  %v8798_v60 = vpop.permute.xlu0 %2104  ;;  %vm1485_vm12 = vcmp.eq.f32.partialorder %v1453_v18, %v8351_v26  ;;  %vm1165_vm15 = vcmp.eq.f32.partialorder %v1133_v61, 1.0  ;;  %vm1164_vm0 = vcmp.eq.f32.partialorder %v1132_v24, 1.0  ;;  %vm1166_vm4 = vcmp.eq.f32.partialorder %v1134_v6, 1.0 }
  0xe5   : > { %17193 = vst [vmem:[#allocation44_spill] sm:$0xff] %v8796_v22  ;;  %17194 = vst [vmem:[#allocation45_spill] sm:$0xff] %v8798_v60  ;;  %2683 = vperm.xlu1 %7170, %v8587_v15   ;;  %2680 = vperm.xlu0 %7169, %v8550_v14   ;;  %v1138_v14 = vand.u32 2147483647, %v1106_v34  ;;  %v1108_v15 = vsub.f32 %v8378_v58, %v8390_v53  ;;  %v8831_v62 = vsel %vm1485_vm12, 1, %v17179_v52  ;;  %vm1169_vm6 = vcmp.eq.f32.partialorder %v1137_v28, 1.0 }
  0xe6   : > { %v1129_v25 = vsub.f32 %v8678_v55, %v8697_v3  ;;  %v8840_v58 = vld [vmem:[%s16153_s3] ss:$0 sm:$0xff]  ;;  %vm1168_vm7 = vcmp.eq.f32.partialorder %v1136_v45, 1.0  ;;  %vm1171_vm8 = vcmp.eq.f32.partialorder %v1139_v49, 1.0  ;;  %v1141_v34 = vand.u32 2147483647, %v1109_v37 }
  0xe7   : > { %v8860_v46 = vsel %vm1164_vm0, 1, %v17179_v52  ;;  %v8864_v53 = vsel %vm1167_vm3, 1, %v17179_v52  ;;  %v8868_v8 = vsel %vm1166_vm4, 1, %v17179_v52  ;;  %v8872_v54 = vsel %vm1169_vm6, 1, %v17179_v52 }
  0xe8   : > { %v8826_v47 = vpop.permute.xlu1 %2113  ;;  %v8828_v12 = vpop.permute.xlu0 %2110  ;;  %vm1170_vm9 = vcmp.eq.f32.partialorder %v1138_v14, 1.0  ;;  %v1140_v18 = vand.u32 2147483647, %v1108_v15  ;;  %v8879_v32 = vsel %vm1168_vm7, 1, %v17179_v52  ;;  %v8883_v6 = vsel %vm1171_vm8, 1, %v17179_v52 }
  0xe9   : > { %17195 = vst [vmem:[#allocation46_spill] sm:$0xff] %v8826_v47  ;;  %17196 = vst [vmem:[#allocation47_spill] sm:$0xff] %v8828_v12  ;;  %2689 = vperm.xlu1 %7170, %v8599_v13   ;;  %2686 = vperm.xlu0 %7169, %v8613_v31   ;;  %v8852_v31 = vsel %vm1484_vm13, 1, %v17179_v52  ;;  %v8856_v13 = vsel %vm1165_vm15, 1, %v17179_v52  ;;  %v1161_v12 = vand.u32 2147483647, %v1129_v25  ;;  %v1131_v45 = vsub.f32 %v8697_v3, %v8351_v26 }
  0xea   : > { %vm1173_vm2 = vcmp.eq.f32.partialorder %v1141_v34, 1.0  ;;  %v1142_v15 = vand.u32 2147483647, %v1110_v0  ;;  %vm1172_vm11 = vcmp.eq.f32.partialorder %v1140_v18, 1.0  ;;  %v1226_v0 = vsub.f32 %v8340_v29, %v8751_v2 }
  0xeb   : > { %v6890_v9 = vpop.f32.mrb[0].mxu0  ;;  %vm1193_vm12 = vcmp.eq.f32.partialorder %v1161_v12, 1.0  ;;  %v1225_v22 = vsub.f32 %v8351_v26, %v8697_v3 }
  0xec   : > { %v611_v61 = vmul.f32 %v6890_v9, %v8840_v58  ;;  %v475_v24 = vpop.f32.mrb[1].mxu0  ;;  %v8875_v37 = vpop.permute.xlu1 %2119  ;;  %vm1174_vm13 = vcmp.eq.f32.partialorder %v1142_v15, 1.0 }
  0xed   : > { %17197 = vst [vmem:[#allocation48_spill] sm:$0xff] %v8875_v37  ;;  %v609_v28 = vmul.f32 %v8840_v58, %v475_v24  ;;  %v8886_v47 = vpop.permute.xlu0 %2116  ;;  %v6891_v60 = vpop.f32.mrb[2].mxu0  ;;  %2695 = vperm.xlu1 %7170, %v8618_v51   ;;  %2692 = vperm.xlu0 %7169, %v8628_v35   ;;  %v8898_v24 = vsel %vm1170_vm9, 1, %v17179_v52  ;;  %v1130_v51 = vsub.f32 %v8785_v21, %v8751_v2  ;;  %v1163_v2 = vand.u32 2147483647, %v1131_v45 }
  0xee   : > { %17198 = vst [vmem:[#allocation49_spill] sm:$0xff] %v8886_v47  ;;  %v8893_v9 = vadd.f32 %v8847_v63, %v611_v61  ;;  %v612_v49 = vmul.f32 %v6891_v60, %v8840_v58  ;;  %v478_v25 = vpop.f32.mrb[3].mxu0  ;;  %17199 = vst [vmem:[#allocation50_spill] sm:$0xff] %v8898_v24  ;;  %v8915_v47 = vsel %vm1173_vm2, 1, %v17179_v52 }
  0xef   : > { %v8903_v35 = vadd.f32 %v8847_v63, %v609_v28  ;;  %v610_v34 = vmul.f32 %v8840_v58, %v478_v25  ;;  %17201 = vst [vmem:[#allocation52_spill] sm:$0xff] %v8915_v47  ;;  %vm1195_vm15 = vcmp.eq.f32.partialorder %v1163_v2, 1.0 }
  0xf0   : > { %v6666_v61 = vmul.f32 -1.442695, %v8893_v9  ;;  %v8910_v60 = vadd.f32 %v8847_v63, %v612_v49  ;;  %v8912_v14 = vpop.permute.xlu1 %2125 }
  0xf1   : > { %17200 = vst [vmem:[#allocation51_spill] sm:$0xff] %v8912_v14  ;;  %v6664_v28 = vmul.f32 -1.442695, %v8903_v35  ;;  %v8919_v37 = vadd.f32 %v8847_v63, %v610_v34  ;;  %v8921_v25 = vpop.permute.xlu0 %2122  ;;  %2701 = vperm.xlu1 %7170, %v8639_v27   ;;  %2698 = vperm.xlu0 %7169, %v8669_v5   ;;  %v1162_v14 = vand.u32 2147483647, %v1130_v51  ;;  %v8938_v51 = vsel %vm1193_vm12, 1, %v17179_v52 }
  0xf2   : > { %17202 = vst [vmem:[#allocation53_spill] sm:$0xff] %v8921_v25  ;;  %7171 = vpow2.f32 %v6666_v61  ;;  %v6667_v49 = vmul.f32 -1.442695, %v8910_v60  ;;  %v8931_v25 = vsel %vm1172_vm11, 1, %v17179_v52  ;;  %v1258_v27 = vand.u32 2147483647, %v1226_v0 }
  0xf3   : > { %7173 = vpow2.f32 %v6664_v28  ;;  %v6665_v47 = vmul.f32 -1.442695, %v8919_v37  ;;  %v6894_v34 = vpop.f32.mrb[4].mxu0  ;;  %17203 = vst [vmem:[#allocation54_spill] sm:$0xff] %v8931_v25  ;;  %v1196_v28 = vsub.f32 %v8327_v33, %v8340_v29  ;;  %v8949_v0 = vsel %vm1174_vm13, 1, %v17179_v52 }
  0xf4   : > { %7175 = vpow2.f32 %v6667_v49  ;;  %v615_v5 = vmul.f32 %v6894_v34, %v8840_v58  ;;  %v491_v45 = vpop.f32.mrb[5].mxu0  ;;  %v8934_v61 = vpop.permute.xlu1 %2131  ;;  %vm1194_vm0 = vcmp.eq.f32.partialorder %v1162_v14, 1.0  ;;  %v8955_v49 = vand.u32 2147483647, %v1225_v22 }
  0xf5   : > { %17204 = vst [vmem:[#allocation55_spill] sm:$0xff] %v8934_v61  ;;  %7177 = vpow2.f32 %v6665_v47  ;;  %v613_v24 = vmul.f32 %v8840_v58, %v491_v45  ;;  %v8943_v18 = vpop.permute.xlu0 %2128  ;;  %v6895_v25 = vpop.f32.mrb[6].mxu0  ;;  %2707 = vperm.xlu1 %7170, %v8690_v16   ;;  %2704 = vperm.xlu0 %7169, %v8685_v41   ;;  %vm1290_vm3 = vcmp.eq.f32.partialorder %v1258_v27, 1.0  ;;  %v1227_v41 = vsub.f32 %v8321_v20, %v8351_v26 }
  0xf6   : > { %17205 = vst [vmem:[#allocation56_spill] sm:$0xff] %v8943_v18  ;;  %v8952_v12 = vadd.f32 %v8847_v63, %v615_v5  ;;  %v616_v29 = vmul.f32 %v6895_v25, %v8840_v58  ;;  %v494_v47 = vpop.f32.mrb[7].mxu0  ;;  %v8969_v25 = vand.u32 2147483647, %v1196_v28  ;;  %v1127_v22 = vsub.f32 %v8648_v38, %v8678_v55 }
  0xf7   : > { %v8958_v34 = vadd.f32 %v8847_v63, %v613_v24  ;;  %v614_v16 = vmul.f32 %v8840_v58, %v494_v47  ;;  %v8983_v26 = vsel %vm1195_vm15, 1, %v17179_v52  ;;  %v1197_v28 = vsub.f32 %v8358_v39, %v8321_v20 }
  0xf8   : > { %v6670_v15 = vmul.f32 -1.442695, %v8952_v12  ;;  %v8965_v5 = vadd.f32 %v8847_v63, %v616_v29  ;;  %v8967_v45 = vpop.permute.xlu1 %2137  ;;  %v8990_v29 = vsel %vm1194_vm0, 1, %v17179_v52  ;;  %vm1289_vm4 = vcmp.eq.f32.partialorder %v8955_v49, 1.0 }
  0xf9   : > { %17206 = vst [vmem:[#allocation57_spill] sm:$0xff] %v8967_v45  ;;  %v6668_v24 = vmul.f32 -1.442695, %v8958_v34  ;;  %v8975_v47 = vadd.f32 %v8847_v63, %v614_v16  ;;  %v8977_v18 = vpop.permute.xlu0 %2134  ;;  %2713 = vperm.xlu1 %7170, %v8707_v43   ;;  %2710 = vperm.xlu0 %7169, %v8712_v57   ;;  %17208 = vst [vmem:[#allocation59_spill] sm:$0xff] %v8990_v29  ;;  %v8996_v2 = vsel %vm1290_vm3, 1, %v17179_v52  ;;  %vm1260_vm6 = vcmp.eq.f32.partialorder %v8969_v25, 1.0 }
  0xfa   : > { %17207 = vst [vmem:[#allocation58_spill] sm:$0xff] %v8977_v18  ;;  %7179 = vpow2.f32 %v6670_v15  ;;  %v6671_v55 = vmul.f32 -1.442695, %v8965_v5  ;;  %17209 = vst [vmem:[#allocation60_spill] sm:$0xff] %v8996_v2  ;;  %v8998_v16 = vand.u32 2147483647, %v1227_v41 }
  0xfb   : > { %7181 = vpow2.f32 %v6668_v24  ;;  %v6669_v43 = vmul.f32 -1.442695, %v8975_v47  ;;  %v6898_v57 = vpop.f32.mrb[8].mxu0  ;;  %v9004_v45 = vand.u32 2147483647, %v1127_v22  ;;  %vm16797_vm12 = vcmp.eq.s32.totalorder %v8162_v59, 1 }
  0xfc   : > { %v7172_v20 = vpop.eup %7171  ;;  %7183 = vpow2.f32 %v6671_v55  ;;  %v619_v15 = vmul.f32 %v6898_v57, %v8840_v58  ;;  %v507_v18 = vpop.f32.mrb[9].mxu0  ;;  %v9011_v55 = vand.u32 2147483647, %v1197_v28  ;;  %vm1291_vm7 = vcmp.eq.f32.partialorder %v8998_v16, 1.0 }
  0xfd   : > { %v9001_v14 = vpop.permute.xlu1 %2143  ;;  %v7174_v24 = vpop.eup %7173  ;;  %v778_v61 = vadd.f32 1.0, %v7172_v20  ;;  %7185 = vpow2.f32 %v6669_v43  ;;  %v617_v27 = vmul.f32 %v8840_v58, %v507_v18  ;;  %2719 = vperm.xlu1 %7170, %v8716_v23   ;;  %2716 = vperm.xlu0 %7169, %v8721_v30   ;;  %v1198_v18 = vsub.f32 %v8364_v40, %v8327_v33 }
  0xfe   : > { %17210 = vst [vmem:[#allocation61_spill] sm:$0xff] %v9001_v14  ;;  %v9007_v29 = vpop.permute.xlu0 %2140  ;;  %v6899_v41 = vpop.f32.mrb[10].mxu0  ;;  %v776_v14 = vadd.f32 1.0, %v7174_v24  ;;  %v9014_v2 = vadd.f32 %v8847_v63, %v619_v15  ;;  %vm1191_vm8 = vcmp.eq.f32.partialorder %v9004_v45, 1.0  ;;  %vm1261_vm9 = vcmp.eq.f32.partialorder %v9011_v55, 1.0 }
  0xff   : > { %17211 = vst [vmem:[#allocation62_spill] sm:$0xff] %v9007_v29  ;;  %v7176_v57 = vpop.eup %7175  ;;  %v620_v22 = vmul.f32 %v6899_v41, %v8840_v58  ;;  %v510_v20 = vpop.f32.mrb[11].mxu0  ;;  %7187 = vrcp.f32 %v778_v61  ;;  %v9020_v23 = vadd.f32 %v8847_v63, %v617_v27  ;;  %v9098_v16 = vsel %vm1261_vm9, 1, %v17179_v52 }
 0x100   : > { %v7178_v43 = vpop.eup %7177  ;;  %v779_v29 = vadd.f32 1.0, %v7176_v57  ;;  %v618_v30 = vmul.f32 %v8840_v58, %v510_v20  ;;  %7189 = vrcp.f32 %v776_v14  ;;  %v6674_v24 = vmul.f32 -1.442695, %v9014_v2 }
 0x101   : > { %v777_v28 = vadd.f32 1.0, %v7178_v43  ;;  %v9025_v15 = vadd.f32 %v8847_v63, %v620_v22  ;;  %v9027_v41 = vpop.permute.xlu1 %2149  ;;  %v6672_v33 = vmul.f32 -1.442695, %v9020_v23  ;;  %2725 = vperm.xlu1 %7170, %v8727_v36   ;;  %2722 = vperm.xlu0 %7169, %v8731_v50   ;;  %v1128_v14 = vsub.f32 %v8659_v7, %v8785_v21 }
 0x102   : > { %17212 = vst [vmem:[#allocation63_spill] sm:$0xff] %v9027_v41  ;;  %7191 = vrcp.f32 %v779_v29  ;;  %v9031_v40 = vadd.f32 %v8847_v63, %v618_v30  ;;  %v9033_v61 = vpop.permute.xlu0 %2146  ;;  %v9043_v29 = vsel %vm1289_vm4, 1, %v17179_v52  ;;  %v1230_v57 = vand.u32 2147483647, %v1198_v18 }
 0x103   : > { %17213 = vst [vmem:[#allocation64_spill] sm:$0xff] %v9033_v61  ;;  %7193 = vrcp.f32 %v777_v28  ;;  %v6675_v27 = vmul.f32 -1.442695, %v9025_v15  ;;  %v6902_v20 = vpop.f32.mrb[12].mxu0  ;;  %v9049_v36 = vsel %vm1260_vm6, 1, %v17179_v52  ;;  %vm16548_vm13 = vcmp.eq.s32.totalorder %v8606_v42, 1 }
 0x104   : > { %7195 = vpow2.f32 %v6674_v24  ;;  %v6673_v22 = vmul.f32 -1.442695, %v9031_v40  ;;  %v7180_v7 = vpop.eup %7179  ;;  %v623_v50 = vmul.f32 %v6902_v20, %v8840_v58  ;;  %v523_v21 = vpop.f32.mrb[13].mxu0  ;;  %v1160_v24 = vand.u32 2147483647, %v1128_v14 }
 0x105   : > { %7197 = vpow2.f32 %v6672_v33  ;;  %v9053_v49 = vpop.permute.xlu1 %2155  ;;  %v7182_v18 = vpop.eup %7181  ;;  %v782_v43 = vadd.f32 1.0, %v7180_v7  ;;  %v621_v25 = vmul.f32 %v8840_v58, %v523_v21  ;;  %2731 = vperm.xlu1 %7170, %v8774_v17   ;;  %2728 = vperm.xlu0 %7169, %v8762_v11   ;;  %vm1262_vm2 = vcmp.eq.f32.partialorder %v1230_v57, 1.0 }
 0x106   : > { %17214 = vst [vmem:[#allocation65_spill] sm:$0xff] %v9053_v49  ;;  %7199 = vpow2.f32 %v6675_v27  ;;  %v9058_v30 = vpop.permute.xlu0 %2152  ;;  %v6903_v28 = vpop.f32.mrb[14].mxu0  ;;  %v780_v20 = vadd.f32 1.0, %v7182_v18  ;;  %v9063_v49 = vadd.f32 %v8847_v63, %v623_v50  ;;  %vm1192_vm11 = vcmp.eq.f32.partialorder %v1160_v24, 1.0 }
 0x107   : > { %17215 = vst [vmem:[#allocation66_spill] sm:$0xff] %v9058_v30  ;;  %v7184_v33 = vpop.eup %7183  ;;  %7201 = vpow2.f32 %v6673_v22  ;;  %v526_v61 = vpop.f32.mrb[15].mxu0  ;;  %v9066_v21 = vadd.f32 %v8847_v63, %v621_v25  ;;  %v624_v30 = vmul.f32 %v6903_v28, %v8840_v58  ;;  %v9084_v25 = vsel %vm1291_vm7, 1, %v17179_v52 }
 0x108   : > { %v7186_v7 = vpop.eup %7185  ;;  %7203 = vrcp.f32 %v782_v43  ;;  %v783_v27 = vadd.f32 1.0, %v7184_v33  ;;  %v6678_v11 = vmul.f32 -1.442695, %v9063_v49  ;;  %v622_v14 = vmul.f32 %v8840_v58, %v526_v61 }
 0x109   : > { %7205 = vrcp.f32 %v780_v20  ;;  %v781_v17 = vadd.f32 1.0, %v7186_v7  ;;  %v9071_v22 = vpop.permute.xlu1 %2161  ;;  %v7188_v50 = vpop.eup %7187  ;;  %v6676_v18 = vmul.f32 -1.442695, %v9066_v21  ;;  %v9075_v43 = vadd.f32 %v8847_v63, %v624_v30  ;;  %2737 = vperm.xlu1 %7170, %v8803_v1   ;;  %2734 = vperm.xlu0 %7169, %v8806_v19  }
 0x10a   : > { %17216 = vst [vmem:[#allocation67_spill] sm:$0xff] %v9071_v22  ;;  %7207 = vrcp.f32 %v783_v27  ;;  %v9077_v33 = vpop.permute.xlu0 %2158  ;;  %v7190_v61 = vpop.eup %7189  ;;  %v9087_v28 = vadd.f32 %v8847_v63, %v622_v14  ;;  %v9092_v30 = vsel %vm1191_vm8, 1, %v17179_v52  ;;  %v9102_v7 = vsel %vm1262_vm2, 1, %v17179_v52 }
 0x10b   : > { %17217 = vst [vmem:[#allocation68_spill] sm:$0xff] %v9077_v33  ;;  %7209 = vrcp.f32 %v781_v17  ;;  %v6679_v1 = vmul.f32 -1.442695, %v9075_v43  ;;  %v6906_v19 = vpop.f32.mrb[16].mxu0  ;;  %v1515_v33 = vsub.f32 %v8648_v38, %v8697_v3  ;;  %v9122_v38 = vmul.f32 %v7190_v61, %v8903_v35 }
 0x10c   : > { %v7192_v20 = vpop.eup %7191  ;;  %7211 = vpow2.f32 %v6678_v11  ;;  %v6677_v45 = vmul.f32 -1.442695, %v9087_v28  ;;  %v627_v17 = vmul.f32 %v6906_v19, %v8840_v58  ;;  %v539_v14 = vpop.f32.mrb[17].mxu0  ;;  %vm16266_vm15 = vcmp.eq.s32.totalorder %v8160_v56, 1 }
 0x10d   : > { %v7194_v27 = vpop.eup %7193  ;;  %7213 = vpow2.f32 %v6676_v18  ;;  %v9106_v11 = vpop.permute.xlu1 %2167  ;;  %v625_v55 = vmul.f32 %v8840_v58, %v539_v14  ;;  %2743 = vperm.xlu1 %7170, %v8816_v48   ;;  %2740 = vperm.xlu0 %7169, %v8821_v4   ;;  %v9117_v18 = vsel %vm1192_vm11, 1, %v17179_v52  ;;  %17220 = vst [vmem:[#allocation71_spill] sm:$0xff] %v9122_v38 }
 0x10e   : > { %17218 = vst [vmem:[#allocation69_spill] sm:$0xff] %v9106_v11  ;;  %v7196_v22 = vpop.eup %7195  ;;  %7215 = vpow2.f32 %v6679_v1  ;;  %v9111_v41 = vpop.permute.xlu0 %2164  ;;  %v9125_v1 = vadd.f32 %v8847_v63, %v627_v17  ;;  %v9134_v35 = vmul.f32 %v7194_v27, %v8919_v37  ;;  %v9148_v27 = vmul.f32 %v7188_v50, %v8893_v9 }
 0x10f   : > { %17219 = vst [vmem:[#allocation70_spill] sm:$0xff] %v9111_v41  ;;  %v6907_v57 = vpop.f32.mrb[18].mxu0  ;;  %v7198_v11 = vpop.eup %7197  ;;  %v786_v3 = vadd.f32 1.0, %v7196_v22  ;;  %7217 = vpow2.f32 %v6677_v45  ;;  %v9129_v24 = vadd.f32 %v8847_v63, %v625_v55 }
 0x110   : > { %v542_v14 = vpop.f32.mrb[19].mxu0  ;;  %v7200_v48 = vpop.eup %7199  ;;  %v784_v4 = vadd.f32 1.0, %v7198_v11  ;;  %v628_v41 = vmul.f32 %v6907_v57, %v8840_v58  ;;  %17221 = vst [vmem:[#allocation72_spill] sm:$0xff] %v9134_v35  ;;  %v6682_v61 = vmul.f32 -1.442695, %v9125_v1  ;;  %17224 = vst [vmem:[#allocation75_spill] sm:$0xff] %v9148_v27 }
 0x111   : > { %v626_v19 = vmul.f32 %v8840_v58, %v542_v14  ;;  %v7202_v39 = vpop.eup %7201  ;;  %7219 = vrcp.f32 %v786_v3  ;;  %v787_v22 = vadd.f32 1.0, %v7200_v48  ;;  %v9137_v45 = vpop.permute.xlu1 %2173  ;;  %v6680_v55 = vmul.f32 -1.442695, %v9129_v24  ;;  %2749 = vperm.xlu1 %7170, %v8831_v62   ;;  %2746 = vperm.xlu0 %7169, %v8852_v31  }
 0x112   : > { %17222 = vst [vmem:[#allocation73_spill] sm:$0xff] %v9137_v45  ;;  %v7204_v17 = vpop.eup %7203  ;;  %7221 = vrcp.f32 %v784_v4  ;;  %v785_v11 = vadd.f32 1.0, %v7202_v39  ;;  %v9141_v44 = vadd.f32 %v8847_v63, %v628_v41  ;;  %v9143_v57 = vpop.permute.xlu0 %2170  ;;  %v9153_v39 = vand.u32 2147483647, %v1515_v33 }
 0x113   : > { %17223 = vst [vmem:[#allocation74_spill] sm:$0xff] %v9143_v57  ;;  %v7206_v37 = vpop.eup %7205  ;;  %7223 = vrcp.f32 %v787_v22  ;;  %v9151_v3 = vadd.f32 %v8847_v63, %v626_v19  ;;  %v9156_v41 = vmul.f32 %v7192_v20, %v8910_v60  ;;  %v6910_v62 = vpop.f32.mrb[20].mxu0  ;;  %v9162_v9 = vmul.f32 %v7204_v17, %v8952_v12 }
 0x114   : > { %17225 = vst [vmem:[#allocation76_spill] sm:$0xff] %v9153_v39  ;;  %v7208_v14 = vpop.eup %7207  ;;  %7225 = vrcp.f32 %v785_v11  ;;  %v6683_v48 = vmul.f32 -1.442695, %v9141_v44  ;;  %v631_v33 = vmul.f32 %v6910_v62, %v8840_v58  ;;  %v555_v19 = vpop.f32.mrb[21].mxu0  ;;  %v9169_v22 = vmul.f32 %v7206_v37, %v8958_v34 }
 0x115   : > { %17226 = vst [vmem:[#allocation77_spill] sm:$0xff] %v9156_v41  ;;  %v7210_v4 = vpop.eup %7209  ;;  %17227 = vst [vmem:[#allocation78_spill] sm:$0xff] %v9162_v9  ;;  %7227 = vpow2.f32 %v6682_v61  ;;  %v6681_v50 = vmul.f32 -1.442695, %v9151_v3  ;;  %v9166_v60 = vpop.permute.xlu1 %2371  ;;  %v629_v11 = vmul.f32 %v8840_v58, %v555_v19  ;;  %2883 = vperm.xlu1 %7170, %v8856_v13   ;;  %2880 = vperm.xlu0 %7169, %v8860_v46   ;;  %v17232_v13 = vrot.slane %v9122_v38, 7 }
 0x116   : > { %17228 = vst [vmem:[#allocation79_spill] sm:$0xff] %v9166_v60  ;;  %v7212_v20 = vpop.eup %7211  ;;  %17229 = vst [vmem:[#allocation80_spill] sm:$0xff] %v9169_v22  ;;  %7229 = vpow2.f32 %v6680_v55  ;;  %v9173_v57 = vpop.permute.xlu0 %2368  ;;  %v9178_v62 = vadd.f32 %v8847_v63, %v631_v33  ;;  %vm16549_vm3 = vcmp.eq.s32.totalorder %v9166_v60, 1 }
 0x117   : > { %17230 = vst [vmem:[#allocation81_spill] sm:$0xff] %v9173_v57  ;;  %v6911_v12 = vpop.f32.mrb[22].mxu0  ;;  %v7214_v61 = vpop.eup %7213  ;;  %v790_v17 = vadd.f32 1.0, %v7212_v20  ;;  %7231 = vpow2.f32 %v6683_v48  ;;  %v9182_v31 = vadd.f32 %v8847_v63, %v629_v11  ;;  %v17231_v57 = vrot.slane %v9134_v35, 7 }
 0x118   : > { %v558_v55 = vpop.f32.mrb[23].mxu0  ;;  %v7216_v37 = vpop.eup %7215  ;;  %v788_v19 = vadd.f32 1.0, %v7214_v61  ;;  %7233 = vpow2.f32 %v6681_v50  ;;  %v6686_v20 = vmul.f32 -1.442695, %v9178_v62  ;;  %v9196_v50 = vmul.f32 %v7208_v14, %v8965_v5 }
 0x119   : > { %v1757_v46 = vsel %vm17122_vm1, %v17232_v13, %v17231_v57  ;;  %v7218_v48 = vpop.eup %7217  ;;  %7235 = vrcp.f32 %v790_v17  ;;  %v791_v33 = vadd.f32 1.0, %v7216_v37  ;;  %v9193_v61 = vpop.permute.xlu1 %2377  ;;  %v6684_v45 = vmul.f32 -1.442695, %v9182_v31  ;;  %2889 = vperm.xlu1 %7170, %v8864_v53   ;;  %2886 = vperm.xlu0 %7169, %v8868_v8  }
 0x11a   : > { %v1920_v34 = vsel %vm16797_vm12, %v1757_v46, -1e+30  ;;  %17233 = vst [vmem:[#allocation82_spill] sm:$0xff] %v9193_v61  ;;  %17234 = vst [vmem:[#allocation83_spill] sm:$0xff] %v9196_v50  ;;  %7237 = vrcp.f32 %v788_v19  ;;  %v789_v11 = vadd.f32 1.0, %v7218_v48  ;;  %v9199_v52 = vpop.permute.xlu0 %2374  ;;  %v16227_v17 = vrot.slane %v9148_v27, 1 }
 0x11b   : > { %17235 = vst [vmem:[#allocation84_spill] sm:$0xff] %v9199_v52  ;;  %v7220_v57 = vpop.eup %7219  ;;  %7239 = vrcp.f32 %v791_v33  ;;  %v16230_v37 = vrot.slane %v9122_v38, 6  ;;  %v16231_v5 = vrot.slane %v9134_v35, 6  ;;  %v17236_v19 = vld [vmem:[#allocation38_spill] sm:$0xff]  ;;  %v9209_v13 = vmul.f32 %v7210_v4, %v8975_v47  ;;  %v9213_v8 = vpop.f32.mrb[24].mxu0 }
 0x11c   : > { %v7222_v14 = vpop.eup %7221  ;;  %vm16261_vm0 = vcmp.eq.s32.totalorder %v17236_v19, 1  ;;  %7241 = vrcp.f32 %v789_v11  ;;  %v1952_v53 = vmax.f32 %v9134_v35, %v1920_v34  ;;  %v9216_v48 = vmul.f32 %v7220_v57, %v9014_v2  ;;  %v9230_v34 = vpop.f32.mrb[25].mxu0  ;;  %v17260_v19 = vld [vmem:[#allocation54_spill] sm:$0xff] }
 0x11d   : > { %17237 = vst [vmem:[#allocation85_spill] sm:$0xff] %v9209_v13  ;;  %v7224_v46 = vpop.eup %7223  ;;  %7243 = vpow2.f32 %v6686_v20  ;;  %v17239_v33 = vrot.slane %v9134_v35, 1  ;;  %v2333_v4 = vsel %vm1324_vm10, %v16230_v37, %v16231_v5  ;;  %v9232_v11 = vpop.permute.xlu1 %2383  ;;  %v9235_v20 = vmul.f32 %v7222_v14, %v9020_v23  ;;  %2895 = vperm.xlu1 %7170, %v8872_v54   ;;  %2892 = vperm.xlu0 %7169, %v8879_v32  }
 0x11e   : > { %17238 = vst [vmem:[#allocation86_spill] sm:$0xff] %v9216_v48  ;;  %17240 = vst [vmem:[#allocation87_spill] sm:$0xff] %v9232_v11  ;;  %v7226_v2 = vpop.eup %7225  ;;  %v9238_v57 = vmul.f32 %v7224_v46, %v9025_v15  ;;  %7245 = vpow2.f32 %v6684_v45  ;;  %v9244_v59 = vpop.f32.mrb[26].mxu0  ;;  %v9253_v23 = vsel %vm16549_vm3, %v2333_v4, -1e+30  ;;  %v632_v15 = vmul.f32 %v6911_v12, %v8840_v58 }
 0x11f   : > { %v2044_v47 = vsel %vm1035_vm5, %v17239_v33, %v16227_v17  ;;  %17241 = vst [vmem:[#allocation88_spill] sm:$0xff] %v9235_v20  ;;  %v9242_v17 = vpop.permute.xlu0 %2380  ;;  %v7228_v37 = vpop.eup %7227  ;;  %v9249_v5 = vmul.f32 %v7226_v2, %v9031_v40  ;;  %17245 = vst [vmem:[#allocation92_spill] sm:$0xff] %v9253_v23  ;;  %v630_v45 = vmul.f32 %v8840_v58, %v558_v55  ;;  %v1697_v32 = vrot.slane %v9148_v27, 7 }
 0x120   : > { %17242 = vst [vmem:[#allocation89_spill] sm:$0xff] %v9238_v57  ;;  %v2208_v33 = vsel %vm16548_vm13, %v2044_v47, -1e+30  ;;  %17243 = vst [vmem:[#allocation90_spill] sm:$0xff] %v9242_v17  ;;  %v9257_v14 = vpop.f32.mrb[27].mxu0  ;;  %v7230_v46 = vpop.eup %7229  ;;  %v17246_v47 = vld [vmem:[#allocation2_spill] sm:$0xff]  ;;  %v9265_v4 = vadd.f32 %v8847_v63, %v632_v15 }
 0x121   : > { %17244 = vst [vmem:[#allocation91_spill] sm:$0xff] %v9249_v5  ;;  %vm16395_vm4 = vcmp.eq.s32.totalorder %v17246_v47, 1  ;;  %v794_v54 = vadd.f32 1.0, %v7228_v37  ;;  %v9260_v42 = vmax.f32 %v1952_v53, %v2208_v33  ;;  %v16241_v40 = vrot.slane %v9156_v41, 7  ;;  %v7232_v2 = vpop.eup %7231  ;;  %v9271_v38 = vpop.permute.xlu1 %2389  ;;  %2901 = vperm.xlu1 %7170, %v8883_v6   ;;  %v17250_v15 = vld [vmem:[#allocation50_spill] sm:$0xff]  ;;  %v17251_v57 = vld [vmem:[#allocation39_spill] sm:$0xff] }
 0x122   : > { %v792_v60 = vadd.f32 1.0, %v7230_v46  ;;  %v9268_v12 = vadd.f32 %v8847_v63, %v630_v45  ;;  %v1986_v55 = vrot.slane %v9156_v41, 1  ;;  %17248 = vst [vmem:[#allocation94_spill] sm:$0xff] %v9271_v38  ;;  %v7234_v39 = vpop.eup %7233  ;;  %v795_v37 = vadd.f32 1.0, %v7232_v2  ;;  %2898 = vperm.xlu0 %7169, %v17250_v15  }
 0x123   : > { %17247 = vst [vmem:[#allocation93_spill] sm:$0xff] %v9260_v42  ;;  %7247 = vrcp.f32 %v794_v54  ;;  %v1755_v53 = vsel %vm17122_vm1, %v1697_v32, %v16241_v40  ;;  %v9278_v46 = vpop.permute.xlu0 %2386  ;;  %v7236_v45 = vpop.eup %7235  ;;  %vm16324_vm6 = vcmp.eq.s32.totalorder %v17251_v57, 1  ;;  %v793_v48 = vadd.f32 1.0, %v7234_v39  ;;  %v17255_v42 = vld [vmem:[#allocation6_spill] sm:$0xff] }
 0x124   : > { %17249 = vst [vmem:[#allocation95_spill] sm:$0xff] %v9278_v46  ;;  %7249 = vrcp.f32 %v792_v60  ;;  %v6687_v54 = vmul.f32 -1.442695, %v9265_v4  ;;  %v6685_v2 = vmul.f32 -1.442695, %v9268_v12  ;;  %v7238_v5 = vpop.eup %7237  ;;  %v17252_v6 = vrot.slane %v9169_v22, 1 }
 0x125   : > { %7251 = vrcp.f32 %v795_v37  ;;  %v1922_v33 = vsel %vm16266_vm15, %v1755_v53, -1e+30  ;;  %v9293_v46 = vpop.f32.mrb[28].mxu0  ;;  %v7240_v39 = vpop.eup %7239  ;;  %v9296_v60 = vmul.f32 %v7236_v45, %v9063_v49  ;;  %vm16263_vm7 = vcmp.eq.s32.totalorder %v17255_v42, 1 }
 0x126   : > { %v2042_v15 = vsel %vm1035_vm5, %v1986_v55, %v17252_v6  ;;  %7253 = vrcp.f32 %v793_v48  ;;  %v1954_v37 = vmax.f32 %v9156_v41, %v1922_v33  ;;  %v9301_v23 = vpop.f32.mrb[29].mxu0  ;;  %v9303_v53 = vpop.permute.xlu1 %2395  ;;  %v9307_v6 = vmul.f32 %v7238_v5, %v9066_v21  ;;  %2904 = vperm.xlu0 %7169, %v17260_v19   ;;  %v17264_v48 = vld [vmem:[#allocation40_spill] sm:$0xff] }
 0x127   : > { %17253 = vst [vmem:[#allocation50_spill] sm:$0xff] %v9296_v60  ;;  %v2210_v40 = vsel %vm16261_vm0, %v2042_v15, -1e+30  ;;  %17254 = vst [vmem:[#allocation96_spill] sm:$0xff] %v9303_v53  ;;  %v7242_v56 = vpop.eup %7241  ;;  %7255 = vpow2.f32 %v6687_v54  ;;  %v2273_v49 = vrot.slane %v9148_v27, 6  ;;  %v9311_v45 = vpop.permute.xlu0 %2392  ;;  %v17259_v15 = vld [vmem:[#allocation52_spill] sm:$0xff]  ;;  %v9318_v53 = vmul.f32 %v7240_v39, %v9075_v43 }
 0x128   : > { %17256 = vst [vmem:[#allocation97_spill] sm:$0xff] %v9307_v6  ;;  %17257 = vst [vmem:[#allocation98_spill] sm:$0xff] %v9311_v45  ;;  %v9313_v33 = vpop.f32.mrb[30].mxu0  ;;  %2907 = vperm.xlu1 %7170, %v17259_v15   ;;  %v7244_v60 = vpop.eup %7243  ;;  %7257 = vpow2.f32 %v6685_v2  ;;  %v9320_v21 = vmax.f32 %v1954_v37, %v2210_v40  ;;  %vm16252_vm8 = vcmp.eq.s32.totalorder %v9193_v61, 1  ;;  %vm16268_vm9 = vcmp.eq.s32.totalorder %v17264_v48, 1 }
 0x129   : > { %17258 = vst [vmem:[#allocation99_spill] sm:$0xff] %v9313_v33  ;;  %17261 = vst [vmem:[#allocation52_spill] sm:$0xff] %v9318_v53  ;;  %v9323_v5 = vpop.f32.mrb[31].mxu0  ;;  %v7246_v54 = vpop.eup %7245  ;;  %v798_v6 = vadd.f32 1.0, %v7244_v60  ;;  %v17265_v33 = vrot.slane %v9156_v41, 6  ;;  %v17266_v15 = vrot.slane %v9134_v35, 7 }
 0x12a   : > { %17262 = vst [vmem:[#allocation54_spill] sm:$0xff] %v9320_v21  ;;  %17263 = vst [vmem:[#allocation100_spill] sm:$0xff] %v9323_v5  ;;  %v17267_v40 = vrot.slane %v9148_v27, 1  ;;  %v796_v39 = vadd.f32 1.0, %v7246_v54  ;;  %v9348_v5 = vpop.permute.xlu1 %2401  ;;  %2910 = vperm.xlu0 %7169, %v8949_v0   ;;  %v1699_v0 = vrot.slane %v9169_v22, 7  ;;  %vm16269_vm15 = vcmp.eq.s32.totalorder %v9232_v11, 1 }
 0x12b   : > { %v2331_v19 = vsel %vm1324_vm10, %v2273_v49, %v17265_v33  ;;  %v1756_v43 = vsel %vm17122_vm1, %v17266_v15, %v1697_v32  ;;  %v17269_v33 = vrot.slane %v9134_v35, 6  ;;  %17270 = vst [vmem:[#allocation102_spill] sm:$0xff] %v9348_v5  ;;  %v9351_v32 = vmul.f32 %v7242_v56, %v9087_v28  ;;  %v17273_v15 = vld [vmem:[#allocation7_spill] sm:$0xff]  ;;  %v17289_v21 = vld [vmem:[#allocation60_spill] sm:$0xff] }
 0x12c   : > { %v2043_v2 = vsel %vm1035_vm5, %v17267_v40, %v1986_v55  ;;  %v9340_v37 = vsel %vm16252_vm8, %v2331_v19, -1e+30  ;;  %v1921_v60 = vsel %vm16395_vm4, %v1756_v43, -1e+30  ;;  %7259 = vrcp.f32 %v798_v6  ;;  %v9356_v19 = vpop.permute.xlu0 %2398  ;;  %2967 = vperm.xlu1 %7170, %v8938_v51   ;;  %v17305_v11 = vld [vmem:[#allocation44_spill] sm:$0xff] }
 0x12d   : > { %17268 = vst [vmem:[#allocation101_spill] sm:$0xff] %v9340_v37  ;;  %v2332_v53 = vsel %vm1324_vm10, %v17269_v33, %v2273_v49  ;;  %17271 = vst [vmem:[#allocation103_spill] sm:$0xff] %v9351_v32  ;;  %v1953_v54 = vmax.f32 %v9148_v27, %v1921_v60  ;;  %vm16279_vm2 = vcmp.eq.s32.totalorder %v17273_v15, 1  ;;  %v17274_v49 = vld [vmem:[#allocation41_spill] sm:$0xff]  ;;  %7261 = vrcp.f32 %v796_v39  ;;  %v7248_v6 = vpop.eup %7247 }
 0x12e   : > { %17272 = vst [vmem:[#allocation104_spill] sm:$0xff] %v9356_v19  ;;  %vm16270_vm11 = vcmp.eq.s32.totalorder %v17274_v49, 1  ;;  %vm16323_vm8 = vcmp.eq.s32.totalorder %v9199_v52, 1  ;;  %v635_v56 = vmul.f32 %v9213_v8, %v8840_v58  ;;  %v633_v28 = vmul.f32 %v8840_v58, %v9230_v34  ;;  %v7250_v39 = vpop.eup %7249  ;;  %v17325_v15 = vld [vmem:[#allocation96_spill] sm:$0xff] }
 0x12f   : > { %v2209_v43 = vsel %vm16324_vm6, %v2043_v2, -1e+30  ;;  %v9371_v51 = vsel %vm16323_vm8, %v2332_v53, -1e+30  ;;  %v16257_v40 = vrot.slane %v9209_v13, 7  ;;  %v1988_v33 = vrot.slane %v9209_v13, 1  ;;  %v9384_v2 = vpop.permute.xlu1 %2407  ;;  %v7252_v55 = vpop.eup %7251 }
 0x130   : > { %17275 = vst [vmem:[#allocation105_spill] sm:$0xff] %v9371_v51  ;;  %v9375_v60 = vmax.f32 %v1953_v54, %v2209_v43  ;;  %v9378_v8 = vadd.f32 %v8847_v63, %v635_v56  ;;  %v9381_v34 = vadd.f32 %v8847_v63, %v633_v28  ;;  %17277 = vst [vmem:[#allocation107_spill] sm:$0xff] %v9384_v2  ;;  %v9397_v28 = vpop.permute.xlu0 %2404  ;;  %2973 = vperm.xlu1 %7170, %v8983_v26   ;;  %v17281_v43 = vld [vmem:[#allocation59_spill] sm:$0xff]  ;;  %v7254_v52 = vpop.eup %7253  ;;  %v17284_v51 = vld [vmem:[#allocation8_spill] sm:$0xff] }
 0x131   : > { %v9387_v53 = vmul.f32 %v7248_v6, %v9125_v1  ;;  %v9390_v61 = vmul.f32 %v7250_v39, %v9129_v24  ;;  %v1753_v54 = vsel %vm17122_vm1, %v1699_v0, %v16257_v40  ;;  %17280 = vst [vmem:[#allocation110_spill] sm:$0xff] %v9397_v28  ;;  %2970 = vperm.xlu0 %7169, %v17281_v43   ;;  %v7256_v40 = vpop.eup %7255  ;;  %v17283_v26 = vrot.slane %v9162_v9, 1 }
 0x132   : > { %17276 = vst [vmem:[#allocation106_spill] sm:$0xff] %v9375_v60  ;;  %v6690_v24 = vmul.f32 -1.442695, %v9378_v8  ;;  %v6688_v6 = vmul.f32 -1.442695, %v9381_v34  ;;  %v9408_v56 = vmul.f32 %v7252_v55, %v9141_v44  ;;  %v2275_v1 = vrot.slane %v9169_v22, 6  ;;  %v7258_v47 = vpop.eup %7257 }
 0x133   : > { %17278 = vst [vmem:[#allocation108_spill] sm:$0xff] %v9387_v53  ;;  %17279 = vst [vmem:[#allocation109_spill] sm:$0xff] %v9390_v61  ;;  %v1924_v39 = vsel %vm16263_vm7, %v1753_v54, -1e+30  ;;  %v2040_v43 = vsel %vm1035_vm5, %v1988_v33, %v17283_v26  ;;  %vm16275_vm0 = vcmp.eq.s32.totalorder %v17284_v51, 1  ;;  %v799_v60 = vadd.f32 1.0, %v7256_v40  ;;  %v9420_v55 = vpop.permute.xlu1 %2413 }
 0x134   : > { %17282 = vst [vmem:[#allocation59_spill] sm:$0xff] %v9408_v56  ;;  %v1956_v57 = vmax.f32 %v9209_v13, %v1924_v39  ;;  %7263 = vpow2.f32 %v6690_v24  ;;  %v2212_v54 = vsel %vm16268_vm9, %v2040_v43, -1e+30  ;;  %v16273_v44 = vrot.slane %v9209_v13, 6  ;;  %17285 = vst [vmem:[#allocation111_spill] sm:$0xff] %v9420_v55  ;;  %v17286_v39 = vld [vmem:[#allocation42_spill] sm:$0xff]  ;;  %v9426_v26 = vpop.permute.xlu0 %2410  ;;  %3194 = vperm.xlu1 %7170, %v17289_v21  }
 0x135   : > { %vm16288_vm7 = vcmp.eq.s32.totalorder %v17286_v39, 1  ;;  %v797_v42 = vadd.f32 1.0, %v7258_v47  ;;  %7265 = vpow2.f32 %v6688_v6  ;;  %17288 = vst [vmem:[#allocation113_spill] sm:$0xff] %v9426_v26  ;;  %3191 = vperm.xlu0 %7169, %v9043_v29   ;;  %v17290_v24 = vrot.slane %v9156_v41, 7  ;;  %v17292_v21 = vld [vmem:[#allocation9_spill] sm:$0xff] }
 0x136   : > { %v9423_v37 = vmax.f32 %v1956_v57, %v2212_v54  ;;  %7267 = vrcp.f32 %v799_v60  ;;  %v2329_v40 = vsel %vm1324_vm10, %v2275_v1, %v16273_v44  ;;  %v17291_v47 = vrot.slane %v9169_v22, 1  ;;  %v7260_v43 = vpop.eup %7259 }
 0x137   : > { %v1754_v57 = vsel %vm17122_vm1, %v17290_v24, %v1699_v0  ;;  %vm16289_vm9 = vcmp.eq.s32.totalorder %v17292_v21, 1  ;;  %7269 = vrcp.f32 %v797_v42  ;;  %v9445_v29 = vsel %vm16269_vm15, %v2329_v40, -1e+30  ;;  %v7262_v0 = vpop.eup %7261 }
 0x138   : > { %17287 = vst [vmem:[#allocation112_spill] sm:$0xff] %v9423_v37  ;;  %v2041_v6 = vsel %vm1035_vm5, %v17291_v47, %v1988_v33  ;;  %17293 = vst [vmem:[#allocation60_spill] sm:$0xff] %v9445_v29  ;;  %v1923_v60 = vsel %vm16279_vm2, %v1754_v57, -1e+30  ;;  %v9452_v24 = vmul.f32 %v7254_v52, %v9151_v3  ;;  %v9455_v33 = vmul.f32 %v7260_v43, %v9178_v62  ;;  %v9469_v3 = vpop.permute.xlu1 %2419  ;;  %v17298_v62 = vld [vmem:[#allocation43_spill] sm:$0xff]  ;;  %v17328_v37 = vld [vmem:[#allocation46_spill] sm:$0xff] }
 0x139   : > { %v2211_v54 = vsel %vm16270_vm11, %v2041_v6, -1e+30  ;;  %v1955_v47 = vmax.f32 %v9169_v22, %v1923_v60  ;;  %v17296_v40 = vrot.slane %v9156_v41, 6  ;;  %vm16272_vm15 = vcmp.eq.s32.totalorder %v9242_v17, 1  ;;  %17297 = vst [vmem:[#allocation116_spill] sm:$0xff] %v9469_v3  ;;  %3104 = vperm.xlu1 %7170, %v9049_v36   ;;  %3197 = vperm.xlu0 %7169, %v9084_v25  }
 0x13a   : > { %17294 = vst [vmem:[#allocation114_spill] sm:$0xff] %v9452_v24  ;;  %17295 = vst [vmem:[#allocation115_spill] sm:$0xff] %v9455_v33  ;;  %v636_v6 = vmul.f32 %v9244_v59, %v8840_v58  ;;  %v634_v52 = vmul.f32 %v8840_v58, %v9257_v14  ;;  %vm16296_vm11 = vcmp.eq.s32.totalorder %v17298_v62, 1  ;;  %v9475_v43 = vmul.f32 %v7262_v0, %v9182_v31 }
 0x13b   : > { %v2330_v57 = vsel %vm1324_vm10, %v17296_v40, %v2275_v1  ;;  %v9477_v1 = vmax.f32 %v1955_v47, %v2211_v54  ;;  %v1701_v60 = vrot.slane %v9162_v9, 7  ;;  %v16271_v59 = vrot.slane %v9196_v50, 7  ;;  %v9481_v40 = vpop.permute.xlu0 %2416 }
 0x13c   : > { %17299 = vst [vmem:[#allocation117_spill] sm:$0xff] %v9475_v43  ;;  %17301 = vst [vmem:[#allocation119_spill] sm:$0xff] %v9481_v40  ;;  %v9484_v58 = vadd.f32 %v8847_v63, %v636_v6  ;;  %v9487_v36 = vadd.f32 %v8847_v63, %v634_v52  ;;  %v1990_v25 = vrot.slane %v9196_v50, 1  ;;  %v16276_v14 = vrot.slane %v9235_v20, 1  ;;  %v9529_v39 = vpop.permute.xlu1 %2425 }
 0x13d   : > { %17300 = vst [vmem:[#allocation118_spill] sm:$0xff] %v9477_v1  ;;  %v9493_v31 = vsel %vm16272_vm15, %v2330_v57, -1e+30  ;;  %v1751_v54 = vsel %vm17122_vm1, %v1701_v60, %v16271_v59  ;;  %v2277_v0 = vrot.slane %v9162_v9, 6  ;;  %2961 = vperm.xlu1 %7170, %v9092_v30   ;;  %3107 = vperm.xlu0 %7169, %v9098_v16   ;;  %v17303_v59 = vld [vmem:[#allocation10_spill] sm:$0xff]  ;;  %v17304_v51 = vrot.slane %v9196_v50, 6 }
 0x13e   : > { %17302 = vst [vmem:[#allocation120_spill] sm:$0xff] %v9493_v31  ;;  %v6691_v63 = vmul.f32 -1.442695, %v9484_v58  ;;  %v6689_v6 = vmul.f32 -1.442695, %v9487_v36  ;;  %v2038_v57 = vsel %vm1035_vm5, %v1990_v25, %v16276_v14  ;;  %v7264_v42 = vpop.eup %7263  ;;  %vm16302_vm15 = vcmp.eq.s32.totalorder %v17303_v59, 1 }
 0x13f   : > { %v1926_v52 = vsel %vm16275_vm0, %v1751_v54, -1e+30  ;;  %v2214_v47 = vsel %vm16288_vm7, %v2038_v57, -1e+30  ;;  %v2327_v54 = vsel %vm1324_vm10, %v2277_v0, %v17304_v51  ;;  %vm16286_vm0 = vcmp.eq.s32.totalorder %v9271_v38, 1  ;;  %v7266_v14 = vpop.eup %7265  ;;  %17308 = vst [vmem:[#allocation122_spill] sm:$0xff] %v9529_v39 }
 0x140   : > { %v1958_v44 = vmax.f32 %v9196_v50, %v1926_v52  ;;  %vm16306_vm2 = vcmp.eq.s32.totalorder %v17305_v11, 1  ;;  %v802_v30 = vadd.f32 1.0, %v7264_v42  ;;  %7271 = vpow2.f32 %v6691_v63  ;;  %v7268_v48 = vpop.eup %7267  ;;  %v9535_v63 = vpop.permute.xlu0 %2422 }
 0x141   : > { %v9523_v16 = vsel %vm16286_vm0, %v2327_v54, -1e+30  ;;  %v17307_v52 = vrot.slane %v9209_v13, 7  ;;  %v800_v51 = vadd.f32 1.0, %v7266_v14  ;;  %7273 = vpow2.f32 %v6689_v6  ;;  %17310 = vst [vmem:[#allocation124_spill] sm:$0xff] %v9535_v63  ;;  %v7270_v38 = vpop.eup %7269  ;;  %v17311_v54 = vld [vmem:[#allocation11_spill] sm:$0xff]  ;;  %3110 = vperm.xlu1 %7170, %v9102_v7   ;;  %2964 = vperm.xlu0 %7169, %v9117_v18  }
 0x142   : > { %17306 = vst [vmem:[#allocation121_spill] sm:$0xff] %v9523_v16  ;;  %v9531_v17 = vmax.f32 %v1958_v44, %v2214_v47  ;;  %vm16315_vm0 = vcmp.eq.s32.totalorder %v17311_v54, 1  ;;  %7275 = vrcp.f32 %v802_v30  ;;  %v17313_v14 = vld [vmem:[#allocation45_spill] sm:$0xff]  ;;  %v9549_v47 = vmul.f32 %v7268_v48, %v9265_v4  ;;  %v17317_v18 = vld [vmem:[#allocation95_spill] sm:$0xff]  ;;  %v7459_v4 = vld [vmem:[%s16153_s3] ss:$0 sm:$0xff]  ;;  %v9583_v30 = vpop.permute.xlu1 %2431 }
 0x143   : > { %v1752_v57 = vsel %vm17122_vm1, %v17307_v52, %v1701_v60  ;;  %v17312_v52 = vrot.slane %v9162_v9, 1  ;;  %vm16321_vm7 = vcmp.eq.s32.totalorder %v17313_v14, 1  ;;  %v9552_v6 = vmul.f32 %v7270_v38, %v9268_v12  ;;  %17322 = vst [vmem:[#allocation129_spill] sm:$0xff] %v9583_v30  ;;  %v17326_v16 = vld [vmem:[#allocation12_spill] sm:$0xff] }
 0x144   : > { %17309 = vst [vmem:[#allocation123_spill] sm:$0xff] %v9531_v17  ;;  %v1925_v42 = vsel %vm16289_vm9, %v1752_v57, -1e+30  ;;  %17314 = vst [vmem:[#allocation125_spill] sm:$0xff] %v9549_v47  ;;  %7277 = vrcp.f32 %v800_v51  ;;  %vm16294_vm9 = vcmp.eq.s32.totalorder %v17317_v18, 1  ;;  %v639_v38 = vmul.f32 %v7459_v4, %v9293_v46  ;;  %v9593_v62 = vpop.permute.xlu0 %2428 }
 0x145   : > { %v1957_v60 = vmax.f32 %v9162_v9, %v1925_v42  ;;  %v2039_v44 = vsel %vm1035_vm5, %v17312_v52, %v1990_v25  ;;  %17315 = vst [vmem:[#allocation126_spill] sm:$0xff] %v9552_v6  ;;  %v17316_v25 = vrot.slane %v9209_v13, 6  ;;  %v637_v48 = vmul.f32 %v7459_v4, %v9301_v23  ;;  %v17319_v42 = vld [vmem:[#allocation91_spill] sm:$0xff]  ;;  %17323 = vst [vmem:[#allocation130_spill] sm:$0xff] %v9593_v62 }
 0x146   : > { %v2213_v57 = vsel %vm16296_vm11, %v2039_v44, -1e+30  ;;  %v1703_v51 = vrot.slane %v9235_v20, 7  ;;  %v16297_v52 = vrot.slane %v17319_v42, 7  ;;  %v1992_v46 = vrot.slane %v17319_v42, 1 }
 0x147   : > { %v2328_v7 = vsel %vm1324_vm10, %v17316_v25, %v2277_v0  ;;  %v9567_v12 = vmax.f32 %v1957_v60, %v2213_v57  ;;  %v7460_v0 = vld [vmem:[%s16154_s4] ss:$0 sm:$0xff]  ;;  %v2279_v49 = vrot.slane %v9235_v20, 6  ;;  %vm16329_vm11 = vcmp.eq.s32.totalorder %v17326_v16, 1 }
 0x148   : > { %v9574_v44 = vsel %vm16294_vm9, %v2328_v7, -1e+30  ;;  %v9579_v25 = vadd.f32 %v7460_v0, %v639_v38  ;;  %v17321_v60 = vld [vmem:[#allocation86_spill] sm:$0xff]  ;;  %v9585_v23 = vadd.f32 %v7460_v0, %v637_v48  ;;  %v1749_v7 = vsel %vm17122_vm1, %v1703_v51, %v16297_v52 }
 0x149   : > { %17318 = vst [vmem:[#allocation127_spill] sm:$0xff] %v9567_v12  ;;  %17320 = vst [vmem:[#allocation128_spill] sm:$0xff] %v9574_v44  ;;  %v1928_v57 = vsel %vm16302_vm15, %v1749_v7, -1e+30  ;;  %v17324_v21 = vrot.slane %v17321_v60, 1  ;;  %vm16314_vm9 = vcmp.eq.s32.totalorder %v17325_v15, 1 }
 0x14a   : > { %v6694_v38 = vmul.f32 -1.442695, %v9579_v25  ;;  %v6692_v52 = vmul.f32 -1.442695, %v9585_v23  ;;  %v1960_v18 = vmax.f32 %v17319_v42, %v1928_v57  ;;  %v17327_v29 = vrot.slane %v17319_v42, 6  ;;  %v7272_v59 = vpop.eup %7271 }
 0x14b   : > { %v2036_v48 = vsel %vm1035_vm5, %v1992_v46, %v17324_v21  ;;  %vm16345_vm15 = vcmp.eq.s32.totalorder %v17328_v37, 1  ;;  %v17330_v31 = vrot.slane %v9196_v50, 7  ;;  %v7274_v1 = vpop.eup %7273  ;;  %v803_v9 = vadd.f32 1.0, %v7272_v59 }
 0x14c   : > { %v2216_v17 = vsel %vm16306_vm2, %v2036_v48, -1e+30  ;;  %v2325_v7 = vsel %vm1324_vm10, %v2279_v49, %v17327_v29  ;;  %7279 = vpow2.f32 %v6694_v38  ;;  %v17331_v48 = vrot.slane %v9235_v20, 1  ;;  %v17332_v29 = vld [vmem:[#allocation13_spill] sm:$0xff]  ;;  %v7276_v15 = vpop.eup %7275 }
 0x14d   : > { %v9615_v21 = vsel %vm16314_vm9, %v2325_v7, -1e+30  ;;  %v1750_v57 = vsel %vm17122_vm1, %v17330_v31, %v1703_v51  ;;  %vm16351_vm2 = vcmp.eq.s32.totalorder %v17332_v29, 1  ;;  %7281 = vpow2.f32 %v6692_v52  ;;  %v17338_v52 = vld [vmem:[#allocation47_spill] sm:$0xff] }
 0x14e   : > { %17329 = vst [vmem:[#allocation131_spill] sm:$0xff] %v9615_v21  ;;  %v2037_v11 = vsel %vm1035_vm5, %v17331_v48, %v1992_v46  ;;  %v9626_v38 = vmax.f32 %v1960_v18, %v2216_v17  ;;  %v1927_v7 = vsel %vm16315_vm0, %v1750_v57, -1e+30  ;;  %v801_v13 = vadd.f32 1.0, %v7274_v1  ;;  %v9635_v48 = vpop.permute.xlu1 %2437  ;;  %v7278_v22 = vpop.eup %7277  ;;  %v17349_v21 = vld [vmem:[#allocation15_spill] sm:$0xff] }
 0x14f   : > { %v1959_v51 = vmax.f32 %v9235_v20, %v1927_v7  ;;  %v2215_v46 = vsel %vm16321_vm7, %v2037_v11, -1e+30  ;;  %17334 = vst [vmem:[#allocation133_spill] sm:$0xff] %v9635_v48  ;;  %v9638_v59 = vmul.f32 %v7276_v15, %v9378_v8  ;;  %7283 = vrcp.f32 %v803_v9  ;;  %v9645_v18 = vpop.permute.xlu0 %2434  ;;  %v17341_v9 = vld [vmem:[#allocation99_spill] sm:$0xff]  ;;  %v17342_v7 = vld [vmem:[#allocation100_spill] sm:$0xff] }
 0x150   : > { %17333 = vst [vmem:[#allocation132_spill] sm:$0xff] %v9626_v38  ;;  %v17336_v17 = vrot.slane %v9196_v50, 6  ;;  %vm16318_vm9 = vcmp.eq.s32.totalorder %v9311_v45, 1  ;;  %17337 = vst [vmem:[#allocation135_spill] sm:$0xff] %v9645_v18  ;;  %vm16347_vm0 = vcmp.eq.s32.totalorder %v17338_v52, 1  ;;  %v9649_v11 = vmul.f32 %v7278_v22, %v9381_v34 }
 0x151   : > { %17335 = vst [vmem:[#allocation134_spill] sm:$0xff] %v9638_v59  ;;  %7285 = vrcp.f32 %v801_v13  ;;  %v9653_v8 = vmax.f32 %v1959_v51, %v2215_v46  ;;  %v640_v57 = vmul.f32 %v7459_v4, %v17341_v9  ;;  %v638_v31 = vmul.f32 %v7459_v4, %v17342_v7  ;;  %v17345_v13 = vld [vmem:[#allocation97_spill] sm:$0xff]  ;;  %v17350_v9 = vld [vmem:[#allocation48_spill] sm:$0xff] }
 0x152   : > { %v2326_v1 = vsel %vm1324_vm10, %v17336_v17, %v2279_v49  ;;  %17339 = vst [vmem:[#allocation136_spill] sm:$0xff] %v9649_v11  ;;  %v1705_v49 = vrot.slane %v17321_v60, 7  ;;  %v17343_v17 = vld [vmem:[#allocation89_spill] sm:$0xff]  ;;  %v1995_v34 = vrot.slane %v17345_v13, 1  ;;  %v2281_v15 = vrot.slane %v17321_v60, 6 }
 0x153   : > { %17340 = vst [vmem:[#allocation137_spill] sm:$0xff] %v9653_v8  ;;  %v1706_v14 = vrot.slane %v17343_v17, 7  ;;  %v9661_v54 = vsel %vm16318_vm9, %v2326_v1, -1e+30  ;;  %v1994_v22 = vrot.slane %v17343_v17, 1  ;;  %v9666_v51 = vadd.f32 %v7460_v0, %v640_v57  ;;  %v9692_v12 = vpop.permute.xlu0 %2440 }
 0x154   : > { %17344 = vst [vmem:[#allocation99_spill] sm:$0xff] %v9661_v54  ;;  %v9668_v46 = vadd.f32 %v7460_v0, %v638_v31  ;;  %vm16346_vm9 = vcmp.eq.s32.totalorder %v9348_v5, 1  ;;  %v17346_v45 = vrot.slane %v17319_v42, 7  ;;  %v9682_v0 = vpop.permute.xlu1 %2443  ;;  %v17348_v31 = vld [vmem:[#allocation14_spill] sm:$0xff]  ;;  %vm16377_vm8 = vcmp.eq.s32.totalorder %v17349_v21, 1  ;;  %17351 = vst [vmem:[#allocation138_spill] sm:$0xff] %v9692_v12 }
 0x155   : > { %v1747_v4 = vsel %vm17122_vm1, %v1705_v49, %v1706_v14  ;;  %v2034_v1 = vsel %vm1035_vm5, %v1994_v22, %v1995_v34  ;;  %17347 = vst [vmem:[#allocation100_spill] sm:$0xff] %v9682_v0  ;;  %vm16357_vm7 = vcmp.eq.s32.totalorder %v17348_v31, 1  ;;  %vm16358_vm6 = vcmp.eq.s32.totalorder %v17350_v9, 1 }
 0x156   : > { %v1930_v7 = vsel %vm16329_vm11, %v1747_v4, -1e+30  ;;  %v1748_v57 = vsel %vm17122_vm1, %v17346_v45, %v1705_v49  ;;  %v6695_v4 = vmul.f32 -1.442695, %v9666_v51  ;;  %v6693_v16 = vmul.f32 -1.442695, %v9668_v46  ;;  %v7280_v45 = vpop.eup %7279 }
 0x157   : > { %v1962_v38 = vmax.f32 %v17343_v17, %v1930_v7  ;;  %v2218_v44 = vsel %vm16345_vm15, %v2034_v1, -1e+30  ;;  %v17352_v49 = vld [vmem:[#allocation49_spill] sm:$0xff]  ;;  %v17353_v50 = vrot.slane %v17343_v17, 6  ;;  %v1929_v27 = vsel %vm16351_vm2, %v1748_v57, -1e+30  ;;  %v7282_v37 = vpop.eup %7281 }
 0x158   : > { %vm16374_vm11 = vcmp.eq.s32.totalorder %v17352_v49, 1  ;;  %v17354_v7 = vrot.slane %v17321_v60, 1  ;;  %v806_v35 = vadd.f32 1.0, %v7280_v45  ;;  %7287 = vpow2.f32 %v6695_v4 }
 0x159   : > { %v2323_v41 = vsel %vm1324_vm10, %v2281_v15, %v17353_v50  ;;  %v9707_v12 = vmax.f32 %v1962_v38, %v2218_v44  ;;  %v804_v54 = vadd.f32 1.0, %v7282_v37  ;;  %7289 = vpow2.f32 %v6693_v16  ;;  %v7284_v8 = vpop.eup %7283  ;;  %v17358_v38 = vld [vmem:[#allocation16_spill] sm:$0xff] }
 0x15a   : > { %v2035_v1 = vsel %vm1035_vm5, %v17354_v7, %v1994_v22  ;;  %v9711_v20 = vsel %vm16346_vm9, %v2323_v41, -1e+30  ;;  %v1961_v50 = vmax.f32 %v17321_v60, %v1929_v27  ;;  %v17357_v57 = vrot.slane %v17319_v42, 6  ;;  %v17363_v7 = vld [vmem:[#allocation50_spill] sm:$0xff] }
 0x15b   : > { %17355 = vst [vmem:[#allocation139_spill] sm:$0xff] %v9707_v12  ;;  %17356 = vst [vmem:[#allocation140_spill] sm:$0xff] %v9711_v20  ;;  %7291 = vrcp.f32 %v806_v35  ;;  %v2217_v22 = vsel %vm16347_vm0, %v2035_v1, -1e+30  ;;  %vm16348_vm15 = vcmp.eq.s32.totalorder %v9356_v19, 1  ;;  %v1707_v44 = vrot.slane %v17345_v13, 7  ;;  %v7286_v41 = vpop.eup %7285  ;;  %v9730_v35 = vpop.permute.xlu1 %2449 }
 0x15c   : > { %v2324_v29 = vsel %vm1324_vm10, %v17357_v57, %v2281_v15  ;;  %vm16380_vm9 = vcmp.eq.s32.totalorder %v17358_v38, 1  ;;  %v9724_v37 = vmul.f32 %v7284_v8, %v9484_v58  ;;  %7293 = vrcp.f32 %v804_v54  ;;  %17361 = vst [vmem:[#allocation143_spill] sm:$0xff] %v9730_v35  ;;  %v9739_v58 = vpop.permute.xlu0 %2446  ;;  %v17365_v54 = vld [vmem:[#allocation51_spill] sm:$0xff] }
 0x15d   : > { %v9728_v16 = vmax.f32 %v1961_v50, %v2217_v22  ;;  %v9734_v15 = vsel %vm16348_vm15, %v2324_v29, -1e+30  ;;  %v1708_v4 = vrot.slane %v9351_v32, 7  ;;  %v1996_v45 = vrot.slane %v9351_v32, 1  ;;  %17364 = vst [vmem:[#allocation145_spill] sm:$0xff] %v9739_v58 }
 0x15e   : > { %17359 = vst [vmem:[#allocation141_spill] sm:$0xff] %v9724_v37  ;;  %17362 = vst [vmem:[#allocation144_spill] sm:$0xff] %v9734_v15  ;;  %v1997_v1 = vrot.slane %v17363_v7, 1  ;;  %vm16382_vm0 = vcmp.eq.s32.totalorder %v17365_v54, 1  ;;  %v9743_v8 = vmul.f32 %v7286_v41, %v9487_v36  ;;  %v2283_v50 = vrot.slane %v17345_v13, 6  ;;  %v17367_v36 = vld [vmem:[#allocation17_spill] sm:$0xff] }
 0x15f   : > { %17360 = vst [vmem:[#allocation142_spill] sm:$0xff] %v9728_v16  ;;  %v2284_v57 = vrot.slane %v9351_v32, 6  ;;  %vm16369_vm15 = vcmp.eq.s32.totalorder %v9384_v2, 1  ;;  %v1745_v29 = vsel %vm17122_vm1, %v1707_v44, %v1708_v4  ;;  %v1746_v27 = vsel %vm17122_vm1, %v1706_v14, %v1707_v44  ;;  %v17379_v15 = vld [vmem:[#allocation55_spill] sm:$0xff] }
 0x160   : > { %17366 = vst [vmem:[#allocation146_spill] sm:$0xff] %v9743_v8  ;;  %v2032_v22 = vsel %vm1035_vm5, %v1996_v45, %v1997_v1  ;;  %v2033_v5 = vsel %vm1035_vm5, %v1995_v34, %v1996_v45  ;;  %vm16383_vm2 = vcmp.eq.s32.totalorder %v17367_v36, 1  ;;  %v1932_v41 = vsel %vm16357_vm7, %v1745_v29, -1e+30  ;;  %v17369_v45 = vld [vmem:[#allocation53_spill] sm:$0xff] }
 0x161   : > { %v2220_v19 = vsel %vm16358_vm6, %v2032_v22, -1e+30  ;;  %v2321_v52 = vsel %vm1324_vm10, %v2283_v50, %v2284_v57  ;;  %v1931_v20 = vsel %vm16377_vm8, %v1746_v27, -1e+30  ;;  %v1964_v12 = vmax.f32 %v9351_v32, %v1932_v41  ;;  %v17371_v41 = vld [vmem:[#allocation52_spill] sm:$0xff] }
 0x162   : > { %v9768_v14 = vsel %vm16369_vm15, %v2321_v52, -1e+30  ;;  %v1963_v34 = vmax.f32 %v17345_v13, %v1931_v20  ;;  %v2219_v44 = vsel %vm16374_vm11, %v2033_v5, -1e+30  ;;  %vm16387_vm7 = vcmp.eq.s32.totalorder %v17369_v45, 1  ;;  %v9781_v52 = vpop.permute.xlu1 %2455  ;;  %v7288_v9 = vpop.eup %7287 }
 0x163   : > { %17368 = vst [vmem:[#allocation147_spill] sm:$0xff] %v9768_v14  ;;  %v17370_v29 = vrot.slane %v17343_v17, 6  ;;  %vm16372_vm6 = vcmp.eq.s32.totalorder %v9397_v28, 1  ;;  %v1709_v27 = vrot.slane %v17363_v7, 7  ;;  %v1710_v2 = vrot.slane %v17371_v41, 7  ;;  %17372 = vst [vmem:[#allocation148_spill] sm:$0xff] %v9781_v52 }
 0x164   : > { %v9785_v5 = vmax.f32 %v1964_v12, %v2220_v19  ;;  %v9787_v31 = vmax.f32 %v1963_v34, %v2219_v44  ;;  %v807_v21 = vadd.f32 1.0, %v7288_v9  ;;  %v1998_v13 = vrot.slane %v17371_v41, 1  ;;  %v17377_v19 = vld [vmem:[#allocation18_spill] sm:$0xff]  ;;  %v17378_v28 = vld [vmem:[#allocation19_spill] sm:$0xff]  ;;  %v17380_v34 = vld [vmem:[#allocation56_spill] sm:$0xff] }
 0x165   : > { %v2322_v22 = vsel %vm1324_vm10, %v17370_v29, %v2283_v50  ;;  %v9793_v50 = vpop.permute.xlu0 %2452  ;;  %v7290_v29 = vpop.eup %7289  ;;  %v1743_v32 = vsel %vm17122_vm1, %v1709_v27, %v1710_v2  ;;  %v1999_v17 = vrot.slane %v9390_v61, 1  ;;  %vm16400_vm15 = vcmp.eq.s32.totalorder %v17377_v19, 1 }
 0x166   : > { %17373 = vst [vmem:[#allocation149_spill] sm:$0xff] %v9785_v5  ;;  %17374 = vst [vmem:[#allocation150_spill] sm:$0xff] %v9787_v31  ;;  %v9791_v49 = vsel %vm16372_vm6, %v2322_v22, -1e+30  ;;  %v7292_v20 = vpop.eup %7291  ;;  %v805_v12 = vadd.f32 1.0, %v7290_v29  ;;  %v2285_v22 = vrot.slane %v17363_v7, 6  ;;  %7295 = vrcp.f32 %v807_v21 }
 0x167   : > { %17375 = vst [vmem:[#allocation151_spill] sm:$0xff] %v9791_v49  ;;  %17376 = vst [vmem:[#allocation152_spill] sm:$0xff] %v9793_v50  ;;  %v1934_v44 = vsel %vm16380_vm9, %v1743_v32, -1e+30  ;;  %v7294_v9 = vpop.eup %7293  ;;  %vm16410_vm6 = vcmp.eq.s32.totalorder %v17378_v28, 1  ;;  %vm16402_vm11 = vcmp.eq.s32.totalorder %v17379_v15, 1  ;;  %v2030_v29 = vsel %vm1035_vm5, %v1998_v13, %v1999_v17  ;;  %v9826_v49 = vpop.permute.xlu1 %2461 }
 0x168   : > { %v1966_v60 = vmax.f32 %v17371_v41, %v1934_v44  ;;  %vm16403_vm8 = vcmp.eq.s32.totalorder %v17380_v34, 1  ;;  %v9814_v32 = vmul.f32 %v7292_v20, %v9579_v25  ;;  %7297 = vrcp.f32 %v805_v12  ;;  %17383 = vst [vmem:[#allocation155_spill] sm:$0xff] %v9826_v49  ;;  %v17398_v15 = vld [vmem:[#allocation22_spill] sm:$0xff] }
 0x169   : > { %v2222_v38 = vsel %vm16382_vm0, %v2030_v29, -1e+30  ;;  %v2286_v14 = vrot.slane %v17371_v41, 6  ;;  %vm16384_vm9 = vcmp.eq.s32.totalorder %v9420_v55, 1  ;;  %v1744_v44 = vsel %vm17122_vm1, %v1708_v4, %v1709_v27  ;;  %v9837_v12 = vpop.permute.xlu0 %2458  ;;  %v17388_v29 = vld [vmem:[#allocation21_spill] sm:$0xff] }
 0x16a   : > { %17381 = vst [vmem:[#allocation153_spill] sm:$0xff] %v9814_v32  ;;  %v9819_v21 = vmax.f32 %v1966_v60, %v2222_v38  ;;  %v2031_v16 = vsel %vm1035_vm5, %v1997_v1, %v1998_v13  ;;  %v9829_v25 = vmul.f32 %v7294_v9, %v9585_v23  ;;  %v1933_v60 = vsel %vm16383_vm2, %v1744_v44, -1e+30  ;;  %17385 = vst [vmem:[#allocation157_spill] sm:$0xff] %v9837_v12  ;;  %v17387_v9 = vld [vmem:[#allocation20_spill] sm:$0xff]  ;;  %v17390_v55 = vld [vmem:[#allocation57_spill] sm:$0xff] }
 0x16b   : > { %v2319_v20 = vsel %vm1324_vm10, %v2285_v22, %v2286_v14  ;;  %v2320_v38 = vsel %vm1324_vm10, %v2284_v57, %v2285_v22  ;;  %v1965_v13 = vmax.f32 %v17363_v7, %v1933_v60  ;;  %vm16394_vm0 = vcmp.eq.s32.totalorder %v9426_v26, 1 }
 0x16c   : > { %17382 = vst [vmem:[#allocation154_spill] sm:$0xff] %v9819_v21  ;;  %17384 = vst [vmem:[#allocation156_spill] sm:$0xff] %v9829_v25  ;;  %v9841_v4 = vsel %vm16384_vm9, %v2319_v20, -1e+30  ;;  %v1711_v23 = vrot.slane %v9390_v61, 7  ;;  %v1712_v57 = vrot.slane %v9452_v24, 7 }
 0x16d   : > { %17386 = vst [vmem:[#allocation158_spill] sm:$0xff] %v9841_v4  ;;  %v2221_v27 = vsel %vm16387_vm7, %v2031_v16, -1e+30  ;;  %v2000_v22 = vrot.slane %v9452_v24, 1  ;;  %vm16418_vm2 = vcmp.eq.s32.totalorder %v17387_v9, 1  ;;  %vm16421_vm9 = vcmp.eq.s32.totalorder %v17388_v29, 1 }
 0x16e   : > { %v9856_v44 = vsel %vm16394_vm0, %v2320_v38, -1e+30  ;;  %v2001_v20 = vrot.slane %v9387_v53, 1  ;;  %v2287_v60 = vrot.slane %v9390_v61, 6  ;;  %v2288_v1 = vrot.slane %v9452_v24, 6 }
 0x16f   : > { %17389 = vst [vmem:[#allocation159_spill] sm:$0xff] %v9856_v44  ;;  %vm16420_vm7 = vcmp.eq.s32.totalorder %v17390_v55, 1  ;;  %v9862_v16 = vmax.f32 %v1965_v13, %v2221_v27  ;;  %v1741_v54 = vsel %vm17122_vm1, %v1711_v23, %v1712_v57  ;;  %v1742_v45 = vsel %vm17122_vm1, %v1710_v2, %v1711_v23  ;;  %v9877_v13 = vpop.permute.xlu1 %2659  ;;  %v17393_v27 = vld [vmem:[#allocation58_spill] sm:$0xff] }
 0x170   : > { %v2029_v38 = vsel %vm1035_vm5, %v1999_v17, %v2000_v22  ;;  %v1936_v26 = vsel %vm16400_vm15, %v1741_v54, -1e+30  ;;  %v2028_v36 = vsel %vm1035_vm5, %v2000_v22, %v2001_v20  ;;  %v2317_v4 = vsel %vm1324_vm10, %v2287_v60, %v2288_v1  ;;  %17392 = vst [vmem:[#allocation161_spill] sm:$0xff] %v9877_v13  ;;  %v9887_v22 = vpop.permute.xlu0 %2656  ;;  %v7296_v19 = vpop.eup %7295 }
 0x171   : > { %17391 = vst [vmem:[#allocation160_spill] sm:$0xff] %v9862_v16  ;;  %vm16404_vm0 = vcmp.eq.s32.totalorder %v9469_v3, 1  ;;  %vm16425_vm4 = vcmp.eq.s32.totalorder %v17393_v27, 1  ;;  %v1968_v17 = vmax.f32 %v9452_v24, %v1936_v26  ;;  %v2224_v54 = vsel %vm16402_vm11, %v2028_v36, -1e+30  ;;  %17394 = vst [vmem:[#allocation162_spill] sm:$0xff] %v9887_v22 }
 0x172   : > { %v1935_v23 = vsel %vm16410_vm6, %v1742_v45, -1e+30  ;;  %v2223_v31 = vsel %vm16403_vm8, %v2029_v38, -1e+30  ;;  %v2318_v5 = vsel %vm1324_vm10, %v2286_v14, %v2287_v60  ;;  %vm16407_vm15 = vcmp.eq.s32.totalorder %v9481_v40, 1  ;;  %v7298_v26 = vpop.eup %7297  ;;  %v17405_v40 = vld [vmem:[#allocation62_spill] sm:$0xff] }
 0x173   : > { %v1967_v21 = vmax.f32 %v9390_v61, %v1935_v23  ;;  %v9896_v2 = vmul.f32 %v7296_v19, %v9666_v51  ;;  %v9898_v36 = vmax.f32 %v1968_v17, %v2224_v54  ;;  %v9902_v45 = vsel %vm16404_vm0, %v2317_v4, -1e+30  ;;  %v17402_v19 = vld [vmem:[#allocation23_spill] sm:$0xff]  ;;  %v17403_v17 = vld [vmem:[#allocation61_spill] sm:$0xff] }
 0x174   : > { %17397 = vst [vmem:[#allocation165_spill] sm:$0xff] %v9902_v45  ;;  %v1713_v23 = vrot.slane %v9387_v53, 7  ;;  %vm16441_vm11 = vcmp.eq.s32.totalorder %v17398_v15, 1  ;;  %v9907_v38 = vmul.f32 %v7298_v26, %v9668_v46  ;;  %v9913_v60 = vsel %vm16407_vm15, %v2318_v5, -1e+30  ;;  %v9929_v26 = vpop.permute.xlu1 %2665 }
 0x175   : > { %17395 = vst [vmem:[#allocation163_spill] sm:$0xff] %v9896_v2  ;;  %17396 = vst [vmem:[#allocation164_spill] sm:$0xff] %v9898_v36  ;;  %v9909_v14 = vmax.f32 %v1967_v21, %v2223_v31  ;;  %v1714_v51 = vrot.slane %v9408_v56, 7  ;;  %vm16451_vm8 = vcmp.eq.s32.totalorder %v17402_v19, 1  ;;  %vm16437_vm0 = vcmp.eq.s32.totalorder %v17403_v17, 1  ;;  %v9940_v36 = vpop.permute.xlu0 %2662 }
 0x176   : > { %17399 = vst [vmem:[#allocation166_spill] sm:$0xff] %v9907_v38  ;;  %17401 = vst [vmem:[#allocation168_spill] sm:$0xff] %v9913_v60  ;;  %v2002_v4 = vrot.slane %v9408_v56, 1  ;;  %v2003_v54 = vrot.slane %v9475_v43, 1  ;;  %v2289_v3 = vrot.slane %v9387_v53, 6  ;;  %v2290_v46 = vrot.slane %v9408_v56, 6 }
 0x177   : > { %17400 = vst [vmem:[#allocation167_spill] sm:$0xff] %v9909_v14  ;;  %v1739_v5 = vsel %vm17122_vm1, %v1713_v23, %v1714_v51  ;;  %vm16422_vm15 = vcmp.eq.s32.totalorder %v9529_v39, 1  ;;  %v1740_v21 = vsel %vm17122_vm1, %v1712_v57, %v1713_v23  ;;  %17404 = vst [vmem:[#allocation169_spill] sm:$0xff] %v9929_v26  ;;  %vm16446_vm6 = vcmp.eq.s32.totalorder %v17405_v40, 1  ;;  %v17409_v57 = vld [vmem:[#allocation24_spill] sm:$0xff]  ;;  %v17425_v40 = vld [vmem:[#allocation29_spill] sm:$0xff] }
 0x178   : > { %v1938_v34 = vsel %vm16418_vm2, %v1739_v5, -1e+30  ;;  %v2026_v28 = vsel %vm1035_vm5, %v2002_v4, %v2003_v54  ;;  %v2315_v31 = vsel %vm1324_vm10, %v2289_v3, %v2290_v46  ;;  %v1937_v45 = vsel %vm16421_vm9, %v1740_v21, -1e+30  ;;  %17406 = vst [vmem:[#allocation170_spill] sm:$0xff] %v9940_v36  ;;  %v9979_v55 = vpop.permute.xlu1 %2671 }
 0x179   : > { %v1970_v23 = vmax.f32 %v9408_v56, %v1938_v34  ;;  %v2226_v9 = vsel %vm16420_vm7, %v2026_v28, -1e+30  ;;  %v1969_v5 = vmax.f32 %v9387_v53, %v1937_v45  ;;  %v2027_v44 = vsel %vm1035_vm5, %v2001_v20, %v2002_v4  ;;  %v17410_v20 = vld [vmem:[#allocation25_spill] sm:$0xff]  ;;  %17414 = vst [vmem:[#allocation175_spill] sm:$0xff] %v9979_v55  ;;  %v17416_v56 = vld [vmem:[#allocation64_spill] sm:$0xff] }
 0x17a   : > { %v2316_v16 = vsel %vm1324_vm10, %v2288_v1, %v2289_v3  ;;  %vm16432_vm2 = vcmp.eq.s32.totalorder %v9535_v63, 1  ;;  %v1715_v21 = vrot.slane %v9475_v43, 7  ;;  %v9958_v34 = vsel %vm16422_vm15, %v2315_v31, -1e+30  ;;  %v17412_v31 = vld [vmem:[#allocation63_spill] sm:$0xff] }
 0x17b   : > { %v9954_v29 = vmax.f32 %v1970_v23, %v2226_v9  ;;  %17408 = vst [vmem:[#allocation172_spill] sm:$0xff] %v9958_v34  ;;  %v2225_v28 = vsel %vm16425_vm4, %v2027_v44, -1e+30  ;;  %v1716_v45 = vrot.slane %v9552_v6, 7  ;;  %vm16456_vm7 = vcmp.eq.s32.totalorder %v17409_v57, 1 }
 0x17c   : > { %vm16455_vm9 = vcmp.eq.s32.totalorder %v17410_v20, 1  ;;  %v9967_v3 = vsel %vm16432_vm2, %v2316_v16, -1e+30  ;;  %v2004_v1 = vrot.slane %v9552_v6, 1  ;;  %v2005_v9 = vrot.slane %v9455_v33, 1 }
 0x17d   : > { %17407 = vst [vmem:[#allocation171_spill] sm:$0xff] %v9954_v29  ;;  %17411 = vst [vmem:[#allocation173_spill] sm:$0xff] %v9967_v3  ;;  %v2291_v4 = vrot.slane %v9475_v43, 6  ;;  %vm16490_vm15 = vcmp.eq.s32.totalorder %v17412_v31, 1  ;;  %v9973_v23 = vmax.f32 %v1969_v5, %v2225_v28  ;;  %v1737_v44 = vsel %vm17122_vm1, %v1715_v21, %v1716_v45  ;;  %v9989_v28 = vpop.permute.xlu0 %2668  ;;  %v17481_v29 = vld [vmem:[#allocation3_spill] sm:$0xff] }
 0x17e   : > { %v2292_v39 = vrot.slane %v9552_v6, 6  ;;  %vm16440_vm4 = vcmp.eq.s32.totalorder %v9583_v30, 1  ;;  %v1940_v63 = vsel %vm16441_vm11, %v1737_v44, -1e+30  ;;  %v2024_v27 = vsel %vm1035_vm5, %v2004_v1, %v2005_v9  ;;  %17415 = vst [vmem:[#allocation176_spill] sm:$0xff] %v9989_v28 }
 0x17f   : > { %17413 = vst [vmem:[#allocation174_spill] sm:$0xff] %v9973_v23  ;;  %v1738_v5 = vsel %vm17122_vm1, %v1714_v51, %v1715_v21  ;;  %vm16466_vm2 = vcmp.eq.s32.totalorder %v17416_v56, 1  ;;  %v1972_v60 = vmax.f32 %v9552_v6, %v1940_v63  ;;  %v2228_v14 = vsel %vm16437_vm0, %v2024_v27, -1e+30 }
 0x180   : > { %v2313_v16 = vsel %vm1324_vm10, %v2291_v4, %v2292_v39  ;;  %v1939_v44 = vsel %vm16451_vm8, %v1738_v5, -1e+30  ;;  %v2025_v21 = vsel %vm1035_vm5, %v2003_v54, %v2004_v1  ;;  %v2314_v63 = vsel %vm1324_vm10, %v2290_v46, %v2291_v4 }
 0x181   : > { %v10001_v15 = vsel %vm16440_vm4, %v2313_v16, -1e+30  ;;  %v1971_v51 = vmax.f32 %v9475_v43, %v1939_v44  ;;  %v10008_v17 = vmax.f32 %v1972_v60, %v2228_v14  ;;  %v2227_v27 = vsel %vm16446_vm6, %v2025_v21, -1e+30  ;;  %v17421_v14 = vld [vmem:[#allocation28_spill] sm:$0xff]  ;;  %v10028_v21 = vpop.permute.xlu1 %2677  ;;  %v17482_v43 = vld [vmem:[#allocation37_spill] sm:$0xff] }
 0x182   : > { %17417 = vst [vmem:[#allocation177_spill] sm:$0xff] %v10001_v15  ;;  %vm16442_vm0 = vcmp.eq.s32.totalorder %v9593_v62, 1  ;;  %v1717_v5 = vrot.slane %v9455_v33, 7  ;;  %v1718_v46 = vrot.slane %v9549_v47, 7  ;;  %vm16471_vm4 = vcmp.eq.s32.totalorder %v17421_v14, 1  ;;  %17422 = vst [vmem:[#allocation181_spill] sm:$0xff] %v10028_v21  ;;  %v10038_v62 = vpop.permute.xlu0 %2674 }
 0x183   : > { %17418 = vst [vmem:[#allocation178_spill] sm:$0xff] %v10008_v17  ;;  %v10016_v30 = vmax.f32 %v1971_v51, %v2227_v27  ;;  %v10020_v54 = vsel %vm16442_vm0, %v2314_v63, -1e+30  ;;  %v2006_v60 = vrot.slane %v9549_v47, 1  ;;  %v2007_v1 = vrot.slane %v9649_v11, 1  ;;  %v17423_v51 = vld [vmem:[#allocation65_spill] sm:$0xff] }
 0x184   : > { %17420 = vst [vmem:[#allocation180_spill] sm:$0xff] %v10020_v54  ;;  %v2293_v4 = vrot.slane %v9455_v33, 6  ;;  %v2294_v44 = vrot.slane %v9549_v47, 6  ;;  %vm16474_vm11 = vcmp.eq.s32.totalorder %v17423_v51, 1  ;;  %v1735_v27 = vsel %vm17122_vm1, %v1717_v5, %v1718_v46  ;;  %17424 = vst [vmem:[#allocation182_spill] sm:$0xff] %v10038_v62  ;;  %v17426_v17 = vld [vmem:[#allocation66_spill] sm:$0xff] }
 0x185   : > { %17419 = vst [vmem:[#allocation179_spill] sm:$0xff] %v10016_v30  ;;  %vm16462_vm0 = vcmp.eq.s32.totalorder %v9635_v48, 1  ;;  %v1736_v16 = vsel %vm17122_vm1, %v1716_v45, %v1717_v5  ;;  %vm16491_vm6 = vcmp.eq.s32.totalorder %v17425_v40, 1  ;;  %v1942_v19 = vsel %vm16456_vm7, %v1735_v27, -1e+30  ;;  %v17441_v14 = vld [vmem:[#allocation31_spill] sm:$0xff] }
 0x186   : > { %v2022_v3 = vsel %vm1035_vm5, %v2006_v60, %v2007_v1  ;;  %v2311_v63 = vsel %vm1324_vm10, %v2293_v4, %v2294_v44  ;;  %v1941_v15 = vsel %vm16455_vm9, %v1736_v16, -1e+30  ;;  %vm16488_vm8 = vcmp.eq.s32.totalorder %v17426_v17, 1  ;;  %v17428_v16 = vld [vmem:[#allocation76_spill] sm:$0xff]  ;;  %v17445_v51 = vld [vmem:[#allocation138_spill] sm:$0xff] }
 0x187   : > { %v1974_v45 = vmax.f32 %v9549_v47, %v1942_v19  ;;  %v2230_v5 = vsel %vm16490_vm15, %v2022_v3, -1e+30  ;;  %v10055_v57 = vsel %vm16462_vm0, %v2311_v63, -1e+30  ;;  %v1973_v27 = vmax.f32 %v9455_v33, %v1941_v15 }
 0x188   : > { %17427 = vst [vmem:[#allocation183_spill] sm:$0xff] %v10055_v57  ;;  %v2023_v23 = vsel %vm1035_vm5, %v2005_v9, %v2006_v60  ;;  %v2312_v20 = vsel %vm1324_vm10, %v2292_v39, %v2293_v4  ;;  %vm16463_vm9 = vcmp.eq.s32.totalorder %v9645_v18, 1  ;;  %vm1579_vm7 = vcmp.eq.f32.partialorder %v17428_v16, 2.0  ;;  %v17433_v9 = vld [vmem:[#allocation27_spill] sm:$0xff]  ;;  %v17434_v39 = vld [vmem:[#allocation26_spill] sm:$0xff] }
 0x189   : > { %v10064_v19 = vmax.f32 %v1974_v45, %v2230_v5  ;;  %v2229_v3 = vsel %vm16466_vm2, %v2023_v23, -1e+30  ;;  %v10070_v63 = vsel %vm16463_vm9, %v2312_v20, -1e+30  ;;  %v17431_v15 = vmov 0   ;;  %v10080_v5 = vpop.permute.xlu1 %2683  ;;  %v17439_v23 = vld [vmem:[#allocation67_spill] sm:$0xff] }
 0x18a   : > { %17430 = vst [vmem:[#allocation184_spill] sm:$0xff] %v10070_v63  ;;  %v3324_v48 = vsel %vm1579_vm7, 1, %v17431_v15  ;;  %v10073_v31 = vmax.f32 %v1973_v27, %v2229_v3  ;;  %v17435_v60 = vsub.f32 %v17433_v9, %v17434_v39  ;;  %v1719_v16 = vrot.slane %v9649_v11, 7  ;;  %17436 = vst [vmem:[#allocation27_spill] sm:$0xff] %v10080_v5  ;;  %v17438_v3 = vld [vmem:[#allocation30_spill] sm:$0xff] }
 0x18b   : > { %17429 = vst [vmem:[#allocation76_spill] sm:$0xff] %v10064_v19  ;;  %3415 = vperm.xlu1 %7170, %v3324_v48   ;;  %v16467_v45 = vrot.slane %v9743_v8, 7  ;;  %v2008_v20 = vrot.slane %v9743_v8, 1  ;;  %v2295_v27 = vrot.slane %v9649_v11, 6  ;;  %v10087_v48 = vpop.permute.xlu0 %2680  ;;  %vm16494_vm7 = vcmp.eq.s32.totalorder %v17438_v3, 1  ;;  %v17453_v3 = vld [vmem:[#allocation33_spill] sm:$0xff] }
 0x18c   : > { %17432 = vst [vmem:[#allocation185_spill] sm:$0xff] %v10073_v31  ;;  %v1231_v4 = vand.u32 2147483647, %v17435_v60  ;;  %17437 = vst [vmem:[#allocation26_spill] sm:$0xff] %v10087_v48  ;;  %v16472_v60 = vrot.slane %v9743_v8, 6  ;;  %vm16524_vm9 = vcmp.eq.s32.totalorder %v17439_v23, 1 }
 0x18d   : > { %v1733_v39 = vsel %vm17122_vm1, %v1719_v16, %v16467_v45  ;;  %v17440_v57 = vrot.slane %v9638_v59, 1  ;;  %vm16485_vm2 = vcmp.eq.s32.totalorder %v9682_v0, 1  ;;  %v17442_v31 = vld [vmem:[#allocation68_spill] sm:$0xff]  ;;  %v16492_v17 = vrot.slane %v9724_v37, 7 }
 0x18e   : > { %vm1263_vm0 = vcmp.eq.f32.partialorder %v1231_v4, 1.0  ;;  %v1944_v56 = vsel %vm16471_vm4, %v1733_v39, -1e+30  ;;  %v2309_v63 = vsel %vm1324_vm10, %v2295_v27, %v16472_v60  ;;  %v1734_v39 = vsel %vm17122_vm1, %v1718_v46, %v1719_v16 }
 0x18f   : > { %v3074_v18 = vsel %vm1263_vm0, 1, %v17431_v15  ;;  %v2020_v9 = vsel %vm1035_vm5, %v2008_v20, %v17440_v57  ;;  %v1976_v4 = vmax.f32 %v9743_v8, %v1944_v56  ;;  %vm16517_vm0 = vcmp.eq.s32.totalorder %v17441_v14, 1 }
 0x190   : > { %3113 = vperm.xlu0 %7169, %v3074_v18   ;;  %v2232_v45 = vsel %vm16474_vm11, %v2020_v9, -1e+30  ;;  %vm16518_vm4 = vcmp.eq.s32.totalorder %v17442_v31, 1  ;;  %v10119_v18 = vsel %vm16485_vm2, %v2309_v63, -1e+30  ;;  %v2021_v57 = vsel %vm1035_vm5, %v2007_v1, %v2008_v20  ;;  %v10133_v63 = vpop.permute.xlu1 %2689  ;;  %v10142_v1 = vld [vmem:[%s16151_s1 + $0xf8] sm:$0xff] }
 0x191   : > { %17443 = vst [vmem:[#allocation186_spill] sm:$0xff] %v10119_v18  ;;  %v1943_v56 = vsel %vm16491_vm6, %v1734_v39, -1e+30  ;;  %v2310_v9 = vsel %vm1324_vm10, %v2294_v44, %v2295_v27  ;;  %v10127_v60 = vmax.f32 %v1976_v4, %v2232_v45  ;;  %v2231_v16 = vsel %vm16488_vm8, %v2021_v57, -1e+30  ;;  %17446 = vst [vmem:[#allocation188_spill] sm:$0xff] %v10133_v63  ;;  %v10161_v57 = vpop.permute.xlu0 %2686 }
 0x192   : > { %v1975_v46 = vmax.f32 %v9649_v11, %v1943_v56  ;;  %vm16489_vm11 = vcmp.eq.s32.totalorder %v17445_v51, 1  ;;  %v10147_v44 = vld [vmem:[%s16151_s1 + $0xd8] sm:$0xff]  ;;  %v7463_v20 = vld [vmem:[%s16151_s1 + $0xd0] sm:$0xff]  ;;  %v1721_v56 = vrot.slane %v9638_v59, 7  ;;  %17448 = vst [vmem:[#allocation190_spill] sm:$0xff] %v10161_v57  ;;  %v2010_v51 = vrot.slane %v9724_v37, 1 }
 0x193   : > { %17444 = vst [vmem:[#allocation187_spill] sm:$0xff] %v10127_v60  ;;  %v10137_v39 = vsel %vm16489_vm11, %v2310_v9, -1e+30  ;;  %v1517_v45 = vsub.f32 %v10147_v44, %v10142_v1  ;;  %v10157_v27 = vld [vmem:[%s16151_s1 + $0xf0] sm:$0xff]  ;;  %v16495_v11 = vrot.slane %v9829_v25, 1  ;;  %v2297_v47 = vrot.slane %v9638_v59, 6 }
 0x194   : > { %17447 = vst [vmem:[#allocation189_spill] sm:$0xff] %v10137_v39  ;;  %v1516_v4 = vsub.f32 %v7463_v20, %v10157_v27  ;;  %v10165_v0 = vmax.f32 %v1975_v46, %v2231_v16  ;;  %v17450_v20 = vld [vmem:[#allocation32_spill] sm:$0xff]  ;;  %v1731_v46 = vsel %vm17122_vm1, %v1721_v56, %v16492_v17  ;;  %vm16515_vm8 = vcmp.eq.s32.totalorder %v9730_v35, 1  ;;  %v17451_v9 = vld [vmem:[#allocation69_spill] sm:$0xff] }
 0x195   : > { %v1549_v40 = vand.u32 2147483647, %v1517_v45  ;;  %vm16545_vm2 = vcmp.eq.s32.totalorder %v17450_v20, 1  ;;  %v1946_v45 = vsel %vm16494_vm7, %v1731_v46, -1e+30  ;;  %vm16830_vm6 = vcmp.eq.s32.totalorder %v17451_v9, 1  ;;  %v10208_v23 = vpop.permute.xlu0 %2692 }
 0x196   : > { %17449 = vst [vmem:[#allocation191_spill] sm:$0xff] %v10165_v0  ;;  %v1548_v19 = vand.u32 2147483647, %v1516_v4  ;;  %v2018_v4 = vsel %vm1035_vm5, %v2010_v51, %v16495_v11  ;;  %v1978_v16 = vmax.f32 %v9724_v37, %v1946_v45  ;;  %vm16543_vm7 = vcmp.eq.s32.totalorder %v17453_v3, 1  ;;  %17457 = vst [vmem:[#allocation193_spill] sm:$0xff] %v10208_v23 }
 0x197   : > { %vm1581_vm11 = vcmp.eq.f32.partialorder %v1549_v40, 2.0  ;;  %v2234_v40 = vsel %vm16524_vm9, %v2018_v4, -1e+30  ;;  %v17454_v46 = vrot.slane %v9724_v37, 6  ;;  %v17455_v18 = vrot.slane %v9743_v8, 7 }
 0x198   : > { %vm1580_vm15 = vcmp.eq.f32.partialorder %v1548_v19, 2.0  ;;  %v3326_v33 = vsel %vm1581_vm11, 1, %v17431_v15  ;;  %v10192_v19 = vpop.permute.xlu1 %2695  ;;  %v17456_v45 = vrot.slane %v9638_v59, 1  ;;  %v1723_v14 = vrot.slane %v9829_v25, 7 }
 0x199   : > { %v3325_v17 = vsel %vm1580_vm15, 1, %v17431_v15  ;;  %17452 = vst [vmem:[#allocation192_spill] sm:$0xff] %v10192_v19  ;;  %3421 = vperm.xlu1 %7170, %v3326_v33   ;;  %v2307_v11 = vsel %vm1324_vm10, %v2297_v47, %v17454_v46  ;;  %v1732_v60 = vsel %vm17122_vm1, %v17455_v18, %v1721_v56  ;;  %vm16516_vm15 = vcmp.eq.s32.totalorder %v9739_v58, 1  ;;  %v17460_v56 = vld [vmem:[#allocation70_spill] sm:$0xff] }
 0x19a   : > { %3418 = vperm.xlu0 %7169, %v3325_v17   ;;  %v2019_v4 = vsel %vm1035_vm5, %v17456_v45, %v2010_v51  ;;  %v10210_v33 = vmax.f32 %v1978_v16, %v2234_v40  ;;  %v10214_v17 = vsel %vm16515_vm8, %v2307_v11, -1e+30  ;;  %v1945_v46 = vsel %vm16517_vm0, %v1732_v60, -1e+30  ;;  %v10229_v11 = vld [vmem:[%s16151_s1 + $0x28] sm:$0xff]  ;;  %v10234_v60 = vld [vmem:[%s16151_s1 + $0x38] sm:$0xff] }
 0x19b   : > { %17459 = vst [vmem:[#allocation195_spill] sm:$0xff] %v10214_v17  ;;  %v2233_v18 = vsel %vm16518_vm4, %v2019_v4, -1e+30  ;;  %vm16544_vm11 = vcmp.eq.s32.totalorder %v17460_v56, 1  ;;  %v1977_v51 = vmax.f32 %v9638_v59, %v1945_v46  ;;  %v17461_v45 = vrot.slane %v9743_v8, 6  ;;  %v10241_v4 = vld [vmem:[%s16151_s1 + $0x20] sm:$0xff] }
 0x19c   : > { %17458 = vst [vmem:[#allocation194_spill] sm:$0xff] %v10210_v33  ;;  %v1201_v40 = vsub.f32 %v10234_v60, %v10229_v11  ;;  %v16519_v31 = vrot.slane %v9907_v38, 7  ;;  %v2012_v8 = vrot.slane %v9907_v38, 1  ;;  %v10268_v17 = vpop.permute.xlu1 %2701  ;;  %v17465_v33 = vld [vmem:[#allocation34_spill] sm:$0xff]  ;;  %v17468_v34 = vrot.slane %v9814_v32, 1  ;;  %v17479_v56 = vld [vmem:[#allocation71_spill] sm:$0xff] }
 0x19d   : > { %v2308_v16 = vsel %vm1324_vm10, %v17461_v45, %v2297_v47  ;;  %v10246_v47 = vld [vmem:[%s16151_s1 + $0x30] sm:$0xff]  ;;  %v10258_v39 = vmax.f32 %v1977_v51, %v2233_v18  ;;  %17464 = vst [vmem:[#allocation198_spill] sm:$0xff] %v10268_v17  ;;  %vm16577_vm8 = vcmp.eq.s32.totalorder %v17465_v33, 1  ;;  %v17470_v20 = vrot.slane %v9724_v37, 7 }
 0x19e   : > { %v1200_v46 = vsub.f32 %v10246_v47, %v10241_v4  ;;  %v10254_v35 = vsel %vm16516_vm15, %v2308_v16, -1e+30  ;;  %v1233_v0 = vand.u32 2147483647, %v1201_v40  ;;  %v1729_v6 = vsel %vm17122_vm1, %v1723_v14, %v16519_v31  ;;  %v10275_v40 = vpop.permute.xlu0 %2698 }
 0x19f   : > { %17462 = vst [vmem:[#allocation196_spill] sm:$0xff] %v10254_v35  ;;  %17463 = vst [vmem:[#allocation197_spill] sm:$0xff] %v10258_v39  ;;  %v2299_v16 = vrot.slane %v9829_v25, 6  ;;  %v1948_v51 = vsel %vm16545_vm2, %v1729_v6, -1e+30  ;;  %v2016_v18 = vsel %vm1035_vm5, %v2012_v8, %v17468_v34  ;;  %v17471_v35 = vld [vmem:[#allocation35_spill] sm:$0xff] }
 0x1a0   : > { %v1232_v59 = vand.u32 2147483647, %v1200_v46  ;;  %vm1265_vm15 = vcmp.eq.f32.partialorder %v1233_v0, 1.0  ;;  %17466 = vst [vmem:[#allocation199_spill] sm:$0xff] %v10275_v40  ;;  %v17467_v46 = vld [vmem:[#allocation73_spill] sm:$0xff]  ;;  %v1980_v45 = vmax.f32 %v9907_v38, %v1948_v51  ;;  %v1730_v51 = vsel %vm17122_vm1, %v17470_v20, %v1723_v14 }
 0x1a1   : > { %vm16568_vm4 = vcmp.eq.s32.totalorder %v17467_v46, 1  ;;  %v3076_v31 = vsel %vm1265_vm15, 1, %v17431_v15  ;;  %v2236_v6 = vsel %vm16830_vm6, %v2016_v18, -1e+30  ;;  %vm16525_vm15 = vcmp.eq.s32.totalorder %v9781_v52, 1 }
 0x1a2   : > { %vm1264_vm0 = vcmp.eq.f32.partialorder %v1232_v59, 1.0  ;;  %3119 = vperm.xlu1 %7170, %v3076_v31   ;;  %v17469_v59 = vrot.slane %v9907_v38, 6  ;;  %v10297_v34 = vmax.f32 %v1980_v45, %v2236_v6  ;;  %v1947_v31 = vsel %vm16543_vm7, %v1730_v51, -1e+30  ;;  %v17476_v6 = vld [vmem:[#allocation74_spill] sm:$0xff]  ;;  %v10325_v51 = vld [vmem:[%s16151_s1 + $0x8] sm:$0xff] }
 0x1a3   : > { %v3075_v58 = vsel %vm1264_vm0, 1, %v17431_v15  ;;  %vm16831_vm0 = vcmp.eq.s32.totalorder %v17471_v35, 1  ;;  %v17474_v18 = vrot.slane %v9829_v25, 1  ;;  %v1979_v14 = vmax.f32 %v9829_v25, %v1947_v31  ;;  %v10330_v31 = vld [vmem:[%s16151_s1 + $0xe8] sm:$0xff] }
 0x1a4   : > { %3116 = vperm.xlu0 %7169, %v3075_v58   ;;  %v2305_v0 = vsel %vm1324_vm10, %v2299_v16, %v17469_v59  ;;  %17472 = vst [vmem:[#allocation200_spill] sm:$0xff] %v10297_v34  ;;  %v17475_v20 = vrot.slane %v9724_v37, 6  ;;  %vm16541_vm9 = vcmp.eq.s32.totalorder %v9793_v50, 1  ;;  %v1725_v3 = vrot.slane %v9814_v32, 7  ;;  %v10355_v34 = vpop.permute.xlu0 %2704 }
 0x1a5   : > { %v10301_v58 = vsel %vm16525_vm15, %v2305_v0, -1e+30  ;;  %v2017_v59 = vsel %vm1035_vm5, %v17474_v18, %v2012_v8  ;;  %vm16833_vm15 = vcmp.eq.s32.totalorder %v17476_v6, 1  ;;  %v10337_v18 = vld [vmem:[%s16151_s1] sm:$0xff]  ;;  %v10346_v0 = vpop.permute.xlu1 %2707  ;;  %v1726_v52 = vrot.slane %v9896_v2, 7  ;;  %17480 = vst [vmem:[#allocation204_spill] sm:$0xff] %v10355_v34 }
 0x1a6   : > { %17473 = vst [vmem:[#allocation201_spill] sm:$0xff] %v10301_v58  ;;  %v2306_v45 = vsel %vm1324_vm10, %v17475_v20, %v2299_v16  ;;  %v2235_v8 = vsel %vm16544_vm11, %v2017_v59, -1e+30  ;;  %v1487_v16 = vsub.f32 %v10330_v31, %v10325_v51  ;;  %v10342_v59 = vld [vmem:[%s16151_s1 + $0xe0] sm:$0xff]  ;;  %17477 = vst [vmem:[#allocation202_spill] sm:$0xff] %v10346_v0  ;;  %v1983_v58 = vrot.slane %v17479_v56, 1 }
 0x1a7   : > { %v1486_v20 = vsub.f32 %v10342_v59, %v10337_v18  ;;  %v10350_v9 = vsel %vm16541_vm9, %v2306_v45, -1e+30  ;;  %v2014_v37 = vrot.slane %v9896_v2, 1  ;;  %v2301_v54 = vrot.slane %v9814_v32, 6 }
 0x1a8   : > { %17478 = vst [vmem:[#allocation203_spill] sm:$0xff] %v10350_v9  ;;  %v1519_v39 = vand.u32 2147483647, %v1487_v16  ;;  %v10359_v30 = vmax.f32 %v1979_v14, %v2235_v8  ;;  %v1727_v45 = vsel %vm17122_vm1, %v1725_v3, %v1726_v52  ;;  %v2302_v50 = vrot.slane %v9896_v2, 6  ;;  %v17483_v14 = vld [vmem:[#allocation81_spill] sm:$0xff] }
 0x1a9   : > { %v1518_v25 = vand.u32 2147483647, %v1486_v20  ;;  %vm16567_vm9 = vcmp.eq.s32.totalorder %v9826_v49, 1  ;;  %vm16615_vm7 = vcmp.eq.s32.totalorder %v17481_v29, 1  ;;  %v1950_v16 = vsel %vm16577_vm8, %v1727_v45, -1e+30 }
 0x1aa   : > { %vm1551_vm11 = vcmp.eq.f32.partialorder %v1519_v39, 2.0  ;;  %v2046_v20 = vsel %vm1035_vm5, %v2014_v37, %v1983_v58  ;;  %vm16614_vm13 = vcmp.eq.s32.totalorder %v17482_v43, 1  ;;  %vm16584_vm3 = vcmp.eq.s32.totalorder %v17483_v14, 1  ;;  %v17491_v49 = vld [vmem:[#allocation75_spill] sm:$0xff] }
 0x1ab   : > { %vm1550_vm2 = vcmp.eq.f32.partialorder %v1518_v25, 2.0  ;;  %v3296_v8 = vsel %vm1551_vm11, 1, %v17431_v15  ;;  %v1982_v0 = vmax.f32 %v9896_v2, %v1950_v16  ;;  %v2238_v39 = vsel %vm16568_vm4, %v2046_v20, -1e+30  ;;  %v10388_v16 = vpop.permute.xlu1 %2713 }
 0x1ac   : > { %v3295_v34 = vsel %vm1550_vm2, 1, %v17431_v15  ;;  %3331 = vperm.xlu1 %7170, %v3296_v8   ;;  %v2303_v25 = vsel %vm1324_vm10, %v2301_v54, %v2302_v50  ;;  %v17484_v45 = vrot.slane %v9907_v38, 7  ;;  %v17485_v53 = vrot.slane %v9814_v32, 1  ;;  %17486 = vst [vmem:[#allocation205_spill] sm:$0xff] %v10388_v16 }
 0x1ad   : > { %3328 = vperm.xlu0 %7169, %v3295_v34   ;;  %vm16828_vm2 = vcmp.eq.s32.totalorder %v9837_v12, 1  ;;  %v10392_v20 = vmax.f32 %v1982_v0, %v2238_v39  ;;  %v10396_v8 = vsel %vm16567_vm9, %v2303_v25, -1e+30  ;;  %v1224_v0 = vsub.f32 %v10157_v27, %v10342_v59  ;;  %v17490_v34 = vld [vmem:[#allocation72_spill] sm:$0xff] }
 0x1ae   : > { %v1728_v33 = vsel %vm17122_vm1, %v17484_v45, %v1725_v3  ;;  %v2015_v24 = vsel %vm1035_vm5, %v17485_v53, %v2014_v37  ;;  %v10400_v45 = vpop.permute.xlu0 %2710  ;;  %v17488_v37 = vrot.slane %v9907_v38, 6  ;;  %v1223_v39 = vsub.f32 %v10330_v31, %v10147_v44 }
 0x1af   : > { %v1949_v3 = vsel %vm16831_vm0, %v1728_v33, -1e+30  ;;  %17487 = vst [vmem:[#allocation206_spill] sm:$0xff] %v10400_v45  ;;  %v2237_v25 = vsel %vm16833_vm15, %v2015_v24, -1e+30  ;;  %v2561_v35 = vrot.slane %v17491_v49, 2  ;;  %v10440_v49 = vpop.permute.xlu1 %2719 }
 0x1b0   : > { %v1981_v53 = vmax.f32 %v9814_v32, %v1949_v3  ;;  %v2304_v46 = vsel %vm1324_vm10, %v17488_v37, %v2301_v54  ;;  %v2560_v3 = vrot.slane %v17490_v34, 2  ;;  %v1256_v54 = vand.u32 2147483647, %v1224_v0  ;;  %17496 = vst [vmem:[#allocation209_spill] sm:$0xff] %v10440_v49 }
 0x1b1   : > { %v10415_v33 = vsel %vm16828_vm2, %v2304_v46, -1e+30  ;;  %v1255_v37 = vand.u32 2147483647, %v1223_v39  ;;  %vm16579_vm11 = vcmp.eq.s32.totalorder %v9877_v13, 1  ;;  %v17493_v6 = vrot.slane %v17479_v56, 7 }
 0x1b2   : > { %17489 = vst [vmem:[#allocation207_spill] sm:$0xff] %v10415_v33  ;;  %v10419_v2 = vmax.f32 %v1981_v53, %v2237_v25  ;;  %v2620_v9 = vsel %vm1421_vm14, %v2560_v3, %v2561_v35  ;;  %v17494_v46 = vrot.slane %v17490_v34, 1  ;;  %v17495_v53 = vrot.slane %v17479_v56, 6  ;;  %v17499_v34 = vld [vmem:[#allocation80_spill] sm:$0xff] }
 0x1b3   : > { %v1758_v24 = vsel %vm17122_vm1, %v1726_v52, %v17493_v6  ;;  %vm1288_vm9 = vcmp.eq.f32.partialorder %v1256_v54, 1.0  ;;  %vm1287_vm4 = vcmp.eq.f32.partialorder %v1255_v37, 1.0  ;;  %v16578_v25 = vrot.slane %v17479_v56, 2 }
 0x1b4   : > { %17492 = vst [vmem:[#allocation208_spill] sm:$0xff] %v10419_v2  ;;  %v2045_v12 = vsel %vm1035_vm5, %v1983_v58, %v17494_v46  ;;  %v2334_v0 = vsel %vm1324_vm10, %v2302_v50, %v17495_v53  ;;  %v3099_v52 = vsel %vm1288_vm9, 1, %v17431_v15  ;;  %v3098_v6 = vsel %vm1287_vm4, 1, %v17431_v15  ;;  %v10448_v46 = vpop.permute.xlu0 %2716 }
 0x1b5   : > { %v2784_v58 = vsel %vm16579_vm11, %v2620_v9, -1e+30  ;;  %v1919_v50 = vsel %vm16615_vm7, %v1758_v24, -1e+30  ;;  %17497 = vst [vmem:[#allocation210_spill] sm:$0xff] %v10448_v46  ;;  %3188 = vperm.xlu1 %7170, %v3099_v52   ;;  %3185 = vperm.xlu0 %7169, %v3098_v6   ;;  %vm16580_vm4 = vcmp.eq.s32.totalorder %v9887_v22, 1  ;;  %v2621_v39 = vsel %vm1421_vm14, %v16578_v25, %v2560_v3 }
 0x1b6   : > { %v1951_v53 = vmax.f32 %v17479_v56, %v1919_v50  ;;  %v2207_v54 = vsel %vm16614_vm13, %v2045_v12, -1e+30  ;;  %v2495_v37 = vsel %vm16584_vm3, %v2334_v0, -1e+30  ;;  %v10460_v9 = vld [vmem:[%s16151_s1 + $0x18] sm:$0xff]  ;;  %v10467_v52 = vld [vmem:[%s16151_s1 + $0x10] sm:$0xff] }
 0x1b7   : > { %v1489_v24 = vsub.f32 %v10142_v1, %v10460_v9  ;;  %v1488_v12 = vsub.f32 %v10157_v27, %v10467_v52  ;;  %v17498_v0 = vld [vmem:[#allocation77_spill] sm:$0xff]  ;;  %v2563_v13 = vrot.slane %v17499_v34, 2  ;;  %vm16581_vm9 = vcmp.eq.s32.totalorder %v9929_v26, 1  ;;  %v17502_v34 = vld [vmem:[#allocation92_spill] sm:$0xff] }
 0x1b8   : > { %v2562_v6 = vrot.slane %v17498_v0, 2  ;;  %v2239_v50 = vmax.f32 %v1951_v53, %v2207_v54  ;;  %v2783_v14 = vsel %vm16580_vm4, %v2621_v39, -1e+30  ;;  %vm16726_vm8 = vcmp.eq.s32.totalorder %v9940_v36, 1  ;;  %v10487_v54 = vpop.permute.xlu1 %2725  ;;  %v17501_v25 = vld [vmem:[#allocation93_spill] sm:$0xff] }
 0x1b9   : > { %v1521_v43 = vand.u32 2147483647, %v1489_v24  ;;  %v1520_v29 = vand.u32 2147483647, %v1488_v12  ;;  %v1612_v3 = vsub.f32 %v10467_v52, %v10157_v27  ;;  %17500 = vst [vmem:[#allocation211_spill] sm:$0xff] %v10487_v54  ;;  %v17503_v0 = vmax.f32 %v17501_v25, %v17502_v34  ;;  %v17506_v34 = vld [vmem:[#allocation54_spill] sm:$0xff] }
 0x1ba   : > { %v2619_v33 = vsel %vm1421_vm14, %v2561_v35, %v2562_v6  ;;  %v2527_v2 = vmax.f32 %v2239_v50, %v2495_v37  ;;  %v2618_v53 = vsel %vm1421_vm14, %v2562_v6, %v2563_v13  ;;  %v10496_v37 = vpop.permute.xlu0 %2722  ;;  %v17507_v25 = vld [vmem:[#allocation101_spill] sm:$0xff]  ;;  %v17511_v50 = vld [vmem:[#allocation78_spill] sm:$0xff]  ;;  %vm16630_vm13 = vcmp.eq.s32.totalorder %v10192_v19, 1 }
 0x1bb   : > { %v10492_v39 = vmax.f32 %v17503_v0, %v2784_v58  ;;  %vm1553_vm11 = vcmp.eq.f32.partialorder %v1521_v43, 2.0  ;;  %vm1552_vm4 = vcmp.eq.f32.partialorder %v1520_v29, 2.0  ;;  %v2786_v35 = vsel %vm16581_vm9, %v2618_v53, -1e+30  ;;  %17504 = vst [vmem:[#allocation93_spill] sm:$0xff] %v10496_v37  ;;  %v17570_v19 = vld [vmem:[#allocation158_spill] sm:$0xff] }
 0x1bc   : > { %v10498_v24 = vmax.f32 %v2527_v2, %v2783_v14  ;;  %v3298_v12 = vsel %vm1553_vm11, 1, %v17431_v15  ;;  %v3297_v27 = vsel %vm1552_vm4, 1, %v17431_v15  ;;  %v2785_v6 = vsel %vm16726_vm8, %v2619_v33, -1e+30  ;;  %v17510_v2 = vld [vmem:[#allocation85_spill] sm:$0xff]  ;;  %v10518_v33 = vld [vmem:[%s16151_s1 + $0x40] sm:$0xff] }
 0x1bd   : > { %3337 = vperm.xlu1 %7170, %v3298_v12   ;;  %3334 = vperm.xlu0 %7169, %v3297_v27   ;;  %v17508_v43 = vmax.f32 %v17506_v34, %v17507_v25  ;;  %v1644_v58 = vand.u32 2147483647, %v1612_v3  ;;  %v1611_v0 = vsub.f32 %v10325_v51, %v10330_v31  ;;  %v2564_v14 = vrot.slane %v17510_v2, 2  ;;  %v17513_v2 = vld [vmem:[#allocation106_spill] sm:$0xff] }
 0x1be   : > { %17505 = vst [vmem:[#allocation92_spill] sm:$0xff] %v10498_v24  ;;  %v2565_v53 = vrot.slane %v17511_v50, 2  ;;  %vm16594_vm11 = vcmp.eq.s32.totalorder %v9979_v55, 1  ;;  %vm16593_vm4 = vcmp.eq.s32.totalorder %v9989_v28, 1  ;;  %v1613_v12 = vsub.f32 %v10460_v9, %v10142_v1  ;;  %v10531_v50 = vpop.permute.xlu1 %2731  ;;  %v10540_v36 = vpop.permute.xlu0 %2728  ;;  %v17517_v28 = vld [vmem:[#allocation118_spill] sm:$0xff]  ;;  %v17521_v24 = vld [vmem:[#allocation83_spill] sm:$0xff] }
 0x1bf   : > { %v10507_v29 = vmax.f32 %v17508_v43, %v2786_v35  ;;  %v1202_v35 = vsub.f32 %v10518_v33, %v10246_v47  ;;  %vm1676_vm9 = vcmp.eq.f32.partialorder %v1644_v58, 2.0  ;;  %v1643_v3 = vand.u32 2147483647, %v1611_v0  ;;  %17512 = vst [vmem:[#allocation101_spill] sm:$0xff] %v10531_v50  ;;  %v17514_v58 = vld [vmem:[#allocation105_spill] sm:$0xff]  ;;  %17516 = vst [vmem:[#allocation106_spill] sm:$0xff] %v10540_v36 }
 0x1c0   : > { %v2617_v31 = vsel %vm1421_vm14, %v2563_v13, %v2564_v14  ;;  %v3549_v27 = vsel %vm1676_vm9, 1, %v17431_v15  ;;  %v2616_v34 = vsel %vm1421_vm14, %v2564_v14, %v2565_v53  ;;  %v17515_v0 = vmax.f32 %v17513_v2, %v17514_v58 }
 0x1c1   : > { %17509 = vst [vmem:[#allocation54_spill] sm:$0xff] %v10507_v29  ;;  %v2787_v25 = vsel %vm16593_vm4, %v2617_v31, -1e+30  ;;  %v1234_v43 = vand.u32 2147483647, %v1202_v35  ;;  %3642 = vperm.xlu1 %7170, %v3549_v27   ;;  %vm1675_vm3 = vcmp.eq.f32.partialorder %v1643_v3, 2.0 }
 0x1c2   : > { %v10536_v26 = vmax.f32 %v17515_v0, %v2785_v6  ;;  %v2788_v13 = vsel %vm16594_vm11, %v2616_v34, -1e+30  ;;  %v1645_v22 = vand.u32 2147483647, %v1613_v12  ;;  %v3548_v14 = vsel %vm1675_vm3, 1, %v17431_v15  ;;  %v17518_v31 = vld [vmem:[#allocation120_spill] sm:$0xff] }
 0x1c3   : > { %v17519_v35 = vmax.f32 %v17517_v28, %v17518_v31  ;;  %vm1266_vm9 = vcmp.eq.f32.partialorder %v1234_v43, 1.0  ;;  %v2566_v2 = vrot.slane %v17521_v24, 2  ;;  %3639 = vperm.xlu0 %7169, %v3548_v14   ;;  %v17522_v3 = vld [vmem:[#allocation88_spill] sm:$0xff]  ;;  %vm16601_vm11 = vcmp.eq.s32.totalorder %v10028_v21, 1  ;;  %v17549_v21 = vld [vmem:[#allocation139_spill] sm:$0xff] }
 0x1c4   : > { %v3077_v6 = vsel %vm1266_vm9, 1, %v17431_v15  ;;  %vm1677_vm4 = vcmp.eq.f32.partialorder %v1645_v22, 2.0  ;;  %v2567_v27 = vrot.slane %v17522_v3, 2  ;;  %vm16602_vm3 = vcmp.eq.s32.totalorder %v10038_v62, 1  ;;  %v17523_v0 = vld [vmem:[#allocation112_spill] sm:$0xff]  ;;  %v17526_v3 = vld [vmem:[#allocation86_spill] sm:$0xff] }
 0x1c5   : > { %v10546_v29 = vmax.f32 %v17519_v35, %v2787_v25  ;;  %v3550_v12 = vsel %vm1677_vm4, 1, %v17431_v15  ;;  %v2615_v34 = vsel %vm1421_vm14, %v2565_v53, %v2566_v2  ;;  %v1491_v28 = vsub.f32 %v10325_v51, %v10229_v11  ;;  %3122 = vperm.xlu1 %7170, %v3077_v6   ;;  %v17524_v14 = vld [vmem:[#allocation60_spill] sm:$0xff] }
 0x1c6   : > { %v2614_v25 = vsel %vm1421_vm14, %v2566_v2, %v2567_v27  ;;  %v2789_v22 = vsel %vm16602_vm3, %v2615_v34, -1e+30  ;;  %v1490_v43 = vsub.f32 %v10337_v18, %v10241_v4  ;;  %v2568_v58 = vrot.slane %v17319_v42, 2  ;;  %v10573_v2 = vpop.permute.xlu1 %2737  ;;  %v17528_v34 = vld [vmem:[#allocation127_spill] sm:$0xff]  ;;  %v17529_v62 = vld [vmem:[#allocation128_spill] sm:$0xff] }
 0x1c7   : > { %17520 = vst [vmem:[#allocation105_spill] sm:$0xff] %v10546_v29  ;;  %v17525_v53 = vmax.f32 %v17523_v0, %v17524_v14  ;;  %v2790_v35 = vsel %vm16601_vm11, %v2614_v25, -1e+30  ;;  %v1523_v6 = vand.u32 2147483647, %v1491_v28  ;;  %v2569_v24 = vrot.slane %v17526_v3, 2  ;;  %3645 = vperm.xlu0 %7169, %v3550_v12   ;;  %v10583_v0 = vpop.permute.xlu0 %2734 }
 0x1c8   : > { %17527 = vst [vmem:[#allocation118_spill] sm:$0xff] %v10573_v2  ;;  %v17530_v55 = vmax.f32 %v17528_v34, %v17529_v62  ;;  %v1522_v42 = vand.u32 2147483647, %v1490_v43  ;;  %vm16603_vm4 = vcmp.eq.s32.totalorder %v10080_v5, 1  ;;  %17532 = vst [vmem:[#allocation112_spill] sm:$0xff] %v10583_v0  ;;  %vm16612_vm11 = vcmp.eq.s32.totalorder %v10087_v48, 1 }
 0x1c9   : > { %v10568_v31 = vmax.f32 %v17525_v53, %v2788_v13  ;;  %v2613_v13 = vsel %vm1421_vm14, %v2567_v27, %v2568_v58  ;;  %vm1555_vm9 = vcmp.eq.f32.partialorder %v1523_v6, 2.0  ;;  %v2612_v28 = vsel %vm1421_vm14, %v2568_v58, %v2569_v24  ;;  %v17533_v62 = vld [vmem:[#allocation123_spill] sm:$0xff]  ;;  %v17537_v58 = vld [vmem:[#allocation132_spill] sm:$0xff] }
 0x1ca   : > { %v10578_v29 = vmax.f32 %v17530_v55, %v2789_v22  ;;  %v1583_v12 = vsub.f32 %v10229_v11, %v10325_v51  ;;  %v17534_v55 = vld [vmem:[#allocation121_spill] sm:$0xff]  ;;  %v3300_v43 = vsel %vm1555_vm9, 1, %v17431_v15  ;;  %vm1554_vm3 = vcmp.eq.f32.partialorder %v1522_v42, 2.0  ;;  %v17538_v53 = vld [vmem:[#allocation131_spill] sm:$0xff] }
 0x1cb   : > { %v17535_v25 = vmax.f32 %v17533_v62, %v17534_v55  ;;  %v2792_v27 = vsel %vm16603_vm4, %v2612_v28, -1e+30  ;;  %3343 = vperm.xlu1 %7170, %v3300_v43   ;;  %v3299_v14 = vsel %vm1554_vm3, 1, %v17431_v15  ;;  %v17539_v6 = vmax.f32 %v17537_v58, %v17538_v53  ;;  %v17541_v42 = vld [vmem:[#allocation89_spill] sm:$0xff]  ;;  %v7476_v43 = vld [vmem:[%s16151_s1 + $0xc0] sm:$0xff] }
 0x1cc   : > { %17531 = vst [vmem:[#allocation120_spill] sm:$0xff] %v10578_v29  ;;  %v2791_v51 = vsel %vm16612_vm11, %v2613_v13, -1e+30  ;;  %v1615_v62 = vand.u32 2147483647, %v1583_v12  ;;  %3340 = vperm.xlu0 %7169, %v3299_v14   ;;  %v2570_v55 = vrot.slane %v17541_v42, 2  ;;  %v1514_v13 = vsub.f32 %v7476_v43, %v10342_v59  ;;  %v10620_v14 = vpop.permute.xlu1 %2743 }
 0x1cd   : > { %v10593_v22 = vmax.f32 %v17535_v25, %v2790_v35  ;;  %v10602_v34 = vmax.f32 %v17539_v6, %v2792_v27  ;;  %v1582_v35 = vsub.f32 %v10241_v4, %v10337_v18  ;;  %v17542_v25 = vld [vmem:[#allocation97_spill] sm:$0xff]  ;;  %vm16613_vm9 = vcmp.eq.s32.totalorder %v10133_v63, 1  ;;  %17543 = vst [vmem:[#allocation128_spill] sm:$0xff] %v10620_v14  ;;  %v17546_v42 = vld [vmem:[#allocation99_spill] sm:$0xff] }
 0x1ce   : > { %v2571_v28 = vrot.slane %v17542_v25, 2  ;;  %vm1647_vm3 = vcmp.eq.f32.partialorder %v1615_v62, 2.0  ;;  %vm16682_vm4 = vcmp.eq.s32.totalorder %v10161_v57, 1  ;;  %v7477_v12 = vld [vmem:[%s16151_s1 + $0xb8] sm:$0xff]  ;;  %v2611_v62 = vsel %vm1421_vm14, %v2569_v24, %v2570_v55  ;;  %v10627_v25 = vpop.permute.xlu0 %2740 }
 0x1cf   : > { %17536 = vst [vmem:[#allocation60_spill] sm:$0xff] %v10593_v22  ;;  %17540 = vst [vmem:[#allocation127_spill] sm:$0xff] %v10602_v34  ;;  %v1513_v27 = vsub.f32 %v7477_v12, %v10147_v44  ;;  %v3520_v58 = vsel %vm1647_vm3, 1, %v17431_v15  ;;  %v1614_v53 = vand.u32 2147483647, %v1582_v35  ;;  %v17545_v43 = vld [vmem:[#allocation137_spill] sm:$0xff]  ;;  %v1585_v35 = vsub.f32 %v10234_v60, %v10460_v9 }
 0x1d0   : > { %v2610_v6 = vsel %vm1421_vm14, %v2570_v55, %v2571_v28  ;;  %17544 = vst [vmem:[#allocation123_spill] sm:$0xff] %v10627_v25  ;;  %v17547_v3 = vmax.f32 %v17545_v43, %v17546_v42  ;;  %3555 = vperm.xlu1 %7170, %v3520_v58   ;;  %v1546_v48 = vand.u32 2147483647, %v1514_v13  ;;  %v17550_v34 = vld [vmem:[#allocation140_spill] sm:$0xff]  ;;  %v2793_v55 = vsel %vm16682_vm4, %v2611_v62, -1e+30 }
 0x1d1   : > { %v2794_v12 = vsel %vm16613_vm9, %v2610_v6, -1e+30  ;;  %vm1646_vm3 = vcmp.eq.f32.partialorder %v1614_v53, 2.0  ;;  %v17551_v29 = vmax.f32 %v17549_v21, %v17550_v34  ;;  %v1545_v42 = vand.u32 2147483647, %v1513_v27  ;;  %v10656_v27 = vpop.permute.xlu1 %2749  ;;  %v17555_v53 = vld [vmem:[#allocation142_spill] sm:$0xff] }
 0x1d2   : > { %v10632_v5 = vmax.f32 %v17547_v3, %v2791_v51  ;;  %v3519_v3 = vsel %vm1646_vm3, 1, %v17431_v15  ;;  %vm1578_vm11 = vcmp.eq.f32.partialorder %v1546_v48, 2.0  ;;  %v17553_v51 = vld [vmem:[#allocation103_spill] sm:$0xff]  ;;  %v2573_v13 = vrot.slane %v17363_v7, 2  ;;  %17554 = vst [vmem:[#allocation131_spill] sm:$0xff] %v10656_v27  ;;  %v17556_v62 = vld [vmem:[#allocation144_spill] sm:$0xff]  ;;  %v10668_v7 = vpop.permute.xlu0 %2746 }
 0x1d3   : > { %v10641_v24 = vmax.f32 %v17551_v29, %v2794_v12  ;;  %v2572_v58 = vrot.slane %v17553_v51, 2  ;;  %3552 = vperm.xlu0 %7169, %v3519_v3   ;;  %v3323_v6 = vsel %vm1578_vm11, 1, %v17431_v15  ;;  %vm1577_vm9 = vcmp.eq.f32.partialorder %v1545_v42, 2.0  ;;  %17559 = vst [vmem:[#allocation99_spill] sm:$0xff] %v10668_v7  ;;  %v17560_v51 = vld [vmem:[#allocation149_spill] sm:$0xff] }
 0x1d4   : > { %17548 = vst [vmem:[#allocation121_spill] sm:$0xff] %v10632_v5  ;;  %vm16681_vm7 = vcmp.eq.s32.totalorder %v10208_v23, 1  ;;  %3412 = vperm.xlu1 %7170, %v3323_v6   ;;  %v3322_v21 = vsel %vm1577_vm9, 1, %v17431_v15  ;;  %v1617_v34 = vand.u32 2147483647, %v1585_v35  ;;  %v17557_v43 = vmax.f32 %v17555_v53, %v17556_v62 }
 0x1d5   : > { %17552 = vst [vmem:[#allocation132_spill] sm:$0xff] %v10641_v24  ;;  %v2608_v29 = vsel %vm1421_vm14, %v2572_v58, %v2573_v13  ;;  %v2609_v48 = vsel %vm1421_vm14, %v2571_v28, %v2572_v58  ;;  %v1584_v3 = vsub.f32 %v10246_v47, %v10467_v52  ;;  %v2574_v6 = vrot.slane %v17371_v41, 2  ;;  %v17561_v28 = vld [vmem:[#allocation147_spill] sm:$0xff]  ;;  %v17569_v41 = vld [vmem:[#allocation154_spill] sm:$0xff]  ;;  %v17583_v24 = vld [vmem:[#allocation168_spill] sm:$0xff] }
 0x1d6   : > { %v10661_v12 = vmax.f32 %v17557_v43, %v2793_v55  ;;  %v2796_v42 = vsel %vm16630_vm13, %v2608_v29, -1e+30  ;;  %v17562_v35 = vmax.f32 %v17560_v51, %v17561_v28  ;;  %v2795_v53 = vsel %vm16681_vm7, %v2609_v48, -1e+30 }
 0x1d7   : > { %vm1649_vm11 = vcmp.eq.f32.partialorder %v1617_v34, 2.0  ;;  %v2575_v55 = vrot.slane %v9390_v61, 2  ;;  %3409 = vperm.xlu0 %7169, %v3322_v21   ;;  %v1616_v62 = vand.u32 2147483647, %v1584_v3  ;;  %vm16627_vm9 = vcmp.eq.s32.totalorder %v10268_v17, 1  ;;  %v10690_v21 = vld [vmem:[%s16151_s1 + $0x48] sm:$0xff]  ;;  %v10716_v17 = vpop.permute.xlu0 %2880 }
 0x1d8   : > { %17558 = vst [vmem:[#allocation137_spill] sm:$0xff] %v10661_v12  ;;  %v10673_v58 = vmax.f32 %v17562_v35, %v2796_v42  ;;  %v3522_v29 = vsel %vm1649_vm11, 1, %v17431_v15  ;;  %v2607_v43 = vsel %vm1421_vm14, %v2573_v13, %v2574_v6  ;;  %vm16631_vm3 = vcmp.eq.s32.totalorder %v10275_v40, 1  ;;  %v17564_v42 = vld [vmem:[#allocation150_spill] sm:$0xff]  ;;  %v17565_v3 = vld [vmem:[#allocation151_spill] sm:$0xff]  ;;  %17576 = vst [vmem:[#allocation149_spill] sm:$0xff] %v10716_v17 }
 0x1d9   : > { %3561 = vperm.xlu1 %7170, %v3522_v29   ;;  %v2606_v51 = vsel %vm1421_vm14, %v2574_v6, %v2575_v55  ;;  %v1492_v48 = vsub.f32 %v10467_v52, %v10246_v47  ;;  %v1203_v34 = vsub.f32 %v10690_v21, %v10234_v60  ;;  %v17566_v13 = vmax.f32 %v17564_v42, %v17565_v3  ;;  %v17568_v35 = vld [vmem:[#allocation114_spill] sm:$0xff]  ;;  %v10710_v42 = vpop.permute.xlu1 %2883  ;;  %v17587_v61 = vld [vmem:[#allocation117_spill] sm:$0xff] }
 0x1da   : > { %17563 = vst [vmem:[#allocation139_spill] sm:$0xff] %v10673_v58  ;;  %vm1648_vm11 = vcmp.eq.f32.partialorder %v1616_v62, 2.0  ;;  %v2798_v6 = vsel %vm16627_vm9, %v2606_v51, -1e+30  ;;  %v2576_v29 = vrot.slane %v17568_v35, 2  ;;  %v17571_v23 = vmax.f32 %v17569_v41, %v17570_v19  ;;  %17573 = vst [vmem:[#allocation144_spill] sm:$0xff] %v10710_v42 }
 0x1db   : > { %v10697_v28 = vmax.f32 %v17566_v13, %v2795_v53  ;;  %v3521_v52 = vsel %vm1648_vm11, 1, %v17431_v15  ;;  %v2797_v57 = vsel %vm16631_vm3, %v2607_v43, -1e+30  ;;  %v1524_v58 = vand.u32 2147483647, %v1492_v48  ;;  %v17574_v62 = vld [vmem:[#allocation108_spill] sm:$0xff] }
 0x1dc   : > { %v10706_v63 = vmax.f32 %v17571_v23, %v2798_v6  ;;  %3558 = vperm.xlu0 %7169, %v3521_v52   ;;  %v1235_v53 = vand.u32 2147483647, %v1203_v34  ;;  %v2577_v3 = vrot.slane %v17574_v62, 2  ;;  %v17575_v51 = vld [vmem:[#allocation202_spill] sm:$0xff]  ;;  %v2605_v13 = vsel %vm1421_vm14, %v2575_v55, %v2576_v29  ;;  %v17577_v41 = vld [vmem:[#allocation204_spill] sm:$0xff]  ;;  %v17579_v6 = vld [vmem:[#allocation159_spill] sm:$0xff] }
 0x1dd   : > { %17567 = vst [vmem:[#allocation140_spill] sm:$0xff] %v10697_v28  ;;  %vm16640_vm9 = vcmp.eq.s32.totalorder %v17575_v51, 1  ;;  %vm1556_vm11 = vcmp.eq.f32.partialorder %v1524_v58, 2.0  ;;  %vm16639_vm13 = vcmp.eq.s32.totalorder %v17577_v41, 1  ;;  %v1587_v23 = vsub.f32 %v10690_v21, %v10229_v11  ;;  %v17578_v34 = vld [vmem:[#allocation160_spill] sm:$0xff] }
 0x1de   : > { %17572 = vst [vmem:[#allocation142_spill] sm:$0xff] %v10706_v63  ;;  %v1586_v19 = vsub.f32 %v10518_v33, %v10241_v4  ;;  %v3301_v43 = vsel %vm1556_vm11, 1, %v17431_v15  ;;  %vm1267_vm3 = vcmp.eq.f32.partialorder %v1235_v53, 1.0  ;;  %v2604_v48 = vsel %vm1421_vm14, %v2576_v29, %v2577_v3  ;;  %v17582_v53 = vld [vmem:[#allocation167_spill] sm:$0xff] }
 0x1df   : > { %v2799_v55 = vsel %vm16639_vm13, %v2605_v13, -1e+30  ;;  %v17580_v58 = vmax.f32 %v17578_v34, %v17579_v6  ;;  %3346 = vperm.xlu1 %7170, %v3301_v43   ;;  %v3078_v40 = vsel %vm1267_vm3, 1, %v17431_v15  ;;  %v2800_v63 = vsel %vm16640_vm9, %v2604_v48, -1e+30  ;;  %v17586_v13 = vld [vmem:[#allocation59_spill] sm:$0xff] }
 0x1e0   : > { %v1619_v28 = vand.u32 2147483647, %v1587_v23  ;;  %3125 = vperm.xlu0 %7169, %v3078_v40   ;;  %v17584_v62 = vmax.f32 %v17582_v53, %v17583_v24  ;;  %v1618_v41 = vand.u32 2147483647, %v1586_v19  ;;  %v2578_v35 = vrot.slane %v17586_v13, 2  ;;  %v10747_v23 = vpop.permute.xlu1 %2889  ;;  %v10754_v19 = vpop.permute.xlu0 %2886  ;;  %v17591_v43 = vld [vmem:[#allocation165_spill] sm:$0xff] }
 0x1e1   : > { %v10731_v52 = vmax.f32 %v17580_v58, %v2797_v57  ;;  %v2579_v34 = vrot.slane %v17587_v61, 2  ;;  %vm16642_vm13 = vcmp.eq.s32.totalorder %v10388_v16, 1  ;;  %vm16643_vm3 = vcmp.eq.s32.totalorder %v10400_v45, 1  ;;  %17588 = vst [vmem:[#allocation151_spill] sm:$0xff] %v10747_v23  ;;  %17589 = vst [vmem:[#allocation154_spill] sm:$0xff] %v10754_v19  ;;  %v17594_v6 = vld [vmem:[#allocation171_spill] sm:$0xff] }
 0x1e2   : > { %v10739_v29 = vmax.f32 %v17584_v62, %v2799_v55  ;;  %vm1651_vm11 = vcmp.eq.f32.partialorder %v1619_v28, 2.0  ;;  %v1610_v57 = vsub.f32 %v10337_v18, %v10342_v59  ;;  %vm1650_vm9 = vcmp.eq.f32.partialorder %v1618_v41, 2.0  ;;  %v17590_v28 = vld [vmem:[#allocation164_spill] sm:$0xff] }
 0x1e3   : > { %17581 = vst [vmem:[#allocation147_spill] sm:$0xff] %v10731_v52  ;;  %v3524_v40 = vsel %vm1651_vm11, 1, %v17431_v15  ;;  %v2602_v24 = vsel %vm1421_vm14, %v2578_v35, %v2579_v34  ;;  %v2603_v62 = vsel %vm1421_vm14, %v2577_v3, %v2578_v35  ;;  %v17592_v48 = vmax.f32 %v17590_v28, %v17591_v43  ;;  %v17595_v58 = vld [vmem:[#allocation172_spill] sm:$0xff]  ;;  %v17598_v28 = vld [vmem:[#allocation126_spill] sm:$0xff] }
 0x1e4   : > { %17585 = vst [vmem:[#allocation150_spill] sm:$0xff] %v10739_v29  ;;  %3567 = vperm.xlu1 %7170, %v3524_v40   ;;  %v3523_v18 = vsel %vm1650_vm9, 1, %v17431_v15  ;;  %v2802_v59 = vsel %vm16642_vm13, %v2602_v24, -1e+30  ;;  %v1609_v41 = vsub.f32 %v10142_v1, %v10147_v44  ;;  %v17596_v35 = vmax.f32 %v17594_v6, %v17595_v58  ;;  %v10805_v16 = vpop.permute.xlu0 %2892 }
 0x1e5   : > { %v10759_v55 = vmax.f32 %v17592_v48, %v2800_v63  ;;  %3564 = vperm.xlu0 %7169, %v3523_v18   ;;  %v2801_v53 = vsel %vm16643_vm3, %v2603_v62, -1e+30  ;;  %v1642_v63 = vand.u32 2147483647, %v1610_v57  ;;  %v2580_v40 = vrot.slane %v17598_v28, 2  ;;  %v17599_v48 = vld [vmem:[#allocation115_spill] sm:$0xff] }
 0x1e6   : > { %v10769_v3 = vmax.f32 %v17596_v35, %v2802_v59  ;;  %v1641_v43 = vand.u32 2147483647, %v1609_v41  ;;  %v2581_v51 = vrot.slane %v17599_v48, 2  ;;  %vm16651_vm9 = vcmp.eq.s32.totalorder %v10440_v49, 1  ;;  %v10784_v57 = vld [vmem:[%s16151_s1 + $0x50] sm:$0xff]  ;;  %v10793_v59 = vpop.permute.xlu1 %2895  ;;  %v17602_v41 = vld [vmem:[#allocation173_spill] sm:$0xff] }
 0x1e7   : > { %17593 = vst [vmem:[#allocation158_spill] sm:$0xff] %v10759_v55  ;;  %vm16652_vm11 = vcmp.eq.s32.totalorder %v10448_v46, 1  ;;  %vm1674_vm13 = vcmp.eq.f32.partialorder %v1642_v63, 2.0  ;;  %v2601_v1 = vsel %vm1421_vm14, %v2579_v34, %v2580_v40  ;;  %v1493_v44 = vsub.f32 %v10460_v9, %v10234_v60  ;;  %17600 = vst [vmem:[#allocation159_spill] sm:$0xff] %v10793_v59  ;;  %v17601_v9 = vld [vmem:[#allocation174_spill] sm:$0xff]  ;;  %v17673_v28 = vld [vmem:[#allocation105_spill] sm:$0xff] }
 0x1e8   : > { %17597 = vst [vmem:[#allocation160_spill] sm:$0xff] %v10769_v3  ;;  %v1204_v24 = vsub.f32 %v10784_v57, %v10518_v33  ;;  %v3547_v62 = vsel %vm1674_vm13, 1, %v17431_v15  ;;  %vm1673_vm3 = vcmp.eq.f32.partialorder %v1641_v43, 2.0  ;;  %v2600_v18 = vsel %vm1421_vm14, %v2580_v40, %v2581_v51  ;;  %17605 = vst [vmem:[#allocation168_spill] sm:$0xff] %v10805_v16  ;;  %v17606_v40 = vld [vmem:[#allocation179_spill] sm:$0xff] }
 0x1e9   : > { %v2803_v34 = vsel %vm16652_vm11, %v2601_v1, -1e+30  ;;  %v17603_v6 = vmax.f32 %v17601_v9, %v17602_v41  ;;  %3636 = vperm.xlu1 %7170, %v3547_v62   ;;  %v3546_v35 = vsel %vm1673_vm3, 1, %v17431_v15  ;;  %v10803_v63 = vsel %vm16651_vm9, %v2600_v18, -1e+30  ;;  %v17607_v1 = vld [vmem:[#allocation180_spill] sm:$0xff] }
 0x1ea   : > { %v1525_v43 = vand.u32 2147483647, %v1493_v44  ;;  %3633 = vperm.xlu0 %7169, %v3546_v35   ;;  %v17608_v46 = vmax.f32 %v17606_v40, %v17607_v1  ;;  %v1236_v3 = vand.u32 2147483647, %v1204_v24  ;;  %v17610_v9 = vld [vmem:[#allocation125_spill] sm:$0xff]  ;;  %v17611_v41 = vld [vmem:[#allocation136_spill] sm:$0xff]  ;;  %v1588_v40 = vsub.f32 %v10784_v57, %v10246_v47  ;;  %v10846_v29 = vpop.permute.xlu1 %2901 }
 0x1eb   : > { %v10798_v58 = vmax.f32 %v17603_v6, %v2801_v53  ;;  %v2582_v53 = vrot.slane %v17610_v9, 2  ;;  %v2583_v62 = vrot.slane %v17611_v41, 2  ;;  %vm16664_vm3 = vcmp.eq.s32.totalorder %v10487_v54, 1  ;;  %v10819_v44 = vld [vmem:[%s16151_s1 + $0x58] sm:$0xff]  ;;  %v17613_v1 = vld [vmem:[#allocation183_spill] sm:$0xff]  ;;  %v17620_v54 = vld [vmem:[#allocation146_spill] sm:$0xff] }
 0x1ec   : > { %v10810_v45 = vmax.f32 %v17608_v46, %v2803_v34  ;;  %vm1557_vm13 = vcmp.eq.f32.partialorder %v1525_v43, 2.0  ;;  %vm16665_vm9 = vcmp.eq.s32.totalorder %v10496_v37, 1  ;;  %v1205_v18 = vsub.f32 %v10819_v44, %v10690_v21  ;;  %17621 = vst [vmem:[#allocation172_spill] sm:$0xff] %v10846_v29  ;;  %v17622_v37 = vld [vmem:[#allocation134_spill] sm:$0xff] }
 0x1ed   : > { %17604 = vst [vmem:[#allocation167_spill] sm:$0xff] %v10798_v58  ;;  %v3302_v46 = vsel %vm1557_vm13, 1, %v17431_v15  ;;  %vm1268_vm11 = vcmp.eq.f32.partialorder %v1236_v3, 1.0  ;;  %v2598_v24 = vsel %vm1421_vm14, %v2582_v53, %v2583_v62  ;;  %v2599_v34 = vsel %vm1421_vm14, %v2581_v51, %v2582_v53  ;;  %v17612_v3 = vld [vmem:[#allocation76_spill] sm:$0xff]  ;;  %v17616_v58 = vld [vmem:[#allocation185_spill] sm:$0xff] }
 0x1ee   : > { %17609 = vst [vmem:[#allocation164_spill] sm:$0xff] %v10810_v45  ;;  %3349 = vperm.xlu1 %7170, %v3302_v46   ;;  %v3079_v6 = vsel %vm1268_vm11, 1, %v17431_v15  ;;  %v2806_v35 = vsel %vm16664_vm3, %v2598_v24, -1e+30  ;;  %v2805_v43 = vsel %vm16665_vm9, %v2599_v34, -1e+30  ;;  %v17614_v49 = vmax.f32 %v17612_v3, %v17613_v1 }
 0x1ef   : > { %3128 = vperm.xlu0 %7169, %v3079_v6   ;;  %v17617_v51 = vld [vmem:[#allocation184_spill] sm:$0xff]  ;;  %v1237_v55 = vand.u32 2147483647, %v1205_v18  ;;  %v2584_v24 = vrot.slane %v17620_v54, 2  ;;  %v1620_v34 = vand.u32 2147483647, %v1588_v40  ;;  %v10851_v6 = vpop.permute.xlu0 %2898  ;;  %v1494_v18 = vsub.f32 %v10241_v4, %v10518_v33 }
 0x1f0   : > { %v10838_v45 = vmax.f32 %v17614_v49, %v2806_v35  ;;  %v17618_v53 = vmax.f32 %v17616_v58, %v17617_v51  ;;  %v2585_v52 = vrot.slane %v17622_v37, 2  ;;  %vm16669_vm11 = vcmp.eq.s32.totalorder %v10531_v50, 1  ;;  %17623 = vst [vmem:[#allocation174_spill] sm:$0xff] %v10851_v6  ;;  %v17624_v3 = vld [vmem:[#allocation191_spill] sm:$0xff]  ;;  %v17625_v1 = vld [vmem:[#allocation189_spill] sm:$0xff]  ;;  %v17633_v54 = vld [vmem:[#allocation156_spill] sm:$0xff] }
 0x1f1   : > { %vm16670_vm13 = vcmp.eq.s32.totalorder %v10540_v36, 1  ;;  %vm1269_vm3 = vcmp.eq.f32.partialorder %v1237_v55, 1.0  ;;  %v2597_v49 = vsel %vm1421_vm14, %v2583_v62, %v2584_v24  ;;  %v1589_v58 = vsub.f32 %v10819_v44, %v10234_v60 }
 0x1f2   : > { %17615 = vst [vmem:[#allocation165_spill] sm:$0xff] %v10838_v45  ;;  %v10843_v46 = vmax.f32 %v17618_v53, %v2805_v43  ;;  %v3080_v35 = vsel %vm1269_vm3, 1, %v17431_v15  ;;  %vm1652_vm9 = vcmp.eq.f32.partialorder %v1620_v34, 2.0  ;;  %v2596_v43 = vsel %vm1421_vm14, %v2584_v24, %v2585_v52  ;;  %v17628_v34 = vld [vmem:[#allocation187_spill] sm:$0xff] }
 0x1f3   : > { %v2807_v40 = vsel %vm16670_vm13, %v2597_v49, -1e+30  ;;  %3131 = vperm.xlu1 %7170, %v3080_v35   ;;  %v3525_v55 = vsel %vm1652_vm9, 1, %v17431_v15  ;;  %v2808_v62 = vsel %vm16669_vm11, %v2596_v43, -1e+30  ;;  %v17626_v51 = vmax.f32 %v17624_v3, %v17625_v1  ;;  %v17632_v49 = vld [vmem:[#allocation141_spill] sm:$0xff] }
 0x1f4   : > { %17619 = vst [vmem:[#allocation171_spill] sm:$0xff] %v10843_v46  ;;  %v1621_v4 = vand.u32 2147483647, %v1589_v58  ;;  %3570 = vperm.xlu0 %7169, %v3525_v55   ;;  %v17629_v46 = vld [vmem:[#allocation186_spill] sm:$0xff]  ;;  %v1526_v36 = vand.u32 2147483647, %v1494_v18  ;;  %v10895_v55 = vpop.permute.xlu0 %2904  ;;  %v1497_v9 = vsub.f32 %v10234_v60, %v10819_v44 }
 0x1f5   : > { %v10870_v53 = vmax.f32 %v17626_v51, %v2807_v40  ;;  %v17630_v37 = vmax.f32 %v17628_v34, %v17629_v46  ;;  %v2586_v35 = vrot.slane %v17632_v49, 2  ;;  %v2587_v41 = vrot.slane %v17633_v54, 2  ;;  %v10884_v58 = vld [vmem:[%s16151_s1 + $0x60] sm:$0xff]  ;;  %17635 = vst [vmem:[#allocation76_spill] sm:$0xff] %v10895_v55 }
 0x1f6   : > { %vm1653_vm9 = vcmp.eq.f32.partialorder %v1621_v4, 2.0  ;;  %vm16675_vm3 = vcmp.eq.s32.totalorder %v10573_v2, 1  ;;  %vm16676_vm11 = vcmp.eq.s32.totalorder %v10583_v0, 1  ;;  %v1206_v46 = vsub.f32 %v10884_v58, %v10784_v57  ;;  %v17636_v51 = vld [vmem:[#allocation194_spill] sm:$0xff]  ;;  %v17637_v4 = vld [vmem:[#allocation195_spill] sm:$0xff] }
 0x1f7   : > { %17627 = vst [vmem:[#allocation173_spill] sm:$0xff] %v10870_v53  ;;  %v10875_v24 = vmax.f32 %v17630_v37, %v2808_v62  ;;  %v10888_v37 = vpop.permute.xlu1 %2907  ;;  %v3526_v18 = vsel %vm1653_vm9, 1, %v17431_v15  ;;  %vm1558_vm13 = vcmp.eq.f32.partialorder %v1526_v36, 2.0  ;;  %v2594_v43 = vsel %vm1421_vm14, %v2586_v35, %v2587_v41 }
 0x1f8   : > { %17634 = vst [vmem:[#allocation180_spill] sm:$0xff] %v10888_v37  ;;  %v2595_v40 = vsel %vm1421_vm14, %v2585_v52, %v2586_v35  ;;  %3573 = vperm.xlu1 %7170, %v3526_v18   ;;  %v3303_v62 = vsel %vm1558_vm13, 1, %v17431_v15  ;;  %v2810_v3 = vsel %vm16675_vm3, %v2594_v43, -1e+30  ;;  %v1111_v36 = vsub.f32 %v10690_v21, %v10819_v44  ;;  %v17640_v52 = vld [vmem:[#allocation197_spill] sm:$0xff]  ;;  %v17641_v35 = vld [vmem:[#allocation196_spill] sm:$0xff] }
 0x1f9   : > { %17631 = vst [vmem:[#allocation179_spill] sm:$0xff] %v10875_v24  ;;  %v2809_v1 = vsel %vm16676_vm11, %v2595_v40, -1e+30  ;;  %3352 = vperm.xlu0 %7169, %v3303_v62   ;;  %v17638_v34 = vmax.f32 %v17636_v51, %v17637_v4  ;;  %v17642_v18 = vmax.f32 %v17640_v52, %v17641_v35  ;;  %v1238_v49 = vand.u32 2147483647, %v1206_v46 }
 0x1fa   : > { %v2588_v43 = vrot.slane %v9907_v38, 2  ;;  %v1143_v2 = vand.u32 2147483647, %v1111_v36  ;;  %v2589_v40 = vrot.slane %v9814_v32, 2  ;;  %vm16829_vm13 = vcmp.eq.s32.totalorder %v10620_v14, 1  ;;  %v17653_v38 = vld [vmem:[#allocation163_spill] sm:$0xff] }
 0x1fb   : > { %v10907_v50 = vmax.f32 %v17638_v34, %v2810_v3  ;;  %v10912_v54 = vmax.f32 %v17642_v18, %v2809_v1  ;;  %vm16686_vm9 = vcmp.eq.s32.totalorder %v10627_v25, 1  ;;  %vm1270_vm3 = vcmp.eq.f32.partialorder %v1238_v49, 1.0  ;;  %v10929_v4 = vpop.permute.xlu1 %2967  ;;  %v17645_v49 = vld [vmem:[#allocation178_spill] sm:$0xff]  ;;  %v10940_v18 = vpop.permute.xlu0 %2910 }
 0x1fc   : > { %v2593_v62 = vsel %vm1421_vm14, %v2587_v41, %v2588_v43  ;;  %v1590_v3 = vsub.f32 %v10884_v58, %v10518_v33  ;;  %v1495_v1 = vsub.f32 %v10229_v11, %v10690_v21  ;;  %v3081_v46 = vsel %vm1270_vm3, 1, %v17431_v15  ;;  %17644 = vst [vmem:[#allocation184_spill] sm:$0xff] %v10929_v4  ;;  %v17646_v41 = vld [vmem:[#allocation177_spill] sm:$0xff]  ;;  %17649 = vst [vmem:[#allocation189_spill] sm:$0xff] %v10940_v18 }
 0x1fd   : > { %17639 = vst [vmem:[#allocation183_spill] sm:$0xff] %v10907_v50  ;;  %17643 = vst [vmem:[#allocation185_spill] sm:$0xff] %v10912_v54  ;;  %vm1175_vm11 = vcmp.eq.f32.partialorder %v1143_v2, 1.0  ;;  %v2592_v36 = vsel %vm1421_vm14, %v2588_v43, %v2589_v40  ;;  %v2811_v51 = vsel %vm16686_vm9, %v2593_v62, -1e+30  ;;  %v17647_v34 = vmax.f32 %v17645_v49, %v17646_v41  ;;  %3134 = vperm.xlu1 %7170, %v3081_v46   ;;  %v17650_v43 = vld [vmem:[#allocation203_spill] sm:$0xff] }
 0x1fe   : > { %v2858_v11 = vsel %vm1175_vm11, 1, %v17431_v15  ;;  %v2812_v2 = vsel %vm16829_vm13, %v2592_v36, -1e+30  ;;  %v1622_v35 = vand.u32 2147483647, %v1590_v3  ;;  %v17651_v62 = vmax.f32 %v10359_v30, %v17650_v43  ;;  %v17657_v43 = vld [vmem:[#allocation208_spill] sm:$0xff] }
 0x1ff   : > { %v10935_v52 = vmax.f32 %v17647_v34, %v10803_v63  ;;  %2913 = vperm.xlu0 %7169, %v2858_v11   ;;  %v1527_v32 = vand.u32 2147483647, %v1495_v1  ;;  %v2590_v49 = vrot.slane %v17653_v38, 2  ;;  %vm16684_vm3 = vcmp.eq.s32.totalorder %v10656_v27, 1  ;;  %v10953_v63 = vld [vmem:[%s16151_s1 + $0x68] sm:$0xff] }
 0x200   : > { %v10945_v0 = vmax.f32 %v17651_v62, %v2811_v51  ;;  %vm1654_vm7 = vcmp.eq.f32.partialorder %v1622_v35, 2.0  ;;  %vm16685_vm11 = vcmp.eq.s32.totalorder %v10668_v7, 1  ;;  %v1207_v3 = vsub.f32 %v10953_v63, %v10819_v44  ;;  %v17658_v62 = vld [vmem:[#allocation207_spill] sm:$0xff] }
 0x201   : > { %17648 = vst [vmem:[#allocation191_spill] sm:$0xff] %v10935_v52  ;;  %v1112_v30 = vsub.f32 %v10784_v57, %v10884_v58  ;;  %v3527_v1 = vsel %vm1654_vm7, 1, %v17431_v15  ;;  %vm1559_vm4 = vcmp.eq.f32.partialorder %v1527_v32, 2.0  ;;  %v17654_v46 = vrot.slane %v17479_v56, 2  ;;  %v10982_v56 = vpop.permute.xlu1 %2973 }
 0x202   : > { %17652 = vst [vmem:[#allocation187_spill] sm:$0xff] %v10945_v0  ;;  %v2591_v51 = vsel %vm1421_vm14, %v2589_v40, %v2590_v49  ;;  %3576 = vperm.xlu1 %7170, %v3527_v1   ;;  %v3304_v41 = vsel %vm1559_vm4, 1, %v17431_v15  ;;  %vm16692_vm7 = vcmp.eq.s32.totalorder %v10710_v42, 1  ;;  %v17655_v32 = vmax.f32 %v10392_v20, %v10396_v8  ;;  %17661 = vst [vmem:[#allocation195_spill] sm:$0xff] %v10982_v56  ;;  %v10990_v20 = vpop.permute.xlu0 %2970  ;;  %v17676_v42 = vld [vmem:[#allocation120_spill] sm:$0xff] }
 0x203   : > { %v2622_v36 = vsel %vm1421_vm14, %v2590_v49, %v17654_v46  ;;  %v2813_v11 = vsel %vm16685_vm11, %v2591_v51, -1e+30  ;;  %3355 = vperm.xlu0 %7169, %v3304_v41   ;;  %v17659_v40 = vmax.f32 %v17657_v43, %v17658_v62  ;;  %v1239_v1 = vand.u32 2147483647, %v1207_v3  ;;  %17662 = vst [vmem:[#allocation197_spill] sm:$0xff] %v10990_v20  ;;  %v17664_v41 = vld [vmem:[#allocation201_spill] sm:$0xff] }
 0x204   : > { %v2814_v34 = vsel %vm16684_vm3, %v2622_v36, -1e+30  ;;  %v1144_v46 = vand.u32 2147483647, %v1112_v30  ;;  %vm16687_vm4 = vcmp.eq.s32.totalorder %v10716_v17, 1  ;;  %v1591_v36 = vsub.f32 %v10953_v63, %v10690_v21  ;;  %v17663_v30 = vld [vmem:[#allocation200_spill] sm:$0xff] }
 0x205   : > { %v10975_v35 = vmax.f32 %v17655_v32, %v2814_v34  ;;  %v10980_v49 = vmax.f32 %v17659_v40, %v2813_v11  ;;  %v1496_v51 = vsub.f32 %v10246_v47, %v10784_v57  ;;  %vm16688_vm3 = vcmp.eq.s32.totalorder %v10747_v23, 1 }
 0x206   : > { %vm1271_vm11 = vcmp.eq.f32.partialorder %v1239_v1, 1.0  ;;  %vm1176_vm9 = vcmp.eq.f32.partialorder %v1144_v46, 1.0  ;;  %v17665_v34 = vmax.f32 %v17663_v30, %v17664_v41  ;;  %v1623_v62 = vand.u32 2147483647, %v1591_v36  ;;  %v17667_v30 = vld [vmem:[#allocation92_spill] sm:$0xff]  ;;  %v17669_v41 = vld [vmem:[#allocation54_spill] sm:$0xff]  ;;  %v11040_v38 = vpop.permute.xlu0 %3191 }
 0x207   : > { %17656 = vst [vmem:[#allocation186_spill] sm:$0xff] %v10975_v35  ;;  %17660 = vst [vmem:[#allocation194_spill] sm:$0xff] %v10980_v49  ;;  %v10995_v8 = vsel %vm16692_vm7, %v10975_v35, -1e+30  ;;  %v11000_v3 = vsel %vm16687_vm4, %v10980_v49, -1e+30  ;;  %v1113_v36 = vsub.f32 %v10819_v44, %v10953_v63 }
 0x208   : > { %v11005_v47 = vmax.f32 %v17665_v34, %v2812_v2  ;;  %v3082_v11 = vsel %vm1271_vm11, 1, %v17431_v15  ;;  %v2859_v32 = vsel %vm1176_vm9, 1, %v17431_v15  ;;  %v1528_v40 = vand.u32 2147483647, %v1496_v51  ;;  %v11019_v2 = vld [vmem:[%s16151_s1 + $0x70] sm:$0xff]  ;;  %17670 = vst [vmem:[#allocation177_spill] sm:$0xff] %v11040_v38 }
 0x209   : > { %3137 = vperm.xlu1 %7170, %v3082_v11   ;;  %2916 = vperm.xlu0 %7169, %v2859_v32   ;;  %v11014_v1 = vsel %vm16688_vm3, %v10492_v39, -1e+30  ;;  %v1208_v46 = vsub.f32 %v11019_v2, %v10884_v58  ;;  %vm16693_vm9 = vcmp.eq.s32.totalorder %v10754_v19, 1  ;;  %vm16694_vm11 = vcmp.eq.s32.totalorder %v10793_v59, 1  ;;  %v11034_v11 = vpop.permute.xlu1 %3194 }
 0x20a   : > { %17666 = vst [vmem:[#allocation196_spill] sm:$0xff] %v11005_v47  ;;  %vm1655_vm4 = vcmp.eq.f32.partialorder %v1623_v62, 2.0  ;;  %vm1560_vm3 = vcmp.eq.f32.partialorder %v1528_v40, 2.0  ;;  %v11032_v51 = vsel %vm16693_vm9, %v17667_v30, -1e+30  ;;  %17668 = vst [vmem:[#allocation178_spill] sm:$0xff] %v11034_v11  ;;  %v1592_v40 = vsub.f32 %v11019_v2, %v10784_v57 }
 0x20b   : > { %v1240_v34 = vand.u32 2147483647, %v1208_v46  ;;  %v3528_v32 = vsel %vm1655_vm4, 1, %v17431_v15  ;;  %v3305_v43 = vsel %vm1560_vm3, 1, %v17431_v15  ;;  %v1145_v17 = vand.u32 2147483647, %v1113_v36 }
 0x20c   : > { %v11045_v62 = vsel %vm16694_vm11, %v17669_v41, -1e+30  ;;  %vm16697_vm9 = vcmp.eq.s32.totalorder %v10805_v16, 1  ;;  %v1624_v52 = vand.u32 2147483647, %v1592_v40  ;;  %vm16706_vm4 = vcmp.eq.s32.totalorder %v10846_v29, 1 }
 0x20d   : > { %3579 = vperm.xlu1 %7170, %v3528_v32   ;;  %3358 = vperm.xlu0 %7169, %v3305_v43   ;;  %vm1272_vm7 = vcmp.eq.f32.partialorder %v1240_v34, 1.0  ;;  %vm1177_vm3 = vcmp.eq.f32.partialorder %v1145_v17, 1.0  ;;  %v11059_v32 = vsel %vm16697_vm9, %v10536_v26, -1e+30  ;;  %vm16707_vm11 = vcmp.eq.s32.totalorder %v10851_v6, 1  ;;  %v11068_v17 = vld [vmem:[%s16151_s1 + $0x78] sm:$0xff]  ;;  %v11080_v48 = vpop.permute.xlu1 %3104 }
 0x20e   : > { %v3083_v36 = vsel %vm1272_vm7, 1, %v17431_v15  ;;  %v2860_v34 = vsel %vm1177_vm3, 1, %v17431_v15  ;;  %v1209_v43 = vsub.f32 %v11068_v17, %v10953_v63  ;;  %v1114_v46 = vsub.f32 %v10884_v58, %v11019_v2  ;;  %17672 = vst [vmem:[#allocation208_spill] sm:$0xff] %v11080_v48 }
 0x20f   : > { %vm1656_vm7 = vcmp.eq.f32.partialorder %v1624_v52, 2.0  ;;  %v1529_v40 = vand.u32 2147483647, %v1497_v9  ;;  %v11077_v60 = vsel %vm16706_vm4, %v10568_v31, -1e+30  ;;  %vm16710_vm3 = vcmp.eq.s32.totalorder %v10888_v37, 1  ;;  %v11090_v52 = vpop.permute.xlu0 %3197 }
 0x210   : > { %17671 = vst [vmem:[#allocation203_spill] sm:$0xff] %v11077_v60  ;;  %v3529_v59 = vsel %vm1656_vm7, 1, %v17431_v15  ;;  %v1241_v9 = vand.u32 2147483647, %v1209_v43  ;;  %17674 = vst [vmem:[#allocation207_spill] sm:$0xff] %v11090_v52  ;;  %vm16725_vm4 = vcmp.eq.s32.totalorder %v10895_v55, 1 }
 0x211   : > { %3140 = vperm.xlu1 %7170, %v3083_v36   ;;  %2919 = vperm.xlu0 %7169, %v2860_v34   ;;  %v11088_v36 = vsel %vm16707_vm11, %v17673_v28, -1e+30  ;;  %vm1561_vm9 = vcmp.eq.f32.partialorder %v1529_v40, 2.0  ;;  %v1146_v29 = vand.u32 2147483647, %v1114_v46  ;;  %v1593_v34 = vsub.f32 %v11068_v17, %v10819_v44  ;;  %v11124_v40 = vld [vmem:[%s16151_s1 + $0x80] sm:$0xff]  ;;  %v11128_v55 = vpop.permute.xlu1 %2961 }
 0x212   : > { %v11097_v23 = vsel %vm16710_vm3, %v10593_v22, -1e+30  ;;  %v3306_v61 = vsel %vm1561_vm9, 1, %v17431_v15  ;;  %vm1273_vm7 = vcmp.eq.f32.partialorder %v1241_v9, 1.0  ;;  %v11108_v46 = vsel %vm16725_vm4, %v17676_v42, -1e+30 }
 0x213   : > { %17675 = vst [vmem:[#allocation200_spill] sm:$0xff] %v11097_v23  ;;  %vm1178_vm11 = vcmp.eq.f32.partialorder %v1146_v29, 1.0  ;;  %17678 = vst [vmem:[#allocation201_spill] sm:$0xff] %v11108_v46  ;;  %v3084_v37 = vsel %vm1273_vm7, 1, %v17431_v15  ;;  %vm16720_vm9 = vcmp.eq.s32.totalorder %v10929_v4, 1  ;;  %vm16724_vm3 = vcmp.eq.s32.totalorder %v10940_v18, 1  ;;  %v11139_v13 = vpop.permute.xlu0 %3107 }
 0x214   : > { %v2861_v9 = vsel %vm1178_vm11, 1, %v17431_v15  ;;  %v3036_v29 = vsel %vm16720_vm9, %v10907_v50, -1e+30  ;;  %v1210_v6 = vsub.f32 %v11124_v40, %v11019_v2  ;;  %17679 = vst [vmem:[#allocation92_spill] sm:$0xff] %v11128_v55  ;;  %v11135_v4 = vsel %vm16724_vm3, %v10632_v5, -1e+30 }
 0x215   : > { %3582 = vperm.xlu1 %7170, %v3529_v59   ;;  %3361 = vperm.xlu0 %7169, %v3306_v61   ;;  %v1498_v59 = vsub.f32 %v10518_v33, %v10884_v58  ;;  %v1625_v61 = vand.u32 2147483647, %v1593_v34  ;;  %17680 = vst [vmem:[#allocation105_spill] sm:$0xff] %v11135_v4  ;;  %v1115_v23 = vsub.f32 %v10953_v63, %v11068_v17  ;;  %17681 = vst [vmem:[#allocation120_spill] sm:$0xff] %v11139_v13 }
 0x216   : > { %v3068_v27 = vmax.f32 %v11005_v47, %v3036_v29  ;;  %v1242_v7 = vand.u32 2147483647, %v1210_v6  ;;  %vm16742_vm7 = vcmp.eq.s32.totalorder %v10982_v56, 1  ;;  %vm16734_vm4 = vcmp.eq.s32.totalorder %v10990_v20, 1 }
 0x217   : > { %v1530_v34 = vand.u32 2147483647, %v1498_v59  ;;  %vm1657_vm11 = vcmp.eq.f32.partialorder %v1625_v61, 2.0  ;;  %v1147_v18 = vand.u32 2147483647, %v1115_v23  ;;  %v1594_v61 = vsub.f32 %v11124_v40, %v10884_v58 }
 0x218   : > { %v3530_v59 = vsel %vm1657_vm11, 1, %v17431_v15  ;;  %vm1274_vm3 = vcmp.eq.f32.partialorder %v1242_v7, 1.0  ;;  %v1499_v29 = vsub.f32 %v10690_v21, %v10953_v63  ;;  %v11175_v21 = vpop.permute.xlu0 %2964  ;;  %v1116_v12 = vsub.f32 %v11019_v2, %v11124_v40 }
 0x219   : > { %3143 = vperm.xlu1 %7170, %v3084_v37   ;;  %2922 = vperm.xlu0 %7169, %v2861_v9   ;;  %vm1562_vm9 = vcmp.eq.f32.partialorder %v1530_v34, 2.0  ;;  %v3038_v37 = vsel %vm16742_vm7, %v11005_v47, -1e+30  ;;  %v3085_v6 = vsel %vm1274_vm3, 1, %v17431_v15  ;;  %vm1179_vm8 = vcmp.eq.f32.partialorder %v1147_v18, 1.0  ;;  %v11162_v34 = vpop.permute.xlu1 %3110  ;;  %17683 = vst [vmem:[#allocation213_spill] sm:$0xff] %v11175_v21 }
 0x21a   : > { %v3307_v46 = vsel %vm1562_vm9, 1, %v17431_v15  ;;  %v3037_v9 = vsel %vm16734_vm4, %v10945_v0, -1e+30  ;;  %v2862_v7 = vsel %vm1179_vm8, 1, %v17431_v15  ;;  %vm16743_vm9 = vcmp.eq.s32.totalorder %v11034_v11, 1  ;;  %17682 = vst [vmem:[#allocation212_spill] sm:$0xff] %v11162_v34 }
 0x21b   : > { %v3069_v23 = vmax.f32 %v10980_v49, %v3037_v9  ;;  %v1626_v18 = vand.u32 2147483647, %v1594_v61  ;;  %v3261_v33 = vsel %vm16743_vm9, %v17667_v30, -1e+30  ;;  %vm16741_vm3 = vcmp.eq.s32.totalorder %v11040_v38, 1 }
 0x21c   : > { %v3070_v9 = vmax.f32 %v10975_v35, %v3038_v37  ;;  %v1531_v4 = vand.u32 2147483647, %v1499_v29  ;;  %v3260_v61 = vsel %vm16741_vm3, %v10975_v35, -1e+30  ;;  %vm16749_vm11 = vcmp.eq.s32.totalorder %v11080_v48, 1 }
 0x21d   : > { %3585 = vperm.xlu1 %7170, %v3530_v59   ;;  %3364 = vperm.xlu0 %7169, %v3307_v46   ;;  %v11171_v46 = vld [vmem:[%s16151_s1 + $0x88] sm:$0xff]  ;;  %vm1658_vm8 = vcmp.eq.f32.partialorder %v1626_v18, 2.0  ;;  %v11183_v20 = vmax.f32 %v3069_v23, %v3261_v33  ;;  %v11186_v11 = vmax.f32 %v3068_v27, %v3260_v61  ;;  %v1148_v37 = vand.u32 2147483647, %v1116_v12  ;;  %v11222_v61 = vld [vmem:[%s16151_s1 + $0x90] sm:$0xff] }
 0x21e   : > { %v1211_v59 = vsub.f32 %v11171_v46, %v11068_v17  ;;  %vm1563_vm4 = vcmp.eq.f32.partialorder %v1531_v4, 2.0  ;;  %v3231_v29 = vsel %vm16749_vm11, %v10536_v26, -1e+30  ;;  %v3531_v38 = vsel %vm1658_vm8, 1, %v17431_v15  ;;  %v11204_v4 = vpop.permute.xlu1 %3415 }
 0x21f   : > { %v3308_v19 = vsel %vm1563_vm4, 1, %v17431_v15  ;;  %vm16748_vm7 = vcmp.eq.s32.totalorder %v11090_v52, 1  ;;  %vm1180_vm9 = vcmp.eq.f32.partialorder %v1148_v37, 1.0  ;;  %v17684_v33 = vmax.f32 %v17667_v30, %v11000_v3  ;;  %17685 = vst [vmem:[#allocation214_spill] sm:$0xff] %v11204_v4  ;;  %v11211_v3 = vpop.permute.xlu0 %3113 }
 0x220   : > { %v1243_v56 = vand.u32 2147483647, %v1211_v59  ;;  %v3262_v27 = vsel %vm16748_vm7, %v10492_v39, -1e+30  ;;  %v1595_v12 = vsub.f32 %v11171_v46, %v10953_v63  ;;  %v1500_v23 = vsub.f32 %v10784_v57, %v11019_v2  ;;  %17686 = vst [vmem:[#allocation215_spill] sm:$0xff] %v11211_v3 }
 0x221   : > { %3146 = vperm.xlu1 %7170, %v3085_v6   ;;  %2925 = vperm.xlu0 %7169, %v2862_v7   ;;  %v11197_v6 = vmax.f32 %v17684_v33, %v3231_v29  ;;  %vm16744_vm4 = vcmp.eq.s32.totalorder %v11128_v55, 1  ;;  %vm16747_vm8 = vcmp.eq.s32.totalorder %v11139_v13, 1  ;;  %v1212_v57 = vsub.f32 %v11222_v61, %v11124_v40 }
 0x222   : > { %vm1275_vm3 = vcmp.eq.f32.partialorder %v1243_v56, 1.0  ;;  %v2863_v56 = vsel %vm1180_vm9, 1, %v17431_v15  ;;  %v1627_v18 = vand.u32 2147483647, %v1595_v12  ;;  %v11216_v59 = vsel %vm16744_vm4, %v10875_v24, -1e+30 }
 0x223   : > { %v3086_v7 = vsel %vm1275_vm3, 1, %v17431_v15  ;;  %v11226_v37 = vmax.f32 %v3070_v9, %v3262_v27  ;;  %v1117_v29 = vsub.f32 %v11068_v17, %v11171_v46  ;;  %v1244_v12 = vand.u32 2147483647, %v1212_v57  ;;  %v11247_v57 = vpop.permute.xlu1 %3421 }
 0x224   : > { %vm1659_vm9 = vcmp.eq.f32.partialorder %v1627_v18, 2.0  ;;  %vm16763_vm3 = vcmp.eq.s32.totalorder %v11162_v34, 1  ;;  %v17687_v9 = vmax.f32 %v10492_v39, %v10995_v8  ;;  %vm16761_vm7 = vcmp.eq.s32.totalorder %v11175_v21, 1  ;;  %17688 = vst [vmem:[#allocation216_spill] sm:$0xff] %v11247_v57 }
 0x225   : > { %3588 = vperm.xlu1 %7170, %v3531_v38   ;;  %3367 = vperm.xlu0 %7169, %v3308_v19   ;;  %v1532_v38 = vand.u32 2147483647, %v1500_v23  ;;  %v3232_v19 = vsel %vm16747_vm8, %v17669_v41, -1e+30  ;;  %v1149_v23 = vand.u32 2147483647, %v1117_v29  ;;  %v17689_v8 = vmax.f32 %v10536_v26, %v11032_v51 }
 0x226   : > { %v11239_v27 = vmax.f32 %v17687_v9, %v3232_v19  ;;  %v3233_v55 = vsel %vm16763_vm3, %v17673_v28, -1e+30  ;;  %v3532_v18 = vsel %vm1659_vm9, 1, %v17431_v15  ;;  %vm1276_vm8 = vcmp.eq.f32.partialorder %v1244_v12, 1.0  ;;  %v11261_v19 = vpop.permute.xlu0 %3418 }
 0x227   : > { %vm1564_vm4 = vcmp.eq.f32.partialorder %v1532_v38, 2.0  ;;  %vm1181_vm11 = vcmp.eq.f32.partialorder %v1149_v23, 1.0  ;;  %v11252_v38 = vmax.f32 %v17689_v8, %v3233_v55  ;;  %17690 = vst [vmem:[#allocation217_spill] sm:$0xff] %v11261_v19  ;;  %v3087_v29 = vsel %vm1276_vm8, 1, %v17431_v15  ;;  %v11277_v23 = vld [vmem:[%s16151_s1 + $0x98] sm:$0xff] }
 0x228   : > { %v3309_v33 = vsel %vm1564_vm4, 1, %v17431_v15  ;;  %v2864_v12 = vsel %vm1181_vm11, 1, %v17431_v15  ;;  %v1501_v9 = vsub.f32 %v10819_v44, %v11068_v17  ;;  %vm16758_vm4 = vcmp.eq.s32.totalorder %v11204_v4, 1  ;;  %17691 = vst [vmem:[#allocation218_spill] sm:$0xff] %v11277_v23 }
 0x229   : > { %3149 = vperm.xlu1 %7170, %v3086_v7   ;;  %2928 = vperm.xlu0 %7169, %v2863_v56   ;;  %v11257_v7 = vsel %vm16761_vm7, %v10912_v54, -1e+30  ;;  %v1596_v56 = vsub.f32 %v11222_v61, %v11019_v2  ;;  %v11271_v51 = vsel %vm16758_vm4, %v10875_v24, -1e+30  ;;  %vm16762_vm9 = vcmp.eq.s32.totalorder %v11211_v3, 1  ;;  %v11301_v3 = vpop.permute.xlu1 %3119 }
 0x22a   : > { %v1213_v8 = vsub.f32 %v11277_v23, %v11171_v46  ;;  %v3234_v4 = vsel %vm16762_vm9, %v10568_v31, -1e+30  ;;  %v1118_v21 = vsub.f32 %v11124_v40, %v11222_v61  ;;  %vm16780_vm8 = vcmp.eq.s32.totalorder %v11247_v57, 1  ;;  %17693 = vst [vmem:[#allocation219_spill] sm:$0xff] %v11301_v3 }
 0x22b   : > { %v1628_v55 = vand.u32 2147483647, %v1596_v56  ;;  %v1533_v56 = vand.u32 2147483647, %v1501_v9  ;;  %v11299_v44 = vsel %vm16780_vm8, %v10907_v50, -1e+30 }
 0x22c   : > { %v1245_v34 = vand.u32 2147483647, %v1213_v8  ;;  %v1150_v9 = vand.u32 2147483647, %v1118_v21  ;;  %vm16781_vm9 = vcmp.eq.s32.totalorder %v11261_v19, 1  ;;  %v1119_v19 = vsub.f32 %v11171_v46, %v11277_v23 }
 0x22d   : > { %3591 = vperm.xlu1 %7170, %v3532_v18   ;;  %3370 = vperm.xlu0 %7169, %v3309_v33   ;;  %vm1660_vm11 = vcmp.eq.f32.partialorder %v1628_v55, 2.0  ;;  %vm1565_vm4 = vcmp.eq.f32.partialorder %v1533_v56, 2.0  ;;  %v17692_v33 = vmax.f32 %v17669_v41, %v11014_v1  ;;  %v11306_v56 = vpop.permute.xlu0 %3116  ;;  %v11313_v21 = vsel %vm16781_vm9, %v10912_v54, -1e+30  ;;  %v11329_v1 = vld [vmem:[%s16151_s1 + $0xa0] sm:$0xff]  ;;  %v11352_v25 = vpop.permute.xlu1 %3331 }
 0x22e   : > { %v3533_v55 = vsel %vm1660_vm11, 1, %v17431_v15  ;;  %v3310_v8 = vsel %vm1565_vm4, 1, %v17431_v15  ;;  %vm1277_vm7 = vcmp.eq.f32.partialorder %v1245_v34, 1.0  ;;  %17694 = vst [vmem:[#allocation220_spill] sm:$0xff] %v11306_v56  ;;  %vm1182_vm3 = vcmp.eq.f32.partialorder %v1150_v9, 1.0  ;;  %17695 = vst [vmem:[#allocation221_spill] sm:$0xff] %v11329_v1 }
 0x22f   : > { %v11294_v18 = vmax.f32 %v17692_v33, %v3234_v4  ;;  %v1597_v4 = vsub.f32 %v11277_v23, %v11068_v17  ;;  %v3088_v34 = vsel %vm1277_vm7, 1, %v17431_v15  ;;  %v2865_v33 = vsel %vm1182_vm3, 1, %v17431_v15  ;;  %17698 = vst [vmem:[#allocation222_spill] sm:$0xff] %v11352_v25 }
 0x230   : > { %vm16782_vm4 = vcmp.eq.s32.totalorder %v11301_v3, 1  ;;  %vm16783_vm11 = vcmp.eq.s32.totalorder %v11306_v56, 1  ;;  %v1214_v24 = vsub.f32 %v11329_v1, %v11222_v61  ;;  %v17696_v54 = vmax.f32 %v10568_v31, %v11045_v62 }
 0x231   : > { %3152 = vperm.xlu1 %7170, %v3087_v29   ;;  %2931 = vperm.xlu0 %7169, %v2864_v12   ;;  %v1502_v29 = vsub.f32 %v10884_v58, %v11124_v40  ;;  %v1629_v12 = vand.u32 2147483647, %v1597_v4  ;;  %v3236_v9 = vsel %vm16782_vm4, %v10593_v22, -1e+30  ;;  %v3235_v4 = vsel %vm16783_vm11, %v17676_v42, -1e+30 }
 0x232   : > { %v11343_v3 = vmax.f32 %v17696_v54, %v3236_v9  ;;  %v1246_v13 = vand.u32 2147483647, %v1214_v24  ;;  %v1598_v58 = vsub.f32 %v11329_v1, %v11124_v40  ;;  %v1151_v52 = vand.u32 2147483647, %v1119_v19 }
 0x233   : > { %v1534_v57 = vand.u32 2147483647, %v1502_v29  ;;  %vm1661_vm7 = vcmp.eq.f32.partialorder %v1629_v12, 2.0  ;;  %v17697_v29 = vmax.f32 %v17673_v28, %v11059_v32  ;;  %v1503_v62 = vsub.f32 %v10953_v63, %v11171_v46 }
 0x234   : > { %v3534_v54 = vsel %vm1661_vm7, 1, %v17431_v15  ;;  %vm1278_vm8 = vcmp.eq.f32.partialorder %v1246_v13, 1.0  ;;  %vm16795_vm9 = vcmp.eq.s32.totalorder %v11352_v25, 1  ;;  %vm1183_vm11 = vcmp.eq.f32.partialorder %v1151_v52, 1.0  ;;  %v11379_v52 = vld [vmem:[%s16151_s1 + $0xa8] sm:$0xff]  ;;  %v11403_v60 = vpop.permute.xlu1 %3188 }
 0x235   : > { %3594 = vperm.xlu1 %7170, %v3533_v55   ;;  %3373 = vperm.xlu0 %7169, %v3310_v8   ;;  %vm1566_vm3 = vcmp.eq.f32.partialorder %v1534_v57, 2.0  ;;  %v11350_v56 = vmax.f32 %v17697_v29, %v3235_v4  ;;  %v11354_v55 = vpop.permute.xlu0 %3328  ;;  %v3089_v32 = vsel %vm1278_vm8, 1, %v17431_v15  ;;  %v11366_v57 = vsel %vm16795_vm9, %v11005_v47, -1e+30  ;;  %17700 = vst [vmem:[#allocation224_spill] sm:$0xff] %v11403_v60 }
 0x236   : > { %17699 = vst [vmem:[#allocation223_spill] sm:$0xff] %v11354_v55  ;;  %vm16796_vm4 = vcmp.eq.s32.totalorder %v11354_v55, 1  ;;  %v3311_v24 = vsel %vm1566_vm3, 1, %v17431_v15  ;;  %v2866_v63 = vsel %vm1183_vm11, 1, %v17431_v15  ;;  %v1630_v8 = vand.u32 2147483647, %v1598_v58 }
 0x237   : > { %v11374_v19 = vsel %vm16796_vm4, %v10945_v0, -1e+30  ;;  %v1535_v12 = vand.u32 2147483647, %v1503_v62  ;;  %v1599_v9 = vsub.f32 %v11379_v52, %v11171_v46  ;;  %v1504_v4 = vsub.f32 %v11019_v2, %v11222_v61  ;;  %v11392_v58 = vld [vmem:[%s16151_s1 + $0xb0] sm:$0xff] }
 0x238   : > { %vm1662_vm8 = vcmp.eq.f32.partialorder %v1630_v8, 2.0  ;;  %v1216_v29 = vsub.f32 %v11392_v58, %v11329_v1  ;;  %v1121_v62 = vsub.f32 %v11277_v23, %v11379_v52  ;;  %v1600_v16 = vsub.f32 %v11392_v58, %v11222_v61 }
 0x239   : > { %3155 = vperm.xlu1 %7170, %v3088_v34   ;;  %2934 = vperm.xlu0 %7169, %v2865_v33   ;;  %v1215_v34 = vsub.f32 %v11379_v52, %v11277_v23  ;;  %v1120_v33 = vsub.f32 %v11222_v61, %v11329_v1  ;;  %vm1567_vm11 = vcmp.eq.f32.partialorder %v1535_v12, 2.0  ;;  %v3535_v2 = vsel %vm1662_vm8, 1, %v17431_v15  ;;  %v11405_v43 = vpop.permute.xlu0 %3185 }
 0x23a   : > { %v1631_v55 = vand.u32 2147483647, %v1599_v9  ;;  %v1536_v48 = vand.u32 2147483647, %v1504_v4  ;;  %17701 = vst [vmem:[#allocation225_spill] sm:$0xff] %v11405_v43  ;;  %v3312_v12 = vsel %vm1567_vm11, 1, %v17431_v15  ;;  %v17703_v9 = vmax.f32 %v10907_v50, %v11216_v59 }
 0x23b   : > { %v1247_v25 = vand.u32 2147483647, %v1215_v34  ;;  %v1152_v8 = vand.u32 2147483647, %v1120_v33  ;;  %v1248_v22 = vand.u32 2147483647, %v1216_v29 }
 0x23c   : > { %v1153_v13 = vand.u32 2147483647, %v1121_v62  ;;  %vm16893_vm9 = vcmp.eq.s32.totalorder %v11403_v60, 1  ;;  %vm16800_vm4 = vcmp.eq.s32.totalorder %v11405_v43, 1  ;;  %vm1663_vm8 = vcmp.eq.f32.partialorder %v1631_v55, 2.0  ;;  %v11438_v59 = vld [vmem:[%s16151_s1 + $0xb8] sm:$0xff] }
 0x23d   : > { %3597 = vperm.xlu1 %7170, %v3534_v54   ;;  %3376 = vperm.xlu0 %7169, %v3311_v24   ;;  %vm1279_vm7 = vcmp.eq.f32.partialorder %v1247_v25, 1.0  ;;  %vm1184_vm3 = vcmp.eq.f32.partialorder %v1152_v8, 1.0  ;;  %v3259_v24 = vsel %vm16893_vm9, %v10980_v49, -1e+30  ;;  %v3258_v34 = vsel %vm16800_vm4, %v11005_v47, -1e+30  ;;  %v11449_v8 = vpop.permute.xlu1 %3337 }
 0x23e   : > { %v3090_v54 = vsel %vm1279_vm7, 1, %v17431_v15  ;;  %vm1568_vm12 = vcmp.eq.f32.partialorder %v1536_v48, 2.0  ;;  %v17702_v25 = vmax.f32 %v10945_v0, %v11257_v7  ;;  %v11425_v4 = vmax.f32 %v17703_v9, %v3258_v34  ;;  %17704 = vst [vmem:[#allocation226_spill] sm:$0xff] %v11449_v8  ;;  %v11458_v43 = vld [vmem:[%s16151_s1 + $0xc0] sm:$0xff] }
 0x23f   : > { %v2867_v29 = vsel %vm1184_vm3, 1, %v17431_v15  ;;  %v3536_v62 = vsel %vm1663_vm8, 1, %v17431_v15  ;;  %vm1280_vm11 = vcmp.eq.f32.partialorder %v1248_v22, 1.0  ;;  %vm1185_vm7 = vcmp.eq.f32.partialorder %v1153_v13, 1.0 }
 0x240   : > { %v11420_v33 = vmax.f32 %v17702_v25, %v3259_v24  ;;  %v1632_v55 = vand.u32 2147483647, %v1600_v16  ;;  %v1505_v48 = vsub.f32 %v11068_v17, %v11277_v23  ;;  %v11433_v7 = vsel %vm1280_vm11, 1, %v17431_v15  ;;  %v11451_v24 = vpop.permute.xlu0 %3334 }
 0x241   : > { %3158 = vperm.xlu1 %7170, %v3089_v32   ;;  %2937 = vperm.xlu0 %7169, %v2866_v63   ;;  %v3313_v32 = vsel %vm1568_vm12, 1, %v17431_v15  ;;  %v1217_v63 = vsub.f32 %v11438_v59, %v11379_v52  ;;  %v1122_v22 = vsub.f32 %v11329_v1, %v11392_v58  ;;  %v11445_v16 = vsel %vm1185_vm7, 1, %v17431_v15  ;;  %17705 = vst [vmem:[#allocation227_spill] sm:$0xff] %v11451_v24  ;;  %v11485_v47 = vpop.permute.xlu1 %3642 }
 0x242   : > { %vm1664_vm3 = vcmp.eq.f32.partialorder %v1632_v55, 2.0  ;;  %v1537_v17 = vand.u32 2147483647, %v1505_v48  ;;  %v1601_v13 = vsub.f32 %v11438_v59, %v11277_v23  ;;  %v1506_v9 = vsub.f32 %v11124_v40, %v11329_v1  ;;  %17706 = vst [vmem:[#allocation228_spill] sm:$0xff] %v11485_v47 }
 0x243   : > { %v1249_v34 = vand.u32 2147483647, %v1217_v63  ;;  %v1154_v25 = vand.u32 2147483647, %v1122_v22  ;;  %v1218_v48 = vsub.f32 %v11458_v43, %v11392_v58  ;;  %vm16897_vm12 = vcmp.eq.s32.totalorder %v11449_v8, 1 }
 0x244   : > { %vm16803_vm8 = vcmp.eq.s32.totalorder %v11451_v24, 1  ;;  %vm1569_vm11 = vcmp.eq.f32.partialorder %v1537_v17, 2.0  ;;  %v11476_v63 = vsel %vm1664_vm3, 1, %v17431_v15  ;;  %v1538_v55 = vand.u32 2147483647, %v1506_v9 }
 0x245   : > { %3600 = vperm.xlu1 %7170, %v3535_v2   ;;  %3379 = vperm.xlu0 %7169, %v3312_v12   ;;  %v1633_v2 = vand.u32 2147483647, %v1601_v13  ;;  %v11467_v12 = vsel %vm16897_vm12, %v10975_v35, -1e+30  ;;  %v11472_v40 = vsel %vm16803_vm8, %v10980_v49, -1e+30  ;;  %v1602_v9 = vsub.f32 %v11458_v43, %v11329_v1 }
 0x246   : > { %vm1281_vm7 = vcmp.eq.f32.partialorder %v1249_v34, 1.0  ;;  %v11483_v13 = vsel %vm1569_vm11, 1, %v17431_v15  ;;  %vm1186_vm4 = vcmp.eq.f32.partialorder %v1154_v25, 1.0  ;;  %v1250_v34 = vand.u32 2147483647, %v1218_v48  ;;  %v11502_v25 = vpop.permute.xlu0 %3639 }
 0x247   : > { %v11488_v49 = vsel %vm1281_vm7, 1, %v17431_v15  ;;  %vm1665_vm3 = vcmp.eq.f32.partialorder %v1633_v2, 2.0  ;;  %vm16866_vm8 = vcmp.eq.s32.totalorder %v11485_v47, 1  ;;  %v11492_v22 = vsel %vm1186_vm4, 1, %v17431_v15  ;;  %17707 = vst [vmem:[#allocation229_spill] sm:$0xff] %v11502_v25 }
 0x248   : > { %v11495_v17 = vsel %vm1665_vm3, 1, %v17431_v15  ;;  %vm1570_vm11 = vcmp.eq.f32.partialorder %v1538_v55, 2.0  ;;  %vm1282_vm7 = vcmp.eq.f32.partialorder %v1250_v34, 1.0  ;;  %v17708_v48 = vmax.f32 %v11183_v20, %v11313_v21  ;;  %v11521_v34 = vpop.permute.xlu1 %3122 }
 0x249   : > { %3161 = vperm.xlu1 %7170, %v3090_v54   ;;  %2940 = vperm.xlu0 %7169, %v2867_v29   ;;  %v1123_v54 = vsub.f32 %v11379_v52, %v11438_v59  ;;  %v3709_v29 = vsel %vm16866_vm8, %v10536_v26, -1e+30  ;;  %vm16813_vm4 = vcmp.eq.s32.totalorder %v11502_v25, 1  ;;  %v11513_v0 = vsel %vm1570_vm11, 1, %v17431_v15  ;;  %17710 = vst [vmem:[#allocation231_spill] sm:$0xff] %v11521_v34 }
 0x24a   : > { %v11509_v2 = vmax.f32 %v17708_v48, %v3709_v29  ;;  %v11516_v50 = vsel %vm1282_vm7, 1, %v17431_v15  ;;  %v3708_v55 = vsel %vm16813_vm4, %v10492_v39, -1e+30  ;;  %v1634_v20 = vand.u32 2147483647, %v1602_v9 }
 0x24b   : > { %v1155_v24 = vand.u32 2147483647, %v1123_v54  ;;  %v1507_v21 = vsub.f32 %v11171_v46, %v11379_v52  ;;  %vm16837_vm3 = vcmp.eq.s32.totalorder %v11521_v34, 1  ;;  %v11535_v54 = vpop.permute.xlu0 %3645  ;;  %v6696_v46 = vld [vmem:[%s16155_s5 + $0x1] sm:$0x1]  ;;  %v17714_v1 = vmax.f32 %v17676_v42, %v11088_v36 }
 0x24c   : > { %17709 = vst [vmem:[#allocation230_spill] sm:$0xff] %v11509_v2  ;;  %v4345_v48 = vrot.slane %v11509_v2, 1  ;;  %17713 = vst [vmem:[#allocation233_spill] sm:$0xff] %v11535_v54  ;;  %vm1666_vm7 = vcmp.eq.f32.partialorder %v1634_v20, 2.0  ;;  %v3237_v9 = vsel %vm16837_vm3, %v10632_v5, -1e+30 }
 0x24d   : > { %3603 = vperm.xlu1 %7170, %v3536_v62   ;;  %3382 = vperm.xlu0 %7169, %v3313_v32   ;;  %v17711_v32 = vmax.f32 %v11186_v11, %v11271_v51  ;;  %vm1187_vm11 = vcmp.eq.f32.partialorder %v1155_v24, 1.0  ;;  %vm16863_vm4 = vcmp.eq.s32.totalorder %v11535_v54, 1  ;;  %v11548_v51 = vsel %vm1666_vm7, 1, %v17431_v15  ;;  %v11559_v62 = vld [vmem:[%s16155_s5] sm:$0x1]  ;;  %v11569_v24 = vpop.permute.xlu1 %3343 }
 0x24e   : > { %v11545_v11 = vsel %vm1187_vm11, 1, %v17431_v15  ;;  %v11564_v29 = vmax.f32 %v17714_v1, %v3237_v9  ;;  %v3710_v20 = vsel %vm16863_vm4, %v17669_v41, -1e+30  ;;  %17715 = vst [vmem:[#allocation234_spill] sm:$0xff] %v11569_v24  ;;  %vm16838_vm11 = vcmask 1040384  }
 0x24f   : > { %v11532_v25 = vmax.f32 %v17711_v32, %v3708_v55  ;;  %v1539_v32 = vand.u32 2147483647, %v1507_v21  ;;  %v17718_v1 = vrot.slane %v11509_v2, 6  ;;  %v17720_v54 = vrot.slane %v11509_v2, 2  ;;  %7155 = vmatprep.subr.msk.bf16.mxu0 %vm16838_vm11, %v6696_v46  ;;  %7157 = vmatprep.subr.msk.bf16.mxu1 %vm16838_vm11, %v11559_v62 }
 0x250   : > { %vm16836_vm7 = vcmp.eq.s32.totalorder %v11569_v24, 1 }
 0x251   : > { %17712 = vst [vmem:[#allocation232_spill] sm:$0xff] %v11532_v25  ;;  %v16820_v55 = vrot.slane %v11532_v25, 7  ;;  %3164 = vperm.xlu1 %7170, %v11433_v7   ;;  %2943 = vperm.xlu0 %7169, %v11445_v16   ;;  %v17716_v7 = vrot.slane %v11509_v2, 7  ;;  %v17717_v34 = vrot.slane %v11532_v25, 1  ;;  %v17719_v9 = vrot.slane %v11532_v25, 6 }
 0x252   : > { %v17721_v23 = vrot.slane %v11532_v25, 2 }
 0x253   : > { %v4220_v16 = vsel %vm17122_vm1, %v16820_v55, %v17716_v7  ;;  %v4348_v36 = vsel %vm1035_vm5, %v17717_v34, %v4345_v48  ;;  %v4476_v21 = vsel %vm1324_vm10, %v17719_v9, %v17718_v1  ;;  %v11593_v7 = vpop.permute.xlu0 %3340  ;;  %v17726_v9 = vmax.f32 %v11226_v37, %v11299_v44  ;;  %v17740_v55 = vld [vmem:[#allocation5_spill] sm:$0xff] }
 0x254   : > { %v4604_v41 = vsel %vm1421_vm14, %v17721_v23, %v17720_v54  ;;  %17722 = vst [vmem:[#allocation235_spill] sm:$0xff] %v11593_v7  ;;  %v4281_v34 = vsel %vm16831_vm0, %v4220_v16, -1e+30  ;;  %v11600_v60 = vsel %vm16830_vm6, %v4348_v36, -1e+30  ;;  %vm17111_vm6 = vcmask 15360  }
 0x255   : > { %v11604_v1 = vsel %vm16828_vm2, %v4476_v21, -1e+30  ;;  %v11609_v25 = vmax.f32 %v17726_v9, %v3710_v20  ;;  %v4313_v23 = vmax.f32 %v11509_v2, %v4281_v34  ;;  %v11616_v54 = vsel %vm16829_vm13, %v4604_v41, -1e+30  ;;  %3606 = vperm.xlu1 %7170, %v11476_v63   ;;  %3385 = vperm.xlu0 %7169, %v11483_v13   ;;  %v11630_v41 = vpop.permute.xlu1 %3555  ;;  %v11667_v63 = vld [vmem:[%s16151_s1 + $0xc8] sm:$0xff]  ;;  %v17739_v9 = vld [vmem:[#allocation60_spill] sm:$0xff] }
 0x256   : > { %vm16894_vm2 = vcmp.eq.s32.totalorder %v11593_v7, 1  ;;  %v11628_v16 = vsel %vm16836_vm7, %v10492_v39, -1e+30  ;;  %17728 = vst [vmem:[#allocation237_spill] sm:$0xff] %v11630_v41  ;;  %vm16841_vm13 = vcmp.eq.s32.totalorder %v11630_v41, 1  ;;  %vm1571_vm0 = vcmp.eq.f32.partialorder %v1539_v32, 2.0 }
 0x257   : > { %17727 = vst [vmem:[#allocation236_spill] sm:$0xff] %v11609_v25  ;;  %v16832_v44 = vrot.slane %v11609_v25, 1  ;;  %v11637_v13 = vsel %vm16894_vm2, %v17667_v30, -1e+30  ;;  %v3680_v21 = vsel %vm16841_vm13, %v10568_v31, -1e+30 }
 0x258   : > { %v11650_v34 = vsel %vm1571_vm0, 1, %v17431_v15  ;;  %v3812_v36 = vsel %vm16838_vm11, %v6696_v46, 0  ;;  %v11683_v46 = vld [vmem:[%s16155_s5 + $0x2] sm:$0x1] }
 0x259   : > { %v4347_v39 = vsel %vm1035_vm5, %v4345_v48, %v16832_v44  ;;  %3167 = vperm.xlu1 %7170, %v11488_v49   ;;  %2946 = vperm.xlu0 %7169, %v11492_v22   ;;  %v17730_v48 = vmax.f32 %v11239_v27, %v11366_v57  ;;  %v11661_v44 = vpop.permute.xlu0 %3552  ;;  %v11674_v22 = vpop.permute.xlu1 %3412  ;;  %v1124_v27 = vsub.f32 %v11392_v58, %v11458_v43 }
 0x25a   : > { %v4409_v20 = vsel %vm16833_vm15, %v4347_v39, -1e+30  ;;  %17731 = vst [vmem:[#allocation238_spill] sm:$0xff] %v11661_v44  ;;  %v1219_v39 = vsub.f32 %v11667_v63, %v11438_v59  ;;  %vm16862_vm0 = vcmp.eq.s32.totalorder %v11661_v44, 1  ;;  %17732 = vst [vmem:[#allocation239_spill] sm:$0xff] %v11674_v22  ;;  %6921 = vmatpush3.bf16.msra.mxu0 %v3812_v36  ;;  %v1603_v57 = vsub.f32 %v11667_v63, %v11379_v52 }
 0x25b   : > { %v11659_v32 = vmax.f32 %v17730_v48, %v3680_v21  ;;  %v11671_v49 = vmax.f32 %v4313_v23, %v4409_v20  ;;  %17733 = vst [vmem:[#allocation240_spill] sm:$0xff] %v11683_v46  ;;  %v3679_v36 = vsel %vm16862_vm0, %v17673_v28, -1e+30  ;;  %7156 = vmatprep.subr.msk.bf16.mxu0 %vm16838_vm11, %v11559_v62  ;;  %v17734_v48 = vmax.f32 %v11197_v6, %v11374_v19 }
 0x25c   : > { %vm16835_vm15 = vcmp.eq.s32.totalorder %v11674_v22, 1  ;;  %v1251_v14 = vand.u32 2147483647, %v1219_v39  ;;  %v1156_v21 = vand.u32 2147483647, %v1124_v27  ;;  %v1508_v6 = vsub.f32 %v11222_v61, %v11392_v58 }
 0x25d   : > { %v11696_v37 = vmax.f32 %v17734_v48, %v3679_v36  ;;  %3609 = vperm.xlu1 %7170, %v11495_v17   ;;  %3388 = vperm.xlu0 %7169, %v11513_v0   ;;  %v11704_v23 = vsel %vm16835_vm15, %v10870_v53, -1e+30  ;;  %v11706_v20 = vpop.permute.xlu0 %3409  ;;  %v1635_v35 = vand.u32 2147483647, %v1603_v57  ;;  %v11712_v19 = vsel %vm16838_vm11, %v11559_v62, 0  ;;  %v11719_v36 = vpop.permute.xlu1 %3561 }
 0x25e   : > { %17735 = vst [vmem:[#allocation241_spill] sm:$0xff] %v11706_v20  ;;  %17736 = vst [vmem:[#allocation242_spill] sm:$0xff] %v11719_v36  ;;  %7057 = vmatpush3.bf16.msra.mxu1 %v11712_v19  ;;  %vm16849_vm15 = vcmp.eq.s32.totalorder %v11706_v20, 1  ;;  %vm16854_vm7 = vcmp.eq.s32.totalorder %v11719_v36, 1  ;;  %vm1283_vm3 = vcmp.eq.f32.partialorder %v1251_v14, 1.0  ;;  %v17737_v62 = vrot.slane %v11659_v32, 7 }
 0x25f   : > { %v4187_v39 = vrot.slane %v11696_v37, 7  ;;  %v16846_v0 = vrot.slane %v11696_v37, 6  ;;  %v3743_v61 = vpack.c.bf16 %v11659_v32, %v11696_v37  ;;  %7158 = vmatprep.subr.msk.bf16.mxu1 %vm16838_vm11, %v11683_v46  ;;  %v17738_v48 = vrot.slane %v11659_v32, 6  ;;  %v17756_v36 = vld [vmem:[#allocation2_spill] sm:$0xff] }
 0x260   : > { %v11741_v17 = vsel %vm16849_vm15, %v10838_v45, -1e+30  ;;  %v3682_v8 = vsel %vm16854_vm7, %v17739_v9, -1e+30  ;;  %vm17741_vm11 = vcmp.eq.s32.totalorder %v17740_v55, 1  ;;  %v17754_v55 = vld [vmem:[#allocation36_spill] sm:$0xff] }
 0x261   : > { %v4249_v57 = vsel %vm17122_vm1, %v4187_v39, %v17737_v62  ;;  %v4505_v27 = vsel %vm1324_vm10, %v16846_v0, %v17738_v48  ;;  %v17742_v62 = vld [vmem:[#allocation79_spill] sm:$0xff]  ;;  %3170 = vperm.xlu1 %7170, %v11516_v50   ;;  %2949 = vperm.xlu0 %7169, %v11545_v11   ;;  %v17744_v48 = vmax.f32 %v11294_v18, %v11467_v12  ;;  %v11761_v20 = vpop.permute.xlu0 %3558  ;;  %vm17757_vm7 = vcmp.eq.s32.totalorder %v17756_v36, 1 }
 0x262   : > { %v4252_v22 = vsel %vm17741_vm11, %v4249_v57, -1e+30  ;;  %vm17743_vm13 = vcmp.eq.s32.totalorder %v17742_v62, 1  ;;  %17745 = vst [vmem:[#allocation243_spill] sm:$0xff] %v11761_v20  ;;  %6922 = vmatprep.mubr.msk.bf16.mxu0 %vm17111_vm6, %v3743_v61  ;;  %vm1188_vm11 = vcmp.eq.f32.partialorder %v1156_v21, 1.0  ;;  %v17746_v12 = vmax.f32 %v11252_v38, %v11472_v40  ;;  %v11779_v61 = vpop.permute.xlu1 %3346  ;;  %v17767_v36 = vld [vmem:[#allocation127_spill] sm:$0xff] }
 0x263   : > { %v11750_v53 = vsel %vm17743_vm13, %v4505_v27, -1e+30  ;;  %v11759_v0 = vmax.f32 %v17744_v48, %v3682_v8  ;;  %v4284_v57 = vmax.f32 %v11659_v32, %v4252_v22  ;;  %vm16856_vm13 = vcmp.eq.s32.totalorder %v11761_v20, 1  ;;  %17747 = vst [vmem:[#allocation244_spill] sm:$0xff] %v11779_v61 }
 0x264   : > { %v3094_v27 = vsel %vm1283_vm3, 1, %v17431_v15  ;;  %v3681_v8 = vsel %vm16856_vm13, %v17676_v42, -1e+30  ;;  %v2871_v21 = vsel %vm1188_vm11, 1, %v17431_v15  ;;  %vm1667_vm3 = vcmp.eq.f32.partialorder %v1635_v35, 2.0 }
 0x265   : > { %v16858_v11 = vrot.slane %v11759_v0, 1  ;;  %v11777_v22 = vmax.f32 %v17746_v12, %v3681_v8  ;;  %3612 = vperm.xlu1 %7170, %v11548_v51   ;;  %3391 = vperm.xlu0 %7169, %v11650_v34   ;;  %vm16872_vm15 = vcmp.eq.s32.totalorder %v11779_v61, 1  ;;  %v11786_v48 = vpop.permute.xlu0 %3125  ;;  %v3540_v18 = vsel %vm1667_vm3, 1, %v17431_v15 }
 0x266   : > { %17748 = vst [vmem:[#allocation245_spill] sm:$0xff] %v11786_v48  ;;  %v1540_v38 = vand.u32 2147483647, %v1508_v6  ;;  %v17749_v40 = vrot.slane %v11609_v25, 7  ;;  %v11799_v34 = vsel %vm16872_vm15, %v10536_v26, -1e+30 }
 0x267   : > { %v16855_v12 = vrot.slane %v11777_v22, 7  ;;  %v4317_v35 = vrot.slane %v11777_v22, 1  ;;  %v16861_v51 = vrot.slane %v11777_v22, 6  ;;  %vm16980_vm11 = vcmp.eq.s32.totalorder %v11786_v48, 1 }
 0x268   : > { %v4250_v8 = vsel %vm17122_vm1, %v17749_v40, %v4187_v39  ;;  %v3744_v39 = vpack.c.bf16 %v11759_v0, %v11777_v22  ;;  %v17750_v40 = vrot.slane %v11659_v32, 1  ;;  %v17751_v26 = vrot.slane %v11659_v32, 7 }
 0x269   : > { %v4375_v50 = vsel %vm1035_vm5, %v4317_v35, %v16858_v11  ;;  %v17752_v6 = vrot.slane %v11659_v32, 6  ;;  %vm17755_vm3 = vcmp.eq.s32.totalorder %v17754_v55, 1  ;;  %v17761_v11 = vrot.slane %v11777_v22, 2  ;;  %3173 = vperm.xlu1 %7170, %v3094_v27   ;;  %2952 = vperm.xlu0 %7169, %v2871_v21   ;;  %v17763_v55 = vld [vmem:[#allocation84_spill] sm:$0xff] }
 0x26a   : > { %v4376_v24 = vsel %vm1035_vm5, %v17750_v40, %v4317_v35  ;;  %v4248_v14 = vsel %vm17122_vm1, %v17751_v26, %v16855_v12  ;;  %v11827_v40 = vpop.permute.xlu1 %3567  ;;  %v17758_v12 = vld [vmem:[#allocation39_spill] sm:$0xff]  ;;  %v17760_v35 = vrot.slane %v11759_v0, 2  ;;  %6923 = vmatmul.mubr.msk.bf16.vlgmr.msra.gmra.mrb[32].mxu0 %vm17111_vm6, %v3744_v39  ;;  %vm1572_vm4 = vcmp.eq.f32.partialorder %v1540_v38, 2.0 }
 0x26b   : > { %v4504_v62 = vsel %vm1324_vm10, %v17752_v6, %v16861_v51  ;;  %17753 = vst [vmem:[#allocation246_spill] sm:$0xff] %v11827_v40  ;;  %v4380_v45 = vsel %vm17755_vm3, %v4376_v24, -1e+30  ;;  %v4253_v26 = vsel %vm17757_vm7, %v4248_v14, -1e+30  ;;  %vm17759_vm13 = vcmp.eq.s32.totalorder %v17758_v12, 1  ;;  %v11841_v6 = vpop.permute.xlu0 %3564  ;;  %6955 = vmatpush3.bf16.msra.mxu0 %v11712_v19 }
 0x26c   : > { %v4381_v46 = vsel %vm17759_vm13, %v4375_v50, -1e+30  ;;  %v4631_v20 = vsel %vm1421_vm14, %v17761_v11, %v17760_v35  ;;  %17762 = vst [vmem:[#allocation247_spill] sm:$0xff] %v11841_v6  ;;  %v11843_v51 = vmax.f32 %v4284_v57, %v4380_v45  ;;  %v4285_v24 = vmax.f32 %v11777_v22, %v4253_v26  ;;  %v17765_v12 = vld [vmem:[#allocation170_spill] sm:$0xff]  ;;  %v17768_v57 = vld [vmem:[#allocation203_spill] sm:$0xff] }
 0x26d   : > { %vm17764_vm7 = vcmp.eq.s32.totalorder %v17763_v55, 1  ;;  %vm17766_vm13 = vcmp.eq.s32.totalorder %v17765_v12, 1  ;;  %v3238_v11 = vsel %vm16980_vm11, %v17767_v36, -1e+30  ;;  %vm16981_vm3 = vcmp.eq.s32.totalorder %v11827_v40, 1  ;;  %3615 = vperm.xlu1 %7170, %v3540_v18  }
 0x26e   : > { %v4509_v14 = vsel %vm17764_vm7, %v4504_v62, -1e+30  ;;  %v4637_v50 = vsel %vm17766_vm13, %v4631_v20, -1e+30  ;;  %vm16986_vm0 = vcmp.eq.s32.totalorder %v11841_v6, 1  ;;  %v4413_v45 = vmax.f32 %v4285_v24, %v4381_v46  ;;  %v11879_v35 = vpop.permute.xlu1 %3636  ;;  %v17773_v24 = vld [vmem:[#allocation3_spill] sm:$0xff] }
 0x26f   : > { %v17769_v62 = vmax.f32 %v17739_v9, %v17768_v57  ;;  %v3684_v20 = vsel %vm16981_vm3, %v17767_v36, -1e+30  ;;  %v3683_v21 = vsel %vm16986_vm0, %v10632_v5, -1e+30  ;;  %v17770_v39 = vmax.f32 %v11343_v3, %v11628_v16  ;;  %17772 = vst [vmem:[#allocation127_spill] sm:$0xff] %v11879_v35  ;;  %v11891_v18 = vpop.permute.xlu0 %3633  ;;  %v17823_v6 = vld [vmem:[#allocation34_spill] sm:$0xff] }
 0x270   : > { %v17771_v46 = vmax.f32 %v11350_v56, %v11637_v13  ;;  %v3317_v26 = vsel %vm1572_vm4, 1, %v17431_v15  ;;  %vm17774_vm7 = vcmp.eq.s32.totalorder %v17773_v24, 1  ;;  %v4541_v57 = vmax.f32 %v4413_v45, %v4509_v14  ;;  %17777 = vst [vmem:[#allocation203_spill] sm:$0xff] %v11891_v18  ;;  %v17793_v14 = vld [vmem:[#allocation81_spill] sm:$0xff] }
 0x271   : > { %v11860_v27 = vmax.f32 %v17769_v62, %v3238_v11  ;;  %v11871_v38 = vmax.f32 %v17770_v39, %v3684_v20  ;;  %v4251_v11 = vsel %vm17774_vm7, %v4250_v8, -1e+30  ;;  %3394 = vperm.xlu0 %7169, %v3317_v26   ;;  %vm16887_vm13 = vcmp.eq.s32.totalorder %v11879_v35, 1 }
 0x272   : > { %v11876_v19 = vmax.f32 %v17771_v46, %v3683_v21  ;;  %v4283_v3 = vmax.f32 %v11696_v37, %v4251_v11  ;;  %v17775_v16 = vrot.slane %v11659_v32, 1  ;;  %v17776_v56 = vrot.slane %v11696_v37, 1  ;;  %v11919_v39 = vpop.permute.xlu1 %3349 }
 0x273   : > { %v11897_v45 = vmax.f32 %v4541_v57, %v4637_v50  ;;  %v3707_v46 = vsel %vm16887_vm13, %v17667_v30, -1e+30  ;;  %v17778_v26 = vmax.f32 %v11420_v33, %v11704_v23  ;;  %v17782_v8 = vrot.slane %v11696_v37, 6  ;;  %17784 = vst [vmem:[#allocation249_spill] sm:$0xff] %v11919_v39  ;;  %v17785_v30 = vld [vmem:[#allocation168_spill] sm:$0xff] }
 0x274   : > { %v4377_v13 = vsel %vm1035_vm5, %v17776_v56, %v17775_v16  ;;  %v17780_v16 = vld [vmem:[#allocation37_spill] sm:$0xff]  ;;  %v17783_v50 = vrot.slane %v11609_v25, 6  ;;  %v4540_v62 = vmax.f32 %v11843_v51, %v11750_v53  ;;  %vm17786_vm7 = vcmp.eq.s32.totalorder %v17785_v30, 1  ;;  %v17787_v23 = vld [vmem:[#allocation208_spill] sm:$0xff] }
 0x275   : > { %v11907_v11 = vmax.f32 %v17778_v26, %v3707_v46  ;;  %vm17781_vm4 = vcmp.eq.s32.totalorder %v17780_v16, 1  ;;  %v11924_v33 = vsel %vm17786_vm7, %v11897_v45, -1e+30  ;;  %v11934_v46 = vsel %vm16872_vm15, %v11897_v45, -1e+30  ;;  %v11936_v26 = vpop.permute.xlu0 %3128  ;;  %v17795_v30 = vld [vmem:[#allocation232_spill] sm:$0xff] }
 0x276   : > { %v4379_v56 = vsel %vm17781_vm4, %v4377_v13, -1e+30  ;;  %v4506_v57 = vsel %vm1324_vm10, %v17783_v50, %v17782_v8  ;;  %vm17788_vm4 = vcmp.eq.s32.totalorder %v17787_v23, 1  ;;  %17790 = vst [vmem:[#allocation251_spill] sm:$0xff] %v11934_v46  ;;  %17791 = vst [vmem:[#allocation252_spill] sm:$0xff] %v11936_v26  ;;  %vm17794_vm7 = vcmp.eq.s32.totalorder %v17793_v14, 1  ;;  %v11975_v48 = vpop.permute.xlu1 %3131 }
 0x277   : > { %17779 = vst [vmem:[#allocation248_spill] sm:$0xff] %v11907_v11  ;;  %v11929_v13 = vsel %vm17788_vm4, %v11897_v45, -1e+30  ;;  %v4411_v8 = vmax.f32 %v4283_v3, %v4379_v56  ;;  %v11941_v53 = vsel %vm16866_vm8, %v11897_v45, -1e+30  ;;  %v4215_v51 = vrot.slane %v11907_v11, 7 }
 0x278   : > { %17789 = vst [vmem:[#allocation250_spill] sm:$0xff] %v11929_v13  ;;  %17792 = vst [vmem:[#allocation253_spill] sm:$0xff] %v11941_v53  ;;  %v4343_v50 = vrot.slane %v11907_v11, 1  ;;  %v4471_v20 = vrot.slane %v11907_v11, 6  ;;  %v4507_v21 = vsel %vm17794_vm7, %v4506_v57, -1e+30 }
 0x279   : > { %v4572_v3 = vrot.slane %v11659_v32, 2  ;;  %v17796_v23 = vrot.slane %v17795_v30, 7  ;;  %v17797_v12 = vrot.slane %v17795_v30, 1  ;;  %v17798_v16 = vrot.slane %v17795_v30, 6  ;;  %v17799_v14 = vld [vmem:[#allocation32_spill] sm:$0xff]  ;;  %v17801_v56 = vld [vmem:[#allocation70_spill] sm:$0xff] }
 0x27a   : > { %v4539_v61 = vmax.f32 %v4411_v8, %v4507_v21  ;;  %vm17800_vm4 = vcmp.eq.s32.totalorder %v17799_v14, 1  ;;  %vm17802_vm7 = vcmp.eq.s32.totalorder %v17801_v56, 1  ;;  %v17803_v53 = vld [vmem:[#allocation148_spill] sm:$0xff]  ;;  %v17805_v46 = vrot.slane %v17795_v30, 2  ;;  %17807 = vst [vmem:[#allocation254_spill] sm:$0xff] %v11975_v48  ;;  %v11990_v56 = vpop.permute.xlu0 %3570 }
 0x27b   : > { %v4221_v47 = vsel %vm17122_vm1, %v4215_v51, %v17796_v23  ;;  %v4349_v55 = vsel %vm1035_vm5, %v4343_v50, %v17797_v12  ;;  %v4477_v57 = vsel %vm1324_vm10, %v4471_v20, %v17798_v16  ;;  %vm17804_vm8 = vcmp.eq.s32.totalorder %v17803_v53, 1  ;;  %17812 = vst [vmem:[#allocation255_spill] sm:$0xff] %v11990_v56 }
 0x27c   : > { %v4280_v32 = vsel %vm17800_vm4, %v4221_v47, -1e+30  ;;  %v4407_v24 = vsel %vm17802_vm7, %v4349_v55, -1e+30  ;;  %v4536_v23 = vsel %vm17804_vm8, %v4477_v57, -1e+30 }
 0x27d   : > { %v17806_v40 = vrot.slane %v11907_v11, 2  ;;  %v4312_v21 = vmax.f32 %v17795_v30, %v4280_v32  ;;  %v17808_v16 = vrot.slane %v11777_v22, 2  ;;  %v17809_v55 = vrot.slane %v11696_v37, 2  ;;  %v17810_v57 = vld [vmem:[#allocation123_spill] sm:$0xff]  ;;  %v17815_v32 = vld [vmem:[#allocation161_spill] sm:$0xff] }
 0x27e   : > { %vm17811_vm8 = vcmp.eq.s32.totalorder %v17810_v57, 1  ;;  %vm17816_vm7 = vcmp.eq.s32.totalorder %v17815_v32, 1  ;;  %vm16889_vm15 = vcmp.eq.s32.totalorder %v11891_v18, 1  ;;  %v17818_v14 = vrot.slane %v11509_v2, 7 }
 0x27f   : > { %v4605_v12 = vsel %vm1421_vm14, %v17806_v40, %v17805_v46  ;;  %v4632_v47 = vsel %vm1421_vm14, %v4572_v3, %v17808_v16  ;;  %v4633_v8 = vsel %vm1421_vm14, %v17809_v55, %v4572_v3  ;;  %v17813_v40 = vld [vmem:[#allocation162_spill] sm:$0xff]  ;;  %v17817_v16 = vrot.slane %v11609_v25, 7 }
 0x280   : > { %v11988_v53 = vsel %vm17811_vm8, %v4605_v12, -1e+30  ;;  %vm17814_vm4 = vcmp.eq.s32.totalorder %v17813_v40, 1  ;;  %v4636_v30 = vsel %vm17816_vm7, %v4632_v47, -1e+30  ;;  %v4440_v12 = vmax.f32 %v4312_v21, %v11600_v60  ;;  %v17820_v40 = vld [vmem:[#allocation186_spill] sm:$0xff] }
 0x281   : > { %v4635_v46 = vsel %vm17814_vm4, %v4633_v8, -1e+30  ;;  %v4219_v3 = vsel %vm17122_vm1, %v17818_v14, %v17817_v16  ;;  %v12006_v57 = vmax.f32 %v4540_v62, %v4636_v30  ;;  %v3706_v8 = vsel %vm16889_vm15, %v17820_v40, -1e+30  ;;  %v17830_v40 = vld [vmem:[#allocation154_spill] sm:$0xff] }
 0x282   : > { %v12004_v55 = vmax.f32 %v4539_v61, %v4635_v46  ;;  %v17821_v47 = vmax.f32 %v11425_v4, %v11741_v17  ;;  %vm17824_vm8 = vcmp.eq.s32.totalorder %v17823_v6, 1  ;;  %v17825_v14 = vrot.slane %v11696_v37, 1  ;;  %v12030_v4 = vpop.permute.xlu1 %3573  ;;  %v17832_v16 = vld [vmem:[#allocation178_spill] sm:$0xff]  ;;  %v17840_v6 = vld [vmem:[#allocation155_spill] sm:$0xff] }
 0x283   : > { %17819 = vst [vmem:[#allocation256_spill] sm:$0xff] %v12006_v57  ;;  %v4282_v9 = vsel %vm17824_vm8, %v4219_v3, -1e+30  ;;  %v17826_v60 = vrot.slane %v11609_v25, 1  ;;  %v17827_v62 = vrot.slane %v11609_v25, 6  ;;  %v17828_v30 = vrot.slane %v11509_v2, 6 }
 0x284   : > { %v12014_v32 = vmax.f32 %v17821_v47, %v3706_v8  ;;  %17829 = vst [vmem:[#allocation257_spill] sm:$0xff] %v12030_v4  ;;  %v4568_v17 = vmax.f32 %v4440_v12, %v4536_v23  ;;  %vm17831_vm4 = vcmp.eq.s32.totalorder %v17830_v40, 1  ;;  %vm17833_vm7 = vcmp.eq.s32.totalorder %v17832_v16, 1  ;;  %v12047_v47 = vpop.permute.xlu0 %3352  ;;  %v17838_v16 = vld [vmem:[#allocation73_spill] sm:$0xff] }
 0x285   : > { %v4378_v61 = vsel %vm1035_vm5, %v17826_v60, %v17825_v14  ;;  %v4475_v21 = vsel %vm1324_vm10, %v17828_v30, %v17827_v62  ;;  %v12035_v46 = vsel %vm17831_vm4, %v12004_v55, -1e+30  ;;  %v12040_v3 = vsel %vm17833_vm7, %v12004_v55, -1e+30  ;;  %17835 = vst [vmem:[#allocation259_spill] sm:$0xff] %v12047_v47 }
 0x286   : > { %17822 = vst [vmem:[#allocation186_spill] sm:$0xff] %v12014_v32  ;;  %v12045_v8 = vsel %vm16894_vm2, %v12004_v55, -1e+30  ;;  %v12054_v12 = vsel %vm16887_vm13, %v12004_v55, -1e+30  ;;  %v16878_v14 = vrot.slane %v12014_v32, 7  ;;  %v4314_v60 = vmax.f32 %v11609_v25, %v4282_v9 }
 0x287   : > { %17834 = vst [vmem:[#allocation258_spill] sm:$0xff] %v12045_v8  ;;  %17836 = vst [vmem:[#allocation260_spill] sm:$0xff] %v12054_v12  ;;  %v12059_v62 = vmax.f32 %v4568_v17, %v11616_v54  ;;  %v16879_v30 = vrot.slane %v12014_v32, 1  ;;  %vm17839_vm8 = vcmp.eq.s32.totalorder %v17838_v16, 1  ;;  %v16880_v40 = vrot.slane %v12014_v32, 6  ;;  %v17842_v9 = vld [vmem:[#allocation33_spill] sm:$0xff] }
 0x288   : > { %v4410_v7 = vsel %vm17839_vm8, %v4378_v61, -1e+30  ;;  %v4222_v23 = vsel %vm17122_vm1, %v16878_v14, %v4215_v51  ;;  %vm17841_vm4 = vcmp.eq.s32.totalorder %v17840_v6, 1  ;;  %v4569_v54 = vmax.f32 %v11671_v49, %v11604_v1  ;;  %v17846_v49 = vld [vmem:[#allocation152_spill] sm:$0xff]  ;;  %v12092_v6 = vpop.permute.xlu0 %2913  ;;  %v17857_v32 = vld [vmem:[#allocation99_spill] sm:$0xff] }
 0x289   : > { %17837 = vst [vmem:[#allocation261_spill] sm:$0xff] %v12059_v62  ;;  %v4442_v35 = vmax.f32 %v4314_v60, %v4410_v7  ;;  %v4538_v12 = vsel %vm17841_vm4, %v4475_v21, -1e+30  ;;  %vm17843_vm7 = vcmp.eq.s32.totalorder %v17842_v9, 1  ;;  %v12079_v61 = vsel %vm1035_vm5, %v16879_v30, %v4343_v50  ;;  %v12086_v21 = vpop.permute.xlu1 %3134  ;;  %17848 = vst [vmem:[#allocation264_spill] sm:$0xff] %v12092_v6  ;;  %v17849_v50 = vld [vmem:[#allocation195_spill] sm:$0xff] }
 0x28a   : > { %v4279_v17 = vsel %vm17843_vm7, %v4222_v23, -1e+30  ;;  %17844 = vst [vmem:[#allocation262_spill] sm:$0xff] %v12079_v61  ;;  %v4478_v7 = vsel %vm1324_vm10, %v16880_v40, %v4471_v20  ;;  %17845 = vst [vmem:[#allocation263_spill] sm:$0xff] %v12086_v21  ;;  %vm17847_vm8 = vcmp.eq.s32.totalorder %v17846_v49, 1  ;;  %v4602_v14 = vrot.slane %v11609_v25, 2 }
 0x28b   : > { %v4311_v1 = vmax.f32 %v11907_v11, %v4279_v17  ;;  %v4535_v23 = vsel %vm17847_vm8, %v4478_v7, -1e+30  ;;  %v4570_v60 = vmax.f32 %v4442_v35, %v4538_v12  ;;  %vm17850_vm4 = vcmp.eq.s32.totalorder %v17849_v50, 1  ;;  %v17851_v20 = vld [vmem:[#allocation207_spill] sm:$0xff]  ;;  %v12103_v17 = vld [vmem:[%s16151_s1 + $0xd0] sm:$0xff]  ;;  %v17855_v25 = vld [vmem:[#allocation109_spill] sm:$0xff] }
 0x28c   : > { %v4730_v30 = vsel %vm17850_vm4, %v12059_v62, -1e+30  ;;  %vm17852_vm7 = vcmp.eq.s32.totalorder %v17851_v20, 1  ;;  %v1126_v35 = vsub.f32 %v11458_v43, %v12103_v17  ;;  %v1125_v12 = vsub.f32 %v11438_v59, %v11667_v63  ;;  %v17856_v49 = vld [vmem:[#allocation114_spill] sm:$0xff]  ;;  %v17859_v61 = vld [vmem:[#allocation131_spill] sm:$0xff] }
 0x28d   : > { %v4794_v40 = vsel %vm17852_vm7, %v12006_v57, -1e+30  ;;  %v4439_v7 = vmax.f32 %v4311_v1, %v4407_v24  ;;  %v17853_v51 = vrot.slane %v11509_v2, 2  ;;  %v17854_v20 = vrot.slane %v11696_v37, 2  ;;  %v12125_v2 = vpop.permute.xlu1 %3576 }
 0x28e   : > { %v1686_v9 = vpack.c.bf16 %v17856_v49, %v17855_v25  ;;  %vm17858_vm8 = vcmp.eq.s32.totalorder %v17857_v32, 1  ;;  %vm17860_vm4 = vcmp.eq.s32.totalorder %v17859_v61, 1  ;;  %v1158_v24 = vand.u32 2147483647, %v1126_v35  ;;  %17861 = vst [vmem:[#allocation109_spill] sm:$0xff] %v12125_v2  ;;  %v12130_v25 = vpop.permute.xlu0 %3355  ;;  %v17864_v49 = vld [vmem:[#allocation108_spill] sm:$0xff] }
 0x28f   : > { %v4603_v50 = vsel %vm1421_vm14, %v17853_v51, %v4602_v14  ;;  %v4634_v16 = vsel %vm1421_vm14, %v4602_v14, %v17854_v20  ;;  %v3745_v1 = vpack.c.bf16 %v11871_v38, %v11876_v19  ;;  %v4567_v51 = vmax.f32 %v4439_v7, %v4535_v23  ;;  %17863 = vst [vmem:[#allocation265_spill] sm:$0xff] %v12130_v25  ;;  %v17893_v61 = vld [vmem:[#allocation82_spill] sm:$0xff] }
 0x290   : > { %v4665_v11 = vsel %vm17858_vm8, %v4603_v50, -1e+30  ;;  %v4666_v8 = vsel %vm17860_vm4, %v4634_v16, -1e+30  ;;  %v1157_v14 = vand.u32 2147483647, %v1125_v12  ;;  %6972 = vmatprep.mubr.msk.bf16.mxu1 %vm17111_vm6, %v1686_v9 }
 0x291   : > { %v12127_v37 = vmax.f32 %v4569_v54, %v4665_v11  ;;  %v4698_v13 = vmax.f32 %v4570_v60, %v4666_v8  ;;  %vm1190_vm7 = vcmp.eq.f32.partialorder %v1158_v24, 1.0  ;;  %6926 = vmatprep.mubr.msk.bf16.mxu0 %vm17111_vm6, %v3745_v1  ;;  %v17865_v16 = vld [vmem:[#allocation59_spill] sm:$0xff]  ;;  %vm16905_vm8 = vcmp.eq.s32.totalorder %v11919_v39, 1  ;;  %v17869_v54 = vld [vmem:[#allocation144_spill] sm:$0xff]  ;;  %v17873_v1 = vld [vmem:[#allocation177_spill] sm:$0xff] }
 0x292   : > { %v1687_v50 = vpack.c.bf16 %v17865_v16, %v17864_v49  ;;  %v17866_v20 = vrot.slane %v11759_v0, 7  ;;  %v17867_v23 = vrot.slane %v11777_v22, 7  ;;  %v12143_v8 = vmax.f32 %v4567_v51, %v11988_v53  ;;  %v12178_v35 = vpop.permute.xlu0 %2916  ;;  %v17891_v24 = vld [vmem:[#allocation38_spill] sm:$0xff]  ;;  %v17922_v39 = vld [vmem:[#allocation117_spill] sm:$0xff] }
 0x293   : > { %17862 = vst [vmem:[#allocation114_spill] sm:$0xff] %v12127_v37  ;;  %vm17870_vm4 = vcmp.eq.s32.totalorder %v17869_v54, 1  ;;  %v4762_v60 = vmax.f32 %v4698_v13, %v4730_v30  ;;  %v12152_v12 = vsel %vm16893_vm9, %v12127_v37, -1e+30  ;;  %vm17874_vm13 = vcmp.eq.s32.totalorder %v17873_v1, 1  ;;  %v17878_v30 = vld [vmem:[#allocation197_spill] sm:$0xff]  ;;  %v12176_v1 = vpop.permute.xlu1 %3137 }
 0x294   : > { %v4247_v11 = vsel %vm17122_vm1, %v17867_v23, %v17866_v20  ;;  %17868 = vst [vmem:[#allocation108_spill] sm:$0xff] %v12143_v8  ;;  %v12147_v9 = vsel %vm17870_vm4, %v4698_v13, -1e+30  ;;  %17872 = vst [vmem:[#allocation59_spill] sm:$0xff] %v12152_v12  ;;  %v12158_v49 = vsel %vm17874_vm13, %v4698_v13, -1e+30  ;;  %6973 = vmatmul.mubr.msk.bf16.vlgmr.msra.gmra.mrb[0].mxu1 %vm17111_vm6, %v1687_v50 }
 0x295   : > { %v4732_v7 = vmax.f32 %v12006_v57, %v12147_v9  ;;  %17875 = vst [vmem:[#allocation266_spill] sm:$0xff] %v12158_v49  ;;  %v12162_v53 = vsel %vm16897_vm12, %v4698_v13, -1e+30  ;;  %v12166_v51 = vsel %vm16889_vm15, %v4698_v13, -1e+30  ;;  %vm17879_vm4 = vcmp.eq.s32.totalorder %v17878_v30, 1 }
 0x296   : > { %17877 = vst [vmem:[#allocation267_spill] sm:$0xff] %v12166_v51  ;;  %v4729_v20 = vsel %vm17879_vm4, %v12143_v8, -1e+30  ;;  %v12172_v23 = vmax.f32 %v4762_v60, %v4794_v40  ;;  %v2873_v9 = vsel %vm1190_vm7, 1, %v17431_v15  ;;  %vm1189_vm13 = vcmp.eq.f32.partialorder %v1157_v14, 1.0  ;;  %17881 = vst [vmem:[#allocation269_spill] sm:$0xff] %v12176_v1 }
 0x297   : > { %17882 = vst [vmem:[#allocation270_spill] sm:$0xff] %v12178_v35  ;;  %v4761_v18 = vmax.f32 %v12127_v37, %v4729_v20  ;;  %2958 = vperm.xlu1 %7170, %v2873_v9   ;;  %v2872_v13 = vsel %vm1189_vm13, 1, %v17431_v15  ;;  %v17883_v50 = vld [vmem:[#allocation54_spill] sm:$0xff]  ;;  %v17884_v40 = vld [vmem:[#allocation4_spill] sm:$0xff]  ;;  %v17886_v16 = vrot.slane %v11876_v19, 1  ;;  %v17887_v20 = vrot.slane %v11759_v0, 1 }
 0x298   : > { %17880 = vst [vmem:[#allocation268_spill] sm:$0xff] %v12172_v23  ;;  %v12185_v30 = vsel %vm16905_vm8, %v17883_v50, -1e+30  ;;  %vm17885_vm4 = vcmp.eq.s32.totalorder %v17884_v40, 1  ;;  %2955 = vperm.xlu0 %7169, %v2872_v13   ;;  %v17888_v54 = vrot.slane %v11759_v0, 6  ;;  %v17889_v50 = vrot.slane %v11777_v22, 6 }
 0x299   : > { %v4254_v60 = vsel %vm17885_vm4, %v4247_v11, -1e+30  ;;  %v4374_v9 = vsel %vm1035_vm5, %v17887_v20, %v17886_v16  ;;  %v12205_v13 = vmax.f32 %v4761_v18, %v12040_v3  ;;  %vm17892_vm7 = vcmp.eq.s32.totalorder %v17891_v24, 1  ;;  %v17895_v16 = vld [vmem:[#allocation151_spill] sm:$0xff]  ;;  %v17897_v22 = vld [vmem:[#allocation218_spill] sm:$0xff]  ;;  %v12220_v3 = vpop.permute.xlu1 %3579  ;;  %v17904_v24 = vld [vmem:[#allocation201_spill] sm:$0xff] }
 0x29a   : > { %v4286_v14 = vmax.f32 %v11759_v0, %v4254_v60  ;;  %v4503_v11 = vsel %vm1324_vm10, %v17889_v50, %v17888_v54  ;;  %v4382_v60 = vsel %vm17892_vm7, %v4374_v9, -1e+30  ;;  %vm17894_vm13 = vcmp.eq.s32.totalorder %v17893_v61, 1  ;;  %17898 = vst [vmem:[#allocation218_spill] sm:$0xff] %v12220_v3  ;;  %v12222_v54 = vpop.permute.xlu0 %3358  ;;  %v17901_v50 = vld [vmem:[#allocation137_spill] sm:$0xff] }
 0x29b   : > { %17890 = vst [vmem:[#allocation54_spill] sm:$0xff] %v12205_v13  ;;  %v4510_v40 = vsel %vm17894_vm13, %v4503_v11, -1e+30  ;;  %v16890_v32 = vrot.slane %v11876_v19, 2  ;;  %vm17896_vm4 = vcmp.eq.s32.totalorder %v17895_v16, 1  ;;  %vm16925_vm15 = vcmp.eq.s32.totalorder %v11936_v26, 1 }
 0x29c   : > { %v4414_v51 = vmax.f32 %v4286_v14, %v4382_v60  ;;  %v12215_v20 = vsel %vm17896_vm4, %v12006_v57, -1e+30  ;;  %v1509_v18 = vsub.f32 %v17897_v22, %v11438_v59  ;;  %17899 = vst [vmem:[#allocation271_spill] sm:$0xff] %v12222_v54  ;;  %v17900_v9 = vrot.slane %v11759_v0, 2  ;;  %v17902_v16 = vld [vmem:[#allocation169_spill] sm:$0xff] }
 0x29d   : > { %v3239_v11 = vsel %vm16925_vm15, %v17901_v50, -1e+30  ;;  %v1220_v60 = vsub.f32 %v12103_v17, %v11458_v43  ;;  %vm16917_vm7 = vcmp.eq.s32.totalorder %v11975_v48, 1  ;;  %vm17903_vm13 = vcmp.eq.s32.totalorder %v17902_v16, 1 }
 0x29e   : > { %v4630_v14 = vsel %vm1421_vm14, %v17900_v9, %v16890_v32  ;;  %v4542_v22 = vmax.f32 %v4414_v51, %v4510_v40  ;;  %v17905_v23 = vmax.f32 %v10632_v5, %v17904_v24  ;;  %v1541_v49 = vand.u32 2147483647, %v1509_v18  ;;  %v17906_v32 = vld [vmem:[#allocation132_spill] sm:$0xff]  ;;  %v12250_v51 = vld [vmem:[%s16151_s1 + $0xd8] sm:$0xff]  ;;  %v12266_v16 = vpop.permute.xlu0 %2919 }
 0x29f   : > { %v4638_v61 = vsel %vm17903_vm13, %v4630_v14, -1e+30  ;;  %v1252_v9 = vand.u32 2147483647, %v1220_v60  ;;  %v3240_v12 = vsel %vm16917_vm7, %v17906_v32, -1e+30  ;;  %v1221_v40 = vsub.f32 %v12250_v51, %v11667_v63  ;;  %v12264_v60 = vpop.permute.xlu1 %3140 }
 0x2a0   : > { %v12241_v13 = vmax.f32 %v17905_v23, %v3239_v11  ;;  %vm16924_vm4 = vcmp.eq.s32.totalorder %v11990_v56, 1  ;;  %v12254_v14 = vmax.f32 %v4542_v22, %v4638_v61  ;;  %vm1573_vm13 = vcmp.eq.f32.partialorder %v1541_v49, 2.0  ;;  %v17907_v23 = vld [vmem:[#allocation200_spill] sm:$0xff]  ;;  %17909 = vst [vmem:[#allocation137_spill] sm:$0xff] %v12264_v60  ;;  %17910 = vst [vmem:[#allocation201_spill] sm:$0xff] %v12266_v16  ;;  %v17946_v5 = vld [vmem:[#allocation105_spill] sm:$0xff] }
 0x2a1   : > { %v17908_v24 = vmax.f32 %v17767_v36, %v17907_v23  ;;  %v3685_v11 = vsel %vm16924_vm4, %v17901_v50, -1e+30  ;;  %v3318_v48 = vsel %vm1573_vm13, 1, %v17431_v15  ;;  %vm1284_vm9 = vcmp.eq.f32.partialorder %v1252_v9, 1.0  ;;  %v17914_v56 = vld [vmem:[#allocation120_spill] sm:$0xff] }
 0x2a2   : > { %v17911_v61 = vmax.f32 %v11564_v29, %v11799_v34  ;;  %v1253_v22 = vand.u32 2147483647, %v1221_v40  ;;  %vm17915_vm12 = vcmp.eq.s32.totalorder %v17914_v56, 1  ;;  %v12287_v9 = vsel %vm16905_vm8, %v12254_v14, -1e+30  ;;  %3397 = vperm.xlu1 %7170, %v3318_v48   ;;  %v17917_v34 = vld [vmem:[#allocation233_spill] sm:$0xff] }
 0x2a3   : > { %v12259_v18 = vmax.f32 %v17908_v24, %v3240_v12  ;;  %v17912_v12 = vld [vmem:[#allocation159_spill] sm:$0xff]  ;;  %v4764_v26 = vsel %vm17915_vm12, %v12254_v14, -1e+30  ;;  %17916 = vst [vmem:[#allocation132_spill] sm:$0xff] %v12287_v9  ;;  %vm17918_vm13 = vcmp.eq.s32.totalorder %v17917_v34, 1  ;;  %v1604_v48 = vsub.f32 %v12103_v17, %v11392_v58  ;;  %v17923_v56 = vld [vmem:[#allocation126_spill] sm:$0xff] }
 0x2a4   : > { %v12272_v49 = vmax.f32 %v17911_v61, %v3685_v11  ;;  %vm17913_vm2 = vcmp.eq.s32.totalorder %v17912_v12, 1  ;;  %v12289_v29 = vmax.f32 %v4732_v7, %v4764_v26  ;;  %v12294_v40 = vsel %vm17918_vm13, %v12254_v14, -1e+30  ;;  %v12302_v26 = vpop.permute.xlu1 %3582  ;;  %v12304_v7 = vpop.permute.xlu0 %3361  ;;  %v17924_v9 = vld [vmem:[#allocation115_spill] sm:$0xff]  ;;  %v17925_v61 = vld [vmem:[#allocation125_spill] sm:$0xff] }
 0x2a5   : > { %v12277_v23 = vsel %vm17913_vm2, %v12254_v14, -1e+30  ;;  %17919 = vst [vmem:[#allocation200_spill] sm:$0xff] %v12294_v40  ;;  %v3095_v11 = vsel %vm1284_vm9, 1, %v17431_v15  ;;  %vm1285_vm2 = vcmp.eq.f32.partialorder %v1253_v22, 1.0  ;;  %17920 = vst [vmem:[#allocation272_spill] sm:$0xff] %v12302_v26  ;;  %v1688_v40 = vpack.c.bf16 %v17923_v56, %v17922_v39 }
 0x2a6   : > { %3176 = vperm.xlu0 %7169, %v3095_v11   ;;  %17921 = vst [vmem:[#allocation273_spill] sm:$0xff] %v12304_v7  ;;  %v3096_v34 = vsel %vm1285_vm2, 1, %v17431_v15  ;;  %v1689_v11 = vpack.c.bf16 %v17925_v61, %v17924_v9  ;;  %vm16908_vm9 = vcmp.eq.s32.totalorder %v12030_v4, 1  ;;  %v1636_v12 = vand.u32 2147483647, %v1604_v48  ;;  %v17929_v61 = vld [vmem:[#allocation7_spill] sm:$0xff] }
 0x2a7   : > { %3179 = vperm.xlu1 %7170, %v3096_v34   ;;  %v3686_v58 = vsel %vm16908_vm9, %v17906_v32, -1e+30  ;;  %vm16916_vm12 = vcmp.eq.s32.totalorder %v12047_v47, 1  ;;  %v17926_v22 = vrot.slane %v11876_v19, 7  ;;  %v17927_v24 = vrot.slane %v11759_v0, 7  ;;  %6976 = vmatprep.mubr.msk.bf16.mxu1 %vm17111_vm6, %v1688_v40  ;;  %v17959_v47 = vld [vmem:[#allocation141_spill] sm:$0xff] }
 0x2a8   : > { %v17928_v56 = vmax.f32 %v11860_v27, %v12185_v30  ;;  %v12331_v34 = vsel %vm16916_vm12, %v17673_v28, -1e+30  ;;  %vm17930_vm13 = vcmp.eq.s32.totalorder %v17929_v61, 1  ;;  %v17931_v4 = vrot.slane %v11871_v38, 1  ;;  %6977 = vmatmul.mubr.msk.bf16.gmra.mrb[4].mxu1 %vm17111_vm6, %v1689_v11  ;;  %v17933_v28 = vld [vmem:[#allocation41_spill] sm:$0xff] }
 0x2a9   : > { %v4246_v39 = vsel %vm17122_vm1, %v17927_v24, %v17926_v22  ;;  %v17932_v57 = vrot.slane %v11876_v19, 1  ;;  %vm1668_vm2 = vcmp.eq.f32.partialorder %v1636_v12, 2.0  ;;  %v3495_v27 = vmax.f32 %v12241_v13, %v12331_v34 }
 0x2aa   : > { %v12326_v9 = vmax.f32 %v17928_v56, %v3686_v58  ;;  %v4255_v48 = vsel %vm17930_vm13, %v4246_v39, -1e+30  ;;  %vm17934_vm8 = vcmp.eq.s32.totalorder %v17933_v28, 1  ;;  %v3541_v58 = vsel %vm1668_vm2, 1, %v17431_v15  ;;  %v17940_v39 = vld [vmem:[#allocation90_spill] sm:$0xff] }
 0x2ab   : > { %v4373_v24 = vsel %vm1035_vm5, %v17932_v57, %v17931_v4  ;;  %v4287_v30 = vmax.f32 %v11876_v19, %v4255_v48  ;;  %v12351_v57 = vpop.permute.xlu1 %3143  ;;  %v12353_v4 = vpop.permute.xlu0 %2922  ;;  %3618 = vperm.xlu0 %7169, %v3541_v58   ;;  %v17937_v13 = vrot.slane %v11876_v19, 6  ;;  %v17938_v11 = vrot.slane %v11759_v0, 6  ;;  %v12369_v58 = vld [vmem:[%s16151_s1 + $0xe0] sm:$0xff] }
 0x2ac   : > { %v4383_v40 = vsel %vm17934_vm8, %v4373_v24, -1e+30  ;;  %17935 = vst [vmem:[#allocation117_spill] sm:$0xff] %v12351_v57  ;;  %17936 = vst [vmem:[#allocation126_spill] sm:$0xff] %v12353_v4  ;;  %v16909_v48 = vrot.slane %v11871_v38, 2  ;;  %v17939_v24 = vld [vmem:[#allocation221_spill] sm:$0xff]  ;;  %v17947_v4 = vmax.f32 %v17901_v50, %v17946_v5  ;;  %v1605_v5 = vsub.f32 %v12250_v51, %v11438_v59 }
 0x2ad   : > { %v4415_v12 = vmax.f32 %v4287_v30, %v4383_v40  ;;  %v4502_v34 = vsel %vm1324_vm10, %v17938_v11, %v17937_v13  ;;  %v1510_v22 = vsub.f32 %v17939_v24, %v11458_v43  ;;  %vm17941_vm8 = vcmp.eq.s32.totalorder %v17940_v39, 1  ;;  %v17944_v39 = vld [vmem:[#allocation176_spill] sm:$0xff] }
 0x2ae   : > { %v4511_v56 = vsel %vm17941_vm8, %v4502_v34, -1e+30  ;;  %v1222_v30 = vsub.f32 %v12369_v58, %v12103_v17  ;;  %vm16910_vm13 = vcmp.eq.s32.totalorder %v12086_v21, 1  ;;  %vm16977_vm2 = vcmp.eq.s32.totalorder %v12092_v6, 1  ;;  %v17943_v34 = vld [vmem:[#allocation140_spill] sm:$0xff] }
 0x2af   : > { %v4543_v0 = vmax.f32 %v4415_v12, %v4511_v56  ;;  %v17942_v40 = vrot.slane %v11876_v19, 2  ;;  %v1542_v11 = vand.u32 2147483647, %v1510_v22  ;;  %v3241_v24 = vsel %vm16910_vm13, %v17943_v34, -1e+30 }
 0x2b0   : > { %vm17945_vm8 = vcmp.eq.s32.totalorder %v17944_v39, 1  ;;  %v1254_v61 = vand.u32 2147483647, %v1222_v30  ;;  %v12389_v56 = vmax.f32 %v17947_v4, %v3241_v24  ;;  %v12394_v12 = vsel %vm16977_vm2, %v17767_v36, -1e+30  ;;  %v17948_v4 = vld [vmem:[#allocation136_spill] sm:$0xff]  ;;  %v12407_v39 = vpop.permute.xlu1 %3585 }
 0x2b1   : > { %v4629_v13 = vsel %vm1421_vm14, %v17942_v40, %v16909_v48  ;;  %vm1574_vm9 = vcmp.eq.f32.partialorder %v1542_v11, 2.0  ;;  %v3050_v22 = vmax.f32 %v17906_v32, %v12394_v12  ;;  %v17949_v24 = vld [vmem:[#allocation146_spill] sm:$0xff]  ;;  %17950 = vst [vmem:[#allocation115_spill] sm:$0xff] %v12407_v39  ;;  %v17957_v51 = vmax.f32 %v11897_v45, %v12035_v46 }
 0x2b2   : > { %v4639_v28 = vsel %vm17945_vm8, %v4629_v13, -1e+30  ;;  %v1511_v13 = vsub.f32 %v11379_v52, %v11667_v63  ;;  %v3319_v30 = vsel %vm1574_vm9, 1, %v17431_v15  ;;  %vm1286_vm8 = vcmp.eq.f32.partialorder %v1254_v61, 1.0  ;;  %v17954_v61 = vld [vmem:[#allocation212_spill] sm:$0xff] }
 0x2b3   : > { %v12396_v40 = vmax.f32 %v4543_v0, %v4639_v28  ;;  %v1690_v48 = vpack.c.bf16 %v17949_v24, %v17948_v4  ;;  %v12409_v28 = vpop.permute.xlu0 %3364  ;;  %v17952_v0 = vld [vmem:[#allocation174_spill] sm:$0xff]  ;;  %vm17955_vm9 = vcmp.eq.s32.totalorder %v17954_v61, 1  ;;  %3400 = vperm.xlu1 %7170, %v3319_v30   ;;  %v3097_v24 = vsel %vm1286_vm8, 1, %v17431_v15 }
 0x2b4   : > { %17951 = vst [vmem:[#allocation125_spill] sm:$0xff] %v12409_v28  ;;  %vm17953_vm13 = vcmp.eq.s32.totalorder %v17952_v0, 1  ;;  %v1543_v0 = vand.u32 2147483647, %v1511_v13  ;;  %v1637_v21 = vand.u32 2147483647, %v1605_v5  ;;  %3182 = vperm.xlu0 %7169, %v3097_v24   ;;  %v3746_v52 = vpack.c.bf16 %v12326_v9, %v12272_v49  ;;  %v12474_v24 = vpop.permute.xlu1 %3146 }
 0x2b5   : > { %v12414_v11 = vsel %vm17953_vm13, %v12396_v40, -1e+30  ;;  %v4765_v12 = vsel %vm17955_vm9, %v12396_v40, -1e+30  ;;  %v12424_v59 = vsel %vm16916_vm12, %v12396_v40, -1e+30  ;;  %6980 = vmatprep.mubr.msk.bf16.mxu1 %vm17111_vm6, %v1690_v48 }
 0x2b6   : > { %17956 = vst [vmem:[#allocation221_spill] sm:$0xff] %v12424_v59  ;;  %v12429_v4 = vmax.f32 %v17957_v51, %v4765_v12  ;;  %v17958_v61 = vld [vmem:[#allocation134_spill] sm:$0xff]  ;;  %vm16920_vm13 = vcmp.eq.s32.totalorder %v12125_v2, 1  ;;  %vm16929_vm9 = vcmp.eq.s32.totalorder %v12130_v25, 1  ;;  %vm1575_vm12 = vcmp.eq.f32.partialorder %v1543_v0, 2.0  ;;  %6927 = vmatmul.mubr.msk.bf16.gmra.mrb[36].mxu0 %vm17111_vm6, %v3746_v52  ;;  %17966 = vst [vmem:[#allocation140_spill] sm:$0xff] %v12474_v24 }
 0x2b7   : > { %v1691_v6 = vpack.c.bf16 %v17959_v47, %v17958_v61  ;;  %vm1669_vm7 = vcmp.eq.f32.partialorder %v1637_v21, 2.0  ;;  %v3687_v45 = vsel %vm16920_vm13, %v17943_v34, -1e+30  ;;  %v12445_v46 = vsel %vm16929_vm9, %v10568_v31, -1e+30  ;;  %v17970_v21 = vld [vmem:[#allocation40_spill] sm:$0xff] }
 0x2b8   : > { %v3320_v48 = vsel %vm1575_vm12, 1, %v17431_v15  ;;  %v3542_v13 = vsel %vm1669_vm7, 1, %v17431_v15  ;;  %v12451_v47 = vmax.f32 %v3495_v27, %v3687_v45  ;;  %v17960_v30 = vrot.slane %v11871_v38, 7  ;;  %v12476_v45 = vpop.permute.xlu0 %2925 }
 0x2b9   : > { %6981 = vmatmul.mubr.msk.bf16.gmra.mrb[8].mxu1 %vm17111_vm6, %v1691_v6  ;;  %3403 = vperm.xlu1 %7170, %v3320_v48   ;;  %v17961_v5 = vrot.slane %v11876_v19, 7  ;;  %v17962_v0 = vrot.slane %v12272_v49, 1  ;;  %v17963_v61 = vrot.slane %v11871_v38, 1  ;;  %v17964_v27 = vrot.slane %v11871_v38, 6  ;;  %17967 = vst [vmem:[#allocation105_spill] sm:$0xff] %v12476_v45 }
 0x2ba   : > { %v17965_v52 = vrot.slane %v11876_v19, 6  ;;  %3621 = vperm.xlu0 %7169, %v3542_v13   ;;  %vm17971_vm12 = vcmp.eq.s32.totalorder %v17970_v21, 1  ;;  %v17974_v2 = vrot.slane %v12272_v49, 2  ;;  %v17975_v13 = vrot.slane %v11871_v38, 2 }
 0x2bb   : > { %v4245_v31 = vsel %vm17122_vm1, %v17961_v5, %v17960_v30  ;;  %v4372_v6 = vsel %vm1035_vm5, %v17963_v61, %v17962_v0  ;;  %v17968_v0 = vld [vmem:[#allocation6_spill] sm:$0xff]  ;;  %v17976_v30 = vld [vmem:[#allocation175_spill] sm:$0xff]  ;;  %vm16936_vm4 = vcmp.eq.s32.totalorder %v12220_v3, 1  ;;  %vm16934_vm15 = vcmp.eq.s32.totalorder %v12222_v54, 1 }
 0x2bc   : > { %v4501_v12 = vsel %vm1324_vm10, %v17965_v52, %v17964_v27  ;;  %vm17969_vm7 = vcmp.eq.s32.totalorder %v17968_v0, 1  ;;  %v4384_v27 = vsel %vm17971_vm12, %v4372_v6, -1e+30  ;;  %v17972_v52 = vld [vmem:[#allocation87_spill] sm:$0xff]  ;;  %v4628_v48 = vsel %vm1421_vm14, %v17975_v13, %v17974_v2  ;;  %v7498_v6 = vld [vmem:[%s16151_s1 + $0xb0] sm:$0xff] }
 0x2bd   : > { %v4256_v61 = vsel %vm17969_vm7, %v4245_v31, -1e+30  ;;  %vm17973_vm8 = vcmp.eq.s32.totalorder %v17972_v52, 1  ;;  %vm17977_vm13 = vcmp.eq.s32.totalorder %v17976_v30, 1  ;;  %v1606_v31 = vsub.f32 %v12369_v58, %v11458_v43  ;;  %v17978_v52 = vld [vmem:[#allocation139_spill] sm:$0xff]  ;;  %v7499_v2 = vld [vmem:[%s16151_s1 + $0xf0] sm:$0xff] }
 0x2be   : > { %v4288_v19 = vmax.f32 %v11871_v38, %v4256_v61  ;;  %v4512_v51 = vsel %vm17973_vm8, %v4501_v12, -1e+30  ;;  %v4640_v5 = vsel %vm17977_vm13, %v4628_v48, -1e+30  ;;  %v1512_v61 = vsub.f32 %v7498_v6, %v12103_v17  ;;  %v7500_v0 = vld [vmem:[%s16151_s1 + $0xe8] sm:$0xff] }
 0x2bf   : > { %vm16923_vm7 = vcmp.eq.s32.totalorder %v12176_v1, 1  ;;  %vm16926_vm12 = vcmp.eq.s32.totalorder %v12178_v35, 1  ;;  %v1608_v43 = vsub.f32 %v7499_v2, %v12103_v17  ;;  %v1638_v58 = vand.u32 2147483647, %v1606_v31  ;;  %v12524_v31 = vpop.permute.xlu1 %3588 }
 0x2c0   : > { %v4416_v12 = vmax.f32 %v4288_v19, %v4384_v27  ;;  %v3242_v21 = vsel %vm16923_vm7, %v17978_v52, -1e+30  ;;  %v1544_v48 = vand.u32 2147483647, %v1512_v61  ;;  %v12516_v19 = vsel %vm16926_vm12, %v17901_v50, -1e+30 }
 0x2c1   : > { %v12511_v13 = vmax.f32 %v3050_v22, %v3242_v21  ;;  %v1640_v30 = vand.u32 2147483647, %v1608_v43  ;;  %v1607_v17 = vsub.f32 %v7500_v0, %v11667_v63  ;;  %17979 = vst [vmem:[#allocation136_spill] sm:$0xff] %v12524_v31  ;;  %v12526_v22 = vpop.permute.xlu0 %3367  ;;  %vm1670_vm13 = vcmp.eq.f32.partialorder %v1638_v58, 2.0  ;;  %v17981_v21 = vld [vmem:[#allocation156_spill] sm:$0xff]  ;;  %v17982_v61 = vld [vmem:[#allocation166_spill] sm:$0xff] }
 0x2c2   : > { %v4544_v27 = vmax.f32 %v4416_v12, %v4512_v51  ;;  %17980 = vst [vmem:[#allocation146_spill] sm:$0xff] %v12526_v22  ;;  %vm1576_vm8 = vcmp.eq.f32.partialorder %v1544_v48, 2.0  ;;  %v1692_v2 = vpack.c.bf16 %v17982_v61, %v17981_v21  ;;  %v17983_v51 = vld [vmem:[#allocation153_spill] sm:$0xff]  ;;  %v17984_v12 = vld [vmem:[#allocation163_spill] sm:$0xff]  ;;  %v3543_v43 = vsel %vm1670_vm13, 1, %v17431_v15  ;;  %v17985_v58 = vld [vmem:[#allocation172_spill] sm:$0xff] }
 0x2c3   : > { %v1693_v1 = vpack.c.bf16 %v17984_v12, %v17983_v51  ;;  %v3321_v59 = vsel %vm1576_vm8, 1, %v17431_v15  ;;  %vm1672_vm7 = vcmp.eq.f32.partialorder %v1640_v30, 2.0  ;;  %3624 = vperm.xlu1 %7170, %v3543_v43   ;;  %v1639_v0 = vand.u32 2147483647, %v1607_v17 }
 0x2c4   : > { %v12532_v6 = vmax.f32 %v4544_v27, %v4640_v5  ;;  %3406 = vperm.xlu0 %7169, %v3321_v59   ;;  %v3545_v63 = vsel %vm1672_vm7, 1, %v17431_v15  ;;  %vm17986_vm12 = vcmp.eq.s32.totalorder %v17985_v58, 1  ;;  %v17987_v27 = vld [vmem:[#allocation215_spill] sm:$0xff]  ;;  %6984 = vmatprep.mubr.msk.bf16.mxu1 %vm17111_vm6, %v1692_v2  ;;  %v17989_v17 = vmax.f32 %v12254_v14, %v12215_v20  ;;  %v18010_v58 = vld [vmem:[#allocation149_spill] sm:$0xff] }
 0x2c5   : > { %vm17988_vm13 = vcmp.eq.s32.totalorder %v17987_v27, 1  ;;  %vm1671_vm7 = vcmp.eq.f32.partialorder %v1639_v0, 2.0  ;;  %6985 = vmatmul.mubr.msk.bf16.gmra.mrb[12].mxu1 %vm17111_vm6, %v1693_v1  ;;  %v3688_v61 = vsel %vm16936_vm4, %v17978_v52, -1e+30  ;;  %v3465_v51 = vsel %vm16934_vm15, %v17676_v42, -1e+30 }
 0x2c6   : > { %v12542_v48 = vsel %vm17986_vm12, %v12532_v6, -1e+30  ;;  %v4766_v30 = vsel %vm17988_vm13, %v12532_v6, -1e+30  ;;  %v12552_v59 = vsel %vm16929_vm9, %v12532_v6, -1e+30  ;;  %v17990_v2 = vmax.f32 %v12259_v18, %v12445_v46 }
 0x2c7   : > { %v12558_v21 = vmax.f32 %v17989_v17, %v4766_v30  ;;  %v3544_v12 = vsel %vm1671_vm7, 1, %v17431_v15  ;;  %v3497_v20 = vmax.f32 %v12389_v56, %v3465_v51  ;;  %v17991_v14 = vrot.slane %v12272_v49, 7  ;;  %v12580_v30 = vpop.permute.xlu1 %3149  ;;  %v12582_v17 = vpop.permute.xlu0 %2928  ;;  %3630 = vperm.xlu1 %7170, %v3545_v63   ;;  %v17995_v15 = vld [vmem:[#allocation9_spill] sm:$0xff]  ;;  %v18001_v5 = vld [vmem:[#allocation43_spill] sm:$0xff] }
 0x2c8   : > { %v12571_v43 = vmax.f32 %v17990_v2, %v3688_v61  ;;  %v17992_v1 = vrot.slane %v11871_v38, 7  ;;  %17993 = vst [vmem:[#allocation134_spill] sm:$0xff] %v12580_v30  ;;  %17994 = vst [vmem:[#allocation141_spill] sm:$0xff] %v12582_v17  ;;  %3627 = vperm.xlu0 %7169, %v3544_v12   ;;  %vm17996_vm12 = vcmp.eq.s32.totalorder %v17995_v15, 1  ;;  %v17997_v18 = vrot.slane %v12326_v9, 1 }
 0x2c9   : > { %v17998_v56 = vrot.slane %v12272_v49, 1  ;;  %v17999_v61 = vrot.slane %v12272_v49, 6  ;;  %v18000_v51 = vrot.slane %v11871_v38, 6  ;;  %v16928_v63 = vrot.slane %v12326_v9, 2 }
 0x2ca   : > { %v4244_v0 = vsel %vm17122_vm1, %v17992_v1, %v17991_v14  ;;  %vm18002_vm8 = vcmp.eq.s32.totalorder %v18001_v5, 1  ;;  %v18005_v38 = vrot.slane %v12272_v49, 2  ;;  %v18008_v14 = vld [vmem:[#allocation182_spill] sm:$0xff]  ;;  %v18021_v5 = vld [vmem:[#allocation147_spill] sm:$0xff]  ;;  %vm16951_vm4 = vcmp.eq.s32.totalorder %v12407_v39, 1 }
 0x2cb   : > { %v4257_v42 = vsel %vm17996_vm12, %v4244_v0, -1e+30  ;;  %v4371_v46 = vsel %vm1035_vm5, %v17998_v56, %v17997_v18  ;;  %v4500_v2 = vsel %vm1324_vm10, %v18000_v51, %v17999_v61  ;;  %v18003_v56 = vld [vmem:[#allocation95_spill] sm:$0xff]  ;;  %vm18009_vm12 = vcmp.eq.s32.totalorder %v18008_v14, 1 }
 0x2cc   : > { %v4289_v0 = vmax.f32 %v12272_v49, %v4257_v42  ;;  %v4385_v18 = vsel %vm18002_vm8, %v4371_v46, -1e+30  ;;  %vm18004_vm13 = vcmp.eq.s32.totalorder %v18003_v56, 1  ;;  %v4627_v61 = vsel %vm1421_vm14, %v18005_v38, %v16928_v63  ;;  %v18006_v51 = vld [vmem:[#allocation227_spill] sm:$0xff]  ;;  %v18014_v63 = vld [vmem:[#allocation222_spill] sm:$0xff] }
 0x2cd   : > { %v4513_v25 = vsel %vm18004_vm13, %v4500_v2, -1e+30  ;;  %vm18007_vm7 = vcmp.eq.s32.totalorder %v18006_v51, 1  ;;  %v4641_v42 = vsel %vm18009_vm12, %v4627_v61, -1e+30  ;;  %vm18011_vm8 = vcmp.eq.s32.totalorder %v18010_v58, 1  ;;  %v12639_v61 = vpop.permute.xlu0 %3370 }
 0x2ce   : > { %v4829_v12 = vsel %vm18007_vm7, %v12127_v37, -1e+30  ;;  %v4417_v1 = vmax.f32 %v4289_v0, %v4385_v18  ;;  %v4699_v2 = vsel %vm18011_vm8, %v12127_v37, -1e+30  ;;  %v18012_v56 = vld [vmem:[#allocation223_spill] sm:$0xff]  ;;  %vm18015_vm9 = vcmp.eq.s32.totalorder %v18014_v63, 1 }
 0x2cf   : > { %v4861_v46 = vmax.f32 %v12429_v4, %v4829_v12  ;;  %v4731_v27 = vmax.f32 %v12004_v55, %v4699_v2  ;;  %vm18013_vm13 = vcmp.eq.s32.totalorder %v18012_v56, 1  ;;  %v4828_v51 = vsel %vm18015_vm9, %v12059_v62, -1e+30  ;;  %v12637_v55 = vpop.permute.xlu1 %3591  ;;  %18019 = vst [vmem:[#allocation156_spill] sm:$0xff] %v12639_v61  ;;  %v18020_v2 = vld [vmem:[#allocation250_spill] sm:$0xff]  ;;  %v18061_v62 = vld [vmem:[#allocation11_spill] sm:$0xff] }
 0x2d0   : > { %v4827_v38 = vsel %vm18013_vm13, %v12143_v8, -1e+30  ;;  %vm18016_vm7 = vcmp.eq.s32.totalorder %v11661_v44, 1  ;;  %v4545_v18 = vmax.f32 %v4417_v1, %v4513_v25  ;;  %v4860_v4 = vmax.f32 %v12289_v29, %v4828_v51  ;;  %18018 = vst [vmem:[#allocation139_spill] sm:$0xff] %v12637_v55  ;;  %v18047_v56 = vld [vmem:[#allocation94_spill] sm:$0xff] }
 0x2d1   : > { %v4891_v0 = vsel %vm18016_vm7, %v12396_v40, -1e+30  ;;  %vm18017_vm12 = vcmp.eq.s32.totalorder %v11630_v41, 1  ;;  %vm16932_vm8 = vcmp.eq.s32.totalorder %v12264_v60, 1  ;;  %v4795_v14 = vmax.f32 %v4731_v27, %v18020_v2 }
 0x2d2   : > { %v4892_v12 = vsel %vm18017_vm12, %v12532_v6, -1e+30  ;;  %v3243_v15 = vsel %vm16932_vm8, %v18021_v5, -1e+30  ;;  %vm17002_vm9 = vcmp.eq.s32.totalorder %v12266_v16, 1  ;;  %v3747_v25 = vpack.c.bf16 %v12571_v43, %v12451_v47 }
 0x2d3   : > { %v12648_v29 = vmax.f32 %v4545_v18, %v4641_v42  ;;  %v12650_v1 = vmax.f32 %v4860_v4, %v4892_v12  ;;  %v18023_v51 = vmax.f32 %v17943_v34, %v12516_v19  ;;  %v3020_v27 = vsel %vm17002_vm9, %v17906_v32, -1e+30  ;;  %v18024_v42 = vld [vmem:[#allocation76_spill] sm:$0xff] }
 0x2d4   : > { %v4859_v2 = vmax.f32 %v4795_v14, %v4827_v38  ;;  %v3052_v44 = vmax.f32 %v17978_v52, %v3020_v27  ;;  %6930 = vmatprep.mubr.msk.bf16.mxu0 %vm17111_vm6, %v3747_v25  ;;  %vm16935_vm13 = vcmp.eq.s32.totalorder %v12302_v26, 1  ;;  %vm16953_vm7 = vcmp.eq.s32.totalorder %v12304_v7, 1  ;;  %v18029_v25 = vld [vmem:[#allocation243_spill] sm:$0xff]  ;;  %v18075_v7 = vld [vmem:[#allocation45_spill] sm:$0xff] }
 0x2d5   : > { %18022 = vst [vmem:[#allocation166_spill] sm:$0xff] %v12650_v1  ;;  %v12655_v41 = vmax.f32 %v18023_v51, %v3243_v15  ;;  %vm18025_vm12 = vcmp.eq.s32.totalorder %v18024_v42, 1  ;;  %v18026_v15 = vld [vmem:[#allocation220_spill] sm:$0xff]  ;;  %v12677_v38 = vsel %vm16934_vm15, %v12648_v29, -1e+30  ;;  %v18028_v4 = vmax.f32 %v12396_v40, %v11924_v33 }
 0x2d6   : > { %v12667_v18 = vsel %vm18025_vm12, %v12648_v29, -1e+30  ;;  %vm18027_vm8 = vcmp.eq.s32.totalorder %v18026_v15, 1  ;;  %vm18030_vm12 = vcmp.eq.s32.totalorder %v18029_v25, 1  ;;  %v12687_v27 = vmax.f32 %v4859_v2, %v4891_v0  ;;  %v18033_v15 = vld [vmem:[#allocation60_spill] sm:$0xff]  ;;  %v12705_v2 = vpop.permute.xlu1 %3152 }
 0x2d7   : > { %v4767_v14 = vsel %vm18027_vm8, %v12648_v29, -1e+30  ;;  %v4893_v51 = vsel %vm18030_vm12, %v12648_v29, -1e+30  ;;  %v3689_v19 = vsel %vm16935_vm13, %v18021_v5, -1e+30 }
 0x2d8   : > { %v12682_v12 = vmax.f32 %v18028_v4, %v4767_v14  ;;  %18031 = vst [vmem:[#allocation153_spill] sm:$0xff] %v12687_v27  ;;  %v12692_v42 = vmax.f32 %v4861_v46, %v4893_v51  ;;  %v12694_v54 = vmax.f32 %v3497_v20, %v3689_v19  ;;  %v3466_v33 = vsel %vm16953_vm7, %v18033_v15, -1e+30  ;;  %18036 = vst [vmem:[#allocation250_spill] sm:$0xff] %v12705_v2  ;;  %v12707_v4 = vpop.permute.xlu0 %2931  ;;  %v18038_v19 = vld [vmem:[#allocation8_spill] sm:$0xff] }
 0x2d9   : > { %v18034_v40 = vrot.slane %v12326_v9, 7  ;;  %v18035_v14 = vrot.slane %v12272_v49, 7  ;;  %18037 = vst [vmem:[#allocation147_spill] sm:$0xff] %v12707_v4  ;;  %v4955_v46 = vpack.c.bf16 %v12650_v1, %v12687_v27  ;;  %v3498_v20 = vmax.f32 %v12511_v13, %v3466_v33  ;;  %v18042_v13 = vld [vmem:[#allocation42_spill] sm:$0xff]  ;;  %v18060_v27 = vld [vmem:[#allocation121_spill] sm:$0xff] }
 0x2da   : > { %18032 = vst [vmem:[#allocation163_spill] sm:$0xff] %v12692_v42  ;;  %vm18039_vm8 = vcmp.eq.s32.totalorder %v18038_v19, 1  ;;  %v18040_v15 = vrot.slane %v12451_v47, 1  ;;  %v18041_v25 = vrot.slane %v12326_v9, 1  ;;  %vm18043_vm12 = vcmp.eq.s32.totalorder %v18042_v13, 1  ;;  %v18053_v13 = vld [vmem:[#allocation126_spill] sm:$0xff] }
 0x2db   : > { %v4243_v0 = vsel %vm17122_vm1, %v18035_v14, %v18034_v40  ;;  %6990 = vmatprep.mubr.msk.bf16.mxu1 %vm17111_vm6, %v4955_v46  ;;  %v18045_v19 = vrot.slane %v12272_v49, 6  ;;  %v4862_v40 = vmax.f32 %v12558_v21, %v12162_v53  ;;  %v18049_v14 = vld [vmem:[#allocation240_spill] sm:$0xff]  ;;  %vm16954_vm15 = vcmp.eq.s32.totalorder %v12351_v57, 1  ;;  %v18052_v53 = vld [vmem:[#allocation142_spill] sm:$0xff] }
 0x2dc   : > { %v4258_v51 = vsel %vm18039_vm8, %v4243_v0, -1e+30  ;;  %v4370_v63 = vsel %vm1035_vm5, %v18041_v25, %v18040_v15  ;;  %v18044_v0 = vrot.slane %v12326_v9, 6  ;;  %v4579_v15 = vrot.slane %v12451_v47, 2 }
 0x2dd   : > { %v4290_v58 = vmax.f32 %v12326_v9, %v4258_v51  ;;  %v4386_v33 = vsel %vm18043_vm12, %v4370_v63, -1e+30  ;;  %v12739_v51 = vld [vmem:[%s16155_s5 + $0x3] sm:$0x1]  ;;  %vm18048_vm8 = vcmp.eq.s32.totalorder %v18047_v56, 1  ;;  %vm18050_vm12 = vcmask 1040384  }
 0x2de   : > { %v4499_v25 = vsel %vm1324_vm10, %v18045_v19, %v18044_v0  ;;  %18046 = vst [vmem:[#allocation60_spill] sm:$0xff] %v12739_v51  ;;  %v5022_v49 = vsel %vm18050_vm12, %v18049_v14, 0  ;;  %v18051_v19 = vrot.slane %v12326_v9, 2  ;;  %v3244_v21 = vsel %vm16954_vm15, %v18052_v53, -1e+30 }
 0x2df   : > { %v4418_v46 = vmax.f32 %v4290_v58, %v4386_v33  ;;  %v4514_v63 = vsel %vm18048_vm8, %v4499_v25, -1e+30  ;;  %6989 = vmatpush3.bf16.msra.mxu1 %v5022_v49  ;;  %vm17012_vm13 = vcmp.eq.s32.totalorder %v18053_v13, 1  ;;  %v18054_v33 = vld [vmem:[#allocation181_spill] sm:$0xff]  ;;  %v12757_v25 = vmax.f32 %v3052_v44, %v3244_v21  ;;  %v12764_v49 = vpop.permute.xlu0 %3373 }
 0x2e0   : > { %v4626_v0 = vsel %vm1421_vm14, %v18051_v19, %v4579_v15  ;;  %vm18055_vm8 = vcmp.eq.s32.totalorder %v18054_v33, 1  ;;  %v3021_v56 = vsel %vm17012_vm13, %v17943_v34, -1e+30  ;;  %v12762_v19 = vpop.permute.xlu1 %3594  ;;  %18057 = vst [vmem:[#allocation142_spill] sm:$0xff] %v12764_v49  ;;  %7159 = vmatprep.subr.msk.bf16.mxu1 %vm18050_vm12, %v12739_v51  ;;  %v18058_v44 = vrot.slane %v12451_v47, 7 }
 0x2e1   : > { %v4546_v58 = vmax.f32 %v4418_v46, %v4514_v63  ;;  %v4642_v14 = vsel %vm18055_vm8, %v4626_v0, -1e+30  ;;  %18056 = vst [vmem:[#allocation240_spill] sm:$0xff] %v12762_v19  ;;  %v3053_v1 = vmax.f32 %v18021_v5, %v3021_v56  ;;  %v3690_v46 = vsel %vm16951_vm4, %v18052_v53, -1e+30 }
 0x2e2   : > { %vm16964_vm8 = vcmp.eq.s32.totalorder %v12409_v28, 1  ;;  %v18059_v63 = vrot.slane %v12326_v9, 7  ;;  %v12781_v33 = vmax.f32 %v3498_v20, %v3690_v46  ;;  %vm18062_vm12 = vcmp.eq.s32.totalorder %v18061_v62, 1  ;;  %v18067_v46 = vld [vmem:[#allocation180_spill] sm:$0xff]  ;;  %v18077_v62 = vld [vmem:[#allocation98_spill] sm:$0xff] }
 0x2e3   : > { %v12779_v21 = vmax.f32 %v4546_v58, %v4642_v14  ;;  %v3467_v56 = vsel %vm16964_vm8, %v18060_v27, -1e+30  ;;  %v18063_v39 = vrot.slane %v12571_v43, 1  ;;  %v18064_v57 = vrot.slane %v12451_v47, 1 }
 0x2e4   : > { %v4242_v0 = vsel %vm17122_vm1, %v18059_v63, %v18058_v44  ;;  %v3499_v8 = vmax.f32 %v12655_v41, %v3467_v56  ;;  %v18065_v20 = vrot.slane %v12451_v47, 6  ;;  %v18066_v14 = vrot.slane %v12326_v9, 6  ;;  %v18069_v44 = vld [vmem:[#allocation219_spill] sm:$0xff] }
 0x2e5   : > { %v4259_v37 = vsel %vm18062_vm12, %v4242_v0, -1e+30  ;;  %v4369_v58 = vsel %vm1035_vm5, %v18064_v57, %v18063_v39  ;;  %vm18068_vm12 = vcmp.eq.s32.totalorder %v18067_v46, 1  ;;  %vm18070_vm4 = vcmp.eq.s32.totalorder %v18069_v44, 1  ;;  %v18072_v0 = vld [vmem:[#allocation242_spill] sm:$0xff] }
 0x2e6   : > { %v4291_v51 = vmax.f32 %v12451_v47, %v4259_v37  ;;  %v4498_v27 = vsel %vm1324_vm10, %v18066_v14, %v18065_v20  ;;  %v12805_v41 = vsel %vm18068_vm12, %v12779_v21, -1e+30  ;;  %v4768_v63 = vsel %vm18070_vm4, %v12779_v21, -1e+30 }
 0x2e7   : > { %v12815_v39 = vsel %vm16953_vm7, %v12779_v21, -1e+30  ;;  %v18071_v9 = vmax.f32 %v12532_v6, %v12277_v23  ;;  %vm18073_vm12 = vcmp.eq.s32.totalorder %v18072_v0, 1  ;;  %vm18076_vm4 = vcmp.eq.s32.totalorder %v18075_v7, 1  ;;  %v12834_v6 = vpop.permute.xlu1 %3155 }
 0x2e8   : > { %v4894_v56 = vsel %vm18073_vm12, %v12779_v21, -1e+30  ;;  %v4387_v44 = vsel %vm18076_vm4, %v4369_v58, -1e+30  ;;  %vm18078_vm7 = vcmp.eq.s32.totalorder %v18077_v62, 1  ;;  %18079 = vst [vmem:[#allocation274_spill] sm:$0xff] %v12834_v6 }
 0x2e9   : > { %v12820_v57 = vmax.f32 %v18071_v9, %v4768_v63  ;;  %v12827_v37 = vmax.f32 %v4862_v40, %v4894_v56  ;;  %v4515_v23 = vsel %vm18078_vm7, %v4498_v27, -1e+30  ;;  %v12836_v63 = vpop.permute.xlu0 %2934  ;;  %v4419_v9 = vmax.f32 %v4291_v51, %v4387_v44  ;;  %v18081_v56 = vld [vmem:[#allocation150_spill] sm:$0xff] }
 0x2ea   : > { %18080 = vst [vmem:[#allocation275_spill] sm:$0xff] %v12836_v63  ;;  %v4580_v0 = vrot.slane %v12571_v43, 2  ;;  %vm16955_vm12 = vcmp.eq.s32.totalorder %v12474_v24, 1  ;;  %vm16965_vm15 = vcmp.eq.s32.totalorder %v12476_v45, 1  ;;  %v3748_v51 = vpack.c.bf16 %v12781_v33, %v12694_v54  ;;  %v18082_v62 = vld [vmem:[#allocation26_spill] sm:$0xff] }
 0x2eb   : > { %18074 = vst [vmem:[#allocation121_spill] sm:$0xff] %v12827_v37  ;;  %v4956_v40 = vpack.c.bf16 %v12827_v37, %v12692_v42  ;;  %v3245_v58 = vsel %vm16955_vm12, %v18081_v56, -1e+30  ;;  %v3022_v27 = vsel %vm16965_vm15, %v17978_v52, -1e+30  ;;  %v4547_v44 = vmax.f32 %v4419_v9, %v4515_v23 }
 0x2ec   : > { %v4625_v46 = vsel %vm1421_vm14, %v4579_v15, %v4580_v0  ;;  %v12853_v20 = vmax.f32 %v3053_v1, %v3245_v58  ;;  %v3054_v14 = vmax.f32 %v18052_v53, %v3022_v27  ;;  %vm18083_vm7 = vcmp.eq.s32.totalorder %v18082_v62, 1  ;;  %6931 = vmatmul.mubr.msk.bf16.gmra.mrb[40].mxu0 %vm17111_vm6, %v3748_v51  ;;  %v18086_v58 = vld [vmem:[#allocation10_spill] sm:$0xff] }
 0x2ed   : > { %6991 = vmatmul.mubr.msk.bf16.vlgmr.msra.gmra.mrb[16].mxu1 %vm17111_vm6, %v4956_v40  ;;  %v4643_v7 = vsel %vm18083_vm7, %v4625_v46, -1e+30  ;;  %vm16960_vm4 = vcmp.eq.s32.totalorder %v12524_v31, 1  ;;  %vm16976_vm12 = vcmp.eq.s32.totalorder %v12526_v22, 1  ;;  %v18084_v23 = vrot.slane %v12571_v43, 7  ;;  %v12890_v42 = vpop.permute.xlu0 %3376  ;;  %v18124_v22 = vld [vmem:[#allocation13_spill] sm:$0xff] }
 0x2ee   : > { %v18085_v9 = vrot.slane %v12451_v47, 7  ;;  %v12868_v15 = vmax.f32 %v4547_v44, %v4643_v7  ;;  %v3691_v40 = vsel %vm16960_vm4, %v18081_v56, -1e+30  ;;  %v3468_v46 = vsel %vm16976_vm12, %v17767_v36, -1e+30  ;;  %18091 = vst [vmem:[#allocation276_spill] sm:$0xff] %v12890_v42 }
 0x2ef   : > { %vm18087_vm7 = vcmp.eq.s32.totalorder %v18086_v58, 1  ;;  %v12878_v51 = vmax.f32 %v3499_v8, %v3691_v40  ;;  %v3500_v62 = vmax.f32 %v12757_v25, %v3468_v46  ;;  %v18088_v7 = vrot.slane %v12694_v54, 1  ;;  %v18092_v36 = vld [vmem:[#allocation189_spill] sm:$0xff]  ;;  %v18098_v58 = vld [vmem:[#allocation44_spill] sm:$0xff] }
 0x2f0   : > { %v4241_v1 = vsel %vm17122_vm1, %v18085_v9, %v18084_v23  ;;  %v18089_v44 = vrot.slane %v12571_v43, 1  ;;  %v12888_v9 = vpop.permute.xlu1 %3597  ;;  %v12905_v46 = vsel %vm16964_vm8, %v12868_v15, -1e+30  ;;  %v18100_v31 = vrot.slane %v12571_v43, 6 }
 0x2f1   : > { %v4260_v27 = vsel %vm18087_vm7, %v4241_v1, -1e+30  ;;  %18090 = vst [vmem:[#allocation150_spill] sm:$0xff] %v12888_v9  ;;  %vm18093_vm7 = vcmp.eq.s32.totalorder %v18092_v36, 1  ;;  %v18094_v1 = vld [vmem:[#allocation231_spill] sm:$0xff]  ;;  %18096 = vst [vmem:[#allocation277_spill] sm:$0xff] %v12905_v46 }
 0x2f2   : > { %v4292_v37 = vmax.f32 %v12571_v43, %v4260_v27  ;;  %v4368_v23 = vsel %vm1035_vm5, %v18089_v44, %v18088_v7  ;;  %v12895_v8 = vsel %vm18093_vm7, %v12868_v15, -1e+30  ;;  %vm18095_vm4 = vcmp.eq.s32.totalorder %v18094_v1, 1  ;;  %v18104_v44 = vld [vmem:[#allocation158_spill] sm:$0xff]  ;;  %v18108_v36 = vld [vmem:[#allocation27_spill] sm:$0xff] }
 0x2f3   : > { %v4769_v40 = vsel %vm18095_vm4, %v12868_v15, -1e+30  ;;  %v18097_v27 = vmax.f32 %v12648_v29, %v12414_v11  ;;  %vm18099_vm7 = vcmp.eq.s32.totalorder %v18098_v58, 1  ;;  %v18101_v28 = vrot.slane %v12451_v47, 6 }
 0x2f4   : > { %v4388_v1 = vsel %vm18099_vm7, %v4368_v23, -1e+30  ;;  %v4581_v11 = vrot.slane %v12694_v54, 2  ;;  %vm16972_vm4 = vcmp.eq.s32.totalorder %v12580_v30, 1  ;;  %vm17035_vm7 = vcmp.eq.s32.totalorder %v12582_v17, 1  ;;  %v18110_v30 = vld [vmem:[#allocation258_spill] sm:$0xff] }
 0x2f5   : > { %v12910_v7 = vmax.f32 %v18097_v27, %v4769_v40  ;;  %v4497_v46 = vsel %vm1324_vm10, %v18101_v28, %v18100_v31  ;;  %v4420_v29 = vmax.f32 %v4292_v37, %v4388_v1  ;;  %v18102_v40 = vld [vmem:[#allocation96_spill] sm:$0xff]  ;;  %v3246_v25 = vsel %vm16972_vm4, %v18104_v44, -1e+30  ;;  %v18106_v37 = vld [vmem:[#allocation234_spill] sm:$0xff] }
 0x2f6   : > { %vm18103_vm8 = vcmp.eq.s32.totalorder %v18102_v40, 1  ;;  %v4624_v47 = vsel %vm1421_vm14, %v4580_v0, %v4581_v11  ;;  %v12933_v23 = vmax.f32 %v3054_v14, %v3246_v25  ;;  %v3023_v28 = vsel %vm17035_vm7, %v18021_v5, -1e+30  ;;  %v18105_v31 = vld [vmem:[#allocation256_spill] sm:$0xff]  ;;  %v12946_v0 = vpop.permute.xlu1 %3158  ;;  %v12948_v14 = vpop.permute.xlu0 %2937 }
 0x2f7   : > { %v4516_v27 = vsel %vm18103_vm8, %v4497_v46, -1e+30  ;;  %vm18107_vm15 = vcmp.eq.s32.totalorder %v18106_v37, 1  ;;  %vm18109_vm8 = vcmp.eq.s32.totalorder %v18108_v36, 1  ;;  %v3055_v58 = vmax.f32 %v18081_v56, %v3023_v28  ;;  %18111 = vst [vmem:[#allocation158_spill] sm:$0xff] %v12946_v0  ;;  %18112 = vst [vmem:[#allocation258_spill] sm:$0xff] %v12948_v14 }
 0x2f8   : > { %v4832_v1 = vsel %vm18107_vm15, %v18105_v31, -1e+30  ;;  %v4548_v46 = vmax.f32 %v4420_v29, %v4516_v27  ;;  %v4644_v40 = vsel %vm18109_vm8, %v4624_v47, -1e+30  ;;  %v4863_v24 = vmax.f32 %v12682_v12, %v18110_v30 }
 0x2f9   : > { %v4864_v25 = vmax.f32 %v12820_v57, %v4832_v1  ;;  %v4895_v37 = vsel %vm16986_vm0, %v12868_v15, -1e+30  ;;  %vm17066_vm15 = vcmp.eq.s32.totalorder %v12637_v55, 1  ;;  %vm16992_vm4 = vcmp.eq.s32.totalorder %v12639_v61, 1  ;;  %v18126_v55 = vld [vmem:[#allocation47_spill] sm:$0xff] }
 0x2fa   : > { %v12956_v29 = vmax.f32 %v4548_v46, %v4644_v40  ;;  %v12958_v27 = vmax.f32 %v4863_v24, %v4895_v37  ;;  %v3692_v30 = vsel %vm17066_vm15, %v18104_v44, -1e+30  ;;  %v3469_v12 = vsel %vm16992_vm4, %v17901_v50, -1e+30 }
 0x2fb   : > { %v12966_v57 = vmax.f32 %v3500_v62, %v3692_v30  ;;  %v3501_v47 = vmax.f32 %v12853_v20, %v3469_v12  ;;  %v18115_v28 = vrot.slane %v12694_v54, 7  ;;  %v18116_v1 = vrot.slane %v12571_v43, 7 }
 0x2fc   : > { %18114 = vst [vmem:[#allocation278_spill] sm:$0xff] %v12958_v27  ;;  %v18117_v40 = vrot.slane %v12781_v33, 1  ;;  %v18118_v37 = vrot.slane %v12694_v54, 1  ;;  %v12984_v62 = vsel %vm16977_vm2, %v12956_v29, -1e+30  ;;  %vm18125_vm8 = vcmp.eq.s32.totalorder %v18124_v22, 1 }
 0x2fd   : > { %v4240_v24 = vsel %vm17122_vm1, %v18116_v1, %v18115_v28  ;;  %v4770_v12 = vsel %vm16980_vm11, %v12956_v29, -1e+30  ;;  %v12994_v28 = vsel %vm16976_vm12, %v12956_v29, -1e+30  ;;  %v18121_v1 = vmax.f32 %v12779_v21, %v12542_v48  ;;  %v13013_v21 = vpop.permute.xlu1 %3600 }
 0x2fe   : > { %v4367_v46 = vsel %vm1035_vm5, %v18118_v37, %v18117_v40  ;;  %v4896_v50 = vsel %vm16981_vm3, %v12956_v29, -1e+30  ;;  %v4261_v31 = vsel %vm18125_vm8, %v4240_v24, -1e+30  ;;  %vm18127_vm12 = vcmp.eq.s32.totalorder %v18126_v55, 1  ;;  %18128 = vst [vmem:[#allocation280_spill] sm:$0xff] %v13013_v21 }
 0x2ff   : > { %v12999_v40 = vmax.f32 %v18121_v1, %v4770_v12  ;;  %v13006_v30 = vmax.f32 %v4864_v25, %v4896_v50  ;;  %v4389_v48 = vsel %vm18127_vm12, %v4367_v46, -1e+30  ;;  %v13015_v12 = vpop.permute.xlu0 %3379  ;;  %v4293_v1 = vmax.f32 %v12694_v54, %v4261_v31  ;;  %v18132_v46 = vld [vmem:[#allocation104_spill] sm:$0xff]  ;;  %v18134_v55 = vld [vmem:[#allocation167_spill] sm:$0xff] }
 0x300   : > { %18129 = vst [vmem:[#allocation281_spill] sm:$0xff] %v13015_v12  ;;  %v18130_v20 = vrot.slane %v12694_v54, 6  ;;  %v18131_v26 = vrot.slane %v12571_v43, 6  ;;  %v4582_v50 = vrot.slane %v12781_v33, 2  ;;  %vm16994_vm8 = vcmp.eq.s32.totalorder %v12705_v2, 1  ;;  %v18154_v2 = vld [vmem:[#allocation102_spill] sm:$0xff] }
 0x301   : > { %18123 = vst [vmem:[#allocation279_spill] sm:$0xff] %v13006_v30  ;;  %v4957_v24 = vpack.c.bf16 %v13006_v30, %v12958_v27  ;;  %vm18133_vm12 = vcmp.eq.s32.totalorder %v18132_v46, 1  ;;  %v3247_v31 = vsel %vm16994_vm8, %v18134_v55, -1e+30  ;;  %vm17042_vm2 = vcmp.eq.s32.totalorder %v12707_v4, 1  ;;  %v18135_v46 = vld [vmem:[#allocation190_spill] sm:$0xff] }
 0x302   : > { %v4496_v25 = vsel %vm1324_vm10, %v18131_v26, %v18130_v20  ;;  %v4421_v43 = vmax.f32 %v4293_v1, %v4389_v48  ;;  %v4623_v26 = vsel %vm1421_vm14, %v4581_v11, %v4582_v50  ;;  %v13036_v20 = vmax.f32 %v3055_v58, %v3247_v31  ;;  %v18139_v31 = vld [vmem:[#allocation12_spill] sm:$0xff] }
 0x303   : > { %v4517_v36 = vsel %vm18133_vm12, %v4496_v25, -1e+30  ;;  %v3024_v22 = vsel %vm17042_vm2, %v18052_v53, -1e+30  ;;  %6994 = vmatprep.mubr.msk.bf16.mxu1 %vm17111_vm6, %v4957_v24  ;;  %vm18136_vm12 = vcmp.eq.s32.totalorder %v18135_v46, 1  ;;  %v3749_v30 = vpack.c.bf16 %v12966_v57, %v12878_v51 }
 0x304   : > { %v4645_v25 = vsel %vm18136_vm12, %v4623_v26, -1e+30  ;;  %v3056_v37 = vmax.f32 %v18104_v44, %v3024_v22  ;;  %vm16989_vm11 = vcmp.eq.s32.totalorder %v12762_v19, 1  ;;  %v4549_v48 = vmax.f32 %v4421_v43, %v4517_v36  ;;  %v13072_v19 = vpop.permute.xlu1 %3161 }
 0x305   : > { %v3693_v58 = vsel %vm16989_vm11, %v18134_v55, -1e+30  ;;  %vm17001_vm3 = vcmp.eq.s32.totalorder %v12764_v49, 1  ;;  %v18137_v11 = vrot.slane %v12781_v33, 7  ;;  %v18138_v1 = vrot.slane %v12694_v54, 7  ;;  %6934 = vmatprep.mubr.msk.bf16.mxu0 %vm17111_vm6, %v3749_v30  ;;  %18143 = vst [vmem:[#allocation167_spill] sm:$0xff] %v13072_v19 }
 0x306   : > { %v13059_v22 = vmax.f32 %v3501_v47, %v3693_v58  ;;  %v3470_v36 = vsel %vm17001_vm3, %v17906_v32, -1e+30  ;;  %vm18140_vm12 = vcmp.eq.s32.totalorder %v18139_v31, 1  ;;  %v18141_v26 = vrot.slane %v12878_v51, 1  ;;  %v18145_v58 = vld [vmem:[#allocation46_spill] sm:$0xff]  ;;  %v18156_v31 = vld [vmem:[#allocation251_spill] sm:$0xff] }
 0x307   : > { %v4239_v24 = vsel %vm17122_vm1, %v18138_v1, %v18137_v11  ;;  %v18142_v46 = vrot.slane %v12781_v33, 1  ;;  %v13074_v11 = vpop.permute.xlu0 %2940  ;;  %v13076_v47 = vmax.f32 %v4549_v48, %v4645_v25  ;;  %v3502_v30 = vmax.f32 %v12933_v23, %v3470_v36  ;;  %v18150_v48 = vld [vmem:[#allocation252_spill] sm:$0xff]  ;;  %v18177_v49 = vld [vmem:[#allocation15_spill] sm:$0xff] }
 0x308   : > { %v4262_v43 = vsel %vm18140_vm12, %v4239_v24, -1e+30  ;;  %18144 = vst [vmem:[#allocation282_spill] sm:$0xff] %v13074_v11  ;;  %vm18146_vm0 = vcmp.eq.s32.totalorder %v18145_v58, 1  ;;  %vm18149_vm12 = vcmp.eq.s32.totalorder %v12178_v35, 1  ;;  %vm16993_vm11 = vcmp.eq.s32.totalorder %v12834_v6, 1 }
 0x309   : > { %v4366_v27 = vsel %vm1035_vm5, %v18142_v46, %v18141_v26  ;;  %v4294_v32 = vmax.f32 %v12781_v33, %v4262_v43  ;;  %v18147_v46 = vrot.slane %v12781_v33, 6  ;;  %v18148_v26 = vrot.slane %v12694_v54, 6  ;;  %v18157_v35 = vld [vmem:[#allocation132_spill] sm:$0xff] }
 0x30a   : > { %v4390_v1 = vsel %vm18146_vm0, %v4366_v27, -1e+30  ;;  %v13094_v23 = vsel %vm18149_vm12, %v13076_v47, -1e+30  ;;  %vm18151_vm0 = vcmp.eq.s32.totalorder %v18150_v48, 1  ;;  %v18153_v54 = vmax.f32 %v12868_v15, %v12667_v18  ;;  %v18158_v15 = vld [vmem:[#allocation160_spill] sm:$0xff] }
 0x30b   : > { %v4495_v25 = vsel %vm1324_vm10, %v18148_v26, %v18147_v46  ;;  %v4771_v36 = vsel %vm18151_vm0, %v13076_v47, -1e+30  ;;  %v13104_v43 = vsel %vm16992_vm4, %v13076_v47, -1e+30  ;;  %v4422_v26 = vmax.f32 %v4294_v32, %v4390_v1 }
 0x30c   : > { %18152 = vst [vmem:[#allocation283_spill] sm:$0xff] %v13104_v43  ;;  %v13109_v46 = vmax.f32 %v18153_v54, %v4771_v36  ;;  %vm18155_vm12 = vcmp.eq.s32.totalorder %v18154_v2, 1  ;;  %v4583_v27 = vrot.slane %v12878_v51, 2  ;;  %vm17052_vm0 = vcmp.eq.s32.totalorder %v12836_v63, 1  ;;  %v13130_v36 = vpop.permute.xlu0 %3382  ;;  %v18179_v43 = vld [vmem:[#allocation49_spill] sm:$0xff] }
 0x30d   : > { %v4518_v24 = vsel %vm18155_vm12, %v4495_v25, -1e+30  ;;  %v4865_v61 = vmax.f32 %v12910_v7, %v18156_v31  ;;  %v4866_v48 = vmax.f32 %v12999_v40, %v18157_v35  ;;  %v3248_v32 = vsel %vm16993_vm11, %v18158_v15, -1e+30  ;;  %v13128_v25 = vpop.permute.xlu1 %3603  ;;  %18160 = vst [vmem:[#allocation132_spill] sm:$0xff] %v13130_v36  ;;  %v18161_v7 = vld [vmem:[#allocation188_spill] sm:$0xff] }
 0x30e   : > { %v4550_v58 = vmax.f32 %v4422_v26, %v4518_v24  ;;  %v4622_v18 = vsel %vm1421_vm14, %v4582_v50, %v4583_v27  ;;  %v3025_v1 = vsel %vm17052_vm0, %v18081_v56, -1e+30  ;;  %18159 = vst [vmem:[#allocation251_spill] sm:$0xff] %v13128_v25  ;;  %vm18162_vm12 = vcmp.eq.s32.totalorder %v18161_v7, 1  ;;  %v18163_v50 = vld [vmem:[#allocation255_spill] sm:$0xff]  ;;  %v18170_v7 = vld [vmem:[#allocation254_spill] sm:$0xff] }
 0x30f   : > { %v4646_v31 = vsel %vm18162_vm12, %v4622_v18, -1e+30  ;;  %v13134_v35 = vmax.f32 %v3056_v37, %v3248_v32  ;;  %v3057_v40 = vmax.f32 %v18134_v55, %v3025_v1  ;;  %vm18164_vm4 = vcmp.eq.s32.totalorder %v18163_v50, 1 }
 0x310   : > { %v4897_v24 = vsel %vm18164_vm4, %v13076_v47, -1e+30  ;;  %v13140_v54 = vmax.f32 %v4550_v58, %v4646_v31  ;;  %vm17006_vm11 = vcmp.eq.s32.totalorder %v12888_v9, 1  ;;  %vm17009_vm8 = vcmp.eq.s32.totalorder %v12890_v42, 1 }
 0x311   : > { %v13142_v26 = vmax.f32 %v4865_v61, %v4897_v24  ;;  %v3694_v18 = vsel %vm17006_vm11, %v18158_v15, -1e+30  ;;  %v3471_v37 = vsel %vm17009_vm8, %v17943_v34, -1e+30  ;;  %v18166_v32 = vrot.slane %v12878_v51, 7  ;;  %v18185_v34 = vld [vmem:[#allocation110_spill] sm:$0xff] }
 0x312   : > { %v18167_v1 = vrot.slane %v12781_v33, 7  ;;  %v18168_v58 = vrot.slane %v12966_v57, 1  ;;  %v18169_v31 = vrot.slane %v12878_v51, 1  ;;  %v13167_v50 = vsel %vm17002_vm9, %v13140_v54, -1e+30 }
 0x313   : > { %18165 = vst [vmem:[#allocation160_spill] sm:$0xff] %v13142_v26  ;;  %vm18171_vm4 = vcmp.eq.s32.totalorder %v18170_v7, 1  ;;  %v13188_v9 = vmax.f32 %v3502_v30, %v3694_v18  ;;  %v3503_v6 = vmax.f32 %v13036_v20, %v3471_v37  ;;  %v18183_v18 = vrot.slane %v12878_v51, 6 }
 0x314   : > { %v4238_v61 = vsel %vm17122_vm1, %v18167_v1, %v18166_v32  ;;  %v4365_v24 = vsel %vm1035_vm5, %v18169_v31, %v18168_v58  ;;  %v4772_v2 = vsel %vm18171_vm4, %v13140_v54, -1e+30  ;;  %v13177_v32 = vsel %vm17001_vm3, %v13140_v54, -1e+30  ;;  %v18174_v31 = vld [vmem:[#allocation257_spill] sm:$0xff] }
 0x315   : > { %18172 = vst [vmem:[#allocation284_spill] sm:$0xff] %v13177_v32  ;;  %v18173_v1 = vmax.f32 %v12956_v29, %v12805_v41  ;;  %vm18175_vm12 = vcmp.eq.s32.totalorder %v18174_v31, 1  ;;  %vm18178_vm4 = vcmp.eq.s32.totalorder %v18177_v49, 1  ;;  %vm18180_vm3 = vcmp.eq.s32.totalorder %v18179_v43, 1  ;;  %v13199_v29 = vpop.permute.xlu0 %2943 }
 0x316   : > { %v4898_v16 = vsel %vm18175_vm12, %v13140_v54, -1e+30  ;;  %v4263_v32 = vsel %vm18178_vm4, %v4238_v61, -1e+30  ;;  %v4391_v41 = vsel %vm18180_vm3, %v4365_v24, -1e+30 }
 0x317   : > { %v13182_v58 = vmax.f32 %v18173_v1, %v4772_v2  ;;  %v13190_v7 = vmax.f32 %v4866_v48, %v4898_v16  ;;  %v13197_v2 = vpop.permute.xlu1 %3164  ;;  %18182 = vst [vmem:[#allocation287_spill] sm:$0xff] %v13199_v29  ;;  %v4295_v16 = vmax.f32 %v12878_v51, %v4263_v32  ;;  %v18184_v37 = vrot.slane %v12781_v33, 6  ;;  %v18187_v48 = vld [vmem:[#allocation164_spill] sm:$0xff] }
 0x318   : > { %18181 = vst [vmem:[#allocation286_spill] sm:$0xff] %v13197_v2  ;;  %v4584_v24 = vrot.slane %v12966_v57, 2  ;;  %vm18186_vm3 = vcmp.eq.s32.totalorder %v18185_v34, 1  ;;  %vm17003_vm12 = vcmp.eq.s32.totalorder %v12946_v0, 1  ;;  %vm17065_vm4 = vcmp.eq.s32.totalorder %v12948_v14, 1 }
 0x319   : > { %18176 = vst [vmem:[#allocation285_spill] sm:$0xff] %v13190_v7  ;;  %v4958_v20 = vpack.c.bf16 %v13190_v7, %v13142_v26  ;;  %v4494_v61 = vsel %vm1324_vm10, %v18184_v37, %v18183_v18  ;;  %v4423_v1 = vmax.f32 %v4295_v16, %v4391_v41  ;;  %v3249_v33 = vsel %vm17003_vm12, %v18187_v48, -1e+30  ;;  %v18188_v37 = vld [vmem:[#allocation193_spill] sm:$0xff]  ;;  %v18198_v7 = vld [vmem:[#allocation48_spill] sm:$0xff] }
 0x31a   : > { %v4519_v30 = vsel %vm18186_vm3, %v4494_v61, -1e+30  ;;  %v4621_v32 = vsel %vm1421_vm14, %v4583_v27, %v4584_v24  ;;  %v3026_v41 = vsel %vm17065_vm4, %v18104_v44, -1e+30  ;;  %v3750_v16 = vpack.c.bf16 %v13188_v9, %v13059_v22 }
 0x31b   : > { %6995 = vmatmul.mubr.msk.bf16.gmra.mrb[20].mxu1 %vm17111_vm6, %v4958_v20  ;;  %v4551_v18 = vmax.f32 %v4423_v1, %v4519_v30  ;;  %vm18189_vm3 = vcmp.eq.s32.totalorder %v18188_v37, 1  ;;  %v13232_v34 = vmax.f32 %v3057_v40, %v3249_v33  ;;  %v3058_v20 = vmax.f32 %v18158_v15, %v3026_v41  ;;  %v13250_v33 = vpop.permute.xlu1 %3606  ;;  %v13252_v41 = vpop.permute.xlu0 %3385 }
 0x31c   : > { %v4647_v61 = vsel %vm18189_vm3, %v4621_v32, -1e+30  ;;  %6935 = vmatmul.mubr.msk.bf16.gmra.mrb[44].mxu0 %vm17111_vm6, %v3750_v16  ;;  %vm17013_vm9 = vcmp.eq.s32.totalorder %v13013_v21, 1  ;;  %vm17021_vm12 = vcmp.eq.s32.totalorder %v13015_v12, 1  ;;  %v18190_v27 = vrot.slane %v12966_v57, 7  ;;  %18194 = vst [vmem:[#allocation164_spill] sm:$0xff] %v13250_v33 }
 0x31d   : > { %v18191_v43 = vrot.slane %v12878_v51, 7  ;;  %v18192_v30 = vrot.slane %v13059_v22, 1  ;;  %v18193_v40 = vrot.slane %v12966_v57, 1  ;;  %18195 = vst [vmem:[#allocation288_spill] sm:$0xff] %v13252_v41  ;;  %v13254_v16 = vmax.f32 %v4551_v18, %v4647_v61 }
 0x31e   : > { %v3695_v37 = vsel %vm17013_vm9, %v18187_v48, -1e+30  ;;  %vm18199_vm11 = vcmp.eq.s32.totalorder %v18198_v7, 1  ;;  %v18204_v13 = vrot.slane %v12966_v57, 6  ;;  %v4585_v7 = vrot.slane %v13059_v22, 2 }
 0x31f   : > { %v4237_v1 = vsel %vm17122_vm1, %v18191_v43, %v18190_v27  ;;  %v4364_v32 = vsel %vm1035_vm5, %v18193_v40, %v18192_v30  ;;  %v3472_v43 = vsel %vm17021_vm12, %v17978_v52, -1e+30  ;;  %v18196_v27 = vld [vmem:[#allocation14_spill] sm:$0xff]  ;;  %v13264_v31 = vmax.f32 %v3503_v6, %v3695_v37 }
 0x320   : > { %vm18197_vm3 = vcmp.eq.s32.totalorder %v18196_v27, 1  ;;  %v3504_v30 = vmax.f32 %v13134_v35, %v3472_v43  ;;  %v4392_v18 = vsel %vm18199_vm11, %v4364_v32, -1e+30  ;;  %v13273_v61 = vsel %vm17012_vm13, %v13254_v16, -1e+30  ;;  %v18200_v27 = vld [vmem:[#allocation263_spill] sm:$0xff]  ;;  %v13311_v43 = vpop.permute.xlu0 %2946 }
 0x321   : > { %v4264_v49 = vsel %vm18197_vm3, %v4237_v1, -1e+30  ;;  %vm18201_vm3 = vcmp.eq.s32.totalorder %v18200_v27, 1  ;;  %v13283_v35 = vsel %vm17009_vm8, %v13254_v16, -1e+30  ;;  %v18205_v27 = vrot.slane %v12878_v51, 6  ;;  %v13309_v51 = vpop.permute.xlu1 %3167 }
 0x322   : > { %v4296_v40 = vmax.f32 %v12966_v57, %v4264_v49  ;;  %v4773_v6 = vsel %vm18201_vm3, %v13254_v16, -1e+30  ;;  %18202 = vst [vmem:[#allocation289_spill] sm:$0xff] %v13283_v35  ;;  %v18203_v49 = vmax.f32 %v13076_v47, %v12895_v8  ;;  %vm17014_vm11 = vcmp.eq.s32.totalorder %v13072_v19, 1  ;;  %v18206_v8 = vld [vmem:[#allocation107_spill] sm:$0xff]  ;;  %v18212_v32 = vld [vmem:[#allocation192_spill] sm:$0xff] }
 0x323   : > { %v4493_v42 = vsel %vm1324_vm10, %v18205_v27, %v18204_v13  ;;  %vm18207_vm3 = vcmp.eq.s32.totalorder %v18206_v8, 1  ;;  %vm17087_vm8 = vcmp.eq.s32.totalorder %v13074_v11, 1  ;;  %v4620_v27 = vsel %vm1421_vm14, %v4584_v24, %v4585_v7  ;;  %v18517_v35 = vld [vmem:[#allocation266_spill] sm:$0xff] }
 0x324   : > { %v13288_v37 = vmax.f32 %v18203_v49, %v4773_v6  ;;  %v4424_v52 = vmax.f32 %v4296_v40, %v4392_v18  ;;  %v4520_v47 = vsel %vm18207_vm3, %v4493_v42, -1e+30  ;;  %v18208_v6 = vld [vmem:[#allocation191_spill] sm:$0xff]  ;;  %v18209_v40 = vld [vmem:[#allocation221_spill] sm:$0xff]  ;;  %v3027_v42 = vsel %vm17087_vm8, %v18134_v55, -1e+30 }
 0x325   : > { %v3250_v49 = vsel %vm17014_vm11, %v18208_v6, -1e+30  ;;  %v4867_v18 = vmax.f32 %v13109_v46, %v18209_v40  ;;  %18210 = vst [vmem:[#allocation191_spill] sm:$0xff] %v13309_v51  ;;  %18211 = vst [vmem:[#allocation221_spill] sm:$0xff] %v13311_v43  ;;  %vm18213_vm3 = vcmp.eq.s32.totalorder %v18212_v32, 1  ;;  %v3059_v26 = vmax.f32 %v18187_v48, %v3027_v42  ;;  %v18214_v40 = vld [vmem:[#allocation109_spill] sm:$0xff]  ;;  %v13380_v32 = vpop.permute.xlu0 %3388 }
 0x326   : > { %v4552_v13 = vmax.f32 %v4424_v52, %v4520_v47  ;;  %v13315_v1 = vmax.f32 %v3058_v20, %v3250_v49  ;;  %v4648_v8 = vsel %vm18213_vm3, %v4620_v27, -1e+30  ;;  %v4868_v46 = vmax.f32 %v13182_v58, %v12552_v59  ;;  %18228 = vst [vmem:[#allocation293_spill] sm:$0xff] %v13380_v32 }
 0x327   : > { %vm18215_vm13 = vcmp.eq.s32.totalorder %v18214_v40, 1  ;;  %vm17022_vm9 = vcmp.eq.s32.totalorder %v13128_v25, 1  ;;  %vm17033_vm11 = vcmp.eq.s32.totalorder %v13130_v36, 1  ;;  %v18217_v58 = vrot.slane %v13059_v22, 7  ;;  %v18230_v25 = vld [vmem:[#allocation17_spill] sm:$0xff] }
 0x328   : > { %v4899_v52 = vsel %vm18215_vm13, %v13254_v16, -1e+30  ;;  %v13328_v47 = vmax.f32 %v4552_v13, %v4648_v8  ;;  %v3696_v20 = vsel %vm17022_vm9, %v18208_v6, -1e+30  ;;  %v3473_v59 = vsel %vm17033_vm11, %v18021_v5, -1e+30 }
 0x329   : > { %v13330_v24 = vmax.f32 %v4867_v18, %v4899_v52  ;;  %v18218_v49 = vrot.slane %v12966_v57, 7  ;;  %v18219_v18 = vrot.slane %v13188_v9, 1  ;;  %v18220_v13 = vrot.slane %v13059_v22, 1  ;;  %v18222_v52 = vld [vmem:[#allocation269_spill] sm:$0xff] }
 0x32a   : > { %vm18221_vm13 = vcmp.eq.s32.totalorder %v12476_v45, 1  ;;  %vm18223_vm3 = vcmp.eq.s32.totalorder %v18222_v52, 1  ;;  %v13375_v45 = vmax.f32 %v3504_v30, %v3696_v20  ;;  %v3505_v5 = vmax.f32 %v13232_v34, %v3473_v59  ;;  %v13378_v52 = vpop.permute.xlu1 %3609  ;;  %v18239_v34 = vld [vmem:[#allocation199_spill] sm:$0xff] }
 0x32b   : > { %18216 = vst [vmem:[#allocation290_spill] sm:$0xff] %v13330_v24  ;;  %v4236_v8 = vsel %vm17122_vm1, %v18218_v49, %v18217_v58  ;;  %v4363_v27 = vsel %vm1035_vm5, %v18220_v13, %v18219_v18  ;;  %v13355_v42 = vsel %vm18221_vm13, %v13328_v47, -1e+30  ;;  %v4774_v40 = vsel %vm18223_vm3, %v13328_v47, -1e+30  ;;  %18227 = vst [vmem:[#allocation292_spill] sm:$0xff] %v13378_v52 }
 0x32c   : > { %v13365_v58 = vsel %vm17021_vm12, %v13328_v47, -1e+30  ;;  %v18225_v49 = vmax.f32 %v13140_v54, %v12984_v62  ;;  %vm18226_vm13 = vcmp.eq.s32.totalorder %v12220_v3, 1  ;;  %vm18231_vm3 = vcmp.eq.s32.totalorder %v18230_v25, 1  ;;  %v18232_v62 = vld [vmem:[#allocation53_spill] sm:$0xff] }
 0x32d   : > { %18224 = vst [vmem:[#allocation291_spill] sm:$0xff] %v13365_v58  ;;  %v4900_v13 = vsel %vm18226_vm13, %v13328_v47, -1e+30  ;;  %v4265_v21 = vsel %vm18231_vm3, %v4236_v8, -1e+30  ;;  %vm18233_vm12 = vcmp.eq.s32.totalorder %v18232_v62, 1 }
 0x32e   : > { %v13370_v18 = vmax.f32 %v18225_v49, %v4774_v40  ;;  %v13382_v12 = vmax.f32 %v4868_v46, %v4900_v13  ;;  %v4393_v54 = vsel %vm18233_vm12, %v4363_v27, -1e+30  ;;  %v18234_v40 = vrot.slane %v13059_v22, 6  ;;  %v18236_v13 = vld [vmem:[#allocation113_spill] sm:$0xff] }
 0x32f   : > { %v18235_v49 = vrot.slane %v12966_v57, 6  ;;  %v4297_v59 = vmax.f32 %v13059_v22, %v4265_v21  ;;  %vm18237_vm12 = vcmp.eq.s32.totalorder %v18236_v13, 1  ;;  %v4586_v62 = vrot.slane %v13188_v9, 2  ;;  %v18326_v58 = vld [vmem:[#allocation21_spill] sm:$0xff] }
 0x330   : > { %18229 = vst [vmem:[#allocation294_spill] sm:$0xff] %v13382_v12  ;;  %v4959_v8 = vpack.c.bf16 %v13382_v12, %v13330_v24  ;;  %vm17023_vm13 = vcmp.eq.s32.totalorder %v13197_v2, 1  ;;  %vm17038_vm3 = vcmp.eq.s32.totalorder %v13199_v29, 1  ;;  %v3751_v21 = vpack.c.bf16 %v13375_v45, %v13264_v31  ;;  %v18249_v12 = vld [vmem:[#allocation51_spill] sm:$0xff] }
 0x331   : > { %v4492_v30 = vsel %vm1324_vm10, %v18235_v49, %v18234_v40  ;;  %v4425_v57 = vmax.f32 %v4297_v59, %v4393_v54  ;;  %v18238_v40 = vld [vmem:[#allocation171_spill] sm:$0xff]  ;;  %v4619_v46 = vsel %vm1421_vm14, %v4585_v7, %v4586_v62  ;;  %v3028_v54 = vsel %vm17038_vm3, %v18158_v15, -1e+30 }
 0x332   : > { %v4521_v27 = vsel %vm18237_vm12, %v4492_v30, -1e+30  ;;  %v3251_v49 = vsel %vm17023_vm13, %v18238_v40, -1e+30  ;;  %6998 = vmatprep.mubr.msk.bf16.mxu1 %vm17111_vm6, %v4959_v8  ;;  %vm17027_vm12 = vcmp.eq.s32.totalorder %v13250_v33, 1  ;;  %vm18240_vm9 = vcmp.eq.s32.totalorder %v18239_v34, 1  ;;  %6938 = vmatprep.mubr.msk.bf16.mxu0 %vm17111_vm6, %v3751_v21  ;;  %v13428_v8 = vpop.permute.xlu0 %2949 }
 0x333   : > { %v13413_v30 = vmax.f32 %v3059_v26, %v3251_v49  ;;  %v4553_v59 = vmax.f32 %v4425_v57, %v4521_v27  ;;  %v4649_v20 = vsel %vm18240_vm9, %v4619_v46, -1e+30  ;;  %v3060_v13 = vmax.f32 %v18208_v6, %v3028_v54  ;;  %v13426_v26 = vpop.permute.xlu1 %3170  ;;  %18242 = vst [vmem:[#allocation295_spill] sm:$0xff] %v13428_v8 }
 0x334   : > { %v3697_v7 = vsel %vm17027_vm12, %v18238_v40, -1e+30  ;;  %18241 = vst [vmem:[#allocation171_spill] sm:$0xff] %v13426_v26  ;;  %vm17041_vm13 = vcmp.eq.s32.totalorder %v13252_v41, 1  ;;  %v18243_v27 = vrot.slane %v13188_v9, 7  ;;  %v18244_v46 = vrot.slane %v13059_v22, 7 }
 0x335   : > { %v13430_v49 = vmax.f32 %v3505_v5, %v3697_v7  ;;  %v18245_v21 = vrot.slane %v13264_v31, 1  ;;  %v18246_v54 = vrot.slane %v13188_v9, 1  ;;  %v13445_v25 = vmax.f32 %v4553_v59, %v4649_v20  ;;  %v18247_v7 = vld [vmem:[#allocation16_spill] sm:$0xff] }
 0x336   : > { %v4235_v57 = vsel %vm17122_vm1, %v18244_v46, %v18243_v27  ;;  %v3474_v5 = vsel %vm17041_vm13, %v18052_v53, -1e+30  ;;  %vm18248_vm9 = vcmp.eq.s32.totalorder %v18247_v7, 1  ;;  %vm18250_vm12 = vcmp.eq.s32.totalorder %v18249_v12, 1  ;;  %v18256_v46 = vld [vmem:[#allocation111_spill] sm:$0xff]  ;;  %v18282_v41 = vld [vmem:[#allocation56_spill] sm:$0xff] }
 0x337   : > { %v4362_v34 = vsel %vm1035_vm5, %v18246_v54, %v18245_v21  ;;  %v4266_v3 = vsel %vm18248_vm9, %v4235_v57, -1e+30  ;;  %v3506_v21 = vmax.f32 %v13315_v1, %v3474_v5  ;;  %v13461_v20 = vsel %vm17035_vm7, %v13445_v25, -1e+30  ;;  %v18284_v7 = vld [vmem:[#allocation119_spill] sm:$0xff] }
 0x338   : > { %v4394_v24 = vsel %vm18250_vm12, %v4362_v34, -1e+30  ;;  %vm18251_vm9 = vcmp.eq.s32.totalorder %v12264_v60, 1  ;;  %v13471_v59 = vsel %vm17033_vm11, %v13445_v25, -1e+30  ;;  %v18253_v1 = vmax.f32 %v13254_v16, %v13094_v23  ;;  %v13494_v16 = vpop.permute.xlu0 %3391 }
 0x339   : > { %v4775_v34 = vsel %vm18251_vm9, %v13445_v25, -1e+30  ;;  %18252 = vst [vmem:[#allocation296_spill] sm:$0xff] %v13471_v59  ;;  %v4298_v54 = vmax.f32 %v13188_v9, %v4266_v3  ;;  %v18254_v5 = vrot.slane %v13188_v9, 6  ;;  %v18255_v33 = vrot.slane %v13059_v22, 6  ;;  %v13492_v3 = vpop.permute.xlu1 %3612  ;;  %18259 = vst [vmem:[#allocation298_spill] sm:$0xff] %v13494_v16 }
 0x33a   : > { %v13476_v57 = vmax.f32 %v18253_v1, %v4775_v34  ;;  %v4587_v53 = vrot.slane %v13264_v31, 2  ;;  %vm18257_vm12 = vcmp.eq.s32.totalorder %v18256_v46, 1  ;;  %vm17037_vm9 = vcmp.eq.s32.totalorder %v13309_v51, 1  ;;  %18258 = vst [vmem:[#allocation297_spill] sm:$0xff] %v13492_v3  ;;  %v18260_v34 = vld [vmem:[#allocation165_spill] sm:$0xff] }
 0x33b   : > { %v4491_v27 = vsel %vm1324_vm10, %v18255_v33, %v18254_v5  ;;  %vm17101_vm11 = vcmp.eq.s32.totalorder %v13311_v43, 1  ;;  %v4869_v23 = vmax.f32 %v13288_v37, %v12677_v38  ;;  %v4426_v22 = vmax.f32 %v4298_v54, %v4394_v24  ;;  %v18261_v5 = vld [vmem:[#allocation198_spill] sm:$0xff] }
 0x33c   : > { %v4522_v36 = vsel %vm18257_vm12, %v4491_v27, -1e+30  ;;  %v4618_v33 = vsel %vm1421_vm14, %v4586_v62, %v4587_v53  ;;  %v3252_v1 = vsel %vm17037_vm9, %v18260_v34, -1e+30  ;;  %v3029_v27 = vsel %vm17101_vm11, %v18187_v48, -1e+30 }
 0x33d   : > { %vm18262_vm12 = vcmp.eq.s32.totalorder %v18261_v5, 1  ;;  %v13506_v38 = vmax.f32 %v3060_v13, %v3252_v1  ;;  %v3061_v37 = vmax.f32 %v18238_v40, %v3029_v27  ;;  %v4870_v24 = vmax.f32 %v13370_v18, %v12815_v39  ;;  %v18263_v62 = vld [vmem:[#allocation272_spill] sm:$0xff] }
 0x33e   : > { %v4650_v17 = vsel %vm18262_vm12, %v4618_v33, -1e+30  ;;  %v4554_v54 = vmax.f32 %v4426_v22, %v4522_v36  ;;  %vm18264_vm7 = vcmp.eq.s32.totalorder %v18263_v62, 1  ;;  %vm17043_vm9 = vcmp.eq.s32.totalorder %v13378_v52, 1 }
 0x33f   : > { %v4901_v60 = vsel %vm18264_vm7, %v13445_v25, -1e+30  ;;  %vm17049_vm3 = vcmp.eq.s32.totalorder %v13380_v32, 1  ;;  %v3698_v13 = vsel %vm17043_vm9, %v18260_v34, -1e+30  ;;  %v18266_v39 = vrot.slane %v13264_v31, 7 }
 0x340   : > { %v13516_v46 = vmax.f32 %v4869_v23, %v4901_v60  ;;  %v3475_v33 = vsel %vm17049_vm3, %v18081_v56, -1e+30  ;;  %v18267_v36 = vrot.slane %v13188_v9, 7  ;;  %v13530_v22 = vmax.f32 %v4554_v54, %v4650_v17  ;;  %v18268_v23 = vld [vmem:[#allocation19_spill] sm:$0xff]  ;;  %v13551_v54 = vpop.permute.xlu1 %3173 }
 0x341   : > { %v13532_v1 = vmax.f32 %v3506_v21, %v3698_v13  ;;  %v3507_v60 = vmax.f32 %v13413_v30, %v3475_v33  ;;  %vm18269_vm7 = vcmp.eq.s32.totalorder %v18268_v23, 1  ;;  %v18270_v56 = vrot.slane %v13375_v45, 1  ;;  %18274 = vst [vmem:[#allocation299_spill] sm:$0xff] %v13551_v54  ;;  %v13553_v13 = vpop.permute.xlu0 %2952 }
 0x342   : > { %18265 = vst [vmem:[#allocation165_spill] sm:$0xff] %v13516_v46  ;;  %v4234_v18 = vsel %vm17122_vm1, %v18267_v36, %v18266_v39  ;;  %v18271_v5 = vrot.slane %v13264_v31, 1  ;;  %v18272_v39 = vrot.slane %v13264_v31, 6  ;;  %v18273_v17 = vrot.slane %v13188_v9, 6  ;;  %18275 = vst [vmem:[#allocation300_spill] sm:$0xff] %v13553_v13  ;;  %v18276_v36 = vld [vmem:[#allocation117_spill] sm:$0xff] }
 0x343   : > { %v4267_v27 = vsel %vm18269_vm7, %v4234_v18, -1e+30  ;;  %v13558_v33 = vsel %vm17042_vm2, %v13530_v22, -1e+30  ;;  %vm18277_vm12 = vcmp.eq.s32.totalorder %v18276_v36, 1  ;;  %vm17094_vm2 = vcmp.eq.s32.totalorder %v13428_v8, 1 }
 0x344   : > { %v4299_v62 = vmax.f32 %v13264_v31, %v4267_v27  ;;  %v4361_v12 = vsel %vm1035_vm5, %v18271_v5, %v18270_v56  ;;  %v4490_v21 = vsel %vm1324_vm10, %v18273_v17, %v18272_v39  ;;  %v4776_v9 = vsel %vm18277_vm12, %v13530_v22, -1e+30  ;;  %v18279_v39 = vld [vmem:[#allocation115_spill] sm:$0xff]  ;;  %v13608_v30 = vpop.permute.xlu1 %3615 }
 0x345   : > { %v13568_v18 = vsel %vm17041_vm13, %v13530_v22, -1e+30  ;;  %v18278_v27 = vmax.f32 %v13328_v47, %v13167_v50  ;;  %vm18280_vm7 = vcmp.eq.s32.totalorder %v18279_v39, 1  ;;  %vm18283_vm12 = vcmp.eq.s32.totalorder %v18282_v41, 1 }
 0x346   : > { %v4902_v17 = vsel %vm18280_vm7, %v13530_v22, -1e+30  ;;  %v4395_v23 = vsel %vm18283_vm12, %v4361_v12, -1e+30  ;;  %vm18285_vm13 = vcmp.eq.s32.totalorder %v18284_v7, 1  ;;  %vm17046_vm7 = vcmp.eq.s32.totalorder %v13426_v26, 1 }
 0x347   : > { %v13573_v56 = vmax.f32 %v18278_v27, %v4776_v9  ;;  %v13580_v4 = vmax.f32 %v4870_v24, %v4902_v17  ;;  %v4523_v50 = vsel %vm18285_vm13, %v4490_v21, -1e+30  ;;  %v4427_v47 = vmax.f32 %v4299_v62, %v4395_v23  ;;  %v18287_v17 = vld [vmem:[#allocation204_spill] sm:$0xff]  ;;  %v18289_v12 = vld [vmem:[#allocation173_spill] sm:$0xff] }
 0x348   : > { %v18286_v9 = vrot.slane %v13375_v45, 2  ;;  %vm18288_vm9 = vcmp.eq.s32.totalorder %v18287_v17, 1  ;;  %v3253_v21 = vsel %vm17046_vm7, %v18289_v12, -1e+30  ;;  %v3030_v62 = vsel %vm17094_vm2, %v18208_v6, -1e+30  ;;  %v13610_v17 = vpop.permute.xlu0 %3394 }
 0x349   : > { %18281 = vst [vmem:[#allocation301_spill] sm:$0xff] %v13580_v4  ;;  %v4960_v24 = vpack.c.bf16 %v13580_v4, %v13516_v46  ;;  %v4555_v23 = vmax.f32 %v4427_v47, %v4523_v50  ;;  %v3752_v5 = vpack.c.bf16 %v13532_v1, %v13430_v49  ;;  %18290 = vst [vmem:[#allocation173_spill] sm:$0xff] %v13608_v30  ;;  %vm17053_vm13 = vcmp.eq.s32.totalorder %v13492_v3, 1  ;;  %v18320_v46 = vld [vmem:[#allocation134_spill] sm:$0xff] }
 0x34a   : > { %v4617_v27 = vsel %vm1421_vm14, %v4587_v53, %v18286_v9  ;;  %v13603_v53 = vmax.f32 %v3061_v37, %v3253_v21  ;;  %v3062_v9 = vmax.f32 %v18260_v34, %v3030_v62  ;;  %18291 = vst [vmem:[#allocation302_spill] sm:$0xff] %v13610_v17  ;;  %v18293_v37 = vrot.slane %v13264_v31, 7  ;;  %v18328_v3 = vld [vmem:[#allocation58_spill] sm:$0xff] }
 0x34b   : > { %v4651_v36 = vsel %vm18288_vm9, %v4617_v27, -1e+30  ;;  %6999 = vmatmul.mubr.msk.bf16.gmra.mrb[24].mxu1 %vm17111_vm6, %v4960_v24  ;;  %vm17064_vm9 = vcmp.eq.s32.totalorder %v13494_v16, 1  ;;  %v18292_v27 = vrot.slane %v13375_v45, 7  ;;  %v18294_v47 = vrot.slane %v13430_v49, 1  ;;  %6939 = vmatmul.mubr.msk.bf16.gmra.mrb[48].mxu0 %vm17111_vm6, %v3752_v5 }
 0x34c   : > { %v18295_v21 = vrot.slane %v13375_v45, 1  ;;  %v13627_v7 = vmax.f32 %v4555_v23, %v4651_v36  ;;  %v3699_v24 = vsel %vm17053_vm13, %v18289_v12, -1e+30  ;;  %v3476_v41 = vsel %vm17064_vm9, %v18104_v44, -1e+30  ;;  %v18298_v23 = vld [vmem:[#allocation55_spill] sm:$0xff] }
 0x34d   : > { %v4233_v50 = vsel %vm17122_vm1, %v18293_v37, %v18292_v27  ;;  %v18296_v27 = vld [vmem:[#allocation18_spill] sm:$0xff]  ;;  %v13638_v39 = vmax.f32 %v3507_v60, %v3699_v24  ;;  %v3508_v4 = vmax.f32 %v13506_v38, %v3476_v41  ;;  %vm18299_vm7 = vcmp.eq.s32.totalorder %v18298_v23, 1 }
 0x34e   : > { %v4360_v62 = vsel %vm1035_vm5, %v18295_v21, %v18294_v47  ;;  %vm18297_vm12 = vcmp.eq.s32.totalorder %v18296_v27, 1  ;;  %v13647_v47 = vsel %vm17052_vm0, %v13627_v7, -1e+30  ;;  %v18300_v21 = vld [vmem:[#allocation140_spill] sm:$0xff]  ;;  %v13657_v41 = vsel %vm17049_vm3, %v13627_v7, -1e+30 }
 0x34f   : > { %v4268_v37 = vsel %vm18297_vm12, %v4233_v50, -1e+30  ;;  %v4396_v5 = vsel %vm18299_vm7, %v4360_v62, -1e+30  ;;  %vm18301_vm12 = vcmp.eq.s32.totalorder %v18300_v21, 1  ;;  %v18302_v38 = vmax.f32 %v13445_v25, %v13273_v61  ;;  %v13675_v25 = vpop.permute.xlu1 %2958  ;;  %v13677_v61 = vpop.permute.xlu0 %2955 }
 0x350   : > { %v4300_v36 = vmax.f32 %v13375_v45, %v4268_v37  ;;  %v4777_v60 = vsel %vm18301_vm12, %v13627_v7, -1e+30  ;;  %v18303_v63 = vrot.slane %v13375_v45, 6  ;;  %v18304_v21 = vrot.slane %v13264_v31, 6  ;;  %18305 = vst [vmem:[#allocation303_spill] sm:$0xff] %v13675_v25  ;;  %v18308_v37 = vld [vmem:[#allocation179_spill] sm:$0xff] }
 0x351   : > { %v13662_v50 = vmax.f32 %v18302_v38, %v4777_v60  ;;  %v4589_v23 = vrot.slane %v13430_v49, 2  ;;  %vm17054_vm7 = vcmp.eq.s32.totalorder %v13551_v54, 1  ;;  %v18306_v60 = vld [vmem:[#allocation116_spill] sm:$0xff]  ;;  %vm2999_vm3 = vcmp.eq.s32.totalorder %v13553_v13, 1  ;;  %v18309_v31 = vld [vmem:[#allocation277_spill] sm:$0xff] }
 0x352   : > { %v4428_v44 = vmax.f32 %v4300_v36, %v4396_v5  ;;  %v4489_v32 = vsel %vm1324_vm10, %v18304_v21, %v18303_v63  ;;  %vm18307_vm12 = vcmp.eq.s32.totalorder %v18306_v60, 1  ;;  %v3254_v36 = vsel %vm17054_vm7, %v18308_v37, -1e+30  ;;  %v18311_v60 = vld [vmem:[#allocation202_spill] sm:$0xff] }
 0x353   : > { %v4524_v38 = vsel %vm18307_vm12, %v4489_v32, -1e+30  ;;  %v4871_v63 = vmax.f32 %v13476_v57, %v18309_v31  ;;  %v18310_v21 = vrot.slane %v13375_v45, 2  ;;  %v13691_v24 = vmax.f32 %v3062_v9, %v3254_v36 }
 0x354   : > { %v4556_v5 = vmax.f32 %v4428_v44, %v4524_v38  ;;  %v13696_v32 = vsel %vm2999_vm3, %v18238_v40, -1e+30  ;;  %vm18312_vm12 = vcmp.eq.s32.totalorder %v18311_v60, 1  ;;  %v4872_v57 = vmax.f32 %v13573_v56, %v12994_v28  ;;  %v18313_v44 = vld [vmem:[#allocation136_spill] sm:$0xff] }
 0x355   : > { %v4616_v62 = vsel %vm1421_vm14, %v18310_v21, %v4589_v23  ;;  %vm18314_vm0 = vcmp.eq.s32.totalorder %v18313_v44, 1  ;;  %vm17067_vm13 = vcmp.eq.s32.totalorder %v13608_v30, 1  ;;  %vm17074_vm7 = vcmp.eq.s32.totalorder %v13610_v17, 1  ;;  %v18357_v17 = vld [vmem:[#allocation205_spill] sm:$0xff] }
 0x356   : > { %v4652_v27 = vsel %vm18312_vm12, %v4616_v62, -1e+30  ;;  %v4903_v38 = vsel %vm18314_vm0, %v13627_v7, -1e+30  ;;  %v3700_v62 = vsel %vm17067_vm13, %v18308_v37, -1e+30 }
 0x357   : > { %v13707_v9 = vmax.f32 %v4556_v5, %v4652_v27  ;;  %v13709_v36 = vmax.f32 %v4871_v63, %v4903_v38  ;;  %v13719_v28 = vsel %vm17074_vm7, %v18134_v55, -1e+30  ;;  %v18316_v56 = vrot.slane %v13430_v49, 7  ;;  %v18349_v55 = vld [vmem:[#allocation122_spill] sm:$0xff] }
 0x358   : > { %v18317_v27 = vrot.slane %v13375_v45, 7  ;;  %v18318_v63 = vrot.slane %v13532_v1, 1  ;;  %v18319_v5 = vrot.slane %v13430_v49, 1  ;;  %vm18321_vm0 = vcmp.eq.s32.totalorder %v18320_v46, 1 }
 0x359   : > { %18315 = vst [vmem:[#allocation179_spill] sm:$0xff] %v13709_v36  ;;  %v13736_v38 = vsel %vm17065_vm4, %v13707_v9, -1e+30  ;;  %v4778_v44 = vsel %vm18321_vm0, %v13707_v9, -1e+30  ;;  %v13760_v46 = vmax.f32 %v3508_v4, %v3700_v62  ;;  %v3509_v16 = vmax.f32 %v13603_v53, %v13719_v28  ;;  %v18332_v28 = vld [vmem:[#allocation124_spill] sm:$0xff] }
 0x35a   : > { %v4232_v31 = vsel %vm17122_vm1, %v18317_v27, %v18316_v56  ;;  %v4359_v21 = vsel %vm1035_vm5, %v18319_v5, %v18318_v63  ;;  %v13746_v56 = vsel %vm17064_vm9, %v13707_v9, -1e+30  ;;  %v13748_v27 = vpop.permute.xlu1 %3397  ;;  %v13750_v63 = vpop.permute.xlu0 %3176  ;;  %v18323_v5 = vmax.f32 %v13530_v22, %v13355_v42  ;;  %v18337_v62 = vld [vmem:[#allocation206_spill] sm:$0xff] }
 0x35b   : > { %18322 = vst [vmem:[#allocation277_spill] sm:$0xff] %v13748_v27  ;;  %v4904_v60 = vsel %vm17066_vm15, %v13707_v9, -1e+30  ;;  %vm18327_vm12 = vcmp.eq.s32.totalorder %v18326_v58, 1  ;;  %vm18329_vm0 = vcmp.eq.s32.totalorder %v18328_v3, 1  ;;  %v18330_v42 = vrot.slane %v13430_v49, 6 }
 0x35c   : > { %v13755_v14 = vmax.f32 %v18323_v5, %v4778_v44  ;;  %v13764_v59 = vmax.f32 %v4872_v57, %v4904_v60  ;;  %v4269_v30 = vsel %vm18327_vm12, %v4232_v31, -1e+30  ;;  %v4397_v52 = vsel %vm18329_vm0, %v4359_v21, -1e+30 }
 0x35d   : > { %v18331_v22 = vrot.slane %v13375_v45, 6  ;;  %v4301_v60 = vmax.f32 %v13430_v49, %v4269_v30  ;;  %vm18333_vm12 = vcmp.eq.s32.totalorder %v18332_v28, 1  ;;  %v4590_v21 = vrot.slane %v13532_v1, 2 }
 0x35e   : > { %18325 = vst [vmem:[#allocation304_spill] sm:$0xff] %v13764_v59  ;;  %v4961_v57 = vpack.c.bf16 %v13764_v59, %v13709_v36  ;;  %vm17070_vm0 = vcmp.eq.s32.totalorder %v13675_v25, 1  ;;  %vm17071_vm9 = vcmp.eq.s32.totalorder %v13677_v61, 1  ;;  %v3753_v30 = vpack.c.bf16 %v13760_v46, %v13638_v39  ;;  %v13805_v53 = vpop.permute.xlu0 %3618 }
 0x35f   : > { %v4488_v44 = vsel %vm1324_vm10, %v18331_v22, %v18330_v42  ;;  %v4429_v45 = vmax.f32 %v4301_v60, %v4397_v52  ;;  %v13789_v5 = vsel %vm17070_vm0, %v18289_v12, -1e+30  ;;  %v4615_v42 = vsel %vm1421_vm14, %v4589_v23, %v4590_v21  ;;  %v18334_v22 = vld [vmem:[#allocation185_spill] sm:$0xff]  ;;  %v13803_v60 = vpop.permute.xlu1 %3179  ;;  %18336 = vst [vmem:[#allocation305_spill] sm:$0xff] %v13805_v53 }
 0x360   : > { %v4525_v31 = vsel %vm18333_vm12, %v4488_v44, -1e+30  ;;  %7002 = vmatprep.mubr.msk.bf16.mxu1 %vm17111_vm6, %v4961_v57  ;;  %v3032_v52 = vsel %vm17071_vm9, %v18260_v34, -1e+30  ;;  %vm17079_vm12 = vcmp.eq.s32.totalorder %v13748_v27, 1  ;;  %18335 = vst [vmem:[#allocation185_spill] sm:$0xff] %v13803_v60  ;;  %6942 = vmatprep.mubr.msk.bf16.mxu0 %vm17111_vm6, %v3753_v30 }
 0x361   : > { %v4557_v4 = vmax.f32 %v4429_v45, %v4525_v31  ;;  %vm18338_vm4 = vcmp.eq.s32.totalorder %v18337_v62, 1  ;;  %v3064_v28 = vmax.f32 %v18308_v37, %v3032_v52  ;;  %v13814_v23 = vsel %vm17079_vm12, %v18158_v15, -1e+30  ;;  %v18345_v62 = vld [vmem:[#allocation20_spill] sm:$0xff] }
 0x362   : > { %v4653_v57 = vsel %vm18338_vm4, %v4615_v42, -1e+30  ;;  %v18339_v44 = vrot.slane %v13532_v1, 7  ;;  %v18340_v3 = vrot.slane %v13430_v49, 7  ;;  %v18341_v45 = vrot.slane %v13638_v39, 1 }
 0x363   : > { %v18342_v37 = vrot.slane %v13532_v1, 1  ;;  %v18343_v15 = vrot.slane %v13532_v1, 6  ;;  %v18344_v42 = vrot.slane %v13430_v49, 6  ;;  %v13836_v34 = vmax.f32 %v4557_v4, %v4653_v57  ;;  %v18351_v57 = vld [vmem:[#allocation250_spill] sm:$0xff]  ;;  %v13873_v11 = vpop.permute.xlu1 %3400 }
 0x364   : > { %v4231_v31 = vsel %vm17122_vm1, %v18340_v3, %v18339_v44  ;;  %vm18346_vm4 = vcmp.eq.s32.totalorder %v18345_v62, 1  ;;  %v18347_v3 = vld [vmem:[#allocation57_spill] sm:$0xff]  ;;  %vm18350_vm13 = vcmp.eq.s32.totalorder %v18349_v55, 1  ;;  %vm3223_vm0 = vcmp.eq.s32.totalorder %v13750_v63, 1  ;;  %18355 = vst [vmem:[#allocation307_spill] sm:$0xff] %v13873_v11  ;;  %v18365_v62 = vld [vmem:[#allocation60_spill] sm:$0xff] }
 0x365   : > { %v4358_v30 = vsel %vm1035_vm5, %v18342_v37, %v18341_v45  ;;  %v4487_v52 = vsel %vm1324_vm10, %v18344_v42, %v18343_v15  ;;  %v4270_v58 = vsel %vm18346_vm4, %v4231_v31, -1e+30  ;;  %vm18348_vm15 = vcmp.eq.s32.totalorder %v18347_v3, 1 }
 0x366   : > { %v4398_v44 = vsel %vm18348_vm15, %v4358_v30, -1e+30  ;;  %v4526_v59 = vsel %vm18350_vm13, %v4487_v52, -1e+30  ;;  %v4302_v45 = vmax.f32 %v13532_v1, %v4270_v58  ;;  %v4591_v37 = vrot.slane %v13638_v39, 2 }
 0x367   : > { %vm17089_vm9 = vcmp.eq.s32.totalorder %v13803_v60, 1  ;;  %v13851_v49 = vsel %vm17087_vm8, %v13836_v34, -1e+30  ;;  %vm18352_vm15 = vcmp.eq.s32.totalorder %v18351_v57, 1  ;;  %v13861_v58 = vsel %vm17074_vm7, %v13836_v34, -1e+30  ;;  %v13875_v57 = vpop.permute.xlu0 %3182 }
 0x368   : > { %v4779_v31 = vsel %vm18352_vm15, %v13836_v34, -1e+30  ;;  %v18353_v30 = vmax.f32 %v13627_v7, %v13461_v20  ;;  %v4430_v42 = vmax.f32 %v4302_v45, %v4398_v44  ;;  %v4614_v52 = vsel %vm1421_vm14, %v4590_v21, %v4591_v37  ;;  %18356 = vst [vmem:[#allocation308_spill] sm:$0xff] %v13875_v57  ;;  %v18360_v44 = vld [vmem:[#allocation183_spill] sm:$0xff] }
 0x369   : > { %v3255_v4 = vsel %vm3223_vm0, %v18334_v22, -1e+30  ;;  %vm18358_vm13 = vcmp.eq.s32.totalorder %v18357_v17, 1  ;;  %v18359_v7 = vmax.f32 %v18289_v12, %v13696_v32  ;;  %v3256_v21 = vsel %vm17089_vm9, %v18360_v44, -1e+30  ;;  %v18361_v17 = vld [vmem:[#allocation283_spill] sm:$0xff] }
 0x36a   : > { %v13866_v15 = vmax.f32 %v18353_v30, %v4779_v31  ;;  %v4654_v55 = vsel %vm18358_vm13, %v4614_v52, -1e+30  ;;  %vm17088_vm4 = vcmp.eq.s32.totalorder %v13805_v53, 1  ;;  %v4558_v45 = vmax.f32 %v4430_v42, %v4526_v59  ;;  %v18362_v12 = vld [vmem:[#allocation284_spill] sm:$0xff] }
 0x36b   : > { %v13882_v20 = vmax.f32 %v18359_v7, %v3255_v4  ;;  %v13888_v31 = vmax.f32 %v3064_v28, %v3256_v21  ;;  %v3701_v30 = vsel %vm17088_vm4, %v18334_v22, -1e+30  ;;  %v4873_v52 = vmax.f32 %v13662_v50, %v18361_v17  ;;  %v18363_v4 = vld [vmem:[#allocation240_spill] sm:$0xff]  ;;  %v18379_v21 = vld [vmem:[#allocation23_spill] sm:$0xff] }
 0x36c   : > { %18354 = vst [vmem:[#allocation306_spill] sm:$0xff] %v13866_v15  ;;  %v13895_v3 = vmax.f32 %v3509_v16, %v3701_v30  ;;  %v4874_v32 = vmax.f32 %v13755_v14, %v18362_v12  ;;  %vm18364_vm15 = vcmp.eq.s32.totalorder %v18363_v4, 1  ;;  %vm18366_vm13 = vcmask 1040384  }
 0x36d   : > { %v4905_v7 = vsel %vm18364_vm15, %v13836_v34, -1e+30  ;;  %v6052_v59 = vsel %vm18366_vm13, %v18365_v62, 0  ;;  %v13904_v28 = vmax.f32 %v4558_v45, %v4654_v55  ;;  %vm3447_vm7 = vcmp.eq.s32.totalorder %v13873_v11, 1  ;;  %v18377_v62 = vld [vmem:[#allocation150_spill] sm:$0xff] }
 0x36e   : > { %v13906_v42 = vmax.f32 %v4873_v52, %v4905_v7  ;;  %7023 = vmatpush3.bf16.msra.mxu1 %v6052_v59  ;;  %v18368_v16 = vrot.slane %v13638_v39, 7  ;;  %v18369_v17 = vrot.slane %v13532_v1, 7  ;;  %v3479_v55 = vsel %vm3447_vm7, %v18187_v48, -1e+30  ;;  %v18371_v52 = vld [vmem:[#allocation274_spill] sm:$0xff]  ;;  %v13936_v59 = vpop.permute.xlu1 %3403  ;;  %v13938_v48 = vpop.permute.xlu0 %3621 }
 0x36f   : > { %vm18370_vm15 = vcmp.eq.s32.totalorder %v13199_v29, 1  ;;  %vm18372_vm13 = vcmp.eq.s32.totalorder %v18371_v52, 1  ;;  %v13934_v7 = vsel %vm17079_vm12, %v13904_v28, -1e+30  ;;  %18373 = vst [vmem:[#allocation283_spill] sm:$0xff] %v13936_v59  ;;  %18374 = vst [vmem:[#allocation284_spill] sm:$0xff] %v13938_v48  ;;  %v3511_v50 = vmax.f32 %v13882_v20, %v3479_v55 }
 0x370   : > { %18367 = vst [vmem:[#allocation183_spill] sm:$0xff] %v13906_v42  ;;  %v4230_v14 = vsel %vm17122_vm1, %v18369_v17, %v18368_v16  ;;  %v13924_v45 = vsel %vm18370_vm15, %v13904_v28, -1e+30  ;;  %v4780_v12 = vsel %vm18372_vm13, %v13904_v28, -1e+30  ;;  %v18375_v16 = vmax.f32 %v13707_v9, %v13558_v33  ;;  %v18386_v55 = vld [vmem:[#allocation62_spill] sm:$0xff] }
 0x371   : > { %vm18378_vm15 = vcmp.eq.s32.totalorder %v18377_v62, 1  ;;  %vm18380_vm13 = vcmp.eq.s32.totalorder %v18379_v21, 1  ;;  %v18382_v4 = vrot.slane %v13760_v46, 1  ;;  %v18383_v36 = vrot.slane %v13638_v39, 1  ;;  %v18391_v62 = vld [vmem:[#allocation108_spill] sm:$0xff]  ;;  %v18433_v11 = vld [vmem:[#allocation138_spill] sm:$0xff] }
 0x372   : > { %v13943_v17 = vmax.f32 %v18375_v16, %v4780_v12  ;;  %v4906_v30 = vsel %vm18378_vm15, %v13904_v28, -1e+30  ;;  %v4271_v27 = vsel %vm18380_vm13, %v4230_v14, -1e+30  ;;  %v18384_v9 = vrot.slane %v13638_v39, 6  ;;  %v18388_v14 = vld [vmem:[#allocation130_spill] sm:$0xff] }
 0x373   : > { %v13951_v29 = vmax.f32 %v4874_v32, %v4906_v30  ;;  %v4303_v52 = vmax.f32 %v13638_v39, %v4271_v27  ;;  %v4357_v33 = vsel %vm1035_vm5, %v18383_v36, %v18382_v4  ;;  %v18385_v12 = vrot.slane %v13532_v1, 6  ;;  %v18390_v16 = vld [vmem:[#allocation187_spill] sm:$0xff] }
 0x374   : > { %18376 = vst [vmem:[#allocation60_spill] sm:$0xff] %v13943_v17  ;;  %vm18387_vm15 = vcmp.eq.s32.totalorder %v18386_v55, 1  ;;  %vm18389_vm13 = vcmp.eq.s32.totalorder %v18388_v14, 1  ;;  %v4592_v30 = vrot.slane %v13760_v46, 2  ;;  %vm17085_vm12 = vcmp.eq.s32.totalorder %v13875_v57, 1  ;;  %v14008_v17 = vpop.permute.xlu0 %3406  ;;  %v18406_v14 = vld [vmem:[#allocation61_spill] sm:$0xff] }
 0x375   : > { %18381 = vst [vmem:[#allocation309_spill] sm:$0xff] %v13951_v29  ;;  %v4486_v20 = vsel %vm1324_vm10, %v18385_v12, %v18384_v9  ;;  %v4399_v32 = vsel %vm18387_vm15, %v4357_v33, -1e+30  ;;  %v4962_v36 = vpack.c.bf16 %v13951_v29, %v13906_v42  ;;  %v3257_v1 = vsel %vm17085_vm12, %v18390_v16, -1e+30  ;;  %v18395_v42 = vld [vmem:[#allocation210_spill] sm:$0xff] }
 0x376   : > { %v4527_v27 = vsel %vm18389_vm13, %v4486_v20, -1e+30  ;;  %v4431_v4 = vmax.f32 %v4303_v52, %v4399_v32  ;;  %v13980_v9 = vsel %vm17085_vm12, %v18391_v62, -1e+30  ;;  %v4613_v33 = vsel %vm1421_vm14, %v4591_v37, %v4592_v30  ;;  %18400 = vst [vmem:[#allocation108_spill] sm:$0xff] %v14008_v17 }
 0x377   : > { %v18392_v12 = vmax.f32 %v18334_v22, %v13789_v5  ;;  %vm3448_vm15 = vcmp.eq.s32.totalorder %v13936_v59, 1  ;;  %v18393_v52 = vrot.slane %v13760_v46, 7  ;;  %v18394_v32 = vrot.slane %v13638_v39, 7  ;;  %7003 = vmatmul.mubr.msk.bf16.gmra.mrb[28].mxu1 %vm17111_vm6, %v4962_v36  ;;  %v18397_v22 = vld [vmem:[#allocation22_spill] sm:$0xff] }
 0x378   : > { %v4559_v57 = vmax.f32 %v4431_v4, %v4527_v27  ;;  %vm18396_vm13 = vcmp.eq.s32.totalorder %v18395_v42, 1  ;;  %v14002_v5 = vsel %vm3448_vm15, %v18208_v6, -1e+30  ;;  %vm18398_vm12 = vcmp.eq.s32.totalorder %v18397_v22, 1 }
 0x379   : > { %v13987_v20 = vmax.f32 %v18392_v12, %v3257_v1  ;;  %v4229_v29 = vsel %vm17122_vm1, %v18394_v32, %v18393_v52  ;;  %v4655_v37 = vsel %vm18396_vm13, %v4613_v33, -1e+30  ;;  %v14006_v12 = vpop.permute.xlu1 %3624  ;;  %v18401_v36 = vrot.slane %v13895_v3, 1 }
 0x37a   : > { %v4272_v1 = vsel %vm18398_vm12, %v4229_v29, -1e+30  ;;  %18399 = vst [vmem:[#allocation187_spill] sm:$0xff] %v14006_v12  ;;  %v18402_v4 = vrot.slane %v13760_v46, 1  ;;  %v18403_v33 = vrot.slane %v13760_v46, 6  ;;  %v18404_v29 = vrot.slane %v13638_v39, 6 }
 0x37b   : > { %v4304_v27 = vmax.f32 %v13760_v46, %v4272_v1  ;;  %v14025_v42 = vmax.f32 %v4559_v57, %v4655_v37  ;;  %vm18407_vm12 = vcmp.eq.s32.totalorder %v18406_v14, 1  ;;  %v18408_v1 = vld [vmem:[#allocation129_spill] sm:$0xff]  ;;  %v4593_v22 = vrot.slane %v13895_v3, 2 }
 0x37c   : > { %v4356_v6 = vsel %vm1035_vm5, %v18402_v4, %v18401_v36  ;;  %v4485_v32 = vsel %vm1324_vm10, %v18404_v29, %v18403_v33  ;;  %vm18409_vm13 = vcmp.eq.s32.totalorder %v18408_v1, 1  ;;  %vm17121_vm8 = vcmp.eq.s32.totalorder %v13938_v48, 1  ;;  %v18413_v29 = vld [vmem:[#allocation209_spill] sm:$0xff] }
 0x37d   : > { %18405 = vst [vmem:[#allocation310_spill] sm:$0xff] %v14025_v42  ;;  %v4400_v52 = vsel %vm18407_vm12, %v4356_v6, -1e+30  ;;  %v4528_v55 = vsel %vm18409_vm13, %v4485_v32, -1e+30  ;;  %vm3671_vm4 = vcmp.eq.s32.totalorder %v14006_v12, 1  ;;  %v4612_v6 = vsel %vm1421_vm14, %v4592_v30, %v4593_v22  ;;  %v14148_v12 = vpop.permute.xlu0 %3627 }
 0x37e   : > { %v4432_v21 = vmax.f32 %v4304_v27, %v4400_v52  ;;  %vm17108_vm9 = vcmp.eq.s32.totalorder %v14008_v17, 1  ;;  %v14038_v39 = vsel %vm17101_vm11, %v14025_v42, -1e+30  ;;  %vm18410_vm12 = vcmp.eq.s32.totalorder %v12946_v0, 1  ;;  %v18575_v48 = vld [vmem:[#allocation61_spill] sm:$0xff] }
 0x37f   : > { %v4781_v37 = vsel %vm18410_vm12, %v14025_v42, -1e+30  ;;  %v14048_v52 = vsel %vm3447_vm7, %v14025_v42, -1e+30  ;;  %v18411_v27 = vmax.f32 %v13836_v34, %v13647_v47  ;;  %v3702_v33 = vsel %vm17121_vm8, %v18360_v44, -1e+30 }
 0x380   : > { %v4560_v4 = vmax.f32 %v4432_v21, %v4528_v55  ;;  %vm18414_vm13 = vcmp.eq.s32.totalorder %v18413_v29, 1  ;;  %v18415_v57 = vmax.f32 %v13691_v24, %v13814_v23  ;;  %v3703_v47 = vsel %vm3671_vm4, %v18390_v16, -1e+30 }
 0x381   : > { %v14053_v36 = vmax.f32 %v18411_v27, %v4781_v37  ;;  %v4656_v32 = vsel %vm18414_vm13, %v4612_v6, -1e+30  ;;  %v14073_v34 = vsel %vm3671_vm4, %v18391_v62, -1e+30  ;;  %v14077_v44 = vmax.f32 %v3511_v50, %v3703_v47 }
 0x382   : > { %v14065_v43 = vmax.f32 %v18415_v57, %v3702_v33  ;;  %18416 = vst [vmem:[#allocation312_spill] sm:$0xff] %v14073_v34  ;;  %v14075_v21 = vmax.f32 %v4560_v4, %v4656_v32  ;;  %v3481_v55 = vsel %vm17108_vm9, %v18238_v40, -1e+30  ;;  %v18418_v24 = vrot.slane %v13895_v3, 7  ;;  %v18424_v40 = vld [vmem:[#allocation24_spill] sm:$0xff]  ;;  %v18471_v34 = vld [vmem:[#allocation31_spill] sm:$0xff] }
 0x383   : > { %18412 = vst [vmem:[#allocation311_spill] sm:$0xff] %v14053_v36  ;;  %18417 = vst [vmem:[#allocation313_spill] sm:$0xff] %v14077_v44  ;;  %v18419_v23 = vrot.slane %v13760_v46, 7  ;;  %v3513_v50 = vmax.f32 %v13987_v20, %v3481_v55  ;;  %vm18420_vm12 = vcmp.eq.s32.totalorder %v13072_v19, 1  ;;  %v18421_v20 = vmax.f32 %v13904_v28, %v13736_v38  ;;  %v18428_v36 = vld [vmem:[#allocation29_spill] sm:$0xff] }
 0x384   : > { %v4210_v16 = vrot.slane %v14065_v43, 7  ;;  %v4338_v57 = vrot.slane %v14065_v43, 1  ;;  %v4466_v37 = vrot.slane %v14065_v43, 6  ;;  %v14095_v27 = vsel %vm17094_vm2, %v14075_v21, -1e+30 }
 0x385   : > { %v4228_v30 = vsel %vm17122_vm1, %v18419_v23, %v18418_v24  ;;  %v4782_v4 = vsel %vm18420_vm12, %v14075_v21, -1e+30  ;;  %v14105_v6 = vsel %vm3448_vm15, %v14075_v21, -1e+30  ;;  %v18422_v32 = vmov %v18418_v24 }
 0x386   : > { %v14110_v33 = vmax.f32 %v18421_v20, %v4782_v4  ;;  %v4227_v47 = vsel %vm17122_vm1, %v18422_v32, %v4210_v16  ;;  %v18423_v55 = vrot.slane %v13895_v3, 6  ;;  %v4211_v23 = vrot.slane %v14077_v44, 7 }
 0x387   : > { %vm18425_vm13 = vcmp.eq.s32.totalorder %v18424_v40, 1  ;;  %v17098_v19 = vrot.slane %v14077_v44, 1  ;;  %v17099_v38 = vrot.slane %v14077_v44, 6  ;;  %vm18429_vm2 = vcmp.eq.s32.totalorder %v18428_v36, 1 }
 0x388   : > { %v4483_v24 = vsel %vm1324_vm10, %v18423_v55, %v4466_v37  ;;  %v4274_v8 = vsel %vm18425_vm13, %v4227_v47, -1e+30  ;;  %v4226_v32 = vsel %vm17122_vm1, %v4210_v16, %v4211_v23  ;;  %v18426_v55 = vld [vmem:[#allocation25_spill] sm:$0xff]  ;;  %v14146_v16 = vpop.permute.xlu1 %3630  ;;  %vm18434_vm13 = vcmp.eq.s32.totalorder %v18433_v11, 1 }
 0x389   : > { %v4306_v20 = vmax.f32 %v14065_v43, %v4274_v8  ;;  %vm18427_vm12 = vcmp.eq.s32.totalorder %v18426_v55, 1  ;;  %v14135_v47 = vsel %vm18429_vm2, %v4226_v32, -1e+30  ;;  %v4354_v28 = vsel %vm1035_vm5, %v4338_v57, %v17098_v19  ;;  %18430 = vst [vmem:[#allocation314_spill] sm:$0xff] %v14146_v16  ;;  %v18431_v32 = vld [vmem:[#allocation63_spill] sm:$0xff] }
 0x38a   : > { %v4273_v0 = vsel %vm18427_vm12, %v4228_v30, -1e+30  ;;  %v4482_v8 = vsel %vm1324_vm10, %v4466_v37, %v17099_v38  ;;  %v4307_v30 = vmax.f32 %v14077_v44, %v14135_v47  ;;  %vm18432_vm2 = vcmp.eq.s32.totalorder %v18431_v32, 1  ;;  %v18440_v32 = vld [vmem:[#allocation135_spill] sm:$0xff] }
 0x38b   : > { %v4305_v4 = vmax.f32 %v13895_v3, %v4273_v0  ;;  %v4402_v59 = vsel %vm18432_vm2, %v4354_v28, -1e+30  ;;  %v14156_v19 = vsel %vm18434_vm13, %v4482_v8, -1e+30  ;;  %v18435_v29 = vrot.slane %v13895_v3, 1  ;;  %v18436_v0 = vld [vmem:[#allocation64_spill] sm:$0xff] }
 0x38c   : > { %vm18437_vm12 = vcmp.eq.s32.totalorder %v18436_v0, 1  ;;  %v18438_v1 = vrot.slane %v13895_v3, 6  ;;  %v18439_v14 = vrot.slane %v13760_v46, 6  ;;  %v17100_v28 = vrot.slane %v14065_v43, 2  ;;  %v18454_v0 = vld [vmem:[#allocation133_spill] sm:$0xff] }
 0x38d   : > { %v4355_v37 = vsel %vm1035_vm5, %v18435_v29, %v4338_v57  ;;  %v3754_v8 = vpack.c.bf16 %v14065_v43, %v13895_v3  ;;  %vm18441_vm2 = vcmp.eq.s32.totalorder %v18440_v32, 1  ;;  %vm17103_vm13 = vcmp.eq.s32.totalorder %v14146_v16, 1  ;;  %v18443_v3 = vld [vmem:[#allocation114_spill] sm:$0xff]  ;;  %v18445_v57 = vld [vmem:[#allocation196_spill] sm:$0xff]  ;;  %v18452_v32 = vld [vmem:[#allocation67_spill] sm:$0xff] }
 0x38e   : > { %v4401_v38 = vsel %vm18437_vm12, %v4355_v37, -1e+30  ;;  %v4484_v47 = vsel %vm1324_vm10, %v18439_v14, %v18438_v1  ;;  %vm3672_vm12 = vcmp.eq.s32.totalorder %v14148_v12, 1  ;;  %v4611_v46 = vsel %vm1421_vm14, %v4593_v22, %v17100_v28  ;;  %v18442_v14 = vld [vmem:[#allocation194_spill] sm:$0xff]  ;;  %v18446_v37 = vld [vmem:[#allocation93_spill] sm:$0xff] }
 0x38f   : > { %v4433_v11 = vmax.f32 %v4305_v4, %v4401_v38  ;;  %v4529_v36 = vsel %vm18441_vm2, %v4484_v47, -1e+30  ;;  %6943 = vmatmul.mubr.msk.bf16.gmra.mrb[52].mxu0 %vm17111_vm6, %v3754_v8  ;;  %v3705_v1 = vsel %vm17103_vm13, %v18442_v14, -1e+30  ;;  %v14188_v29 = vsel %vm17103_vm13, %v18443_v3, -1e+30 }
 0x390   : > { %18444 = vst [vmem:[#allocation194_spill] sm:$0xff] %v14188_v29  ;;  %v3704_v38 = vsel %vm3672_vm12, %v18445_v57, -1e+30  ;;  %vm18447_vm2 = vcmp.eq.s32.totalorder %v18446_v37, 1  ;;  %v14195_v22 = vmax.f32 %v3513_v50, %v3705_v1  ;;  %v18449_v8 = vmax.f32 %v13888_v31, %v14002_v5  ;;  %v18451_v14 = vld [vmem:[#allocation262_spill] sm:$0xff]  ;;  %v18456_v57 = vld [vmem:[#allocation248_spill] sm:$0xff] }
 0x391   : > { %v4561_v4 = vmax.f32 %v4433_v11, %v4529_v36  ;;  %v4657_v47 = vsel %vm18447_vm2, %v4611_v46, -1e+30  ;;  %vm18453_vm11 = vcmp.eq.s32.totalorder %v18452_v32, 1  ;;  %v4434_v16 = vmax.f32 %v4306_v20, %v4402_v59  ;;  %v18458_v36 = vld [vmem:[#allocation186_spill] sm:$0xff] }
 0x392   : > { %18448 = vst [vmem:[#allocation114_spill] sm:$0xff] %v14195_v22  ;;  %v14200_v28 = vmax.f32 %v18449_v8, %v3704_v38  ;;  %v4406_v3 = vsel %vm18453_vm11, %v18451_v14, -1e+30  ;;  %vm18455_vm13 = vcmp.eq.s32.totalorder %v18454_v0, 1  ;;  %v18457_v11 = vrot.slane %v18456_v57, 2  ;;  %v18465_v32 = vld [vmem:[#allocation30_spill] sm:$0xff] }
 0x393   : > { %v4530_v40 = vsel %vm18455_vm13, %v4483_v24, -1e+30  ;;  %v18459_v37 = vrot.slane %v18458_v36, 2  ;;  %v14213_v46 = vmax.f32 %v4561_v4, %v4657_v47  ;;  %v4213_v31 = vrot.slane %v14195_v22, 7 }
 0x394   : > { %18450 = vst [vmem:[#allocation196_spill] sm:$0xff] %v14200_v28  ;;  %v4341_v5 = vrot.slane %v14195_v22, 1  ;;  %v4469_v1 = vrot.slane %v14195_v22, 6  ;;  %v4597_v59 = vrot.slane %v14195_v22, 2  ;;  %v4212_v20 = vrot.slane %v14200_v28, 7 }
 0x395   : > { %v4606_v50 = vsel %vm1421_vm14, %v18459_v37, %v18457_v11  ;;  %v4340_v24 = vrot.slane %v14200_v28, 1  ;;  %v4468_v38 = vrot.slane %v14200_v28, 6  ;;  %v14225_v37 = vsel %vm2999_vm3, %v14213_v46, -1e+30 }
 0x396   : > { %vm18460_vm11 = vcmp.eq.s32.totalorder %v13197_v2, 1  ;;  %v14235_v8 = vsel %vm17108_vm9, %v14213_v46, -1e+30  ;;  %v18461_v14 = vmax.f32 %v14025_v42, %v13851_v49  ;;  %v18462_v57 = vrot.slane %v18458_v36, 7  ;;  %v18469_v42 = vld [vmem:[#allocation112_spill] sm:$0xff] }
 0x397   : > { %v4783_v47 = vsel %vm18460_vm11, %v14213_v46, -1e+30  ;;  %v18463_v4 = vrot.slane %v18458_v36, 1  ;;  %v18464_v0 = vrot.slane %v18458_v36, 2  ;;  %vm18466_vm13 = vcmp.eq.s32.totalorder %v18465_v32, 1  ;;  %v18473_v32 = vld [vmem:[#allocation28_spill] sm:$0xff] }
 0x398   : > { %v14240_v11 = vmax.f32 %v18461_v14, %v4783_v47  ;;  %v4223_v13 = vsel %vm17122_vm1, %v4213_v31, %v18462_v57  ;;  %v18467_v47 = vld [vmem:[#allocation68_spill] sm:$0xff]  ;;  %vm18470_vm11 = vcmp.eq.s32.totalorder %v18469_v42, 1  ;;  %v4224_v57 = vsel %vm17122_vm1, %v4212_v20, %v4213_v31 }
 0x399   : > { %v4351_v2 = vsel %vm1035_vm5, %v4341_v5, %v18463_v4  ;;  %v4607_v17 = vsel %vm1421_vm14, %v4597_v59, %v18464_v0  ;;  %v4278_v49 = vsel %vm18466_vm13, %v4223_v13, -1e+30  ;;  %vm18468_vm2 = vcmp.eq.s32.totalorder %v18467_v47, 1  ;;  %v18478_v47 = vld [vmem:[#allocation65_spill] sm:$0xff] }
 0x39a   : > { %v4405_v14 = vsel %vm18468_vm2, %v4351_v2, -1e+30  ;;  %v4661_v55 = vsel %vm18470_vm11, %v4607_v17, -1e+30  ;;  %v4225_v29 = vsel %vm17122_vm1, %v4211_v23, %v4212_v20  ;;  %vm18472_vm9 = vcmp.eq.s32.totalorder %v18471_v34, 1  ;;  %v18476_v20 = vld [vmem:[#allocation66_spill] sm:$0xff] }
 0x39b   : > { %v4277_v0 = vsel %vm18472_vm9, %v4224_v57, -1e+30  ;;  %v4310_v13 = vmax.f32 %v18458_v36, %v4278_v49  ;;  %vm18474_vm13 = vcmp.eq.s32.totalorder %v18473_v32, 1  ;;  %v4352_v17 = vsel %vm1035_vm5, %v4340_v24, %v4341_v5 }
 0x39c   : > { %v4276_v2 = vsel %vm18474_vm13, %v4225_v29, -1e+30  ;;  %v4309_v42 = vmax.f32 %v14195_v22, %v4277_v0  ;;  %v18475_v31 = vrot.slane %v14077_v44, 1  ;;  %vm18477_vm2 = vcmp.eq.s32.totalorder %v18476_v20, 1 }
 0x39d   : > { %v4308_v23 = vmax.f32 %v14200_v28, %v4276_v2  ;;  %vm18479_vm9 = vcmp.eq.s32.totalorder %v18478_v47, 1  ;;  %v4438_v34 = vmax.f32 %v4310_v13, %v4406_v3  ;;  %v18480_v0 = vrot.slane %v18458_v36, 6  ;;  %v18484_v3 = vld [vmem:[#allocation143_spill] sm:$0xff] }
 0x39e   : > { %v4353_v4 = vsel %vm1035_vm5, %v18475_v31, %v4340_v24  ;;  %v4404_v49 = vsel %vm18479_vm9, %v4352_v17, -1e+30  ;;  %v4437_v32 = vmax.f32 %v4309_v42, %v4405_v14  ;;  %v4480_v22 = vsel %vm1324_vm10, %v4468_v38, %v4469_v1  ;;  %v18482_v31 = vld [vmem:[#allocation145_spill] sm:$0xff] }
 0x39f   : > { %v4403_v57 = vsel %vm18477_vm2, %v4353_v4, -1e+30  ;;  %v4479_v5 = vsel %vm1324_vm10, %v4469_v1, %v18480_v0  ;;  %v4436_v24 = vmax.f32 %v4308_v23, %v4404_v49  ;;  %v18481_v2 = vrot.slane %v14077_v44, 6 }
 0x3a0   : > { %v4435_v29 = vmax.f32 %v4307_v30, %v4403_v57  ;;  %vm18483_vm11 = vcmp.eq.s32.totalorder %v18482_v31, 1  ;;  %vm18485_vm13 = vcmp.eq.s32.totalorder %v18484_v3, 1  ;;  %v18486_v30 = vld [vmem:[#allocation100_spill] sm:$0xff]  ;;  %v4562_v13 = vmax.f32 %v4434_v16, %v4530_v40  ;;  %v18492_v3 = vld [vmem:[#allocation118_spill] sm:$0xff] }
 0x3a1   : > { %v4481_v4 = vsel %vm1324_vm10, %v18481_v2, %v4468_v38  ;;  %v4533_v17 = vsel %vm18483_vm11, %v4480_v22, -1e+30  ;;  %v4534_v42 = vsel %vm18485_vm13, %v4479_v5, -1e+30  ;;  %vm18487_vm2 = vcmp.eq.s32.totalorder %v18486_v30, 1  ;;  %v18490_v2 = vld [vmem:[#allocation211_spill] sm:$0xff] }
 0x3a2   : > { %v4532_v14 = vsel %vm18487_vm2, %v4481_v4, -1e+30  ;;  %v4563_v57 = vmax.f32 %v4435_v29, %v14156_v19  ;;  %v4565_v0 = vmax.f32 %v4437_v32, %v4533_v17  ;;  %v4566_v23 = vmax.f32 %v4438_v34, %v4534_v42  ;;  %v18494_v19 = vld [vmem:[#allocation261_spill] sm:$0xff]  ;;  %v18498_v17 = vld [vmem:[#allocation106_spill] sm:$0xff] }
 0x3a3   : > { %v4564_v1 = vmax.f32 %v4436_v24, %v4532_v14  ;;  %v4596_v49 = vrot.slane %v14200_v28, 2  ;;  %v18488_v36 = vrot.slane %v14077_v44, 2  ;;  %v18489_v38 = vrot.slane %v14065_v43, 2  ;;  %v18495_v32 = vld [vmem:[#allocation225_spill] sm:$0xff]  ;;  %v18520_v44 = vld [vmem:[#allocation239_spill] sm:$0xff] }
 0x3a4   : > { %vm18491_vm9 = vcmp.eq.s32.totalorder %v18490_v2, 1  ;;  %vm18493_vm11 = vcmp.eq.s32.totalorder %v18492_v3, 1  ;;  %v4693_v16 = vmax.f32 %v4565_v0, %v4661_v55  ;;  %vm18496_vm13 = vcmp.eq.s32.totalorder %v18495_v32, 1  ;;  %v18500_v14 = vld [vmem:[#allocation101_spill] sm:$0xff] }
 0x3a5   : > { %v4610_v22 = vsel %vm1421_vm14, %v18489_v38, %v18488_v36  ;;  %v4662_v40 = vsel %vm18493_vm11, %v4606_v50, -1e+30  ;;  %v4790_v34 = vsel %vm18496_vm13, %v18494_v19, -1e+30  ;;  %v4608_v29 = vsel %vm1421_vm14, %v4596_v49, %v4597_v59  ;;  %v18502_v50 = vld [vmem:[#allocation213_spill] sm:$0xff] }
 0x3a6   : > { %v4658_v5 = vsel %vm18491_vm9, %v4610_v22, -1e+30  ;;  %v18497_v24 = vmov %v18488_v36  ;;  %v4694_v4 = vmax.f32 %v4566_v23, %v4662_v40  ;;  %vm18499_vm2 = vcmp.eq.s32.totalorder %v18498_v17, 1 }
 0x3a7   : > { %v4609_v43 = vsel %vm1421_vm14, %v18497_v24, %v4596_v49  ;;  %v4690_v36 = vmax.f32 %v4562_v13, %v4658_v5  ;;  %vm18501_vm9 = vcmp.eq.s32.totalorder %v18500_v14, 1  ;;  %vm18503_vm11 = vcmp.eq.s32.totalorder %v18502_v50, 1  ;;  %v18505_v49 = vld [vmem:[#allocation184_spill] sm:$0xff] }
 0x3a8   : > { %v4659_v42 = vsel %vm18499_vm2, %v4609_v43, -1e+30  ;;  %v4660_v55 = vsel %vm18501_vm9, %v4608_v29, -1e+30  ;;  %v4727_v0 = vsel %vm18503_vm11, %v4693_v16, -1e+30 }
 0x3a9   : > { %v4691_v59 = vmax.f32 %v4563_v57, %v4659_v42  ;;  %v4692_v22 = vmax.f32 %v4564_v1, %v4660_v55  ;;  %vm18504_vm13 = vcmp.eq.s32.totalorder %v13677_v61, 1  ;;  %vm18506_vm6 = vcmp.eq.s32.totalorder %v18505_v49, 1  ;;  %v18509_v57 = vld [vmem:[#allocation92_spill] sm:$0xff] }
 0x3aa   : > { %v4724_v32 = vsel %vm18504_vm13, %v4690_v36, -1e+30  ;;  %v4728_v13 = vsel %vm18506_vm6, %v4694_v4, -1e+30  ;;  %v4754_v23 = vmax.f32 %v4690_v36, %v14095_v27  ;;  %v4759_v5 = vmax.f32 %v18391_v62, %v4727_v0 }
 0x3ab   : > { %v4760_v40 = vmax.f32 %v18494_v19, %v4728_v13  ;;  %vm18507_vm2 = vcmp.eq.s32.totalorder %v13309_v51, 1  ;;  %vm18508_vm9 = vcmp.eq.s32.totalorder %v13675_v25, 1  ;;  %vm18510_vm11 = vcmp.eq.s32.totalorder %v18509_v57, 1 }
 0x3ac   : > { %v4784_v29 = vsel %vm18507_vm2, %v4690_v36, -1e+30  ;;  %v4725_v24 = vsel %vm18508_vm9, %v4691_v59, -1e+30  ;;  %v4726_v1 = vsel %vm18510_vm11, %v4692_v22, -1e+30  ;;  %v4755_v43 = vmax.f32 %v4691_v59, %v14225_v37 }
 0x3ad   : > { %v4756_v42 = vmax.f32 %v4692_v22, %v4724_v32  ;;  %v4757_v55 = vmax.f32 %v4693_v16, %v4725_v24  ;;  %v4758_v38 = vmax.f32 %v4694_v4, %v4726_v1  ;;  %vm18511_vm6 = vcmp.eq.s32.totalorder %v13426_v26, 1  ;;  %v18516_v26 = vld [vmem:[#allocation59_spill] sm:$0xff] }
 0x3ae   : > { %v4785_v27 = vsel %vm18511_vm6, %v4691_v59, -1e+30  ;;  %vm18512_vm13 = vcmp.eq.s32.totalorder %v13551_v54, 1  ;;  %v4787_v0 = vsel %vm3223_vm0, %v4693_v16, -1e+30  ;;  %vm18513_vm2 = vcmp.eq.s32.totalorder %v13803_v60, 1 }
 0x3af   : > { %v4786_v62 = vsel %vm18512_vm13, %v4692_v22, -1e+30  ;;  %v4788_v13 = vsel %vm18513_vm2, %v4694_v4, -1e+30  ;;  %v18514_v49 = vmax.f32 %v14075_v21, %v13924_v45  ;;  %v18515_v37 = vmax.f32 %v14213_v46, %v14038_v39  ;;  %v18518_v60 = vld [vmem:[#allocation241_spill] sm:$0xff] }
 0x3b0   : > { %v4818_v24 = vmax.f32 %v4754_v23, %v4786_v62  ;;  %v4819_v1 = vmax.f32 %v4755_v43, %v4787_v0  ;;  %v4820_v57 = vmax.f32 %v4756_v42, %v4788_v13  ;;  %v4821_v25 = vmax.f32 %v4757_v55, %v13980_v9  ;;  %v18526_v9 = vld [vmem:[#allocation216_spill] sm:$0xff]  ;;  %v18528_v62 = vld [vmem:[#allocation54_spill] sm:$0xff] }
 0x3b1   : > { %v4816_v50 = vmax.f32 %v18514_v49, %v4784_v29  ;;  %v4817_v32 = vmax.f32 %v18515_v37, %v4785_v27  ;;  %v4822_v54 = vmax.f32 %v4758_v38, %v4790_v34  ;;  %v4823_v51 = vmax.f32 %v4759_v5, %v18516_v26  ;;  %v18522_v49 = vld [vmem:[#allocation214_spill] sm:$0xff]  ;;  %v18524_v29 = vld [vmem:[#allocation217_spill] sm:$0xff]  ;;  %v18529_v13 = vld [vmem:[#allocation268_spill] sm:$0xff] }
 0x3b2   : > { %v4824_v15 = vmax.f32 %v4760_v40, %v18517_v35  ;;  %vm18519_vm9 = vcmp.eq.s32.totalorder %v18518_v60, 1  ;;  %vm18521_vm11 = vcmp.eq.s32.totalorder %v18520_v44, 1  ;;  %vm18523_vm6 = vcmp.eq.s32.totalorder %v18522_v49, 1  ;;  %v18571_v44 = vld [vmem:[#allocation63_spill] sm:$0xff]  ;;  %v18573_v60 = vld [vmem:[#allocation62_spill] sm:$0xff] }
 0x3b3   : > { %v4854_v28 = vsel %vm18519_vm9, %v4690_v36, -1e+30  ;;  %v4855_v45 = vsel %vm18521_vm11, %v4691_v59, -1e+30  ;;  %v4856_v39 = vsel %vm18523_vm6, %v4692_v22, -1e+30  ;;  %v4880_v43 = vmax.f32 %v4816_v50, %v13746_v56 }
 0x3b4   : > { %vm18525_vm13 = vcmp.eq.s32.totalorder %v18524_v29, 1  ;;  %vm18527_vm2 = vcmp.eq.s32.totalorder %v18526_v9, 1  ;;  %v4881_v26 = vmax.f32 %v4817_v32, %v13861_v58  ;;  %v4882_v35 = vmax.f32 %v4818_v24, %v13934_v7  ;;  %v18530_v50 = vld [vmem:[#allocation292_spill] sm:$0xff]  ;;  %v18532_v9 = vld [vmem:[#allocation297_spill] sm:$0xff] }
 0x3b5   : > { %v4857_v23 = vsel %vm18525_vm13, %v4693_v16, -1e+30  ;;  %v4858_v34 = vsel %vm18527_vm2, %v4694_v4, -1e+30  ;;  %v4883_v38 = vmax.f32 %v4819_v1, %v14048_v52  ;;  %v4884_v5 = vmax.f32 %v4820_v57, %v14105_v6  ;;  %v18534_v7 = vld [vmem:[#allocation173_spill] sm:$0xff]  ;;  %v18544_v1 = vld [vmem:[#allocation267_spill] sm:$0xff] }
 0x3b6   : > { %v4885_v40 = vmax.f32 %v4821_v25, %v14235_v8  ;;  %v4886_v42 = vmax.f32 %v4822_v54, %v4854_v28  ;;  %v4887_v55 = vmax.f32 %v4823_v51, %v4855_v45  ;;  %v4888_v27 = vmax.f32 %v4824_v15, %v4856_v39  ;;  %v18538_v28 = vld [vmem:[#allocation256_spill] sm:$0xff]  ;;  %v18539_v8 = vld [vmem:[#allocation229_spill] sm:$0xff] }
 0x3b7   : > { %v4889_v0 = vmax.f32 %v18528_v62, %v4857_v23  ;;  %v4890_v56 = vmax.f32 %v18529_v13, %v4858_v34  ;;  %vm18531_vm9 = vcmp.eq.s32.totalorder %v18530_v50, 1  ;;  %vm18533_vm11 = vcmp.eq.s32.totalorder %v18532_v9, 1  ;;  %v18546_v23 = vld [vmem:[#allocation253_spill] sm:$0xff]  ;;  %v18547_v34 = vld [vmem:[#allocation200_spill] sm:$0xff] }
 0x3b8   : > { %v4910_v37 = vsel %vm18531_vm9, %v4690_v36, -1e+30  ;;  %v4911_v58 = vsel %vm18533_vm11, %v4691_v59, -1e+30  ;;  %vm18535_vm6 = vcmp.eq.s32.totalorder %v18534_v7, 1  ;;  %vm18536_vm13 = vcmp.eq.s32.totalorder %v13805_v53, 1 }
 0x3b9   : > { %v4912_v52 = vsel %vm18535_vm6, %v4692_v22, -1e+30  ;;  %v4913_v6 = vsel %vm18536_vm13, %v4693_v16, -1e+30  ;;  %v18537_v51 = vmax.f32 %v14110_v33, %v13568_v18  ;;  %v4914_v25 = vsel %vm17121_vm8, %v4694_v4, -1e+30 }
 0x3ba   : > { %v4916_v15 = vsel %vm3672_vm12, %v18494_v19, -1e+30  ;;  %vm18540_vm2 = vcmp.eq.s32.totalorder %v18539_v8, 1  ;;  %v18541_v59 = vmax.f32 %v14240_v11, %v13657_v41  ;;  %v14403_v22 = vmax.f32 %v4880_v43, %v4912_v52  ;;  %v18542_v4 = vld [vmem:[#allocation312_spill] sm:$0xff]  ;;  %v18543_v19 = vld [vmem:[#allocation194_spill] sm:$0xff] }
 0x3bb   : > { %v14388_v54 = vmax.f32 %v18537_v51, %v4910_v37  ;;  %v4920_v36 = vsel %vm18540_vm2, %v18538_v28, -1e+30  ;;  %v14405_v18 = vmax.f32 %v4881_v26, %v4913_v6  ;;  %v14407_v33 = vmax.f32 %v4882_v35, %v4914_v25  ;;  %v18545_v41 = vld [vmem:[#allocation260_spill] sm:$0xff] }
 0x3bc   : > { %v14401_v16 = vmax.f32 %v18541_v59, %v4911_v58  ;;  %v14410_v57 = vmax.f32 %v4883_v38, %v18542_v4  ;;  %v14412_v32 = vmax.f32 %v4884_v5, %v4916_v15  ;;  %v14415_v24 = vmax.f32 %v4885_v40, %v18543_v19  ;;  %v18712_v50 = vld [vmem:[#allocation4_spill] sm:$0xff] }
 0x3bd   : > { %v14418_v45 = vmax.f32 %v4886_v42, %v18544_v1  ;;  %v14421_v11 = vmax.f32 %v4887_v55, %v18545_v41  ;;  %v14423_v39 = vmax.f32 %v4888_v27, %v4920_v36  ;;  %v14426_v43 = vmax.f32 %v4889_v0, %v18546_v23  ;;  %v18548_v1 = vld [vmem:[#allocation25_spill] sm:$0xff]  ;;  %v18550_v23 = vld [vmem:[#allocation24_spill] sm:$0xff] }
 0x3be   : > { %v14429_v26 = vmax.f32 %v4890_v56, %v18547_v34  ;;  %v17123_v35 = vrot.slane %v14388_v54, 7  ;;  %v5237_v38 = vrot.slane %v14401_v16, 7  ;;  %v5238_v5 = vrot.slane %v14403_v22, 7 }
 0x3bf   : > { %v5239_v40 = vrot.slane %v14405_v18, 7  ;;  %v5240_v42 = vrot.slane %v14407_v33, 7  ;;  %v5241_v55 = vrot.slane %v14410_v57, 7  ;;  %v5242_v27 = vrot.slane %v14412_v32, 7 }
 0x3c0   : > { %v5243_v62 = vrot.slane %v14415_v24, 7  ;;  %v5244_v0 = vrot.slane %v14418_v45, 7  ;;  %v5245_v13 = vrot.slane %v14421_v11, 7  ;;  %v5246_v56 = vrot.slane %v14423_v39, 7 }
 0x3c1   : > { %v17124_v37 = vrot.slane %v14426_v43, 7  ;;  %v5257_v58 = vsel %vm17122_vm1, %v5239_v40, %v5240_v42  ;;  %v5255_v51 = vsel %vm17122_vm1, %v5241_v55, %v5242_v27  ;;  %v5256_v25 = vsel %vm17122_vm1, %v5240_v42, %v5241_v55  ;;  %v18552_v42 = vld [vmem:[#allocation23_spill] sm:$0xff] }
 0x3c2   : > { %v5253_v52 = vsel %vm17122_vm1, %v5243_v62, %v5244_v0  ;;  %v5254_v6 = vsel %vm17122_vm1, %v5242_v27, %v5243_v62  ;;  %v5251_v28 = vsel %vm17122_vm1, %v5245_v13, %v5246_v56  ;;  %v5252_v36 = vsel %vm17122_vm1, %v5244_v0, %v5245_v13  ;;  %v18554_v27 = vld [vmem:[#allocation22_spill] sm:$0xff]  ;;  %v18556_v62 = vld [vmem:[#allocation29_spill] sm:$0xff]  ;;  %v18558_v13 = vld [vmem:[#allocation28_spill] sm:$0xff] }
 0x3c3   : > { %v5250_v15 = vsel %vm17122_vm1, %v5246_v56, %v17124_v37  ;;  %v5258_v59 = vsel %vm17122_vm1, %v5238_v5, %v5239_v40  ;;  %v5259_v4 = vsel %vm17122_vm1, %v5237_v38, %v5238_v5  ;;  %v5260_v19 = vsel %vm17122_vm1, %v17123_v35, %v5237_v38  ;;  %v18560_v56 = vld [vmem:[#allocation31_spill] sm:$0xff] }
 0x3c4   : > { %vm18549_vm9 = vcmp.eq.s32.totalorder %v18548_v1, 1  ;;  %vm18551_vm11 = vcmp.eq.s32.totalorder %v18550_v23, 1  ;;  %vm18553_vm6 = vcmp.eq.s32.totalorder %v18552_v42, 1  ;;  %vm18555_vm13 = vcmp.eq.s32.totalorder %v18554_v27, 1  ;;  %v18562_v1 = vld [vmem:[#allocation30_spill] sm:$0xff] }
 0x3c5   : > { %v5303_v41 = vsel %vm18549_vm9, %v5258_v59, -1e+30  ;;  %v5304_v34 = vsel %vm18551_vm11, %v5257_v58, -1e+30  ;;  %v5301_v55 = vsel %vm18553_vm6, %v5260_v19, -1e+30 }
 0x3c6   : > { %v5302_v40 = vsel %vm18555_vm13, %v5259_v4, -1e+30  ;;  %vm18557_vm2 = vcmp.eq.s32.totalorder %v18556_v62, 1  ;;  %v5335_v0 = vmax.f32 %v14405_v18, %v5303_v41  ;;  %vm18559_vm8 = vcmp.eq.s32.totalorder %v18558_v13, 1  ;;  %v18564_v19 = vld [vmem:[#allocation33_spill] sm:$0xff]  ;;  %v18566_v4 = vld [vmem:[#allocation32_spill] sm:$0xff] }
 0x3c7   : > { %v5305_v5 = vsel %vm18557_vm2, %v5256_v25, -1e+30  ;;  %v5306_v38 = vsel %vm18559_vm8, %v5255_v51, -1e+30  ;;  %vm18561_vm1 = vcmp.eq.s32.totalorder %v18560_v56, 1  ;;  %vm18563_vm9 = vcmp.eq.s32.totalorder %v18562_v1, 1 }
 0x3c8   : > { %v5307_v59 = vsel %vm18561_vm1, %v5254_v6, -1e+30  ;;  %v5308_v58 = vsel %vm18563_vm9, %v5253_v52, -1e+30  ;;  %v5333_v23 = vmax.f32 %v14401_v16, %v5301_v55  ;;  %vm18565_vm11 = vcmp.eq.s32.totalorder %v18564_v19, 1  ;;  %v18568_v25 = vld [vmem:[#allocation35_spill] sm:$0xff] }
 0x3c9   : > { %v5309_v42 = vsel %vm18565_vm11, %v5252_v36, -1e+30  ;;  %vm18567_vm6 = vcmp.eq.s32.totalorder %v18566_v4, 1  ;;  %vm18569_vm13 = vcmp.eq.s32.totalorder %v18568_v25, 1  ;;  %v5334_v62 = vmax.f32 %v14403_v22, %v5302_v40 }
 0x3ca   : > { %v5310_v27 = vsel %vm18567_vm6, %v5251_v28, -1e+30  ;;  %v5311_v41 = vsel %vm18569_vm13, %v5250_v15, -1e+30  ;;  %v5336_v51 = vmax.f32 %v14407_v33, %v5304_v34  ;;  %v5337_v6 = vmax.f32 %v14410_v57, %v5305_v5 }
 0x3cb   : > { %v5338_v13 = vmax.f32 %v14412_v32, %v5306_v38  ;;  %v5339_v52 = vmax.f32 %v14415_v24, %v5307_v59  ;;  %v5340_v55 = vmax.f32 %v14418_v45, %v5308_v58  ;;  %v5341_v36 = vmax.f32 %v14421_v11, %v5309_v42 }
 0x3cc   : > { %v5342_v56 = vmax.f32 %v14423_v39, %v5310_v27  ;;  %v5343_v28 = vmax.f32 %v14426_v43, %v5311_v41  ;;  %v5366_v40 = vrot.slane %v14403_v22, 1  ;;  %v5367_v34 = vrot.slane %v14405_v18, 1 }
 0x3cd   : > { %v5368_v5 = vrot.slane %v14407_v33, 1  ;;  %v5369_v38 = vrot.slane %v14410_v57, 1  ;;  %v5370_v59 = vrot.slane %v14412_v32, 1  ;;  %v5371_v1 = vrot.slane %v14415_v24, 1 }
 0x3ce   : > { %v5372_v58 = vrot.slane %v14418_v45, 1  ;;  %v5373_v19 = vrot.slane %v14421_v11, 1  ;;  %v5374_v42 = vrot.slane %v14423_v39, 1  ;;  %v5375_v4 = vrot.slane %v14426_v43, 1 }
 0x3cf   : > { %v17125_v27 = vrot.slane %v14429_v26, 1  ;;  %v5382_v41 = vsel %vm1035_vm5, %v5370_v59, %v5371_v1  ;;  %v5383_v35 = vsel %vm1035_vm5, %v5369_v38, %v5370_v59  ;;  %v5384_v37 = vsel %vm1035_vm5, %v5368_v5, %v5369_v38 }
 0x3d0   : > { %v5381_v25 = vsel %vm1035_vm5, %v5371_v1, %v5372_v58  ;;  %v5378_v29 = vsel %vm1035_vm5, %v5374_v42, %v5375_v4  ;;  %v5379_v8 = vsel %vm1035_vm5, %v5373_v19, %v5374_v42  ;;  %v5380_v1 = vsel %vm1035_vm5, %v5372_v58, %v5373_v19  ;;  %v18577_v19 = vld [vmem:[#allocation64_spill] sm:$0xff] }
 0x3d1   : > { %v5377_v15 = vsel %vm1035_vm5, %v5375_v4, %v17125_v27  ;;  %v5385_v59 = vsel %vm1035_vm5, %v5367_v34, %v5368_v5  ;;  %v5386_v38 = vsel %vm1035_vm5, %v5366_v40, %v5367_v34  ;;  %v18570_v49 = vrot.slane %v14401_v16, 1 }
 0x3d2   : > { %vm18572_vm1 = vcmp.eq.s32.totalorder %v18571_v44, 1  ;;  %vm18574_vm8 = vcmp.eq.s32.totalorder %v18573_v60, 1  ;;  %vm18576_vm2 = vcmp.eq.s32.totalorder %v18575_v48, 1  ;;  %vm18578_vm9 = vcmp.eq.s32.totalorder %v18577_v19, 1  ;;  %v18583_v60 = vld [vmem:[#allocation67_spill] sm:$0xff] }
 0x3d3   : > { %v5387_v27 = vsel %vm1035_vm5, %v18570_v49, %v5366_v40  ;;  %v5432_v4 = vsel %vm18572_vm1, %v5384_v37, -1e+30  ;;  %v5430_v58 = vsel %vm18576_vm2, %v5386_v38, -1e+30  ;;  %v5431_v5 = vsel %vm18578_vm9, %v5385_v59, -1e+30 }
 0x3d4   : > { %v5429_v42 = vsel %vm18574_vm8, %v5387_v27, -1e+30  ;;  %v14548_v53 = vmax.f32 %v5336_v51, %v5432_v4  ;;  %vm18579_vm11 = vcmp.eq.s32.totalorder %v18476_v20, 1  ;;  %vm18580_vm6 = vcmp.eq.s32.totalorder %v18478_v47, 1  ;;  %v18581_v40 = vld [vmem:[#allocation68_spill] sm:$0xff]  ;;  %v18585_v27 = vld [vmem:[#allocation70_spill] sm:$0xff] }
 0x3d5   : > { %v5433_v34 = vsel %vm18579_vm11, %v5383_v35, -1e+30  ;;  %v5434_v49 = vsel %vm18580_vm6, %v5382_v41, -1e+30  ;;  %vm18582_vm13 = vcmp.eq.s32.totalorder %v18581_v40, 1  ;;  %v14556_v37 = vmax.f32 %v5333_v23, %v5429_v42  ;;  %v18587_v59 = vld [vmem:[#allocation69_spill] sm:$0xff] }
 0x3d6   : > { %v5435_v44 = vsel %vm18582_vm13, %v5381_v25, -1e+30  ;;  %vm18584_vm1 = vcmp.eq.s32.totalorder %v18583_v60, 1  ;;  %vm18586_vm8 = vcmp.eq.s32.totalorder %v18585_v27, 1  ;;  %vm18588_vm2 = vcmp.eq.s32.totalorder %v18587_v59, 1  ;;  %v18589_v20 = vld [vmem:[#allocation74_spill] sm:$0xff] }
 0x3d7   : > { %v5436_v48 = vsel %vm18584_vm1, %v5380_v1, -1e+30  ;;  %v5437_v38 = vsel %vm18586_vm8, %v5379_v8, -1e+30  ;;  %v5438_v51 = vsel %vm18588_vm2, %v5378_v29, -1e+30  ;;  %v14564_v4 = vmax.f32 %v5334_v62, %v5430_v58 }
 0x3d8   : > { %vm18590_vm9 = vcmp.eq.s32.totalorder %v18589_v20, 1  ;;  %v14568_v35 = vmax.f32 %v5335_v0, %v5431_v5  ;;  %v14570_v41 = vmax.f32 %v5337_v6, %v5433_v34  ;;  %v14572_v23 = vmax.f32 %v5338_v13, %v5434_v49  ;;  %v18591_v20 = vld [vmem:[#allocation130_spill] sm:$0xff] }
 0x3d9   : > { %v5439_v47 = vsel %vm18590_vm9, %v5377_v15, -1e+30  ;;  %v14574_v25 = vmax.f32 %v5339_v52, %v5435_v44  ;;  %v14576_v1 = vmax.f32 %v5340_v55, %v5436_v48  ;;  %v14578_v42 = vmax.f32 %v5341_v36, %v5437_v38 }
 0x3da   : > { %v14580_v8 = vmax.f32 %v5342_v56, %v5438_v51  ;;  %v14582_v29 = vmax.f32 %v5343_v28, %v5439_v47  ;;  %v17130_v62 = vrot.slane %v14388_v54, 6  ;;  %v5493_v15 = vrot.slane %v14401_v16, 6 }
 0x3db   : > { %v5494_v0 = vrot.slane %v14403_v22, 6  ;;  %v5495_v6 = vrot.slane %v14405_v18, 6  ;;  %v5496_v13 = vrot.slane %v14407_v33, 6  ;;  %v5497_v52 = vrot.slane %v14410_v57, 6 }
 0x3dc   : > { %v5498_v55 = vrot.slane %v14412_v32, 6  ;;  %v5499_v36 = vrot.slane %v14415_v24, 6  ;;  %v5500_v56 = vrot.slane %v14418_v45, 6  ;;  %v5501_v28 = vrot.slane %v14421_v11, 6 }
 0x3dd   : > { %v5502_v58 = vrot.slane %v14423_v39, 6  ;;  %v17128_v19 = vrot.slane %v14426_v43, 6  ;;  %v5512_v34 = vsel %vm1324_vm10, %v5496_v13, %v5497_v52  ;;  %v5513_v49 = vsel %vm1324_vm10, %v5495_v6, %v5496_v13  ;;  %v18593_v13 = vld [vmem:[#allocation129_spill] sm:$0xff] }
 0x3de   : > { %v5511_v5 = vsel %vm1324_vm10, %v5497_v52, %v5498_v55  ;;  %v5508_v44 = vsel %vm1324_vm10, %v5500_v56, %v5501_v28  ;;  %v5509_v60 = vsel %vm1324_vm10, %v5499_v36, %v5500_v56  ;;  %v5510_v48 = vsel %vm1324_vm10, %v5498_v55, %v5499_v36  ;;  %v18595_v55 = vld [vmem:[#allocation135_spill] sm:$0xff] }
 0x3df   : > { %v5507_v40 = vsel %vm1324_vm10, %v5501_v28, %v5502_v58  ;;  %v5506_v27 = vsel %vm1324_vm10, %v5502_v58, %v17128_v19  ;;  %v5514_v38 = vsel %vm1324_vm10, %v5494_v0, %v5495_v6  ;;  %v5515_v59 = vsel %vm1324_vm10, %v5493_v15, %v5494_v0  ;;  %v18597_v56 = vld [vmem:[#allocation291_spill] sm:$0xff]  ;;  %v18598_v28 = vld [vmem:[#allocation60_spill] sm:$0xff]  ;;  %v18599_v58 = vld [vmem:[#allocation133_spill] sm:$0xff] }
 0x3e0   : > { %v5516_v51 = vsel %vm1324_vm10, %v17130_v62, %v5493_v15  ;;  %vm18592_vm11 = vcmp.eq.s32.totalorder %v18591_v20, 1  ;;  %vm18594_vm6 = vcmp.eq.s32.totalorder %v18593_v13, 1  ;;  %vm18596_vm13 = vcmp.eq.s32.totalorder %v18595_v55, 1  ;;  %v18601_v19 = vld [vmem:[#allocation138_spill] sm:$0xff]  ;;  %v18605_v20 = vld [vmem:[#allocation143_spill] sm:$0xff]  ;;  %v18607_v13 = vld [vmem:[#allocation152_spill] sm:$0xff] }
 0x3e1   : > { %v5557_v47 = vsel %vm18592_vm11, %v5516_v51, -1e+30  ;;  %v5558_v52 = vsel %vm18594_vm6, %v5515_v59, -1e+30  ;;  %v5559_v36 = vsel %vm18596_vm13, %v5514_v38, -1e+30  ;;  %v4876_v6 = vmax.f32 %v18598_v28, %v18597_v56 }
 0x3e2   : > { %vm18600_vm1 = vcmp.eq.s32.totalorder %v18599_v58, 1  ;;  %vm18602_vm8 = vcmp.eq.s32.totalorder %v18601_v19, 1  ;;  %vm18603_vm2 = vcmp.eq.s32.totalorder %v18486_v30, 1  ;;  %v5589_v51 = vmax.f32 %v14556_v37, %v5557_v47  ;;  %v18668_v28 = vld [vmem:[#allocation71_spill] sm:$0xff]  ;;  %v18691_v62 = vld [vmem:[#allocation121_spill] sm:$0xff] }
 0x3e3   : > { %v5560_v0 = vsel %vm18600_vm1, %v5513_v49, -1e+30  ;;  %v5561_v7 = vsel %vm18602_vm8, %v5512_v34, -1e+30  ;;  %v5562_v15 = vsel %vm18603_vm2, %v5511_v5, -1e+30  ;;  %v5590_v58 = vmax.f32 %v14564_v4, %v5558_v52 }
 0x3e4   : > { %vm18604_vm9 = vcmp.eq.s32.totalorder %v18482_v31, 1  ;;  %vm18606_vm11 = vcmp.eq.s32.totalorder %v18605_v20, 1  ;;  %vm18608_vm6 = vcmp.eq.s32.totalorder %v18607_v13, 1  ;;  %v18609_v49 = vld [vmem:[#allocation148_spill] sm:$0xff]  ;;  %v18611_v34 = vld [vmem:[#allocation157_spill] sm:$0xff]  ;;  %v5591_v5 = vmax.f32 %v14568_v35, %v5559_v36 }
 0x3e5   : > { %v5563_v59 = vsel %vm18604_vm9, %v5510_v48, -1e+30  ;;  %v5564_v38 = vsel %vm18606_vm11, %v5509_v60, -1e+30  ;;  %v5565_v55 = vsel %vm18608_vm6, %v5508_v44, -1e+30  ;;  %v5592_v37 = vmax.f32 %v14548_v53, %v5560_v0 }
 0x3e6   : > { %vm18610_vm13 = vcmp.eq.s32.totalorder %v18609_v49, 1  ;;  %vm18612_vm1 = vcmp.eq.s32.totalorder %v18611_v34, 1  ;;  %v5593_v31 = vmax.f32 %v14570_v41, %v5561_v7  ;;  %v5594_v48 = vmax.f32 %v14572_v23, %v5562_v15 }
 0x3e7   : > { %v5566_v19 = vsel %vm18610_vm13, %v5507_v40, -1e+30  ;;  %v5567_v30 = vsel %vm18612_vm1, %v5506_v27, -1e+30  ;;  %v5595_v60 = vmax.f32 %v14574_v25, %v5563_v59  ;;  %v5596_v44 = vmax.f32 %v14576_v1, %v5564_v38 }
 0x3e8   : > { %v5597_v4 = vmax.f32 %v14578_v42, %v5565_v55  ;;  %v5598_v47 = vmax.f32 %v14580_v8, %v5566_v19  ;;  %v5599_v40 = vmax.f32 %v14582_v29, %v5567_v30  ;;  %v17129_v27 = vrot.slane %v14401_v16, 2  ;;  %v18613_v30 = vld [vmem:[#allocation93_spill] sm:$0xff] }
 0x3e9   : > { %v5622_v35 = vrot.slane %v14403_v22, 2  ;;  %v5623_v53 = vrot.slane %v14405_v18, 2  ;;  %v5624_v7 = vrot.slane %v14407_v33, 2  ;;  %v5625_v41 = vrot.slane %v14410_v57, 2 }
 0x3ea   : > { %v5626_v23 = vrot.slane %v14412_v32, 2  ;;  %v5627_v25 = vrot.slane %v14415_v24, 2  ;;  %v5628_v1 = vrot.slane %v14418_v45, 2  ;;  %v5629_v42 = vrot.slane %v14421_v11, 2 }
 0x3eb   : > { %v5630_v8 = vrot.slane %v14423_v39, 2  ;;  %v5631_v29 = vrot.slane %v14426_v43, 2  ;;  %v17131_v52 = vrot.slane %v14429_v26, 2  ;;  %v5640_v36 = vsel %vm1421_vm14, %v5624_v7, %v5625_v41 }
 0x3ec   : > { %v5636_v0 = vsel %vm1421_vm14, %v5628_v1, %v5629_v42  ;;  %v5637_v15 = vsel %vm1421_vm14, %v5627_v25, %v5628_v1  ;;  %v5638_v59 = vsel %vm1421_vm14, %v5626_v23, %v5627_v25  ;;  %v5639_v20 = vsel %vm1421_vm14, %v5625_v41, %v5626_v23  ;;  %v18616_v25 = vld [vmem:[#allocation210_spill] sm:$0xff] }
 0x3ed   : > { %v5633_v38 = vsel %vm1421_vm14, %v5631_v29, %v17131_v52  ;;  %v5634_v13 = vsel %vm1421_vm14, %v5630_v8, %v5631_v29  ;;  %v5635_v55 = vsel %vm1421_vm14, %v5629_v42, %v5630_v8  ;;  %v5641_v49 = vsel %vm1421_vm14, %v5623_v53, %v5624_v7  ;;  %v18618_v42 = vld [vmem:[#allocation209_spill] sm:$0xff]  ;;  %v18623_v29 = vld [vmem:[#allocation112_spill] sm:$0xff] }
 0x3ee   : > { %v5642_v19 = vsel %vm1421_vm14, %v5622_v35, %v5623_v53  ;;  %v5643_v34 = vsel %vm1421_vm14, %v17129_v27, %v5622_v35  ;;  %vm18614_vm8 = vcmp.eq.s32.totalorder %v18613_v30, 1  ;;  %vm18615_vm2 = vcmp.eq.s32.totalorder %v18490_v2, 1 }
 0x3ef   : > { %v5687_v41 = vsel %vm18614_vm8, %v5641_v49, -1e+30  ;;  %v5688_v23 = vsel %vm18615_vm2, %v5640_v36, -1e+30  ;;  %vm18617_vm9 = vcmp.eq.s32.totalorder %v18616_v25, 1  ;;  %vm18619_vm11 = vcmp.eq.s32.totalorder %v18618_v42, 1 }
 0x3f0   : > { %v5685_v1 = vsel %vm18617_vm9, %v5643_v34, -1e+30  ;;  %v5686_v7 = vsel %vm18619_vm11, %v5642_v19, -1e+30  ;;  %vm18620_vm6 = vcmp.eq.s32.totalorder %v18498_v17, 1  ;;  %v14705_v8 = vmax.f32 %v5591_v5, %v5687_v41  ;;  %v18626_v34 = vld [vmem:[#allocation123_spill] sm:$0xff] }
 0x3f1   : > { %v5689_v53 = vsel %vm18620_vm6, %v5639_v20, -1e+30  ;;  %vm18622_vm13 = vcmp.eq.s32.totalorder %v18500_v14, 1  ;;  %vm18624_vm1 = vcmp.eq.s32.totalorder %v18623_v29, 1  ;;  %vm18625_vm8 = vcmp.eq.s32.totalorder %v18492_v3, 1  ;;  %v18628_v19 = vld [vmem:[#allocation128_spill] sm:$0xff] }
 0x3f2   : > { %18621 = vst [vmem:[#allocation262_spill] sm:$0xff] %v14705_v8  ;;  %v5690_v35 = vsel %vm18622_vm13, %v5638_v59, -1e+30  ;;  %v5691_v49 = vsel %vm18624_vm1, %v5637_v15, -1e+30  ;;  %v14713_v36 = vmax.f32 %v5589_v51, %v5685_v1  ;;  %vm18627_vm2 = vcmp.eq.s32.totalorder %v18626_v34, 1 }
 0x3f3   : > { %v5692_v2 = vsel %vm18625_vm8, %v5636_v0, -1e+30  ;;  %v5693_v30 = vsel %vm18627_vm2, %v5635_v55, -1e+30  ;;  %vm18629_vm9 = vcmp.eq.s32.totalorder %v18628_v19, 1  ;;  %v18630_v20 = vld [vmem:[#allocation99_spill] sm:$0xff]  ;;  %v14721_v41 = vmax.f32 %v5590_v58, %v5686_v7 }
 0x3f4   : > { %v5694_v17 = vsel %vm18629_vm9, %v5634_v13, -1e+30  ;;  %vm18631_vm11 = vcmp.eq.s32.totalorder %v18630_v20, 1  ;;  %v14723_v14 = vmax.f32 %v5592_v37, %v5688_v23  ;;  %v14725_v59 = vmax.f32 %v5593_v31, %v5689_v53  ;;  %v18649_v29 = vld [vmem:[#allocation186_spill] sm:$0xff]  ;;  %v18651_v19 = vld [vmem:[#allocation280_spill] sm:$0xff]  ;;  %v18653_v20 = vld [vmem:[#allocation251_spill] sm:$0xff] }
 0x3f5   : > { %v5695_v5 = vsel %vm18631_vm11, %v5633_v38, -1e+30  ;;  %18632 = vst [vmem:[#allocation66_spill] sm:$0xff] %v14721_v41  ;;  %v14727_v15 = vmax.f32 %v5594_v48, %v5690_v35  ;;  %v14729_v3 = vmax.f32 %v5595_v60, %v5691_v49  ;;  %v14731_v51 = vmax.f32 %v5596_v44, %v5692_v2  ;;  %v18640_v48 = vld [vmem:[#allocation313_spill] sm:$0xff]  ;;  %v18641_v60 = vld [vmem:[#allocation196_spill] sm:$0xff]  ;;  %v18648_v35 = vld [vmem:[#allocation114_spill] sm:$0xff] }
 0x3f6   : > { %18633 = vst [vmem:[#allocation65_spill] sm:$0xff] %v14723_v14  ;;  %18634 = vst [vmem:[#allocation145_spill] sm:$0xff] %v14725_v59  ;;  %v14733_v0 = vmax.f32 %v5597_v4, %v5693_v30  ;;  %v14735_v55 = vmax.f32 %v5598_v47, %v5694_v17  ;;  %v14737_v13 = vmax.f32 %v5599_v40, %v5695_v5  ;;  %v5753_v58 = vsel %vm2999_vm3, %v14705_v8, -1e+30  ;;  %v18642_v40 = vld [vmem:[#allocation185_spill] sm:$0xff]  ;;  %v18650_v30 = vld [vmem:[#allocation310_spill] sm:$0xff] }
 0x3f7   : > { %18635 = vst [vmem:[#allocation100_spill] sm:$0xff] %v14727_v15  ;;  %18636 = vst [vmem:[#allocation211_spill] sm:$0xff] %v14729_v3  ;;  %vm18639_vm6 = vcmp.eq.s32.totalorder %v13677_v61, 1  ;;  %v5817_v31 = vsel %vm3223_vm0, %v14729_v3, -1e+30  ;;  %v3755_v44 = vpack.c.bf16 %v18641_v60, %v18640_v48  ;;  %v5785_v4 = vmax.f32 %v14725_v59, %v5753_v58  ;;  %v18655_v38 = vld [vmem:[#allocation306_spill] sm:$0xff] }
 0x3f8   : > { %18637 = vst [vmem:[#allocation118_spill] sm:$0xff] %v14731_v51  ;;  %v5754_v37 = vsel %vm18639_vm6, %v14723_v14, -1e+30  ;;  %vm18643_vm13 = vcmp.eq.s32.totalorder %v18642_v40, 1  ;;  %v5881_v61 = vsel %vm3447_vm7, %v14713_v36, -1e+30  ;;  %v3756_v49 = vpack.c.bf16 %v18649_v29, %v18648_v35 }
 0x3f9   : > { %v5786_v47 = vmax.f32 %v14727_v15, %v5754_v37  ;;  %v5818_v23 = vsel %vm18643_vm13, %v14731_v51, -1e+30  ;;  %v5882_v63 = vsel %vm3448_vm15, %v14721_v41, -1e+30  ;;  %v5945_v7 = vsel %vm3671_vm4, %v14733_v0, -1e+30 }
 0x3fa   : > { %v5946_v53 = vsel %vm3672_vm12, %v14735_v55, -1e+30  ;;  %vm18647_vm3 = vcmask 15360   ;;  %v5849_v2 = vmax.f32 %v5785_v4, %v5817_v31  ;;  %vm18652_vm7 = vcmp.eq.s32.totalorder %v18651_v19, 1  ;;  %v18656_v58 = vld [vmem:[#allocation289_spill] sm:$0xff]  ;;  %v18659_v31 = vld [vmem:[#allocation248_spill] sm:$0xff] }
 0x3fb   : > { %6946 = vmatprep.mubr.msk.bf16.mxu0 %vm18647_vm3, %v3755_v44  ;;  %v5850_v34 = vmax.f32 %v5786_v47, %v5818_v23  ;;  %v4907_v17 = vsel %vm18652_vm7, %v18650_v30, -1e+30  ;;  %vm18654_vm0 = vcmp.eq.s32.totalorder %v18653_v20, 1  ;;  %v18657_v37 = vmax.f32 %v18655_v38, %v18656_v58  ;;  %vm18658_vm4 = vmmov %vm18647_vm3  ;;  %v18660_v60 = vld [vmem:[#allocation232_spill] sm:$0xff]  ;;  %v18661_v4 = vld [vmem:[#allocation230_spill] sm:$0xff] }
 0x3fc   : > { %v4908_v5 = vsel %vm18654_vm0, %v14075_v21, -1e+30  ;;  %6947 = vmatmul.mubr.msk.bf16.gmra.mrb[56].mxu0 %vm18658_vm4, %v3756_v49  ;;  %v3757_v44 = vpack.c.bf16 %v18660_v60, %v18659_v31  ;;  %v18662_v47 = vld [vmem:[#allocation236_spill] sm:$0xff]  ;;  %v5913_v23 = vmax.f32 %v5849_v2, %v5881_v61  ;;  %v18664_v1 = vld [vmem:[#allocation311_spill] sm:$0xff]  ;;  %vm18667_vm12 = vmmov %vm18647_vm3  ;;  %v4965_v30 = vpack.c.bf16 %v14403_v22, %v14401_v16 }
 0x3fd   : > { %v14779_v12 = vmax.f32 %v18657_v37, %v4907_v17  ;;  %v14784_v48 = vmax.f32 %v4876_v6, %v4908_v5  ;;  %v3758_v40 = vpack.c.bf16 %v18662_v47, %v18661_v4  ;;  %v5914_v21 = vmax.f32 %v5850_v34, %v5882_v63  ;;  %v18663_v25 = vld [vmem:[#allocation296_spill] sm:$0xff]  ;;  %v18670_v61 = vld [vmem:[#allocation75_spill] sm:$0xff]  ;;  %v18671_v63 = vld [vmem:[#allocation77_spill] sm:$0xff] }
 0x3fe   : > { %v4877_v42 = vmax.f32 %v18664_v1, %v18663_v25  ;;  %v18665_v35 = vld [vmem:[#allocation164_spill] sm:$0xff]  ;;  %6950 = vmatprep.mubr.msk.bf16.mxu0 %vm18667_vm12, %v3757_v44  ;;  %v1679_v2 = vpack.c.bf16 %v18671_v63, %v18670_v61  ;;  %v14805_v34 = vmax.f32 %v5913_v23, %v5945_v7  ;;  %v18675_v38 = vld [vmem:[#allocation85_spill] sm:$0xff]  ;;  %vm18676_vm1 = vmmov %vm18647_vm3  ;;  %v4966_v37 = vpack.c.bf16 %v14407_v33, %v14405_v18 }
 0x3ff   : > { %vm18666_vm15 = vcmp.eq.s32.totalorder %v18665_v35, 1  ;;  %v4963_v56 = vpack.c.bf16 %v14784_v48, %v14779_v12  ;;  %v18669_v6 = vld [vmem:[#allocation72_spill] sm:$0xff]  ;;  %v14807_v17 = vmax.f32 %v5914_v21, %v5946_v53  ;;  %v4967_v22 = vpack.c.bf16 %v14412_v32, %v14410_v57  ;;  %v18677_v31 = vld [vmem:[#allocation78_spill] sm:$0xff]  ;;  %v18678_v60 = vld [vmem:[#allocation83_spill] sm:$0xff] }
 0x400   : > { %v4909_v29 = vsel %vm18666_vm15, %v14213_v46, -1e+30  ;;  %v1678_v49 = vpack.c.bf16 %v18669_v6, %v18668_v28  ;;  %18672 = vst [vmem:[#allocation261_spill] sm:$0xff] %v14805_v34  ;;  %v18674_v46 = vld [vmem:[#allocation80_spill] sm:$0xff]  ;;  %v18680_v4 = vld [vmem:[#allocation91_spill] sm:$0xff]  ;;  %v18681_v33 = vld [vmem:[#allocation86_spill] sm:$0xff] }
 0x401   : > { %18673 = vst [vmem:[#allocation106_spill] sm:$0xff] %v14807_v17  ;;  %v14809_v5 = vmax.f32 %v4877_v42, %v4909_v29  ;;  %v1680_v58 = vpack.c.bf16 %v18675_v38, %v18674_v46  ;;  %7006 = vmatprep.mubr.msk.bf16.mxu1 %vm18676_vm1, %v4963_v56  ;;  %v18679_v7 = vld [vmem:[#allocation88_spill] sm:$0xff]  ;;  %v18682_v57 = vld [vmem:[#allocation89_spill] sm:$0xff]  ;;  %v18684_v1 = vld [vmem:[#allocation103_spill] sm:$0xff]  ;;  %v5220_v52 = vrot.slane %v18691_v62, 7  ;;  %v5248_v6 = vrot.slane %v14429_v26, 7 }
 0x402   : > { %v18683_v25 = vld [vmem:[#allocation97_spill] sm:$0xff]  ;;  %v18685_v56 = vld [vmem:[#allocation50_spill] sm:$0xff]  ;;  %v18686_v28 = vld [vmem:[#allocation52_spill] sm:$0xff]  ;;  %vm18697_vm6 = vcmp.lt.s32.totalorder %v7590_v10, 1  ;;  %v18700_v21 = vrot.slane %v14426_v43, 7 }
 0x403   : > { %v4964_v23 = vpack.c.bf16 %v14388_v54, %v14809_v5  ;;  %vm18687_vm8 = vmmov %vm18676_vm1  ;;  %v18688_v61 = vld [vmem:[#allocation153_spill] sm:$0xff]  ;;  %v18689_v46 = vld [vmem:[#allocation166_spill] sm:$0xff] }
 0x404   : > { %v5217_v63 = vrot.slane %v18688_v61, 7  ;;  %v5218_v38 = vrot.slane %v18689_v46, 7  ;;  %v18690_v47 = vld [vmem:[#allocation163_spill] sm:$0xff]  ;;  %vm18692_vm2 = vmmov %vm18676_vm1  ;;  %v18694_v42 = vld [vmem:[#allocation278_spill] sm:$0xff] }
 0x405   : > { %7007 = vmatmul.mubr.msk.bf16.gmra.mrb[0].mxu1 %vm18687_vm8, %v4964_v23  ;;  %v5219_v27 = vrot.slane %v18690_v47, 7  ;;  %6951 = vmatmul.mubr.msk.bf16.gmra.mrb[60].mxu0 %vm18692_vm2, %v3758_v40  ;;  %vm18693_vm9 = vmmov %vm18676_vm1  ;;  %v5221_v32 = vrot.slane %v18694_v42, 7  ;;  %v18695_v29 = vld [vmem:[#allocation279_spill] sm:$0xff]  ;;  %v5345_v23 = vrot.slane %v18688_v61, 1  ;;  %v18702_v17 = vld [vmem:[#allocation160_spill] sm:$0xff]  ;;  %vm18713_vm2 = vcmp.eq.s32.totalorder %v18712_v50, 1 }
 0x406   : > { %7010 = vmatprep.mubr.msk.bf16.mxu1 %vm18693_vm9, %v4965_v30  ;;  %v5222_v53 = vrot.slane %v18695_v29, 7  ;;  %vm18696_vm11 = vmmov %vm18676_vm1  ;;  %v5346_v30 = vrot.slane %v18689_v46, 1  ;;  %v18703_v51 = vrot.slane %v18702_v17, 7  ;;  %v18708_v15 = vld [vmem:[#allocation5_spill] sm:$0xff]  ;;  %v18710_v59 = vld [vmem:[#allocation2_spill] sm:$0xff] }
 0x407   : > { %6956 = vmatprep.mubr.msk.bf16.mxu0 %vm18696_vm11, %v1678_v49  ;;  %v5277_v18 = vsel %vm18697_vm6, %v5219_v27, %v5220_v52  ;;  %vm18698_vm13 = vmmov %vm18697_vm6  ;;  %vm18709_vm1 = vcmp.eq.s32.totalorder %v18708_v15, 1  ;;  %vm18711_vm8 = vcmp.eq.s32.totalorder %v18710_v59, 1  ;;  %v18716_v8 = vld [vmem:[#allocation7_spill] sm:$0xff]  ;;  %v18718_v20 = vld [vmem:[#allocation6_spill] sm:$0xff] }
 0x408   : > { %v5278_v44 = vsel %vm18698_vm13, %v5218_v38, %v5219_v27  ;;  %vm18699_vm3 = vmmov %vm18697_vm6  ;;  %v5284_v14 = vsel %vm18713_vm2, %v5277_v18, -1e+30  ;;  %vm18717_vm11 = vcmp.eq.s32.totalorder %v18716_v8, 1  ;;  %vm18719_vm6 = vcmp.eq.s32.totalorder %v18718_v20, 1  ;;  %v18736_v41 = vld [vmem:[#allocation41_spill] sm:$0xff] }
 0x409   : > { %v5279_v40 = vsel %vm18699_vm3, %v5217_v63, %v5218_v38  ;;  %vm18701_vm7 = vmmov %vm18699_vm3  ;;  %v5316_v50 = vmax.f32 %v18691_v62, %v5284_v14  ;;  %v5347_v20 = vrot.slane %v18690_v47, 1  ;;  %v18725_v14 = vld [vmem:[#allocation285_spill] sm:$0xff]  ;;  %vm18737_vm2 = vcmp.eq.s32.totalorder %v18736_v41, 1 }
 0x40a   : > { %v5249_v34 = vsel %vm18701_vm7, %v18700_v21, %v5248_v6  ;;  %vm18704_vm0 = vmmov %vm18699_vm3  ;;  %v5282_v9 = vsel %vm18709_vm1, %v5279_v40, -1e+30  ;;  %v5283_v21 = vsel %vm18711_vm8, %v5278_v44, -1e+30  ;;  %vm18722_vm3 = vcmask 15360  }
 0x40b   : > { %v14865_v49 = vsel %vm18704_vm0, %v5222_v53, %v18703_v51  ;;  %vm18705_vm4 = vmmov %vm18704_vm0  ;;  %v18714_v51 = vld [vmem:[#allocation3_spill] sm:$0xff]  ;;  %v5315_v44 = vmax.f32 %v18690_v47, %v5283_v21  ;;  %v17148_v40 = vrot.slane %v18725_v14, 1 }
 0x40c   : > { %v5275_v3 = vsel %vm18705_vm4, %v5221_v32, %v5222_v53  ;;  %vm18706_vm15 = vmmov %vm18704_vm0  ;;  %vm18715_vm9 = vcmp.eq.s32.totalorder %v18714_v51, 1 }
 0x40d   : > { %v5276_v27 = vsel %vm18706_vm15, %v5220_v52, %v5221_v32  ;;  %vm18707_vm12 = vmmov %vm18704_vm0  ;;  %v5286_v52 = vsel %vm18719_vm6, %v5275_v3, -1e+30  ;;  %v5314_v32 = vmax.f32 %v18689_v46, %v5282_v9  ;;  %7011 = vmatmul.mubr.msk.bf16.gmra.mrb[4].mxu1 %vm18722_vm3, %v4966_v37  ;;  %v5348_v9 = vrot.slane %v18691_v62, 1 }
 0x40e   : > { %v5280_v38 = vsel %vm18707_vm12, %v5248_v6, %v5217_v63  ;;  %v5285_v53 = vsel %vm18717_vm11, %v5276_v27, -1e+30  ;;  %v18720_v6 = vld [vmem:[#allocation34_spill] sm:$0xff]  ;;  %v5318_v63 = vmax.f32 %v18695_v29, %v5286_v52  ;;  %v5349_v3 = vrot.slane %v18694_v42, 1  ;;  %vm18723_vm7 = vmmov %vm18722_vm3  ;;  %v18730_v52 = vld [vmem:[#allocation36_spill] sm:$0xff] }
 0x40f   : > { %v5281_v35 = vsel %vm18715_vm9, %v5280_v38, -1e+30  ;;  %vm18721_vm13 = vcmp.eq.s32.totalorder %v18720_v6, 1  ;;  %v5317_v18 = vmax.f32 %v18694_v42, %v5285_v53  ;;  %6957 = vmatmul.mubr.msk.bf16.vlgmr.msra.gmra.mrb[32].mxu0 %vm18723_vm7, %v1679_v2  ;;  %vm18724_vm0 = vmmov %vm18722_vm3  ;;  %v5406_v27 = vsel %vm1035_vm5, %v5346_v30, %v5347_v20 }
 0x410   : > { %v5312_v15 = vsel %vm18721_vm13, %v5249_v34, -1e+30  ;;  %v5313_v59 = vmax.f32 %v18688_v61, %v5281_v35  ;;  %v5350_v35 = vrot.slane %v18695_v29, 1  ;;  %v5351_v34 = vrot.slane %v18702_v17, 1  ;;  %7014 = vmatprep.mubr.msk.bf16.mxu1 %vm18724_vm0, %v4967_v22  ;;  %vm18727_vm4 = vmmov %vm18724_vm0 }
 0x411   : > { %v5344_v8 = vmax.f32 %v14429_v26, %v5312_v15  ;;  %v5407_v37 = vsel %vm1035_vm5, %v5345_v23, %v5346_v30  ;;  %v18726_v38 = vrot.slane %v14429_v26, 1  ;;  %6960 = vmatprep.mubr.msk.bf16.mxu0 %vm18727_vm4, %v1680_v58  ;;  %v5404_v51 = vsel %vm1035_vm5, %v5348_v9, %v5349_v3  ;;  %v18732_v15 = vld [vmem:[#allocation39_spill] sm:$0xff]  ;;  %vm18743_vm6 = vmmov %vm18724_vm0 }
 0x412   : > { %v5402_v2 = vsel %vm1035_vm5, %v5350_v35, %v5351_v34  ;;  %v5403_v22 = vsel %vm1035_vm5, %v5349_v3, %v5350_v35  ;;  %v5405_v53 = vsel %vm1035_vm5, %v5347_v20, %v5348_v9  ;;  %v14924_v30 = vsel %vm1035_vm5, %v5351_v34, %v17148_v40  ;;  %v18738_v9 = vld [vmem:[#allocation40_spill] sm:$0xff]  ;;  %v18740_v40 = vld [vmem:[#allocation73_spill] sm:$0xff]  ;;  %vm18745_vm13 = vmmov %vm18724_vm0 }
 0x413   : > { %v5408_v21 = vsel %vm1035_vm5, %v18726_v38, %v5345_v23  ;;  %v18728_v23 = vld [vmem:[#allocation37_spill] sm:$0xff]  ;;  %vm18731_vm12 = vcmp.eq.s32.totalorder %v18730_v52, 1  ;;  %vm18733_vm1 = vcmp.eq.s32.totalorder %v18732_v15, 1  ;;  %v18734_v38 = vld [vmem:[#allocation38_spill] sm:$0xff]  ;;  %v5413_v20 = vsel %vm18737_vm2, %v5403_v22, -1e+30  ;;  %vm18747_vm3 = vmmov %vm18724_vm0 }
 0x414   : > { %vm18729_vm15 = vcmp.eq.s32.totalorder %v18728_v23, 1  ;;  %v5410_v6 = vsel %vm18731_vm12, %v5406_v27, -1e+30  ;;  %v5411_v35 = vsel %vm18733_vm1, %v5405_v53, -1e+30  ;;  %vm18735_vm8 = vcmp.eq.s32.totalorder %v18734_v38, 1  ;;  %vm18749_vm7 = vmmov %vm18724_vm0 }
 0x415   : > { %v5409_v58 = vsel %vm18729_vm15, %v5407_v37, -1e+30  ;;  %v5412_v3 = vsel %vm18735_vm8, %v5404_v51, -1e+30  ;;  %vm18739_vm9 = vcmp.eq.s32.totalorder %v18738_v9, 1  ;;  %vm18741_vm11 = vcmp.eq.s32.totalorder %v18740_v40, 1 }
 0x416   : > { %v5414_v19 = vsel %vm18739_vm9, %v5402_v2, -1e+30  ;;  %v14938_v34 = vmax.f32 %v5313_v59, %v5409_v58  ;;  %v5440_v37 = vsel %vm18741_vm11, %v5408_v21, -1e+30  ;;  %v14942_v23 = vmax.f32 %v5314_v32, %v5410_v6  ;;  %v18757_v9 = vld [vmem:[#allocation81_spill] sm:$0xff]  ;;  %vm18766_vm9 = vmmov %vm18747_vm3 }
 0x417   : > { %v14944_v27 = vmax.f32 %v5315_v44, %v5411_v35  ;;  %v14946_v52 = vmax.f32 %v5316_v50, %v5412_v3  ;;  %v14948_v53 = vmax.f32 %v5317_v18, %v5413_v20  ;;  %v14950_v51 = vmax.f32 %v5318_v63, %v5414_v19  ;;  %v18753_v35 = vld [vmem:[#allocation84_spill] sm:$0xff]  ;;  %v18755_v3 = vld [vmem:[#allocation82_spill] sm:$0xff]  ;;  %vm18769_vm11 = vmmov %vm18747_vm3 }
 0x418   : > { %v14952_v41 = vmax.f32 %v5344_v8, %v5440_v37  ;;  %v5473_v22 = vrot.slane %v18688_v61, 6  ;;  %v5474_v59 = vrot.slane %v18689_v46, 6  ;;  %v5475_v2 = vrot.slane %v18690_v47, 6 }
 0x419   : > { %v5476_v40 = vrot.slane %v18691_v62, 6  ;;  %v5477_v32 = vrot.slane %v18694_v42, 6  ;;  %v18742_v44 = vpack.c.bf16 %v14418_v45, %v14415_v24  ;;  %v5478_v19 = vrot.slane %v18695_v29, 6 }
 0x41a   : > { %v5479_v50 = vrot.slane %v18702_v17, 6  ;;  %v5504_v18 = vrot.slane %v14429_v26, 6  ;;  %v5601_v63 = vrot.slane %v18688_v61, 2  ;;  %v18744_v8 = vpack.c.bf16 %v18678_v60, %v18677_v31 }
 0x41b   : > { %7015 = vmatmul.mubr.msk.bf16.gmra.mrb[8].mxu1 %vm18743_vm6, %v18742_v44  ;;  %v18746_v21 = vpack.c.bf16 %v14423_v39, %v14421_v11  ;;  %v5532_v24 = vsel %vm1324_vm10, %v5476_v40, %v5477_v32  ;;  %v5533_v45 = vsel %vm1324_vm10, %v5475_v2, %v5476_v40  ;;  %v5534_v58 = vsel %vm1324_vm10, %v5474_v59, %v5475_v2  ;;  %v18759_v2 = vld [vmem:[#allocation90_spill] sm:$0xff]  ;;  %v18763_v44 = vld [vmem:[#allocation155_spill] sm:$0xff]  ;;  %vm18771_vm6 = vmmov %vm18747_vm3 }
 0x41c   : > { %6961 = vmatmul.mubr.msk.bf16.gmra.mrb[36].mxu0 %vm18745_vm13, %v18744_v8  ;;  %v5602_v61 = vrot.slane %v18689_v46, 2  ;;  %v18748_v31 = vpack.c.bf16 %v18680_v4, %v18679_v7  ;;  %v18750_v11 = vrot.slane %v14426_v43, 6  ;;  %v14994_v60 = vsel %vm1324_vm10, %v5478_v19, %v5479_v50  ;;  %v18751_v4 = vld [vmem:[#allocation79_spill] sm:$0xff] }
 0x41d   : > { %7018 = vmatprep.mubr.msk.bf16.mxu1 %vm18747_vm3, %v18746_v21  ;;  %v5531_v6 = vsel %vm1324_vm10, %v5477_v32, %v5478_v19  ;;  %v5535_v46 = vsel %vm1324_vm10, %v5473_v22, %v5474_v59  ;;  %v5536_v7 = vsel %vm1324_vm10, %v5504_v18, %v5473_v22  ;;  %vm18752_vm0 = vcmp.eq.s32.totalorder %v18751_v4, 1  ;;  %v18761_v32 = vld [vmem:[#allocation87_spill] sm:$0xff] }
 0x41e   : > { %6964 = vmatprep.mubr.msk.bf16.mxu0 %vm18749_vm7, %v18748_v31  ;;  %v5505_v39 = vsel %vm1324_vm10, %v18750_v11, %v5504_v18  ;;  %v5538_v15 = vsel %vm18752_vm0, %v5535_v46, -1e+30  ;;  %vm18754_vm4 = vcmp.eq.s32.totalorder %v18753_v35, 1  ;;  %vm18756_vm15 = vcmp.eq.s32.totalorder %v18755_v3, 1 }
 0x41f   : > { %v5539_v38 = vsel %vm18754_vm4, %v5534_v58, -1e+30  ;;  %v5540_v20 = vsel %vm18756_vm15, %v5533_v45, -1e+30  ;;  %vm18758_vm12 = vcmp.eq.s32.totalorder %v18757_v9, 1  ;;  %vm18760_vm1 = vcmp.eq.s32.totalorder %v18759_v2, 1 }
 0x420   : > { %v5537_v37 = vsel %vm18758_vm12, %v5536_v7, -1e+30  ;;  %v5541_v40 = vsel %vm18760_vm1, %v5532_v24, -1e+30  ;;  %vm18762_vm8 = vcmp.eq.s32.totalorder %v18761_v32, 1  ;;  %v5570_v22 = vmax.f32 %v14942_v23, %v5538_v15  ;;  %v18776_v7 = vld [vmem:[#allocation170_spill] sm:$0xff] }
 0x421   : > { %v5542_v59 = vsel %vm18762_vm8, %v5531_v6, -1e+30  ;;  %vm18764_vm2 = vcmp.eq.s32.totalorder %v18763_v44, 1  ;;  %v5569_v18 = vmax.f32 %v14938_v34, %v5537_v37  ;;  %v5571_v8 = vmax.f32 %v14944_v27, %v5539_v38  ;;  %v18774_v6 = vld [vmem:[#allocation161_spill] sm:$0xff]  ;;  %v18780_v38 = vld [vmem:[#allocation176_spill] sm:$0xff]  ;;  %v18784_v9 = vld [vmem:[#allocation131_spill] sm:$0xff] }
 0x422   : > { %v5568_v19 = vsel %vm18764_vm2, %v5505_v39, -1e+30  ;;  %v5572_v21 = vmax.f32 %v14946_v52, %v5540_v20  ;;  %v5573_v45 = vmax.f32 %v14948_v53, %v5541_v40  ;;  %v5574_v58 = vmax.f32 %v14950_v51, %v5542_v59  ;;  %v18778_v15 = vld [vmem:[#allocation169_spill] sm:$0xff] }
 0x423   : > { %v5600_v24 = vmax.f32 %v14952_v41, %v5568_v19  ;;  %v5603_v31 = vrot.slane %v18690_v47, 2  ;;  %v5604_v11 = vrot.slane %v18691_v62, 2  ;;  %v5605_v23 = vrot.slane %v18694_v42, 2 }
 0x424   : > { %v5606_v39 = vrot.slane %v18695_v29, 2  ;;  %v5607_v34 = vrot.slane %v18702_v17, 2  ;;  %v18765_v27 = vpack.c.bf16 %v14429_v26, %v14426_v43  ;;  %v5608_v52 = vrot.slane %v18725_v14, 2 }
 0x425   : > { %v5662_v53 = vsel %vm1421_vm14, %v5602_v61, %v5603_v31  ;;  %v5663_v47 = vsel %vm1421_vm14, %v5601_v63, %v5602_v61  ;;  %v18767_v62 = vrot.slane %v14429_v26, 2  ;;  %v18768_v29 = vpack.c.bf16 %v18682_v57, %v18681_v33  ;;  %v18772_v57 = vld [vmem:[#allocation162_spill] sm:$0xff] }
 0x426   : > { %7019 = vmatmul.mubr.msk.bf16.gmra.mrb[12].mxu1 %vm18766_vm9, %v18765_v27  ;;  %v5658_v43 = vsel %vm1421_vm14, %v5606_v39, %v5607_v34  ;;  %v5659_v51 = vsel %vm1421_vm14, %v5605_v23, %v5606_v39  ;;  %v5660_v41 = vsel %vm1421_vm14, %v5604_v11, %v5605_v23  ;;  %v5661_v26 = vsel %vm1421_vm14, %v5603_v31, %v5604_v11  ;;  %v18786_v31 = vld [vmem:[#allocation149_spill] sm:$0xff]  ;;  %v18788_v23 = vld [vmem:[#allocation208_spill] sm:$0xff] }
 0x427   : > { %v5664_v42 = vsel %vm1421_vm14, %v18767_v62, %v5601_v63  ;;  %6965 = vmatmul.mubr.msk.bf16.gmra.mrb[40].mxu0 %vm18769_vm11, %v18768_v29  ;;  %v18770_v63 = vpack.c.bf16 %v18684_v1, %v18683_v25  ;;  %v5657_v33 = vsel %vm1421_vm14, %v5607_v34, %v5608_v52  ;;  %vm18773_vm13 = vcmp.eq.s32.totalorder %v18772_v57, 1  ;;  %v18782_v1 = vld [vmem:[#allocation175_spill] sm:$0xff]  ;;  %v18796_v34 = vld [vmem:[#allocation222_spill] sm:$0xff] }
 0x428   : > { %v5665_v61 = vsel %vm18773_vm13, %v5663_v47, -1e+30  ;;  %vm18775_vm3 = vcmp.eq.s32.totalorder %v18774_v6, 1  ;;  %vm18777_vm7 = vcmp.eq.s32.totalorder %v18776_v7, 1  ;;  %vm18779_vm0 = vcmp.eq.s32.totalorder %v18778_v15, 1  ;;  %v18809_v6 = vld [vmem:[#allocation8_spill] sm:$0xff] }
 0x429   : > { %6968 = vmatprep.mubr.msk.bf16.mxu0 %vm18771_vm6, %v18770_v63  ;;  %v5666_v46 = vsel %vm18775_vm3, %v5662_v53, -1e+30  ;;  %v5667_v4 = vsel %vm18777_vm7, %v5661_v26, -1e+30  ;;  %v5668_v35 = vsel %vm18779_vm0, %v5660_v41, -1e+30  ;;  %v15071_v20 = vmax.f32 %v5569_v18, %v5665_v61 }
 0x42a   : > { %vm18781_vm4 = vcmp.eq.s32.totalorder %v18780_v38, 1  ;;  %vm18783_vm15 = vcmp.eq.s32.totalorder %v18782_v1, 1  ;;  %vm18785_vm12 = vcmp.eq.s32.totalorder %v18784_v9, 1  ;;  %v15075_v2 = vmax.f32 %v5570_v22, %v5666_v46  ;;  %v18798_v53 = vld [vmem:[#allocation238_spill] sm:$0xff]  ;;  %v18803_v41 = vld [vmem:[#allocation237_spill] sm:$0xff] }
 0x42b   : > { %v5669_v25 = vsel %vm18781_vm4, %v5659_v51, -1e+30  ;;  %v5670_v3 = vsel %vm18783_vm15, %v5658_v43, -1e+30  ;;  %v5696_v37 = vsel %vm18785_vm12, %v5664_v42, -1e+30  ;;  %v15077_v40 = vmax.f32 %v5571_v8, %v5667_v4 }
 0x42c   : > { %v15079_v32 = vmax.f32 %v5572_v21, %v5668_v35  ;;  %v15081_v59 = vmax.f32 %v5573_v45, %v5669_v25  ;;  %v15083_v44 = vmax.f32 %v5574_v58, %v5670_v3  ;;  %v15085_v19 = vmax.f32 %v5600_v24, %v5696_v37  ;;  %v18790_v8 = vld [vmem:[#allocation120_spill] sm:$0xff]  ;;  %v18792_v45 = vld [vmem:[#allocation223_spill] sm:$0xff]  ;;  %v18805_v63 = vld [vmem:[#allocation9_spill] sm:$0xff] }
 0x42d   : > { %vm18787_vm1 = vcmp.eq.s32.totalorder %v18786_v31, 1  ;;  %vm18789_vm8 = vcmp.eq.s32.totalorder %v18788_v23, 1  ;;  %vm18791_vm2 = vcmp.eq.s32.totalorder %v18790_v8, 1  ;;  %vm18793_vm9 = vcmp.eq.s32.totalorder %v18792_v45, 1  ;;  %v18794_v24 = vld [vmem:[#allocation144_spill] sm:$0xff]  ;;  %v18811_v4 = vld [vmem:[#allocation290_spill] sm:$0xff] }
 0x42e   : > { %v5729_v18 = vsel %vm18787_vm1, %v14737_v13, -1e+30  ;;  %v5793_v22 = vsel %vm18789_vm8, %v15077_v40, -1e+30  ;;  %v5794_v21 = vsel %vm18791_vm2, %v15079_v32, -1e+30  ;;  %v18807_v61 = vpack.c.bf16 %v18686_v28, %v18685_v56 }
 0x42f   : > { %v5761_v11 = vmax.f32 %v15071_v20, %v5729_v18  ;;  %v5857_v58 = vsel %vm18793_vm9, %v14733_v0, -1e+30  ;;  %vm18795_vm11 = vcmp.eq.s32.totalorder %v18794_v24, 1  ;;  %vm18797_vm6 = vcmp.eq.s32.totalorder %v18796_v34, 1  ;;  %v18812_v35 = vld [vmem:[#allocation43_spill] sm:$0xff]  ;;  %v18817_v23 = vld [vmem:[#allocation42_spill] sm:$0xff] }
 0x430   : > { %v5730_v39 = vsel %vm18795_vm11, %v15085_v19, -1e+30  ;;  %v5858_v27 = vsel %vm18797_vm6, %v14735_v55, -1e+30  ;;  %vm18799_vm13 = vcmp.eq.s32.totalorder %v18798_v53, 1  ;;  %v18800_v62 = vrot.slane %v18725_v14, 7 }
 0x431   : > { %v5921_v47 = vsel %vm18799_vm13, %v15081_v59, -1e+30  ;;  %v18801_v42 = vrot.slane %v18702_v17, 7  ;;  %vm18802_vm3 = vcmp.lt.s32.totalorder %v7590_v10, 1  ;;  %v5762_v43 = vmax.f32 %v15075_v2, %v5730_v39  ;;  %v18815_v37 = vld [vmem:[#allocation95_spill] sm:$0xff]  ;;  %v18819_v45 = vld [vmem:[#allocation94_spill] sm:$0xff] }
 0x432   : > { %v5825_v51 = vmax.f32 %v5761_v11, %v5793_v22  ;;  %vm18804_vm7 = vcmp.eq.s32.totalorder %v18803_v41, 1  ;;  %vm18806_vm0 = vcmp.eq.s32.totalorder %v18805_v63, 1  ;;  %vm18808_vm4 = vcmask 15360   ;;  %v18821_v34 = vld [vmem:[#allocation182_spill] sm:$0xff]  ;;  %v18823_v53 = vld [vmem:[#allocation181_spill] sm:$0xff]  ;;  %v18831_v63 = vld [vmem:[#allocation215_spill] sm:$0xff] }
 0x433   : > { %v5273_v29 = vsel %vm18802_vm3, %v18801_v42, %v18800_v62  ;;  %v5922_v26 = vsel %vm18804_vm7, %v15083_v44, -1e+30  ;;  %v5287_v57 = vsel %vm18806_vm0, %v14865_v49, -1e+30  ;;  %6969 = vmatmul.mubr.msk.bf16.gmra.mrb[44].mxu0 %vm18808_vm4, %v18807_v61  ;;  %vm18810_vm15 = vcmp.eq.s32.totalorder %v18809_v6, 1 }
 0x434   : > { %v5288_v46 = vsel %vm18810_vm15, %v5273_v29, -1e+30  ;;  %v5319_v7 = vmax.f32 %v18702_v17, %v5287_v57  ;;  %v5353_v15 = vrot.slane %v18811_v4, 1  ;;  %vm18813_vm12 = vcmp.eq.s32.totalorder %v18812_v35, 1  ;;  %v18827_v29 = vld [vmem:[#allocation151_spill] sm:$0xff]  ;;  %v18835_v35 = vld [vmem:[#allocation226_spill] sm:$0xff] }
 0x435   : > { %v5415_v38 = vsel %vm18813_vm12, %v14924_v30, -1e+30  ;;  %v5826_v25 = vmax.f32 %v5762_v43, %v5794_v21  ;;  %v5889_v1 = vmax.f32 %v5825_v51, %v5857_v58  ;;  %v5320_v49 = vmax.f32 %v18725_v14, %v5288_v46  ;;  %v18833_v46 = vld [vmem:[#allocation227_spill] sm:$0xff] }
 0x436   : > { %v5480_v3 = vrot.slane %v18725_v14, 6  ;;  %v18814_v56 = vrot.slane %v18725_v14, 1  ;;  %v5447_v9 = vmax.f32 %v5319_v7, %v5415_v38  ;;  %vm18816_vm1 = vcmp.eq.s32.totalorder %v18815_v37, 1 }
 0x437   : > { %v5543_v31 = vsel %vm18816_vm1, %v14994_v60, -1e+30  ;;  %v5609_v18 = vrot.slane %v18811_v4, 2  ;;  %v5890_v11 = vmax.f32 %v5826_v25, %v5858_v27  ;;  %v5953_v30 = vmax.f32 %v5889_v1, %v5921_v47  ;;  %v18825_v47 = vld [vmem:[#allocation154_spill] sm:$0xff]  ;;  %v18838_v1 = vld [vmem:[#allocation243_spill] sm:$0xff] }
 0x438   : > { %v5400_v28 = vsel %vm1035_vm5, %v18814_v56, %v5353_v15  ;;  %vm18818_vm8 = vcmp.eq.s32.totalorder %v18817_v23, 1  ;;  %v5529_v8 = vsel %vm1324_vm10, %v5479_v50, %v5480_v3  ;;  %vm18820_vm2 = vcmp.eq.s32.totalorder %v18819_v45, 1  ;;  %v18843_v23 = vld [vmem:[#allocation165_spill] sm:$0xff] }
 0x439   : > { %v5416_v22 = vsel %vm18818_vm8, %v5400_v28, -1e+30  ;;  %v5544_v58 = vsel %vm18820_vm2, %v5529_v8, -1e+30  ;;  %v5575_v24 = vmax.f32 %v5447_v9, %v5543_v31  ;;  %v5656_v60 = vsel %vm1421_vm14, %v5608_v52, %v5609_v18  ;;  %v18840_v28 = vld [vmem:[#allocation294_spill] sm:$0xff] }
 0x43a   : > { %v5448_v21 = vmax.f32 %v5320_v49, %v5416_v22  ;;  %v5954_v39 = vmax.f32 %v5890_v11, %v5922_v26  ;;  %vm18822_vm9 = vcmp.eq.s32.totalorder %v18821_v34, 1  ;;  %vm18824_vm11 = vcmp.eq.s32.totalorder %v18823_v53, 1  ;;  %v18841_v31 = vld [vmem:[#allocation242_spill] sm:$0xff] }
 0x43b   : > { %v5671_v27 = vsel %vm18822_vm9, %v5657_v33, -1e+30  ;;  %v5672_v17 = vsel %vm18824_vm11, %v5656_v60, -1e+30  ;;  %vm18826_vm6 = vcmp.eq.s32.totalorder %v18825_v47, 1  ;;  %vm18828_vm13 = vcmp.eq.s32.totalorder %v18827_v29, 1 }
 0x43c   : > { %v5731_v50 = vsel %vm18826_vm6, %v15071_v20, -1e+30  ;;  %v5576_v62 = vmax.f32 %v5448_v21, %v5544_v58  ;;  %v15162_v42 = vmax.f32 %v5575_v24, %v5671_v27  ;;  %v5732_v43 = vsel %vm18828_vm13, %v15075_v2, -1e+30  ;;  %v18829_v33 = vld [vmem:[#allocation212_spill] sm:$0xff]  ;;  %v18849_v27 = vld [vmem:[#allocation10_spill] sm:$0xff] }
 0x43d   : > { %v5763_v52 = vmax.f32 %v15077_v40, %v5731_v50  ;;  %v5985_v51 = vpack.c.bf16 %v5954_v39, %v5953_v30  ;;  %v5764_v41 = vmax.f32 %v15079_v32, %v5732_v43  ;;  %vm18830_vm3 = vcmp.eq.s32.totalorder %v18829_v33, 1  ;;  %v18847_v39 = vld [vmem:[#allocation11_spill] sm:$0xff]  ;;  %v18851_v29 = vld [vmem:[#allocation45_spill] sm:$0xff] }
 0x43e   : > { %v5795_v26 = vsel %vm18830_vm3, %v15081_v59, -1e+30  ;;  %vm18832_vm7 = vcmp.eq.s32.totalorder %v18831_v63, 1  ;;  %v15175_v61 = vmax.f32 %v5576_v62, %v5672_v17  ;;  %vm18834_vm0 = vcmp.eq.s32.totalorder %v18833_v46, 1  ;;  %v18855_v46 = vld [vmem:[#allocation98_spill] sm:$0xff] }
 0x43f   : > { %v5796_v57 = vsel %vm18832_vm7, %v15083_v44, -1e+30  ;;  %v5827_v6 = vmax.f32 %v5763_v52, %v5795_v26  ;;  %v5859_v7 = vsel %vm18834_vm0, %v14737_v13, -1e+30  ;;  %vm18836_vm4 = vcmp.eq.s32.totalorder %v18835_v35, 1  ;;  %v18853_v52 = vld [vmem:[#allocation44_spill] sm:$0xff] }
 0x440   : > { %v5860_v38 = vsel %vm18836_vm4, %v15085_v19, -1e+30  ;;  %vm18837_vm15 = vcmask 15360   ;;  %v5828_v25 = vmax.f32 %v5764_v41, %v5796_v57  ;;  %vm18839_vm12 = vcmp.eq.s32.totalorder %v18838_v1, 1 }
 0x441   : > { %7024 = vmatprep.mubr.msk.bf16.mxu1 %vm18837_vm15, %v5985_v51  ;;  %v5923_v49 = vsel %vm18839_vm12, %v15162_v42, -1e+30  ;;  %v5225_v56 = vrot.slane %v18811_v4, 7  ;;  %v5226_v9 = vrot.slane %v18840_v28, 7  ;;  %v5891_v37 = vmax.f32 %v5827_v6, %v5859_v7  ;;  %vm18857_vm7 = vmmov %vm18837_vm15 }
 0x442   : > { %vm18842_vm1 = vcmp.eq.s32.totalorder %v18841_v31, 1  ;;  %v5354_v30 = vrot.slane %v18840_v28, 1  ;;  %v5355_v22 = vrot.slane %v18843_v23, 1  ;;  %v5892_v8 = vmax.f32 %v5828_v25, %v5860_v38  ;;  %v18858_v38 = vld [vmem:[#allocation96_spill] sm:$0xff] }
 0x443   : > { %v5924_v11 = vsel %vm18842_vm1, %v15175_v61, -1e+30  ;;  %vm18844_vm8 = vcmp.lt.s32.totalorder %v7590_v10, 1  ;;  %v18845_v45 = vrot.slane %v18725_v14, 7  ;;  %v5481_v24 = vrot.slane %v18811_v4, 6 }
 0x444   : > { %v5271_v21 = vsel %vm18844_vm8, %v5225_v56, %v5226_v9  ;;  %vm18846_vm2 = vmmov %vm18844_vm8  ;;  %v5955_v60 = vmax.f32 %v5891_v37, %v5923_v49  ;;  %vm18848_vm9 = vcmp.eq.s32.totalorder %v18847_v39, 1  ;;  %vm18850_vm11 = vcmp.eq.s32.totalorder %v18849_v27, 1 }
 0x445   : > { %v5272_v58 = vsel %vm18846_vm2, %v18845_v45, %v5225_v56  ;;  %v5290_v53 = vsel %vm18850_vm11, %v5271_v21, -1e+30  ;;  %v5398_v17 = vsel %vm1035_vm5, %v5354_v30, %v5355_v22  ;;  %v5956_v47 = vmax.f32 %v5892_v8, %v5924_v11  ;;  %v18862_v56 = vld [vmem:[#allocation159_spill] sm:$0xff]  ;;  %v18864_v8 = vld [vmem:[#allocation26_spill] sm:$0xff] }
 0x446   : > { %v5289_v34 = vsel %vm18848_vm9, %v5272_v58, -1e+30  ;;  %v5322_v50 = vmax.f32 %v18840_v28, %v5290_v53  ;;  %v5399_v62 = vsel %vm1035_vm5, %v5353_v15, %v5354_v30  ;;  %vm18852_vm6 = vcmp.eq.s32.totalorder %v18851_v29, 1  ;;  %v18866_v45 = vld [vmem:[#allocation27_spill] sm:$0xff] }
 0x447   : > { %v5321_v14 = vmax.f32 %v18811_v4, %v5289_v34  ;;  %v5417_v43 = vsel %vm18852_vm6, %v5399_v62, -1e+30  ;;  %vm18854_vm13 = vcmp.eq.s32.totalorder %v18853_v52, 1  ;;  %v5482_v41 = vrot.slane %v18840_v28, 6  ;;  %v18876_v52 = vld [vmem:[#allocation247_spill] sm:$0xff] }
 0x448   : > { %v5418_v51 = vsel %vm18854_vm13, %v5398_v17, -1e+30  ;;  %v5528_v33 = vsel %vm1324_vm10, %v5480_v3, %v5481_v24  ;;  %v5986_v26 = vpack.c.bf16 %v5956_v47, %v5955_v60  ;;  %vm18856_vm3 = vcmp.eq.s32.totalorder %v18855_v46, 1  ;;  %v18860_v3 = vld [vmem:[#allocation168_spill] sm:$0xff]  ;;  %v18872_v47 = vld [vmem:[#allocation235_spill] sm:$0xff] }
 0x449   : > { %v5449_v63 = vmax.f32 %v5321_v14, %v5417_v43  ;;  %v5450_v57 = vmax.f32 %v5322_v50, %v5418_v51  ;;  %v5527_v6 = vsel %vm1324_vm10, %v5481_v24, %v5482_v41  ;;  %v5545_v15 = vsel %vm18856_vm3, %v5528_v33, -1e+30  ;;  %v18868_v60 = vld [vmem:[#allocation220_spill] sm:$0xff]  ;;  %v18874_v50 = vld [vmem:[#allocation234_spill] sm:$0xff] }
 0x44a   : > { %v5610_v7 = vrot.slane %v18840_v28, 2  ;;  %v5611_v35 = vrot.slane %v18843_v23, 2  ;;  %7025 = vmatmul.mubr.msk.bf16.vlgmr.msra.gmra.mrb[16].mxu1 %vm18857_vm7, %v5986_v26  ;;  %vm18859_vm0 = vcmp.eq.s32.totalorder %v18858_v38, 1  ;;  %vm18861_vm4 = vcmp.eq.s32.totalorder %v18860_v3, 1  ;;  %v18878_v33 = vld [vmem:[#allocation246_spill] sm:$0xff]  ;;  %v18884_v3 = vld [vmem:[#allocation13_spill] sm:$0xff] }
 0x44b   : > { %v5546_v25 = vsel %vm18859_vm0, %v5527_v6, -1e+30  ;;  %v5577_v1 = vmax.f32 %v5449_v63, %v5545_v15  ;;  %v5733_v49 = vsel %vm18861_vm4, %v15077_v40, -1e+30  ;;  %vm18863_vm15 = vcmp.eq.s32.totalorder %v18862_v56, 1  ;;  %v18880_v63 = vld [vmem:[#allocation301_spill] sm:$0xff] }
 0x44c   : > { %v5734_v37 = vsel %vm18863_vm15, %v15079_v32, -1e+30  ;;  %v5578_v31 = vmax.f32 %v5450_v57, %v5546_v25  ;;  %v5654_v28 = vsel %vm1421_vm14, %v5610_v7, %v5611_v35  ;;  %v5655_v11 = vsel %vm1421_vm14, %v5609_v18, %v5610_v7  ;;  %v18870_v18 = vld [vmem:[#allocation219_spill] sm:$0xff] }
 0x44d   : > { %v5765_v30 = vmax.f32 %v15081_v59, %v5733_v49  ;;  %vm18865_vm12 = vcmp.eq.s32.totalorder %v18864_v8, 1  ;;  %vm18867_vm1 = vcmp.eq.s32.totalorder %v18866_v45, 1  ;;  %v5766_v24 = vmax.f32 %v15083_v44, %v5734_v37  ;;  %v18882_v7 = vld [vmem:[#allocation179_spill] sm:$0xff] }
 0x44e   : > { %v5673_v21 = vsel %vm18865_vm12, %v5655_v11, -1e+30  ;;  %v5674_v58 = vsel %vm18867_vm1, %v5654_v28, -1e+30  ;;  %vm18869_vm8 = vcmp.eq.s32.totalorder %v18868_v60, 1  ;;  %vm18871_vm2 = vcmp.eq.s32.totalorder %v18870_v18, 1 }
 0x44f   : > { %v5797_v39 = vsel %vm18869_vm8, %v15162_v42, -1e+30  ;;  %v15250_v34 = vmax.f32 %v5577_v1, %v5673_v21  ;;  %v15252_v4 = vmax.f32 %v5578_v31, %v5674_v58  ;;  %v5798_v27 = vsel %vm18871_vm2, %v15175_v61, -1e+30  ;;  %v18886_v31 = vld [vmem:[#allocation12_spill] sm:$0xff]  ;;  %v18888_v21 = vld [vmem:[#allocation46_spill] sm:$0xff] }
 0x450   : > { %v5829_v53 = vmax.f32 %v5765_v30, %v5797_v39  ;;  %v5830_v17 = vmax.f32 %v5766_v24, %v5798_v27  ;;  %vm18873_vm9 = vcmp.eq.s32.totalorder %v18872_v47, 1  ;;  %vm18875_vm11 = vcmp.eq.s32.totalorder %v18874_v50, 1  ;;  %v18890_v60 = vld [vmem:[#allocation47_spill] sm:$0xff] }
 0x451   : > { %v5861_v14 = vsel %vm18873_vm9, %v15071_v20, -1e+30  ;;  %v5862_v62 = vsel %vm18875_vm11, %v15075_v2, -1e+30  ;;  %v5227_v29 = vrot.slane %v18843_v23, 7  ;;  %vm18877_vm6 = vcmp.eq.s32.totalorder %v18876_v52, 1 }
 0x452   : > { %v5893_v43 = vmax.f32 %v5829_v53, %v5861_v14  ;;  %v5925_v51 = vsel %vm18877_vm6, %v15250_v34, -1e+30  ;;  %vm18879_vm13 = vcmp.eq.s32.totalorder %v18878_v33, 1  ;;  %v5228_v57 = vrot.slane %v18880_v63, 7  ;;  %v18895_v14 = vld [vmem:[#allocation102_spill] sm:$0xff] }
 0x453   : > { %v5926_v26 = vsel %vm18879_vm13, %v15252_v4, -1e+30  ;;  %v5894_v6 = vmax.f32 %v5830_v17, %v5862_v62  ;;  %vm18881_vm3 = vcmp.lt.s32.totalorder %v7590_v10, 1  ;;  %v5356_v15 = vrot.slane %v18880_v63, 1  ;;  %v18899_v33 = vld [vmem:[#allocation190_spill] sm:$0xff] }
 0x454   : > { %v5270_v46 = vsel %vm18881_vm3, %v5226_v9, %v5227_v29  ;;  %v5357_v38 = vrot.slane %v18882_v7, 1  ;;  %v5957_v25 = vmax.f32 %v5893_v43, %v5925_v51  ;;  %vm18883_vm7 = vmmov %vm18881_vm3  ;;  %vm18885_vm0 = vcmp.eq.s32.totalorder %v18884_v3, 1  ;;  %v18905_v3 = vld [vmem:[#allocation188_spill] sm:$0xff] }
 0x455   : > { %v5269_v1 = vsel %vm18883_vm7, %v5227_v29, %v5228_v57  ;;  %v5291_v49 = vsel %vm18885_vm0, %v5270_v46, -1e+30  ;;  %v5483_v56 = vrot.slane %v18843_v23, 6  ;;  %v5958_v37 = vmax.f32 %v5894_v6, %v5926_v26  ;;  %v18897_v29 = vld [vmem:[#allocation174_spill] sm:$0xff] }
 0x456   : > { %vm18887_vm4 = vcmp.eq.s32.totalorder %v18886_v31, 1  ;;  %v5323_v11 = vmax.f32 %v18843_v23, %v5291_v49  ;;  %v5396_v9 = vsel %vm1035_vm5, %v5356_v15, %v5357_v38  ;;  %v5397_v8 = vsel %vm1035_vm5, %v5355_v22, %v5356_v15  ;;  %v18892_v22 = vld [vmem:[#allocation104_spill] sm:$0xff] }
 0x457   : > { %v5292_v28 = vsel %vm18887_vm4, %v5269_v1, -1e+30  ;;  %vm18889_vm15 = vcmp.eq.s32.totalorder %v18888_v21, 1  ;;  %v5484_v58 = vrot.slane %v18880_v63, 6  ;;  %v5987_v24 = vpack.c.bf16 %v5958_v37, %v5957_v25  ;;  %v18903_v25 = vld [vmem:[#allocation231_spill] sm:$0xff]  ;;  %v18907_v37 = vld [vmem:[#allocation245_spill] sm:$0xff] }
 0x458   : > { %v5324_v30 = vmax.f32 %v18880_v63, %v5292_v28  ;;  %v5420_v45 = vsel %vm18889_vm15, %v5396_v9, -1e+30  ;;  %vm18891_vm12 = vcmp.eq.s32.totalorder %v18890_v60, 1  ;;  %v5526_v18 = vsel %vm1324_vm10, %v5482_v41, %v5483_v56  ;;  %v18909_v28 = vld [vmem:[#allocation244_spill] sm:$0xff]  ;;  %v18911_v21 = vld [vmem:[#allocation249_spill] sm:$0xff] }
 0x459   : > { %v5419_v39 = vsel %vm18891_vm12, %v5397_v8, -1e+30  ;;  %v5612_v27 = vrot.slane %v18880_v63, 2  ;;  %v5525_v23 = vsel %vm1324_vm10, %v5483_v56, %v5484_v58  ;;  %vm18893_vm1 = vcmp.eq.s32.totalorder %v18892_v22, 1  ;;  %v18901_v63 = vld [vmem:[#allocation172_spill] sm:$0xff]  ;;  %v18916_v22 = vld [vmem:[#allocation257_spill] sm:$0xff] }
 0x45a   : > { %v5451_v53 = vmax.f32 %v5323_v11, %v5419_v39  ;;  %v5452_v17 = vmax.f32 %v5324_v30, %v5420_v45  ;;  %v5547_v47 = vsel %vm18893_vm1, %v5526_v18, -1e+30  ;;  %vm18894_vm8 = vcmask 15360   ;;  %v18915_v18 = vld [vmem:[#allocation304_spill] sm:$0xff] }
 0x45b   : > { %7028 = vmatprep.mubr.msk.bf16.mxu1 %vm18894_vm8, %v5987_v24  ;;  %vm18896_vm2 = vcmp.eq.s32.totalorder %v18895_v14, 1  ;;  %v5613_v62 = vrot.slane %v18882_v7, 2  ;;  %v5653_v41 = vsel %vm1421_vm14, %v5611_v35, %v5612_v27  ;;  %vm18898_vm9 = vcmp.eq.s32.totalorder %v18897_v29, 1  ;;  %v18913_v24 = vld [vmem:[#allocation255_spill] sm:$0xff] }
 0x45c   : > { %v5548_v50 = vsel %vm18896_vm2, %v5525_v23, -1e+30  ;;  %v5735_v43 = vsel %vm18898_vm9, %v15081_v59, -1e+30  ;;  %v5579_v52 = vmax.f32 %v5451_v53, %v5547_v47  ;;  %vm18900_vm11 = vcmp.eq.s32.totalorder %v18899_v33, 1  ;;  %v18918_v14 = vld [vmem:[#allocation183_spill] sm:$0xff] }
 0x45d   : > { %v5580_v51 = vmax.f32 %v5452_v17, %v5548_v50  ;;  %v5675_v26 = vsel %vm18900_vm11, %v5653_v41, -1e+30  ;;  %vm18902_vm6 = vcmp.eq.s32.totalorder %v18901_v63, 1  ;;  %v5652_v46 = vsel %vm1421_vm14, %v5612_v27, %v5613_v62 }
 0x45e   : > { %v5736_v6 = vsel %vm18902_vm6, %v15083_v44, -1e+30  ;;  %v5767_v15 = vmax.f32 %v15162_v42, %v5735_v43  ;;  %vm18904_vm13 = vcmp.eq.s32.totalorder %v18903_v25, 1  ;;  %vm18906_vm3 = vcmp.eq.s32.totalorder %v18905_v3, 1 }
 0x45f   : > { %v5768_v35 = vmax.f32 %v15175_v61, %v5736_v6  ;;  %v5799_v1 = vsel %vm18904_vm13, %v15250_v34, -1e+30  ;;  %v5676_v49 = vsel %vm18906_vm3, %v5652_v46, -1e+30  ;;  %v15325_v56 = vmax.f32 %v5579_v52, %v5675_v26  ;;  %v18921_v26 = vld [vmem:[#allocation15_spill] sm:$0xff]  ;;  %v18923_v6 = vld [vmem:[#allocation14_spill] sm:$0xff] }
 0x460   : > { %vm18908_vm7 = vcmp.eq.s32.totalorder %v18907_v37, 1  ;;  %vm18910_vm0 = vcmp.eq.s32.totalorder %v18909_v28, 1  ;;  %v15333_v9 = vmax.f32 %v5580_v51, %v5676_v49  ;;  %v5831_v30 = vmax.f32 %v5767_v15, %v5799_v1  ;;  %v15359_v15 = vpop.f32.mrb[48].mxu0  ;;  %v18927_v37 = vld [vmem:[#allocation48_spill] sm:$0xff] }
 0x461   : > { %v5800_v31 = vsel %vm18908_vm7, %v15252_v4, -1e+30  ;;  %v5863_v11 = vsel %vm18910_vm0, %v15077_v40, -1e+30  ;;  %vm18912_vm4 = vcmp.eq.s32.totalorder %v18911_v21, 1  ;;  %vm18914_vm15 = vcmp.eq.s32.totalorder %v18913_v24, 1 }
 0x462   : > { %v5832_v8 = vmax.f32 %v5768_v35, %v5800_v31  ;;  %v5864_v45 = vsel %vm18912_vm4, %v15079_v32, -1e+30  ;;  %v5927_v60 = vsel %vm18914_vm15, %v15325_v56, -1e+30  ;;  %v5229_v39 = vrot.slane %v18882_v7, 7  ;;  %v15369_v3 = vpop.f32.mrb[49].mxu0 }
 0x463   : > { %v5230_v27 = vrot.slane %v18915_v18, 7  ;;  %v5358_v53 = vrot.slane %v18915_v18, 1  ;;  %v5895_v17 = vmax.f32 %v5831_v30, %v5863_v11  ;;  %vm18917_vm12 = vcmp.eq.s32.totalorder %v18916_v22, 1  ;;  %v15376_v11 = vpop.f32.mrb[50].mxu0  ;;  %v18929_v21 = vld [vmem:[#allocation110_spill] sm:$0xff] }
 0x464   : > { %v5896_v23 = vmax.f32 %v5832_v8, %v5864_v45  ;;  %v5928_v47 = vsel %vm18917_vm12, %v15333_v9, -1e+30  ;;  %v5359_v50 = vrot.slane %v18918_v14, 1  ;;  %vm18919_vm1 = vcmp.lt.s32.totalorder %v7590_v10, 1 }
 0x465   : > { %v5267_v41 = vsel %vm18919_vm1, %v5229_v39, %v5230_v27  ;;  %vm18920_vm8 = vmmov %vm18919_vm1  ;;  %v5395_v43 = vsel %vm1035_vm5, %v5357_v38, %v5358_v53  ;;  %v5485_v52 = vrot.slane %v18882_v7, 6  ;;  %v5959_v51 = vmax.f32 %v5895_v17, %v5927_v60  ;;  %v18925_v38 = vld [vmem:[#allocation49_spill] sm:$0xff]  ;;  %v15381_v60 = vpop.f32.mrb[51].mxu0 }
 0x466   : > { %v5268_v29 = vsel %vm18920_vm8, %v5228_v57, %v5229_v39  ;;  %v5960_v33 = vmax.f32 %v5896_v23, %v5928_v47  ;;  %vm18922_vm2 = vcmp.eq.s32.totalorder %v18921_v26, 1  ;;  %vm18924_vm9 = vcmp.eq.s32.totalorder %v18923_v6, 1  ;;  %v18934_v23 = vld [vmem:[#allocation180_spill] sm:$0xff]  ;;  %v18936_v47 = vld [vmem:[#allocation107_spill] sm:$0xff] }
 0x467   : > { %v5293_v63 = vsel %vm18922_vm2, %v5268_v29, -1e+30  ;;  %v5294_v46 = vsel %vm18924_vm9, %v5267_v41, -1e+30  ;;  %v5394_v57 = vsel %vm1035_vm5, %v5358_v53, %v5359_v50  ;;  %vm18926_vm11 = vcmp.eq.s32.totalorder %v18925_v38, 1  ;;  %v18940_v6 = vld [vmem:[#allocation192_spill] sm:$0xff] }
 0x468   : > { %v5325_v35 = vmax.f32 %v18882_v7, %v5293_v63  ;;  %v5326_v25 = vmax.f32 %v18915_v18, %v5294_v46  ;;  %v5421_v1 = vsel %vm18926_vm11, %v5395_v43, -1e+30  ;;  %v5988_v49 = vpack.c.bf16 %v5960_v33, %v5959_v51  ;;  %v18938_v33 = vld [vmem:[#allocation193_spill] sm:$0xff] }
 0x469   : > { %vm18928_vm6 = vcmp.eq.s32.totalorder %v18927_v37, 1  ;;  %v5486_v28 = vrot.slane %v18915_v18, 6  ;;  %v5524_v7 = vsel %vm1324_vm10, %v5484_v58, %v5485_v52  ;;  %vm18930_vm13 = vcmp.eq.s32.totalorder %v18929_v21, 1  ;;  %v18932_v58 = vld [vmem:[#allocation76_spill] sm:$0xff]  ;;  %v18950_v21 = vld [vmem:[#allocation109_spill] sm:$0xff] }
 0x46a   : > { %v5422_v31 = vsel %vm18928_vm6, %v5394_v57, -1e+30  ;;  %v5453_v30 = vmax.f32 %v5325_v35, %v5421_v1  ;;  %v5549_v45 = vsel %vm18930_vm13, %v5524_v7, -1e+30  ;;  %v5614_v24 = vrot.slane %v18915_v18, 2  ;;  %v18944_v57 = vld [vmem:[#allocation254_spill] sm:$0xff] }
 0x46b   : > { %v5454_v8 = vmax.f32 %v5326_v25, %v5422_v31  ;;  %vm18931_vm3 = vcmask 15360   ;;  %v5523_v39 = vsel %vm1324_vm10, %v5485_v52, %v5486_v28  ;;  %v5615_v53 = vrot.slane %v18918_v14, 2  ;;  %v18942_v25 = vld [vmem:[#allocation252_spill] sm:$0xff]  ;;  %v18946_v31 = vld [vmem:[#allocation259_spill] sm:$0xff] }
 0x46c   : > { %7029 = vmatmul.mubr.msk.bf16.gmra.mrb[20].mxu1 %vm18931_vm3, %v5988_v49  ;;  %vm18933_vm7 = vcmp.eq.s32.totalorder %v18932_v58, 1  ;;  %vm18935_vm0 = vcmp.eq.s32.totalorder %v18934_v23, 1  ;;  %vm18937_vm4 = vcmp.eq.s32.totalorder %v18936_v47, 1  ;;  %v5581_v41 = vmax.f32 %v5453_v30, %v5549_v45  ;;  %v18948_v30 = vld [vmem:[#allocation265_spill] sm:$0xff] }
 0x46d   : > { %v5737_v17 = vsel %vm18933_vm7, %v15162_v42, -1e+30  ;;  %v5738_v22 = vsel %vm18935_vm0, %v15175_v61, -1e+30  ;;  %v5550_v18 = vsel %vm18937_vm4, %v5523_v39, -1e+30  ;;  %v5651_v29 = vsel %vm1421_vm14, %v5613_v62, %v5614_v24 }
 0x46e   : > { %v5769_v43 = vmax.f32 %v15250_v34, %v5737_v17  ;;  %v5582_v52 = vmax.f32 %v5454_v8, %v5550_v18  ;;  %v5650_v51 = vsel %vm1421_vm14, %v5614_v24, %v5615_v53  ;;  %vm18939_vm15 = vcmp.eq.s32.totalorder %v18938_v33, 1  ;;  %v18952_v39 = vld [vmem:[#allocation309_spill] sm:$0xff] }
 0x46f   : > { %v5677_v26 = vsel %vm18939_vm15, %v5651_v29, -1e+30  ;;  %v5770_v63 = vmax.f32 %v15252_v4, %v5738_v22  ;;  %vm18941_vm12 = vcmp.eq.s32.totalorder %v18940_v6, 1  ;;  %vm18943_vm1 = vcmp.eq.s32.totalorder %v18942_v25, 1  ;;  %v18953_v22 = vld [vmem:[#allocation218_spill] sm:$0xff] }
 0x470   : > { %v5678_v46 = vsel %vm18941_vm12, %v5650_v51, -1e+30  ;;  %v15405_v35 = vmax.f32 %v5581_v41, %v5677_v26  ;;  %v5801_v62 = vsel %vm18943_vm1, %v15325_v56, -1e+30  ;;  %vm18945_vm8 = vcmp.eq.s32.totalorder %v18944_v57, 1  ;;  %v18957_v51 = vld [vmem:[#allocation17_spill] sm:$0xff] }
 0x471   : > { %v5802_v38 = vsel %vm18945_vm8, %v15333_v9, -1e+30  ;;  %v15413_v1 = vmax.f32 %v5582_v52, %v5678_v46  ;;  %v5833_v49 = vmax.f32 %v5769_v43, %v5801_v62  ;;  %vm18947_vm2 = vcmp.eq.s32.totalorder %v18946_v31, 1  ;;  %v18959_v26 = vld [vmem:[#allocation16_spill] sm:$0xff]  ;;  %v18961_v57 = vld [vmem:[#allocation53_spill] sm:$0xff] }
 0x472   : > { %v5834_v37 = vmax.f32 %v5770_v63, %v5802_v38  ;;  %v5865_v7 = vsel %vm18947_vm2, %v15081_v59, -1e+30  ;;  %vm18949_vm9 = vcmp.eq.s32.totalorder %v18948_v30, 1  ;;  %vm18951_vm11 = vcmp.eq.s32.totalorder %v18950_v21, 1 }
 0x473   : > { %v5866_v8 = vsel %vm18949_vm9, %v15083_v44, -1e+30  ;;  %v5929_v45 = vsel %vm18951_vm11, %v15405_v35, -1e+30  ;;  %v5231_v24 = vrot.slane %v18918_v14, 7  ;;  %v5232_v58 = vrot.slane %v18952_v39, 7 }
 0x474   : > { %v5897_v17 = vmax.f32 %v5833_v49, %v5865_v7  ;;  %v5898_v23 = vmax.f32 %v5834_v37, %v5866_v8  ;;  %vm18954_vm6 = vcmp.eq.s32.totalorder %v18953_v22, 1  ;;  %v5360_v59 = vrot.slane %v18952_v39, 1  ;;  %v18963_v49 = vld [vmem:[#allocation51_spill] sm:$0xff] }
 0x475   : > { %v5930_v47 = vsel %vm18954_vm6, %v15413_v1, -1e+30  ;;  %vm18955_vm13 = vcmp.lt.s32.totalorder %v7590_v10, 1  ;;  %v5361_v41 = vrot.slane %v14779_v12, 1  ;;  %v5487_v29 = vrot.slane %v18918_v14, 6  ;;  %v18970_v22 = vld [vmem:[#allocation111_spill] sm:$0xff] }
 0x476   : > { %v5265_v18 = vsel %vm18955_vm13, %v5231_v24, %v5232_v58  ;;  %vm18956_vm3 = vmmov %vm18955_vm13  ;;  %v5961_v43 = vmax.f32 %v5897_v17, %v5929_v45  ;;  %v5962_v52 = vmax.f32 %v5898_v23, %v5930_v47  ;;  %vm18958_vm7 = vcmp.eq.s32.totalorder %v18957_v51, 1  ;;  %v18968_v17 = vld [vmem:[#allocation189_spill] sm:$0xff] }
 0x477   : > { %v5266_v44 = vsel %vm18956_vm3, %v5230_v27, %v5231_v24  ;;  %vm18960_vm0 = vcmp.eq.s32.totalorder %v18959_v26, 1  ;;  %v5392_v25 = vsel %vm1035_vm5, %v5360_v59, %v5361_v41  ;;  %v5393_v27 = vsel %vm1035_vm5, %v5359_v50, %v5360_v59  ;;  %v18966_v50 = vld [vmem:[#allocation113_spill] sm:$0xff]  ;;  %v18972_v59 = vld [vmem:[#allocation264_spill] sm:$0xff] }
 0x478   : > { %v5295_v33 = vsel %vm18958_vm7, %v5266_v44, -1e+30  ;;  %v5296_v63 = vsel %vm18960_vm0, %v5265_v18, -1e+30  ;;  %v5989_v62 = vpack.c.bf16 %v5962_v52, %v5961_v43  ;;  %vm18962_vm4 = vcmp.eq.s32.totalorder %v18961_v57, 1  ;;  %v18974_v43 = vld [vmem:[#allocation199_spill] sm:$0xff] }
 0x479   : > { %v5327_v6 = vmax.f32 %v18918_v14, %v5295_v33  ;;  %v5328_v46 = vmax.f32 %v18952_v39, %v5296_v63  ;;  %v5423_v38 = vsel %vm18962_vm4, %v5393_v27, -1e+30  ;;  %vm18964_vm15 = vcmp.eq.s32.totalorder %v18963_v49, 1  ;;  %v18976_v33 = vld [vmem:[#allocation198_spill] sm:$0xff]  ;;  %v18980_v27 = vld [vmem:[#allocation269_spill] sm:$0xff] }
 0x47a   : > { %v5424_v37 = vsel %vm18964_vm15, %v5392_v25, -1e+30  ;;  %v5488_v31 = vrot.slane %v18952_v39, 6  ;;  %v5522_v8 = vsel %vm1324_vm10, %v5486_v28, %v5487_v29  ;;  %v5616_v21 = vrot.slane %v18952_v39, 2 }
 0x47b   : > { %v5455_v7 = vmax.f32 %v5327_v6, %v5423_v38  ;;  %v5456_v30 = vmax.f32 %v5328_v46, %v5424_v37  ;;  %vm18965_vm12 = vcmask 15360   ;;  %vm18967_vm1 = vcmp.eq.s32.totalorder %v18966_v50, 1  ;;  %v18978_v6 = vld [vmem:[#allocation263_spill] sm:$0xff] }
 0x47c   : > { %7032 = vmatprep.mubr.msk.bf16.mxu1 %vm18965_vm12, %v5989_v62  ;;  %v5521_v14 = vsel %vm1324_vm10, %v5487_v29, %v5488_v31  ;;  %v5551_v45 = vsel %vm18967_vm1, %v5522_v8, -1e+30  ;;  %v5617_v24 = vrot.slane %v14779_v12, 2  ;;  %vm18969_vm8 = vcmp.eq.s32.totalorder %v18968_v17, 1  ;;  %v18982_v38 = vld [vmem:[#allocation271_spill] sm:$0xff]  ;;  %v18986_v8 = vld [vmem:[#allocation272_spill] sm:$0xff] }
 0x47d   : > { %v5739_v23 = vsel %vm18969_vm8, %v15250_v34, -1e+30  ;;  %vm18971_vm2 = vcmp.eq.s32.totalorder %v18970_v22, 1  ;;  %v5583_v28 = vmax.f32 %v5455_v7, %v5551_v45  ;;  %v5649_v39 = vsel %vm1421_vm14, %v5615_v53, %v5616_v21  ;;  %v18984_v7 = vld [vmem:[#allocation273_spill] sm:$0xff]  ;;  %v18988_v45 = vld [vmem:[#allocation115_spill] sm:$0xff] }
 0x47e   : > { %v5552_v47 = vsel %vm18971_vm2, %v5521_v14, -1e+30  ;;  %vm18973_vm9 = vcmp.eq.s32.totalorder %v18972_v59, 1  ;;  %v5648_v29 = vsel %vm1421_vm14, %v5616_v21, %v5617_v24  ;;  %vm18975_vm11 = vcmp.eq.s32.totalorder %v18974_v43, 1 }
 0x47f   : > { %v5740_v18 = vsel %vm18973_vm9, %v15252_v4, -1e+30  ;;  %v5584_v44 = vmax.f32 %v5456_v30, %v5552_v47  ;;  %v5679_v52 = vsel %vm18975_vm11, %v5649_v39, -1e+30  ;;  %v5771_v51 = vmax.f32 %v15325_v56, %v5739_v23 }
 0x480   : > { %vm18977_vm6 = vcmp.eq.s32.totalorder %v18976_v33, 1  ;;  %v15479_v63 = vmax.f32 %v5583_v28, %v5679_v52  ;;  %v5772_v53 = vmax.f32 %v15333_v9, %v5740_v18  ;;  %vm18979_vm13 = vcmp.eq.s32.totalorder %v18978_v6, 1  ;;  %v18992_v18 = vld [vmem:[#allocation19_spill] sm:$0xff]  ;;  %v18994_v52 = vld [vmem:[#allocation18_spill] sm:$0xff] }
 0x481   : > { %v5680_v26 = vsel %vm18977_vm6, %v5648_v29, -1e+30  ;;  %v5803_v46 = vsel %vm18979_vm13, %v15405_v35, -1e+30  ;;  %vm18981_vm3 = vcmp.eq.s32.totalorder %v18980_v27, 1  ;;  %vm18983_vm7 = vcmp.eq.s32.totalorder %v18982_v38, 1 }
 0x482   : > { %v15485_v25 = vmax.f32 %v5584_v44, %v5680_v26  ;;  %v5804_v62 = vsel %vm18981_vm3, %v15413_v1, -1e+30  ;;  %v5835_v57 = vmax.f32 %v5771_v51, %v5803_v46  ;;  %v5867_v49 = vsel %vm18983_vm7, %v15162_v42, -1e+30  ;;  %v18998_v46 = vld [vmem:[#allocation55_spill] sm:$0xff] }
 0x483   : > { %v5836_v37 = vmax.f32 %v5772_v53, %v5804_v62  ;;  %vm18985_vm0 = vcmp.eq.s32.totalorder %v18984_v7, 1  ;;  %vm18987_vm4 = vcmp.eq.s32.totalorder %v18986_v8, 1  ;;  %v5233_v14 = vrot.slane %v14779_v12, 7  ;;  %v18996_v53 = vld [vmem:[#allocation56_spill] sm:$0xff]  ;;  %v19000_v7 = vld [vmem:[#allocation119_spill] sm:$0xff] }
 0x484   : > { %v5868_v30 = vsel %vm18985_vm0, %v15175_v61, -1e+30  ;;  %v5931_v21 = vsel %vm18987_vm4, %v15479_v63, -1e+30  ;;  %v5899_v50 = vmax.f32 %v5835_v57, %v5867_v49  ;;  %vm18989_vm15 = vcmp.eq.s32.totalorder %v18988_v45, 1 }
 0x485   : > { %v5932_v17 = vsel %vm18989_vm15, %v15485_v25, -1e+30  ;;  %v5234_v23 = vrot.slane %v14784_v48, 7  ;;  %v5362_v42 = vrot.slane %v14784_v48, 1  ;;  %v5900_v22 = vmax.f32 %v5836_v37, %v5868_v30 }
 0x486   : > { %vm18990_vm12 = vcmp.lt.s32.totalorder %v7590_v10, 1  ;;  %v5363_v61 = vrot.slane %v14809_v5, 1  ;;  %v5489_v28 = vrot.slane %v14779_v12, 6  ;;  %v5963_v39 = vmax.f32 %v5899_v50, %v5931_v21  ;;  %v19003_v21 = vld [vmem:[#allocation116_spill] sm:$0xff] }
 0x487   : > { %v5264_v47 = vsel %vm18990_vm12, %v5232_v58, %v5233_v14  ;;  %vm18991_vm1 = vmmov %vm18990_vm12  ;;  %vm18993_vm8 = vcmp.eq.s32.totalorder %v18992_v18, 1  ;;  %v5391_v29 = vsel %vm1035_vm5, %v5361_v41, %v5362_v42  ;;  %v5964_v43 = vmax.f32 %v5900_v22, %v5932_v17  ;;  %v19007_v22 = vld [vmem:[#allocation204_spill] sm:$0xff] }
 0x488   : > { %v5263_v59 = vsel %vm18991_vm1, %v5233_v14, %v5234_v23  ;;  %v5297_v44 = vsel %vm18993_vm8, %v5264_v47, -1e+30  ;;  %vm18995_vm2 = vcmp.eq.s32.totalorder %v18994_v52, 1  ;;  %v5390_v33 = vsel %vm1035_vm5, %v5362_v42, %v5363_v61  ;;  %v19013_v52 = vld [vmem:[#allocation137_spill] sm:$0xff] }
 0x489   : > { %v5298_v51 = vsel %vm18995_vm2, %v5263_v59, -1e+30  ;;  %v5329_v58 = vmax.f32 %v14779_v12, %v5297_v44  ;;  %vm18997_vm9 = vcmp.eq.s32.totalorder %v18996_v53, 1  ;;  %vm18999_vm11 = vcmp.eq.s32.totalorder %v18998_v46, 1  ;;  %v19011_v59 = vld [vmem:[#allocation202_spill] sm:$0xff] }
 0x48a   : > { %v5330_v26 = vmax.f32 %v14784_v48, %v5298_v51  ;;  %v5425_v6 = vsel %vm18997_vm9, %v5391_v29, -1e+30  ;;  %v5426_v27 = vsel %vm18999_vm11, %v5390_v33, -1e+30  ;;  %v5490_v62 = vrot.slane %v14784_v48, 6 }
 0x48b   : > { %v5990_v41 = vpack.c.bf16 %v5964_v43, %v5963_v39  ;;  %v5457_v57 = vmax.f32 %v5329_v58, %v5425_v6  ;;  %v5520_v38 = vsel %vm1324_vm10, %v5488_v31, %v5489_v28  ;;  %v5618_v12 = vrot.slane %v14784_v48, 2  ;;  %v19005_v48 = vld [vmem:[#allocation270_spill] sm:$0xff]  ;;  %v19015_v58 = vld [vmem:[#allocation117_spill] sm:$0xff] }
 0x48c   : > { %v5458_v49 = vmax.f32 %v5330_v26, %v5426_v27  ;;  %v5519_v37 = vsel %vm1324_vm10, %v5489_v28, %v5490_v62  ;;  %vm19001_vm6 = vcmp.eq.s32.totalorder %v19000_v7, 1  ;;  %v5619_v8 = vrot.slane %v14809_v5, 2  ;;  %v19009_v28 = vld [vmem:[#allocation201_spill] sm:$0xff]  ;;  %v19019_v27 = vld [vmem:[#allocation146_spill] sm:$0xff] }
 0x48d   : > { %v5553_v30 = vsel %vm19001_vm6, %v5520_v38, -1e+30  ;;  %vm19002_vm13 = vcmask 15360   ;;  %vm19004_vm3 = vcmp.eq.s32.totalorder %v19003_v21, 1  ;;  %v5647_v31 = vsel %vm1421_vm14, %v5617_v24, %v5618_v12  ;;  %v19017_v26 = vld [vmem:[#allocation125_spill] sm:$0xff] }
 0x48e   : > { %7033 = vmatmul.mubr.msk.bf16.gmra.mrb[24].mxu1 %vm19002_vm13, %v5990_v41  ;;  %v5554_v14 = vsel %vm19004_vm3, %v5519_v37, -1e+30  ;;  %v5585_v50 = vmax.f32 %v5457_v57, %v5553_v30  ;;  %vm19006_vm7 = vcmp.eq.s32.totalorder %v19005_v48, 1  ;;  %v5646_v42 = vsel %vm1421_vm14, %v5618_v12, %v5619_v8  ;;  %v19021_v57 = vld [vmem:[#allocation136_spill] sm:$0xff]  ;;  %v19023_v12 = vld [vmem:[#allocation139_spill] sm:$0xff] }
 0x48f   : > { %v5741_v45 = vsel %vm19006_vm7, %v15325_v56, -1e+30  ;;  %v5586_v17 = vmax.f32 %v5458_v49, %v5554_v14  ;;  %vm19008_vm0 = vcmp.eq.s32.totalorder %v19007_v22, 1  ;;  %vm19010_vm4 = vcmp.eq.s32.totalorder %v19009_v28, 1 }
 0x490   : > { %v5681_v47 = vsel %vm19008_vm0, %v5647_v31, -1e+30  ;;  %v5742_v39 = vsel %vm19010_vm4, %v15333_v9, -1e+30  ;;  %vm19012_vm15 = vcmp.eq.s32.totalorder %v19011_v59, 1  ;;  %v5773_v24 = vmax.f32 %v15405_v35, %v5741_v45 }
 0x491   : > { %v5682_v18 = vsel %vm19012_vm15, %v5646_v42, -1e+30  ;;  %v15551_v44 = vmax.f32 %v5585_v50, %v5681_v47  ;;  %v5774_v29 = vmax.f32 %v15413_v1, %v5742_v39  ;;  %vm19014_vm12 = vcmp.eq.s32.totalorder %v19013_v52, 1  ;;  %v19031_v39 = vld [vmem:[#allocation21_spill] sm:$0xff]  ;;  %v19035_v52 = vld [vmem:[#allocation58_spill] sm:$0xff] }
 0x492   : > { %v15555_v43 = vmax.f32 %v5586_v17, %v5682_v18  ;;  %v5805_v51 = vsel %vm19014_vm12, %v15479_v63, -1e+30  ;;  %vm19016_vm1 = vcmp.eq.s32.totalorder %v19015_v58, 1  ;;  %vm19018_vm8 = vcmp.eq.s32.totalorder %v19017_v26, 1  ;;  %v19033_v18 = vld [vmem:[#allocation20_spill] sm:$0xff]  ;;  %v19037_v58 = vld [vmem:[#allocation57_spill] sm:$0xff] }
 0x493   : > { %v5806_v33 = vsel %vm19016_vm1, %v15485_v25, -1e+30  ;;  %v5869_v53 = vsel %vm19018_vm8, %v15250_v34, -1e+30  ;;  %v5837_v6 = vmax.f32 %v5773_v24, %v5805_v51  ;;  %vm19020_vm2 = vcmp.eq.s32.totalorder %v19019_v27, 1 }
 0x494   : > { %v5838_v46 = vmax.f32 %v5774_v29, %v5806_v33  ;;  %v5870_v41 = vsel %vm19020_vm2, %v15252_v4, -1e+30  ;;  %vm19022_vm9 = vcmp.eq.s32.totalorder %v19021_v57, 1  ;;  %vm19024_vm11 = vcmp.eq.s32.totalorder %v19023_v12, 1  ;;  %v19025_v4 = vld [vmem:[#allocation126_spill] sm:$0xff]  ;;  %v19041_v57 = vld [vmem:[#allocation124_spill] sm:$0xff] }
 0x495   : > { %v5933_v38 = vsel %vm19022_vm9, %v15551_v44, -1e+30  ;;  %v5934_v49 = vsel %vm19024_vm11, %v15555_v43, -1e+30  ;;  %v5235_v37 = vrot.slane %v14809_v5, 7  ;;  %v5364_v7 = vrot.slane %v14388_v54, 1 }
 0x496   : > { %v5491_v34 = vrot.slane %v14809_v5, 6  ;;  %v5901_v30 = vmax.f32 %v5837_v6, %v5869_v53  ;;  %v5902_v21 = vmax.f32 %v5838_v46, %v5870_v41  ;;  %v5620_v14 = vrot.slane %v14388_v54, 2  ;;  %v19043_v12 = vld [vmem:[#allocation122_spill] sm:$0xff] }
 0x497   : > { %vm19026_vm6 = vcmp.eq.s32.totalorder %v19025_v4, 1  ;;  %v19027_v31 = vrot.slane %v14388_v54, 7  ;;  %vm19028_vm13 = vcmp.lt.s32.totalorder %v7590_v10, 1  ;;  %v19030_v17 = vrot.slane %v14401_v16, 1  ;;  %v19050_v4 = vld [vmem:[#allocation206_spill] sm:$0xff] }
 0x498   : > { %v5743_v50 = vsel %vm19026_vm6, %v15405_v35, -1e+30  ;;  %vm19029_vm3 = vmmov %vm19028_vm13  ;;  %v5389_v22 = vsel %vm1035_vm5, %v5363_v61, %v5364_v7  ;;  %v5965_v47 = vmax.f32 %v5901_v30, %v5933_v38  ;;  %v5966_v28 = vmax.f32 %v5902_v21, %v5934_v49 }
 0x499   : > { %v5261_v48 = vsel %vm19028_vm13, %v5235_v37, %v19027_v31  ;;  %v5262_v45 = vsel %vm19029_vm3, %v5234_v23, %v5235_v37  ;;  %v5388_v42 = vsel %vm1035_vm5, %v5364_v7, %v19030_v17  ;;  %vm19032_vm7 = vcmp.eq.s32.totalorder %v19031_v39, 1  ;;  %v19046_v37 = vld [vmem:[#allocation205_spill] sm:$0xff]  ;;  %v19056_v17 = vld [vmem:[#allocation156_spill] sm:$0xff]  ;;  %v19058_v39 = vld [vmem:[#allocation142_spill] sm:$0xff] }
 0x49a   : > { %v5299_v59 = vsel %vm19032_vm7, %v5262_v45, -1e+30  ;;  %vm19034_vm0 = vcmp.eq.s32.totalorder %v19033_v18, 1  ;;  %vm19036_vm4 = vcmp.eq.s32.totalorder %v19035_v52, 1  ;;  %vm19038_vm15 = vcmp.eq.s32.totalorder %v19037_v58, 1  ;;  %v19052_v45 = vld [vmem:[#allocation140_spill] sm:$0xff] }
 0x49b   : > { %v5300_v24 = vsel %vm19034_vm0, %v5261_v48, -1e+30  ;;  %v5331_v29 = vmax.f32 %v14809_v5, %v5299_v59  ;;  %v5427_v51 = vsel %vm19036_vm4, %v5389_v22, -1e+30  ;;  %v5428_v33 = vsel %vm19038_vm15, %v5388_v42, -1e+30 }
 0x49c   : > { %v5332_v23 = vmax.f32 %v14388_v54, %v5300_v24  ;;  %v5991_v26 = vpack.c.bf16 %v5966_v28, %v5965_v47  ;;  %v19039_v61 = vrot.slane %v14388_v54, 6  ;;  %v5518_v6 = vsel %vm1324_vm10, %v5490_v62, %v5491_v34  ;;  %v19060_v18 = vld [vmem:[#allocation141_spill] sm:$0xff] }
 0x49d   : > { %v19040_v46 = vrot.slane %v14401_v16, 2  ;;  %v5459_v27 = vmax.f32 %v5331_v29, %v5427_v51  ;;  %vm19042_vm5 = vcmp.eq.s32.totalorder %v19041_v57, 1  ;;  %vm19044_vm12 = vcmp.eq.s32.totalorder %v19043_v12, 1  ;;  %v19048_v16 = vld [vmem:[#allocation105_spill] sm:$0xff]  ;;  %v19062_v29 = vld [vmem:[#allocation147_spill] sm:$0xff]  ;;  %v19064_v51 = vld [vmem:[#allocation240_spill] sm:$0xff] }
 0x49e   : > { %v5517_v53 = vsel %vm1324_vm10, %v5491_v34, %v19039_v61  ;;  %v5460_v41 = vmax.f32 %v5332_v23, %v5428_v33  ;;  %v5555_v38 = vsel %vm19042_vm5, %v5518_v6, -1e+30  ;;  %vm19045_vm1 = vcmask 15360   ;;  %v19066_v33 = vld [vmem:[#allocation150_spill] sm:$0xff]  ;;  %v19072_v57 = vld [vmem:[#allocation276_spill] sm:$0xff]  ;;  %v19074_v12 = vld [vmem:[#allocation281_spill] sm:$0xff] }
 0x49f   : > { %v5644_v5 = vsel %vm1421_vm14, %v5620_v14, %v19040_v46  ;;  %v5556_v49 = vsel %vm19044_vm12, %v5517_v53, -1e+30  ;;  %7036 = vmatprep.mubr.msk.bf16.mxu1 %vm19045_vm1, %v5991_v26  ;;  %v5645_v54 = vsel %vm1421_vm14, %v5619_v8, %v5620_v14  ;;  %vm19047_vm10 = vcmp.eq.s32.totalorder %v19046_v37, 1  ;;  %v19054_v8 = vld [vmem:[#allocation134_spill] sm:$0xff] }
 0x4a0   : > { %v5684_v62 = vsel %vm19047_vm10, %v5644_v5, -1e+30  ;;  %vm19049_vm8 = vcmp.eq.s32.totalorder %v19048_v16, 1  ;;  %v5775_v34 = vmax.f32 %v15479_v63, %v5743_v50  ;;  %v5587_v30 = vmax.f32 %v5459_v27, %v5555_v38  ;;  %v19068_v53 = vld [vmem:[#allocation250_spill] sm:$0xff] }
 0x4a1   : > { %v5744_v7 = vsel %vm19049_vm8, %v15413_v1, -1e+30  ;;  %v5588_v21 = vmax.f32 %v5460_v41, %v5556_v49  ;;  %vm19051_vm2 = vcmp.eq.s32.totalorder %v19050_v4, 1  ;;  %vm19053_vm9 = vcmp.eq.s32.totalorder %v19052_v45, 1  ;;  %v19070_v46 = vld [vmem:[#allocation274_spill] sm:$0xff]  ;;  %v19081_v4 = vld [vmem:[#allocation275_spill] sm:$0xff] }
 0x4a2   : > { %v5683_v31 = vsel %vm19051_vm2, %v5645_v54, -1e+30  ;;  %v5776_v48 = vmax.f32 %v15485_v25, %v5744_v7  ;;  %v5807_v10 = vsel %vm19053_vm9, %v15551_v44, -1e+30  ;;  %vm19055_vm14 = vcmp.eq.s32.totalorder %v19054_v8, 1  ;;  %v19078_v7 = vld [vmem:[#allocation66_spill] sm:$0xff] }
 0x4a3   : > { %v5808_v14 = vsel %vm19055_vm14, %v15555_v43, -1e+30  ;;  %vm19057_vm11 = vcmp.eq.s32.totalorder %v19056_v17, 1  ;;  %v15639_v50 = vmax.f32 %v5587_v30, %v5683_v31  ;;  %v15641_v22 = vmax.f32 %v5588_v21, %v5684_v62  ;;  %v19076_v62 = vld [vmem:[#allocation280_spill] sm:$0xff] }
 0x4a4   : > { %v5871_v42 = vsel %vm19057_vm11, %v15325_v56, -1e+30  ;;  %v5839_v47 = vmax.f32 %v5775_v34, %v5807_v10  ;;  %v5840_v28 = vmax.f32 %v5776_v48, %v5808_v14  ;;  %vm19059_vm6 = vcmp.eq.s32.totalorder %v19058_v39, 1  ;;  %v19079_v34 = vld [vmem:[#allocation251_spill] sm:$0xff]  ;;  %v19090_v39 = vld [vmem:[#allocation132_spill] sm:$0xff] }
 0x4a5   : > { %v5872_v59 = vsel %vm19059_vm6, %v15333_v9, -1e+30  ;;  %vm19061_vm13 = vcmp.eq.s32.totalorder %v19060_v18, 1  ;;  %vm19063_vm3 = vcmp.eq.s32.totalorder %v19062_v29, 1  ;;  %vm19065_vm7 = vcmp.eq.s32.totalorder %v19064_v51, 1  ;;  %v19092_v18 = vld [vmem:[#allocation288_spill] sm:$0xff] }
 0x4a6   : > { %v5745_v24 = vsel %vm19061_vm13, %v15479_v63, -1e+30  ;;  %v5746_v23 = vsel %vm19063_vm3, %v15485_v25, -1e+30  ;;  %v5903_v52 = vmax.f32 %v5839_v47, %v5871_v42  ;;  %v5904_v56 = vmax.f32 %v5840_v28, %v5872_v59  ;;  %v15689_v42 = vpop.f32.mrb[52].mxu0  ;;  %v19088_v47 = vld [vmem:[#allocation167_spill] sm:$0xff] }
 0x4a7   : > { %v5935_v58 = vsel %vm19065_vm7, %v15639_v50, -1e+30  ;;  %vm19067_vm0 = vcmp.eq.s32.totalorder %v19066_v33, 1  ;;  %v5777_v9 = vmax.f32 %v15551_v44, %v5745_v24  ;;  %v5778_v61 = vmax.f32 %v15555_v43, %v5746_v23  ;;  %v15701_v51 = vpop.f32.mrb[53].mxu0  ;;  %v19095_v33 = vld [vmem:[#allocation164_spill] sm:$0xff] }
 0x4a8   : > { %v5936_v26 = vsel %vm19067_vm0, %v15641_v22, -1e+30  ;;  %vm19069_vm4 = vcmp.eq.s32.totalorder %v19068_v53, 1  ;;  %vm19071_vm15 = vcmp.eq.s32.totalorder %v19070_v46, 1  ;;  %v5967_v27 = vmax.f32 %v5903_v52, %v5935_v58  ;;  %v19094_v58 = vld [vmem:[#allocation262_spill] sm:$0xff] }
 0x4a9   : > { %v5809_v6 = vsel %vm19069_vm4, %v15639_v50, -1e+30  ;;  %v5810_v5 = vsel %vm19071_vm15, %v15641_v22, -1e+30  ;;  %v5968_v41 = vmax.f32 %v5904_v56, %v5936_v26  ;;  %vm19073_vm5 = vcmp.eq.s32.totalorder %v19072_v57, 1  ;;  %v15715_v57 = vpop.f32.mrb[54].mxu0 }
 0x4aa   : > { %v5873_v38 = vsel %vm19073_vm5, %v15405_v35, -1e+30  ;;  %vm19075_vm12 = vcmp.eq.s32.totalorder %v19074_v12, 1  ;;  %v5841_v54 = vmax.f32 %v5777_v9, %v5809_v6  ;;  %v5842_v37 = vmax.f32 %v5778_v61, %v5810_v5  ;;  %v19083_v35 = vld [vmem:[#allocation258_spill] sm:$0xff]  ;;  %v19097_v9 = vld [vmem:[#allocation65_spill] sm:$0xff]  ;;  %v19098_v61 = vld [vmem:[#allocation292_spill] sm:$0xff] }
 0x4ab   : > { %v5874_v49 = vsel %vm19075_vm12, %v15413_v1, -1e+30  ;;  %vm19077_vm1 = vcmp.eq.s32.totalorder %v19076_v62, 1  ;;  %vm19080_vm10 = vcmp.eq.s32.totalorder %v19079_v34, 1  ;;  %v5992_v21 = vpack.c.bf16 %v5968_v41, %v5967_v27  ;;  %v19085_v1 = vld [vmem:[#allocation158_spill] sm:$0xff]  ;;  %v19102_v27 = vld [vmem:[#allocation287_spill] sm:$0xff] }
 0x4ac   : > { %v5937_v16 = vsel %vm19077_vm1, %v14713_v36, -1e+30  ;;  %v5938_v30 = vsel %vm19080_vm10, %v19078_v7, -1e+30  ;;  %vm19082_vm8 = vcmp.eq.s32.totalorder %v19081_v4, 1  ;;  %vm19084_vm2 = vcmp.eq.s32.totalorder %v19083_v35, 1 }
 0x4ad   : > { %v5747_v31 = vsel %vm19082_vm8, %v15551_v44, -1e+30  ;;  %v5748_v48 = vsel %vm19084_vm2, %v15555_v43, -1e+30  ;;  %vm19086_vm9 = vcmp.eq.s32.totalorder %v19085_v1, 1  ;;  %v5905_v10 = vmax.f32 %v5841_v54, %v5873_v38 }
 0x4ae   : > { %v5811_v45 = vsel %vm19086_vm9, %v14713_v36, -1e+30  ;;  %v5906_v8 = vmax.f32 %v5842_v37, %v5874_v49  ;;  %v5779_v14 = vmax.f32 %v15639_v50, %v5747_v31  ;;  %v5780_v17 = vmax.f32 %v15641_v22, %v5748_v48  ;;  %v19104_v49 = vld [vmem:[#allocation286_spill] sm:$0xff]  ;;  %v19106_v37 = vld [vmem:[#allocation191_spill] sm:$0xff] }
 0x4af   : > { %vm19087_vm14 = vcmask 15360   ;;  %vm19089_vm11 = vcmp.eq.s32.totalorder %v19088_v47, 1  ;;  %vm19091_vm6 = vcmp.eq.s32.totalorder %v19090_v39, 1  ;;  %vm19093_vm13 = vcmp.eq.s32.totalorder %v19092_v18, 1  ;;  %v19111_v31 = vld [vmem:[#allocation298_spill] sm:$0xff]  ;;  %v19119_v39 = vld [vmem:[#allocation221_spill] sm:$0xff] }
 0x4b0   : > { %7037 = vmatmul.mubr.msk.bf16.gmra.mrb[28].mxu1 %vm19087_vm14, %v5992_v21  ;;  %v5812_v28 = vsel %vm19089_vm11, %v19078_v7, -1e+30  ;;  %v5875_v59 = vsel %vm19091_vm6, %v15479_v63, -1e+30  ;;  %v5876_v24 = vsel %vm19093_vm13, %v15485_v25, -1e+30  ;;  %v5969_v29 = vmax.f32 %v5905_v10, %v5937_v16  ;;  %vm19108_vm12 = vmmov %vm19087_vm14 }
 0x4b1   : > { %v5970_v23 = vmax.f32 %v5906_v8, %v5938_v30  ;;  %v5843_v52 = vmax.f32 %v5779_v14, %v5811_v45  ;;  %v5844_v56 = vmax.f32 %v5780_v17, %v5812_v28  ;;  %vm19096_vm3 = vcmp.eq.s32.totalorder %v19095_v33, 1  ;;  %v19100_v63 = vld [vmem:[#allocation282_spill] sm:$0xff]  ;;  %v15725_v16 = vpop.f32.mrb[55].mxu0  ;;  %v19109_v21 = vld [vmem:[#allocation293_spill] sm:$0xff]  ;;  %v19116_v14 = vld [vmem:[#allocation100_spill] sm:$0xff] }
 0x4b2   : > { %v5939_v26 = vsel %vm19096_vm3, %v19094_v58, -1e+30  ;;  %vm19099_vm7 = vcmp.eq.s32.totalorder %v19098_v61, 1  ;;  %vm19101_vm0 = vcmp.eq.s32.totalorder %v19100_v63, 1  ;;  %vm19103_vm4 = vcmp.eq.s32.totalorder %v19102_v27, 1  ;;  %v19113_v45 = vld [vmem:[#allocation145_spill] sm:$0xff]  ;;  %vm19125_vm6 = vmmov %vm19108_vm12 }
 0x4b3   : > { %v5940_v53 = vsel %vm19099_vm7, %v19097_v9, -1e+30  ;;  %v5749_v6 = vsel %vm19101_vm0, %v15639_v50, -1e+30  ;;  %v5993_v46 = vpack.c.bf16 %v5970_v23, %v5969_v29  ;;  %v5907_v25 = vmax.f32 %v5843_v52, %v5875_v59  ;;  %v19114_v10 = vld [vmem:[#allocation297_spill] sm:$0xff]  ;;  %v19126_v33 = vld [vmem:[#allocation299_spill] sm:$0xff] }
 0x4b4   : > { %v5908_v5 = vmax.f32 %v5844_v56, %v5876_v24  ;;  %v5750_v41 = vsel %vm19103_vm4, %v15641_v22, -1e+30  ;;  %v5781_v38 = vmax.f32 %v14713_v36, %v5749_v6  ;;  %vm19105_vm15 = vcmp.eq.s32.totalorder %v19104_v49, 1  ;;  %v19117_v17 = vld [vmem:[#allocation173_spill] sm:$0xff] }
 0x4b5   : > { %v5782_v12 = vmax.f32 %v19078_v7, %v5750_v41  ;;  %v5813_v54 = vsel %vm19105_vm15, %v19094_v58, -1e+30  ;;  %vm19107_vm5 = vcmp.eq.s32.totalorder %v19106_v37, 1  ;;  %7040 = vmatprep.mubr.msk.bf16.mxu1 %vm19108_vm12, %v5993_v46  ;;  %v5971_v34 = vmax.f32 %v5907_v25, %v5939_v26  ;;  %v19128_v26 = vld [vmem:[#allocation302_spill] sm:$0xff]  ;;  %v19130_v61 = vld [vmem:[#allocation277_spill] sm:$0xff] }
 0x4b6   : > { %v5814_v62 = vsel %vm19107_vm5, %v19097_v9, -1e+30  ;;  %v5972_v30 = vmax.f32 %v5908_v5, %v5940_v53  ;;  %vm19110_vm1 = vcmp.eq.s32.totalorder %v19109_v21, 1  ;;  %vm19112_vm10 = vcmp.eq.s32.totalorder %v19111_v31, 1  ;;  %v19132_v5 = vld [vmem:[#allocation211_spill] sm:$0xff]  ;;  %v19133_v27 = vld [vmem:[#allocation305_spill] sm:$0xff] }
 0x4b7   : > { %v5877_v4 = vsel %vm19110_vm1, %v15551_v44, -1e+30  ;;  %v5878_v35 = vsel %vm19112_vm10, %v15555_v43, -1e+30  ;;  %v5845_v48 = vmax.f32 %v5781_v38, %v5813_v54  ;;  %v5846_v1 = vmax.f32 %v5782_v12, %v5814_v62  ;;  %v19121_v44 = vld [vmem:[#allocation295_spill] sm:$0xff]  ;;  %v19135_v38 = vld [vmem:[#allocation118_spill] sm:$0xff]  ;;  %vm19146_vm10 = vmmov %vm19125_vm6 }
 0x4b8   : > { %vm19115_vm8 = vcmp.eq.s32.totalorder %v19114_v10, 1  ;;  %vm19118_vm2 = vcmp.eq.s32.totalorder %v19117_v17, 1  ;;  %v5994_v28 = vpack.c.bf16 %v5972_v30, %v5971_v34  ;;  %vm19120_vm9 = vcmp.eq.s32.totalorder %v19119_v39, 1  ;;  %v19123_v43 = vld [vmem:[#allocation171_spill] sm:$0xff]  ;;  %v19136_v12 = vld [vmem:[#allocation284_spill] sm:$0xff] }
 0x4b9   : > { %v5941_v8 = vsel %vm19115_vm8, %v19113_v45, -1e+30  ;;  %v5942_v47 = vsel %vm19118_vm2, %v19116_v14, -1e+30  ;;  %v5751_v59 = vsel %vm19120_vm9, %v14713_v36, -1e+30  ;;  %v5909_v29 = vmax.f32 %v5845_v48, %v5877_v4 }
 0x4ba   : > { %vm19122_vm14 = vcmp.eq.s32.totalorder %v19121_v44, 1  ;;  %vm19124_vm11 = vcmp.eq.s32.totalorder %v19123_v43, 1  ;;  %v5910_v23 = vmax.f32 %v5846_v1, %v5878_v35  ;;  %v5783_v52 = vmax.f32 %v19094_v58, %v5751_v59  ;;  %7041 = vmatmul.mubr.msk.bf16.gmra.mrb[0].mxu1 %vm19125_vm6, %v5994_v28  ;;  %v19138_v54 = vld [vmem:[#allocation303_spill] sm:$0xff]  ;;  %v19142_v31 = vld [vmem:[#allocation308_spill] sm:$0xff]  ;;  %v19144_v48 = vld [vmem:[#allocation225_spill] sm:$0xff] }
 0x4bb   : > { %v5752_v18 = vsel %vm19122_vm14, %v19078_v7, -1e+30  ;;  %v5815_v24 = vsel %vm19124_vm11, %v19113_v45, -1e+30  ;;  %vm19127_vm13 = vcmp.eq.s32.totalorder %v19126_v33, 1  ;;  %vm19129_vm3 = vcmp.eq.s32.totalorder %v19128_v26, 1 }
 0x4bc   : > { %v5784_v56 = vmax.f32 %v19097_v9, %v5752_v18  ;;  %v5816_v36 = vsel %vm19127_vm13, %v19116_v14, -1e+30  ;;  %v5879_v7 = vsel %vm19129_vm3, %v15639_v50, -1e+30  ;;  %vm19131_vm7 = vcmp.eq.s32.totalorder %v19130_v61, 1  ;;  %v19147_v28 = vld [vmem:[#allocation108_spill] sm:$0xff] }
 0x4bd   : > { %v5880_v53 = vsel %vm19131_vm7, %v15641_v22, -1e+30  ;;  %v5973_v63 = vmax.f32 %v5909_v29, %v5941_v8  ;;  %v5974_v6 = vmax.f32 %v5910_v23, %v5942_v47  ;;  %v5847_v46 = vmax.f32 %v5783_v52, %v5815_v24  ;;  %v19140_v22 = vld [vmem:[#allocation92_spill] sm:$0xff]  ;;  %v19149_v59 = vld [vmem:[#allocation241_spill] sm:$0xff]  ;;  %v19159_v61 = vld [vmem:[#allocation203_spill] sm:$0xff] }
 0x4be   : > { %v5848_v25 = vmax.f32 %v5784_v56, %v5816_v36  ;;  %vm19134_vm0 = vcmp.eq.s32.totalorder %v19133_v27, 1  ;;  %vm19137_vm4 = vcmp.eq.s32.totalorder %v19136_v12, 1  ;;  %vm19139_vm15 = vcmp.eq.s32.totalorder %v19138_v54, 1  ;;  %v19151_v43 = vld [vmem:[#allocation213_spill] sm:$0xff]  ;;  %v19153_v29 = vld [vmem:[#allocation184_spill] sm:$0xff] }
 0x4bf   : > { %v5943_v41 = vsel %vm19134_vm0, %v19132_v5, -1e+30  ;;  %v5944_v49 = vsel %vm19137_vm4, %v19135_v38, -1e+30  ;;  %v5755_v50 = vsel %vm19139_vm15, %v19113_v45, -1e+30  ;;  %v5995_v37 = vpack.c.bf16 %v5974_v6, %v5973_v63  ;;  %vm19166_vm0 = vmmov %vm19125_vm6 }
 0x4c0   : > { %v5911_v62 = vmax.f32 %v5847_v46, %v5879_v7  ;;  %v5912_v34 = vmax.f32 %v5848_v25, %v5880_v53  ;;  %vm19141_vm5 = vcmp.eq.s32.totalorder %v19140_v22, 1  ;;  %v5787_v21 = vmax.f32 %v19132_v5, %v5755_v50  ;;  %v19155_v52 = vld [vmem:[#allocation224_spill] sm:$0xff]  ;;  %v19161_v63 = vld [vmem:[#allocation177_spill] sm:$0xff]  ;;  %v19163_v46 = vld [vmem:[#allocation106_spill] sm:$0xff] }
 0x4c1   : > { %v5756_v30 = vsel %vm19141_vm5, %v19116_v14, -1e+30  ;;  %vm19143_vm12 = vcmp.eq.s32.totalorder %v19142_v31, 1  ;;  %vm19145_vm1 = vcmp.eq.s32.totalorder %v19144_v48, 1  ;;  %7044 = vmatprep.mubr.msk.bf16.mxu1 %vm19146_vm10, %v5995_v37  ;;  %vm19148_vm8 = vcmp.eq.s32.totalorder %v19147_v28, 1  ;;  %v19164_v25 = vld [vmem:[#allocation261_spill] sm:$0xff] }
 0x4c2   : > { %v5788_v4 = vmax.f32 %v19135_v38, %v5756_v30  ;;  %v5819_v35 = vsel %vm19143_vm12, %v14733_v0, -1e+30  ;;  %v5820_v1 = vsel %vm19145_vm1, %v14735_v55, -1e+30  ;;  %v5975_v10 = vmax.f32 %v5911_v62, %v5943_v41  ;;  %v19167_v50 = vld [vmem:[#allocation239_spill] sm:$0xff]  ;;  %v19169_v62 = vld [vmem:[#allocation214_spill] sm:$0xff] }
 0x4c3   : > { %v5976_v8 = vmax.f32 %v5912_v34, %v5944_v49  ;;  %v5851_v17 = vmax.f32 %v5787_v21, %v5819_v35  ;;  %v5883_v39 = vsel %vm19148_vm8, %v19094_v58, -1e+30  ;;  %vm19150_vm2 = vcmp.eq.s32.totalorder %v19149_v59, 1  ;;  %v19171_v22 = vld [vmem:[#allocation197_spill] sm:$0xff]  ;;  %v19173_v35 = vld [vmem:[#allocation195_spill] sm:$0xff]  ;;  %v19179_v28 = vld [vmem:[#allocation178_spill] sm:$0xff] }
 0x4c4   : > { %v5852_v47 = vmax.f32 %v5788_v4, %v5820_v1  ;;  %v5884_v44 = vsel %vm19150_vm2, %v19097_v9, -1e+30  ;;  %vm19152_vm9 = vcmp.eq.s32.totalorder %v19151_v43, 1  ;;  %vm19154_vm14 = vcmp.eq.s32.totalorder %v19153_v29, 1  ;;  %v19157_v9 = vld [vmem:[#allocation314_spill] sm:$0xff]  ;;  %v19175_v1 = vld [vmem:[#allocation127_spill] sm:$0xff] }
 0x4c5   : > { %v5996_v18 = vpack.c.bf16 %v5976_v8, %v5975_v10  ;;  %v5757_v24 = vsel %vm19152_vm9, %v19132_v5, -1e+30  ;;  %v5758_v23 = vsel %vm19154_vm14, %v19135_v38, -1e+30  ;;  %vm19156_vm11 = vcmp.eq.s32.totalorder %v19155_v52, 1 }
 0x4c6   : > { %v5821_v56 = vsel %vm19156_vm11, %v14737_v13, -1e+30  ;;  %v5915_v33 = vmax.f32 %v5851_v17, %v5883_v39  ;;  %v5916_v36 = vmax.f32 %v5852_v47, %v5884_v44  ;;  %v5789_v58 = vmax.f32 %v14733_v0, %v5757_v24  ;;  %v19183_v24 = vld [vmem:[#allocation217_spill] sm:$0xff]  ;;  %vm19187_vm11 = vmmov %vm19166_vm0 }
 0x4c7   : > { %v5790_v26 = vmax.f32 %v14735_v55, %v5758_v23  ;;  %7045 = vmatmul.mubr.msk.bf16.gmra.mrb[4].mxu1 %vm19125_vm6, %v5996_v18  ;;  %vm19158_vm13 = vcmp.eq.s32.totalorder %v19157_v9, 1  ;;  %vm19160_vm3 = vcmp.eq.s32.totalorder %v19159_v61, 1  ;;  %vm19162_vm7 = vcmp.eq.s32.totalorder %v19161_v63, 1  ;;  %vm19188_vm6 = vmmov %vm19166_vm0 }
 0x4c8   : > { %v5947_v7 = vsel %vm19158_vm13, %v14737_v13, -1e+30  ;;  %v5948_v53 = vsel %vm19160_vm3, %v15085_v19, -1e+30  ;;  %v5822_v6 = vsel %vm19162_vm7, %v15085_v19, -1e+30  ;;  %v19165_v27 = vpack.c.bf16 %v19163_v46, %v19164_v25  ;;  %vm19193_vm7 = vmmov %vm19166_vm0 }
 0x4c9   : > { %v5979_v41 = vmax.f32 %v5915_v33, %v5947_v7  ;;  %v5980_v12 = vmax.f32 %v5916_v36, %v5948_v53  ;;  %v5853_v49 = vmax.f32 %v5789_v58, %v5821_v56  ;;  %v5854_v54 = vmax.f32 %v5790_v26, %v5822_v6  ;;  %v19191_v56 = vld [vmem:[#allocation233_spill] sm:$0xff] }
 0x4ca   : > { %7048 = vmatprep.mubr.msk.bf16.mxu1 %vm19166_vm0, %v19165_v27  ;;  %vm19168_vm4 = vcmp.eq.s32.totalorder %v19167_v50, 1  ;;  %vm19170_vm15 = vcmp.eq.s32.totalorder %v19169_v62, 1  ;;  %vm19172_vm5 = vcmp.eq.s32.totalorder %v19171_v22, 1  ;;  %vm19174_vm12 = vcmp.eq.s32.totalorder %v19173_v35, 1 }
 0x4cb   : > { %v5885_v37 = vsel %vm19168_vm4, %v19113_v45, -1e+30  ;;  %v5886_v34 = vsel %vm19170_vm15, %v19116_v14, -1e+30  ;;  %v5759_v30 = vsel %vm19172_vm5, %v14733_v0, -1e+30  ;;  %v5998_v21 = vpack.c.bf16 %v5980_v12, %v5979_v41 }
 0x4cc   : > { %v5917_v4 = vmax.f32 %v5853_v49, %v5885_v37  ;;  %v5918_v31 = vmax.f32 %v5854_v54, %v5886_v34  ;;  %v5760_v48 = vsel %vm19174_vm12, %v14735_v55, -1e+30  ;;  %vm19176_vm1 = vcmp.eq.s32.totalorder %v19175_v1, 1  ;;  %v19177_v45 = vld [vmem:[#allocation229_spill] sm:$0xff]  ;;  %v19181_v55 = vld [vmem:[#allocation207_spill] sm:$0xff] }
 0x4cd   : > { %v5949_v10 = vsel %vm19176_vm1, %v15071_v20, -1e+30  ;;  %vm19178_vm10 = vcmp.eq.s32.totalorder %v19177_v45, 1  ;;  %v5791_v14 = vmax.f32 %v14737_v13, %v5759_v30  ;;  %v5792_v17 = vmax.f32 %v15085_v19, %v5760_v48  ;;  %v19185_v13 = vld [vmem:[#allocation216_spill] sm:$0xff]  ;;  %v15894_v1 = vld [vmem:[%s16157_s7] ss:$0 sm:$0xff] }
 0x4ce   : > { %v5950_v8 = vsel %vm19178_vm10, %v15075_v2, -1e+30  ;;  %v5981_v0 = vmax.f32 %v5917_v4, %v5949_v10  ;;  %vm19180_vm8 = vcmp.eq.s32.totalorder %v19179_v28, 1  ;;  %vm19182_vm2 = vcmp.eq.s32.totalorder %v19181_v55, 1 }
 0x4cf   : > { %v5982_v47 = vmax.f32 %v5918_v31, %v5950_v8  ;;  %v5823_v39 = vsel %vm19180_vm8, %v15071_v20, -1e+30  ;;  %v5824_v59 = vsel %vm19182_vm2, %v15075_v2, -1e+30  ;;  %vm19184_vm9 = vcmp.eq.s32.totalorder %v19183_v24, 1  ;;  %7049 = vmatmul.mubr.msk.bf16.gmra.mrb[8].mxu1 %vm19187_vm11, %v5998_v21  ;;  %v19189_v20 = vld [vmem:[#allocation228_spill] sm:$0xff] }
 0x4d0   : > { %v5855_v44 = vmax.f32 %v5791_v14, %v5823_v39  ;;  %v5856_v18 = vmax.f32 %v5792_v17, %v5824_v59  ;;  %v5887_v29 = vsel %vm19184_vm9, %v19132_v5, -1e+30  ;;  %vm19186_vm14 = vcmp.eq.s32.totalorder %v19185_v13, 1  ;;  %v15889_v31 = vld [vmem:[%s16156_s6] ss:$0 sm:$0xff] }
 0x4d1   : > { %v5999_v43 = vpack.c.bf16 %v5982_v47, %v5981_v0  ;;  %v5888_v19 = vsel %vm19186_vm14, %v19135_v38, -1e+30  ;;  %vm19190_vm13 = vcmp.eq.s32.totalorder %v19189_v20, 1  ;;  %vm19192_vm3 = vcmp.eq.s32.totalorder %v19191_v56, 1  ;;  %v15854_v38 = vpop.f32.mrb[56].mxu0 }
 0x4d2   : > { %v5919_v23 = vmax.f32 %v5855_v44, %v5887_v29  ;;  %v5920_v52 = vmax.f32 %v5856_v18, %v5888_v19  ;;  %v5951_v2 = vsel %vm19190_vm13, %v15077_v40, -1e+30  ;;  %v5952_v33 = vsel %vm19192_vm3, %v15079_v32, -1e+30  ;;  %v15856_v26 = vpop.f32.mrb[57].mxu0 }
 0x4d3   : > { %7052 = vmatprep.mubr.msk.bf16.mxu1 %vm19188_vm6, %v5999_v43  ;;  %v15858_v9 = vpop.f32.mrb[58].mxu0  ;;  %vm6549_vm0 = vcmask 64512  }
 0x4d4   : > { %v5983_v36 = vmax.f32 %v5919_v23, %v5951_v2  ;;  %v5984_v5 = vmax.f32 %v5920_v52, %v5952_v33  ;;  %v15860_v7 = vpop.f32.mrb[59].mxu0 }
 0x4d6   : > { %v6000_v58 = vpack.c.bf16 %v5984_v5, %v5983_v36 }
 0x4d8   : > { %7053 = vmatmul.mubr.msk.bf16.gmra.mrb[12].mxu1 %vm19193_vm7, %v6000_v58  ;;  %v15862_v61 = vpop.f32.mrb[60].mxu0 }
 0x4d9   : > { %v15864_v40 = vpop.f32.mrb[61].mxu0 }
 0x4da   : > { %v15866_v53 = vpop.f32.mrb[62].mxu0 }
 0x4db   : > { %v15868_v32 = vpop.f32.mrb[63].mxu0 }
 0x4e2   : > { %v6958_v63 = vpop.f32.mrb[32].mxu0 }
 0x4e3   : > { %v4060_v6 = vpop.f32.mrb[33].mxu0 }
 0x4e4   : > { %v6959_v46 = vpop.f32.mrb[34].mxu0 }
 0x4e5   : > { %v4063_v25 = vpop.f32.mrb[35].mxu0 }
 0x4ef   : > { %v6962_v27 = vpop.f32.mrb[36].mxu0 }
 0x4f0   : > { %v4076_v41 = vpop.f32.mrb[37].mxu0 }
 0x4f1   : > { %v6963_v12 = vpop.f32.mrb[38].mxu0 }
 0x4f2   : > { %v4079_v49 = vpop.f32.mrb[39].mxu0 }
 0x4fa   : > { %v15870_v54 = vpop.f32.mrb[40].mxu0 }
 0x4fb   : > { %v15872_v50 = vpop.f32.mrb[41].mxu0 }
 0x4fc   : > { %v15874_v37 = vpop.f32.mrb[42].mxu0 }
 0x4fd   : > { %v15876_v62 = vpop.f32.mrb[43].mxu0 }
 0x506   : > { %v15878_v34 = vpop.f32.mrb[44].mxu0 }
 0x507   : > { %v15880_v22 = vpop.f32.mrb[45].mxu0 }
 0x508   : > { %v15882_v30 = vpop.f32.mrb[46].mxu0 }
 0x509   : > { %v15884_v21 = vpop.f32.mrb[47].mxu0 }
 0x51d   : > { %v7026_v4 = vpop.f32.mrb[16].mxu1 }
 0x51e   : > { %v7058_v35 = vadd.f32 %v7026_v4, %v6958_v63  ;;  %v6088_v48 = vpop.f32.mrb[17].mxu1 }
 0x51f   : > { %v7059_v10 = vadd.f32 %v6088_v48, %v4060_v6  ;;  %v7027_v45 = vpop.f32.mrb[18].mxu1 }
 0x520   : > { %v6256_v8 = vmul.f32 %v7058_v35, %v15889_v31  ;;  %v7060_v14 = vadd.f32 %v7027_v45, %v6959_v46  ;;  %v6091_v17 = vpop.f32.mrb[19].mxu1 }
 0x521   : > { %v6254_v0 = vmul.f32 %v7059_v10, %v15889_v31  ;;  %v7061_v47 = vadd.f32 %v6091_v17, %v4063_v25 }
 0x522   : > { %v6295_v28 = vadd.f32 %v15894_v1, %v6256_v8  ;;  %v6257_v39 = vmul.f32 %v7060_v14, %v15889_v31 }
 0x523   : > { %v6293_v55 = vadd.f32 %v15894_v1, %v6254_v0  ;;  %v6255_v59 = vmul.f32 %v7061_v47, %v15889_v31 }
 0x524   : > { %v6767_v44 = vmul.f32 -1.442695, %v6295_v28  ;;  %v6296_v18 = vadd.f32 %v15894_v1, %v6257_v39 }
 0x525   : > { %v6765_v43 = vmul.f32 -1.442695, %v6293_v55  ;;  %v6294_v24 = vadd.f32 %v15894_v1, %v6255_v59 }
 0x526   : > { %7299 = vpow2.f32 %v6767_v44  ;;  %v6768_v29 = vmul.f32 -1.442695, %v6296_v18 }
 0x527   : > { %7301 = vpow2.f32 %v6765_v43  ;;  %v6766_v13 = vmul.f32 -1.442695, %v6294_v24 }
 0x528   : > { %7303 = vpow2.f32 %v6768_v29 }
 0x529   : > { %7305 = vpow2.f32 %v6766_v13 }
 0x530   : > { %v7300_v19 = vpop.eup %7299 }
 0x531   : > { %v7302_v23 = vpop.eup %7301  ;;  %v6423_v52 = vadd.f32 1.0, %v7300_v19 }
 0x532   : > { %v7304_v20 = vpop.eup %7303  ;;  %v6421_v2 = vadd.f32 1.0, %v7302_v23 }
 0x533   : > { %v7306_v56 = vpop.eup %7305  ;;  %7307 = vrcp.f32 %v6423_v52  ;;  %v6424_v33 = vadd.f32 1.0, %v7304_v20 }
 0x534   : > { %7309 = vrcp.f32 %v6421_v2  ;;  %v6422_v36 = vadd.f32 1.0, %v7306_v56 }
 0x535   : > { %7311 = vrcp.f32 %v6424_v33 }
 0x536   : > { %7313 = vrcp.f32 %v6422_v36 }
 0x53f   : > { %v7030_v5 = vpop.f32.mrb[20].mxu1 }
 0x540   : > { %v7062_v58 = vadd.f32 %v7030_v5, %v6962_v27  ;;  %v6104_v63 = vpop.f32.mrb[21].mxu1 }
 0x541   : > { %v7063_v6 = vadd.f32 %v6104_v63, %v4076_v41  ;;  %v7031_v46 = vpop.f32.mrb[22].mxu1  ;;  %v7308_v41 = vpop.eup %7307 }
 0x542   : > { %v6260_v25 = vmul.f32 %v7062_v58, %v15889_v31  ;;  %v7064_v4 = vadd.f32 %v7031_v46, %v6963_v12  ;;  %v6107_v35 = vpop.f32.mrb[23].mxu1  ;;  %v7310_v47 = vpop.eup %7309  ;;  %v6519_v39 = vmul.f32 %v7308_v41, %v6295_v28 }
 0x543   : > { %v6258_v48 = vmul.f32 %v7063_v6, %v15889_v31  ;;  %v7065_v10 = vadd.f32 %v6107_v35, %v4079_v49  ;;  %v7312_v44 = vpop.eup %7311  ;;  %v6517_v43 = vmul.f32 %v7310_v47, %v6293_v55 }
 0x544   : > { %v6299_v45 = vadd.f32 %v15894_v1, %v6260_v25  ;;  %v6261_v8 = vmul.f32 %v7064_v4, %v15889_v31  ;;  %v7314_v13 = vpop.eup %7313  ;;  %6552 = vst.msk [vmem:[%s15916_s16 + $0x10] sm:$0xff] %vm6549_vm0, %v6519_v39  ;;  %v6520_v19 = vmul.f32 %v7312_v44, %v6296_v18 }
 0x545   : > { %v6297_v14 = vadd.f32 %v15894_v1, %v6258_v48  ;;  %v6259_v17 = vmul.f32 %v7065_v10, %v15889_v31  ;;  %6550 = vst.msk [vmem:[%s15916_s16] sm:$0xff] %vm6549_vm0, %v6517_v43  ;;  %v6518_v23 = vmul.f32 %v7314_v13, %v6294_v24 }
 0x546   : > { %v6771_v27 = vmul.f32 -1.442695, %v6299_v45  ;;  %v6300_v0 = vadd.f32 %v15894_v1, %v6261_v8  ;;  %6553 = vst.msk [vmem:[%s15916_s16 + $0x18] sm:$0xff] %vm6549_vm0, %v6520_v19 }
 0x547   : > { %v6769_v12 = vmul.f32 -1.442695, %v6297_v14  ;;  %v6298_v49 = vadd.f32 %v15894_v1, %v6259_v17  ;;  %6551 = vst.msk [vmem:[%s15916_s16 + $0x8] sm:$0xff] %vm6549_vm0, %v6518_v23 }
 0x548   : > { %7315 = vpow2.f32 %v6771_v27  ;;  %v6772_v59 = vmul.f32 -1.442695, %v6300_v0 }
 0x549   : > { %7317 = vpow2.f32 %v6769_v12  ;;  %v6770_v29 = vmul.f32 -1.442695, %v6298_v49 }
 0x54a   : > { %7319 = vpow2.f32 %v6772_v59 }
 0x54b   : > { %7321 = vpow2.f32 %v6770_v29 }
 0x552   : > { %v7316_v28 = vpop.eup %7315 }
 0x553   : > { %v7318_v52 = vpop.eup %7317  ;;  %v6427_v20 = vadd.f32 1.0, %v7316_v28 }
 0x554   : > { %v7320_v2 = vpop.eup %7319  ;;  %v6425_v55 = vadd.f32 1.0, %v7318_v52 }
 0x555   : > { %v7322_v56 = vpop.eup %7321  ;;  %7323 = vrcp.f32 %v6427_v20  ;;  %v6428_v33 = vadd.f32 1.0, %v7320_v2 }
 0x556   : > { %7325 = vrcp.f32 %v6425_v55  ;;  %v6426_v36 = vadd.f32 1.0, %v7322_v56 }
 0x557   : > { %7327 = vrcp.f32 %v6428_v33 }
 0x558   : > { %7329 = vrcp.f32 %v6426_v36 }
 0x55f   : > { %v7324_v8 = vpop.eup %7323 }
 0x560   : > { %v7326_v27 = vpop.eup %7325  ;;  %v6523_v41 = vmul.f32 %v7324_v8, %v6299_v45 }
 0x561   : > { %v7034_v18 = vpop.f32.mrb[24].mxu1  ;;  %v7328_v47 = vpop.eup %7327  ;;  %v6521_v39 = vmul.f32 %v7326_v27, %v6297_v14 }
 0x562   : > { %v7066_v24 = vadd.f32 %v7034_v18, %v15870_v54  ;;  %v6120_v5 = vpop.f32.mrb[25].mxu1  ;;  %v7330_v44 = vpop.eup %7329  ;;  %6556 = vst.msk [vmem:[%s15916_s16 + $0x30] sm:$0xff] %vm6549_vm0, %v6523_v41  ;;  %v6524_v43 = vmul.f32 %v7328_v47, %v6300_v0 }
 0x563   : > { %v7067_v58 = vadd.f32 %v6120_v5, %v15872_v50  ;;  %v7035_v63 = vpop.f32.mrb[26].mxu1  ;;  %6554 = vst.msk [vmem:[%s15916_s16 + $0x20] sm:$0xff] %vm6549_vm0, %v6521_v39  ;;  %v6522_v45 = vmul.f32 %v7330_v44, %v6298_v49 }
 0x564   : > { %v6264_v6 = vmul.f32 %v7066_v24, %v15889_v31  ;;  %v7068_v46 = vadd.f32 %v7035_v63, %v15874_v37  ;;  %v6123_v25 = vpop.f32.mrb[27].mxu1  ;;  %6557 = vst.msk [vmem:[%s15916_s16 + $0x38] sm:$0xff] %vm6549_vm0, %v6524_v43 }
 0x565   : > { %v6262_v4 = vmul.f32 %v7067_v58, %v15889_v31  ;;  %v7069_v35 = vadd.f32 %v6123_v25, %v15876_v62  ;;  %6555 = vst.msk [vmem:[%s15916_s16 + $0x28] sm:$0xff] %vm6549_vm0, %v6522_v45 }
 0x566   : > { %v6303_v48 = vadd.f32 %v15894_v1, %v6264_v6  ;;  %v6265_v10 = vmul.f32 %v7068_v46, %v15889_v31 }
 0x567   : > { %v15936_v54 = vadd.f32 %v15894_v1, %v6262_v4  ;;  %v6263_v50 = vmul.f32 %v7069_v35, %v15889_v31 }
 0x568   : > { %v6775_v17 = vmul.f32 -1.442695, %v6303_v48  ;;  %v15940_v37 = vadd.f32 %v15894_v1, %v6265_v10 }
 0x569   : > { %v6773_v62 = vmul.f32 -1.442695, %v15936_v54  ;;  %v15944_v12 = vadd.f32 %v15894_v1, %v6263_v50 }
 0x56a   : > { %7331 = vpow2.f32 %v6775_v17  ;;  %v6776_v59 = vmul.f32 -1.442695, %v15940_v37 }
 0x56b   : > { %7333 = vpow2.f32 %v6773_v62  ;;  %v6774_v29 = vmul.f32 -1.442695, %v15944_v12 }
 0x56c   : > { %7335 = vpow2.f32 %v6776_v59 }
 0x56d   : > { %7337 = vpow2.f32 %v6774_v29 }
 0x574   : > { %v7332_v14 = vpop.eup %7331 }
 0x575   : > { %v7334_v13 = vpop.eup %7333  ;;  %v6431_v19 = vadd.f32 1.0, %v7332_v14 }
 0x576   : > { %v7336_v23 = vpop.eup %7335  ;;  %v6429_v28 = vadd.f32 1.0, %v7334_v13 }
 0x577   : > { %v7338_v52 = vpop.eup %7337  ;;  %7339 = vrcp.f32 %v6431_v19  ;;  %v6432_v0 = vadd.f32 1.0, %v7336_v23 }
 0x578   : > { %7341 = vrcp.f32 %v6429_v28  ;;  %v6430_v20 = vadd.f32 1.0, %v7338_v52 }
 0x579   : > { %7343 = vrcp.f32 %v6432_v0 }
 0x57a   : > { %7345 = vrcp.f32 %v6430_v20 }
 0x583   : > { %v7038_v2 = vpop.f32.mrb[28].mxu1 }
 0x584   : > { %v7070_v49 = vadd.f32 %v7038_v2, %v15878_v34  ;;  %v6136_v55 = vpop.f32.mrb[29].mxu1 }
 0x585   : > { %v7071_v56 = vadd.f32 %v6136_v55, %v15880_v22  ;;  %v7039_v33 = vpop.f32.mrb[30].mxu1 }
 0x586   : > { %v6268_v36 = vmul.f32 %v7070_v49, %v15889_v31  ;;  %v7072_v18 = vadd.f32 %v7039_v33, %v15882_v30  ;;  %v6139_v24 = vpop.f32.mrb[31].mxu1 }
 0x587   : > { %v6266_v5 = vmul.f32 %v7071_v56, %v15889_v31  ;;  %v7073_v58 = vadd.f32 %v6139_v24, %v15884_v21  ;;  %v7340_v21 = vpop.eup %7339 }
 0x588   : > { %v15963_v63 = vadd.f32 %v15894_v1, %v6268_v36  ;;  %v6269_v6 = vmul.f32 %v7072_v18, %v15889_v31  ;;  %v7342_v50 = vpop.eup %7341  ;;  %v6527_v8 = vmul.f32 %v7340_v21, %v6303_v48 }
 0x589   : > { %v15967_v34 = vadd.f32 %v15894_v1, %v6266_v5  ;;  %v6267_v22 = vmul.f32 %v7073_v58, %v15889_v31  ;;  %v7344_v62 = vpop.eup %7343  ;;  %v6525_v47 = vmul.f32 %v7342_v50, %v15936_v54 }
 0x58a   : > { %v6779_v46 = vmul.f32 -1.442695, %v15963_v63  ;;  %v15972_v25 = vadd.f32 %v15894_v1, %v6269_v6  ;;  %v7346_v44 = vpop.eup %7345  ;;  %6560 = vst.msk [vmem:[%s15916_s16 + $0x50] sm:$0xff] %vm6549_vm0, %v6527_v8  ;;  %v6528_v48 = vmul.f32 %v7344_v62, %v15940_v37 }
 0x58b   : > { %v6777_v30 = vmul.f32 -1.442695, %v15967_v34  ;;  %v15976_v4 = vadd.f32 %v15894_v1, %v6267_v22  ;;  %6558 = vst.msk [vmem:[%s15916_s16 + $0x40] sm:$0xff] %vm6549_vm0, %v6525_v47  ;;  %v6526_v54 = vmul.f32 %v7346_v44, %v15944_v12 }
 0x58c   : > { %7347 = vpow2.f32 %v6779_v46  ;;  %v6780_v35 = vmul.f32 -1.442695, %v15972_v25  ;;  %6561 = vst.msk [vmem:[%s15916_s16 + $0x58] sm:$0xff] %vm6549_vm0, %v6528_v48 }
 0x58d   : > { %v7042_v10 = vpop.f32.mrb[0].mxu1  ;;  %7349 = vpow2.f32 %v6777_v30  ;;  %v6778_v17 = vmul.f32 -1.442695, %v15976_v4  ;;  %6559 = vst.msk [vmem:[%s15916_s16 + $0x48] sm:$0xff] %vm6549_vm0, %v6526_v54 }
 0x58e   : > { %v7074_v27 = vadd.f32 %v7042_v10, %v15359_v15  ;;  %v6152_v41 = vpop.f32.mrb[1].mxu1  ;;  %7351 = vpow2.f32 %v6780_v35 }
 0x58f   : > { %v7075_v39 = vadd.f32 %v6152_v41, %v15369_v3  ;;  %v7043_v59 = vpop.f32.mrb[2].mxu1  ;;  %7353 = vpow2.f32 %v6778_v17 }
 0x590   : > { %v6272_v43 = vmul.f32 %v7074_v27, %v15889_v31  ;;  %v7076_v15 = vadd.f32 %v7043_v59, %v15376_v11  ;;  %v6155_v29 = vpop.f32.mrb[3].mxu1 }
 0x591   : > { %v6270_v45 = vmul.f32 %v7075_v39, %v15889_v31  ;;  %v7077_v3 = vadd.f32 %v6155_v29, %v15381_v60 }
 0x592   : > { %v15996_v14 = vadd.f32 %v15894_v1, %v6272_v43  ;;  %v6273_v37 = vmul.f32 %v7076_v15, %v15889_v31 }
 0x593   : > { %v16002_v11 = vadd.f32 %v15894_v1, %v6270_v45  ;;  %v6271_v13 = vmul.f32 %v7077_v3, %v15889_v31 }
 0x594   : > { %v6783_v12 = vmul.f32 -1.442695, %v15996_v14  ;;  %v16007_v19 = vadd.f32 %v15894_v1, %v6273_v37 }
 0x595   : > { %v6781_v60 = vmul.f32 -1.442695, %v16002_v11  ;;  %v16011_v23 = vadd.f32 %v15894_v1, %v6271_v13 }
 0x596   : > { %7355 = vpow2.f32 %v6783_v12  ;;  %v6784_v28 = vmul.f32 -1.442695, %v16007_v19  ;;  %v7348_v0 = vpop.eup %7347 }
 0x597   : > { %7357 = vpow2.f32 %v6781_v60  ;;  %v6782_v20 = vmul.f32 -1.442695, %v16011_v23  ;;  %v7350_v55 = vpop.eup %7349  ;;  %v6435_v56 = vadd.f32 1.0, %v7348_v0 }
 0x598   : > { %7359 = vpow2.f32 %v6784_v28  ;;  %v7352_v18 = vpop.eup %7351  ;;  %v6433_v24 = vadd.f32 1.0, %v7350_v55 }
 0x599   : > { %7361 = vpow2.f32 %v6782_v20  ;;  %v7354_v22 = vpop.eup %7353  ;;  %v6436_v46 = vadd.f32 1.0, %v7352_v18 }
 0x59a   : > { %v7046_v52 = vpop.f32.mrb[4].mxu1  ;;  %7363 = vrcp.f32 %v6435_v56  ;;  %v6434_v21 = vadd.f32 1.0, %v7354_v22 }
 0x59b   : > { %v7078_v2 = vadd.f32 %v7046_v52, %v15689_v42  ;;  %v6168_v49 = vpop.f32.mrb[5].mxu1  ;;  %7365 = vrcp.f32 %v6433_v24 }
 0x59c   : > { %v7079_v33 = vadd.f32 %v6168_v49, %v15701_v51  ;;  %v7047_v36 = vpop.f32.mrb[6].mxu1  ;;  %7367 = vrcp.f32 %v6436_v46 }
 0x59d   : > { %v6276_v5 = vmul.f32 %v7078_v2, %v15889_v31  ;;  %v7080_v58 = vadd.f32 %v7047_v36, %v15715_v57  ;;  %v6171_v6 = vpop.f32.mrb[7].mxu1  ;;  %7369 = vrcp.f32 %v6434_v21 }
 0x59e   : > { %v6274_v42 = vmul.f32 %v7079_v33, %v15889_v31  ;;  %v7081_v30 = vadd.f32 %v6171_v6, %v15725_v16 }
 0x59f   : > { %v16022_v51 = vadd.f32 %v15894_v1, %v6276_v5  ;;  %v6277_v35 = vmul.f32 %v7080_v58, %v15889_v31 }
 0x5a0   : > { %v16026_v10 = vadd.f32 %v15894_v1, %v6274_v42  ;;  %v6275_v57 = vmul.f32 %v7081_v30, %v15889_v31  ;;  %v7356_v39 = vpop.eup %7355 }
 0x5a1   : > { %v6787_v50 = vmul.f32 -1.442695, %v16022_v51  ;;  %v16031_v8 = vadd.f32 %v15894_v1, %v6277_v35  ;;  %v7358_v43 = vpop.eup %7357  ;;  %v6439_v15 = vadd.f32 1.0, %v7356_v39 }
 0x5a2   : > { %v6785_v16 = vmul.f32 -1.442695, %v16026_v10  ;;  %v16035_v17 = vadd.f32 %v15894_v1, %v6275_v57  ;;  %v7050_v27 = vpop.f32.mrb[8].mxu1  ;;  %v7360_v3 = vpop.eup %7359  ;;  %v6437_v37 = vadd.f32 1.0, %v7358_v43 }
 0x5a3   : > { %7371 = vpow2.f32 %v6787_v50  ;;  %v6788_v41 = vmul.f32 -1.442695, %v16031_v8  ;;  %v7082_v62 = vadd.f32 %v7050_v27, %v15854_v38  ;;  %v6184_v47 = vpop.f32.mrb[9].mxu1  ;;  %v7362_v12 = vpop.eup %7361  ;;  %v6440_v60 = vadd.f32 1.0, %v7360_v3 }
 0x5a4   : > { %7373 = vpow2.f32 %v6785_v16  ;;  %v6786_v59 = vmul.f32 -1.442695, %v16035_v17  ;;  %v7083_v44 = vadd.f32 %v6184_v47, %v15856_v26  ;;  %v7051_v48 = vpop.f32.mrb[10].mxu1  ;;  %v7364_v52 = vpop.eup %7363 }
 0x5a5   : > { %7375 = vpow2.f32 %v6788_v41  ;;  %v6280_v29 = vmul.f32 %v7082_v62, %v15889_v31  ;;  %v7084_v54 = vadd.f32 %v7051_v48, %v15858_v9  ;;  %v6187_v45 = vpop.f32.mrb[11].mxu1  ;;  %v6438_v9 = vadd.f32 1.0, %v7362_v12  ;;  %v7366_v2 = vpop.eup %7365 }
 0x5a6   : > { %7377 = vpow2.f32 %v6786_v59  ;;  %v6278_v38 = vmul.f32 %v7083_v44, %v15889_v31  ;;  %v7085_v13 = vadd.f32 %v6187_v45, %v15860_v7  ;;  %v6531_v7 = vmul.f32 %v7364_v52, %v15963_v63  ;;  %v7368_v56 = vpop.eup %7367 }
 0x5a7   : > { %7379 = vrcp.f32 %v6439_v15  ;;  %v16046_v26 = vadd.f32 %v15894_v1, %v6280_v29  ;;  %v6281_v28 = vmul.f32 %v7084_v54, %v15889_v31  ;;  %v6529_v33 = vmul.f32 %v7366_v2, %v15967_v34  ;;  %v7370_v5 = vpop.eup %7369 }
 0x5a8   : > { %7381 = vrcp.f32 %v6437_v37  ;;  %v16050_v0 = vadd.f32 %v15894_v1, %v6278_v38  ;;  %v6279_v20 = vmul.f32 %v7085_v13, %v15889_v31  ;;  %6564 = vst.msk [vmem:[%s15916_s16 + $0x70] sm:$0xff] %vm6549_vm0, %v6531_v7  ;;  %v6532_v63 = vmul.f32 %v7368_v56, %v15972_v25 }
 0x5a9   : > { %7383 = vrcp.f32 %v6440_v60  ;;  %v6791_v49 = vmul.f32 -1.442695, %v16046_v26  ;;  %v16056_v55 = vadd.f32 %v15894_v1, %v6281_v28  ;;  %6562 = vst.msk [vmem:[%s15916_s16 + $0x60] sm:$0xff] %vm6549_vm0, %v6529_v33  ;;  %v6530_v22 = vmul.f32 %v7370_v5, %v15976_v4 }
 0x5aa   : > { %7385 = vrcp.f32 %v6438_v9  ;;  %v6789_v36 = vmul.f32 -1.442695, %v16050_v0  ;;  %v16061_v18 = vadd.f32 %v15894_v1, %v6279_v20  ;;  %6565 = vst.msk [vmem:[%s15916_s16 + $0x78] sm:$0xff] %vm6549_vm0, %v6532_v63 }
 0x5ab   : > { %v7054_v24 = vpop.f32.mrb[12].mxu1  ;;  %7387 = vpow2.f32 %v6791_v49  ;;  %v6792_v58 = vmul.f32 -1.442695, %v16056_v55  ;;  %6563 = vst.msk [vmem:[%s15916_s16 + $0x68] sm:$0xff] %vm6549_vm0, %v6530_v22 }
 0x5ac   : > { %v7086_v6 = vadd.f32 %v7054_v24, %v15862_v61  ;;  %v6200_v34 = vpop.f32.mrb[13].mxu1  ;;  %7389 = vpow2.f32 %v6789_v36  ;;  %v6790_v46 = vmul.f32 -1.442695, %v16061_v18 }
 0x5ad   : > { %v7087_v42 = vadd.f32 %v6200_v34, %v15864_v40  ;;  %v7055_v30 = vpop.f32.mrb[14].mxu1  ;;  %v7372_v21 = vpop.eup %7371  ;;  %7391 = vpow2.f32 %v6792_v58 }
 0x5ae   : > { %v6284_v25 = vmul.f32 %v7086_v6, %v15889_v31  ;;  %v7088_v35 = vadd.f32 %v7055_v30, %v15866_v53  ;;  %v6203_v61 = vpop.f32.mrb[15].mxu1  ;;  %v7374_v57 = vpop.eup %7373  ;;  %v6443_v50 = vadd.f32 1.0, %v7372_v21  ;;  %7393 = vpow2.f32 %v6790_v46 }
 0x5af   : > { %v6282_v4 = vmul.f32 %v7087_v42, %v15889_v31  ;;  %v7089_v16 = vadd.f32 %v6203_v61, %v15868_v32  ;;  %v7376_v40 = vpop.eup %7375  ;;  %v6441_v27 = vadd.f32 1.0, %v7374_v57 }
 0x5b0   : > { %v16082_v41 = vadd.f32 %v15894_v1, %v6284_v25  ;;  %v6285_v62 = vmul.f32 %v7088_v35, %v15889_v31  ;;  %v7378_v47 = vpop.eup %7377  ;;  %7395 = vrcp.f32 %v6443_v50  ;;  %v6444_v53 = vadd.f32 1.0, %v7376_v40 }
 0x5b1   : > { %v16086_v39 = vadd.f32 %v15894_v1, %v6282_v4  ;;  %v6283_v59 = vmul.f32 %v7089_v16, %v15889_v31  ;;  %v7380_v44 = vpop.eup %7379  ;;  %7397 = vrcp.f32 %v6441_v27  ;;  %v6442_v48 = vadd.f32 1.0, %v7378_v47 }
 0x5b2   : > { %v6795_v32 = vmul.f32 -1.442695, %v16082_v41  ;;  %v16091_v43 = vadd.f32 %v15894_v1, %v6285_v62  ;;  %v7382_v15 = vpop.eup %7381  ;;  %v6535_v29 = vmul.f32 %v7380_v44, %v15996_v14  ;;  %7399 = vrcp.f32 %v6444_v53 }
 0x5b3   : > { %v6793_v54 = vmul.f32 -1.442695, %v16086_v39  ;;  %v16096_v45 = vadd.f32 %v15894_v1, %v6283_v59  ;;  %v7384_v31 = vpop.eup %7383  ;;  %v6533_v3 = vmul.f32 %v7382_v15, %v16002_v11  ;;  %7401 = vrcp.f32 %v6442_v48 }
 0x5b4   : > { %v6796_v37 = vmul.f32 -1.442695, %v16091_v43  ;;  %v7386_v38 = vpop.eup %7385  ;;  %6568 = vst.msk [vmem:[%s15916_s16 + $0x90] sm:$0xff] %vm6549_vm0, %v6535_v29  ;;  %v6536_v13 = vmul.f32 %v7384_v31, %v16007_v19  ;;  %7403 = vpow2.f32 %v6795_v32 }
 0x5b5   : > { %v6794_v14 = vmul.f32 -1.442695, %v16096_v45  ;;  %v7388_v12 = vpop.eup %7387  ;;  %6566 = vst.msk [vmem:[%s15916_s16 + $0x80] sm:$0xff] %vm6549_vm0, %v6533_v3  ;;  %v6534_v1 = vmul.f32 %v7386_v38, %v16011_v23  ;;  %7405 = vpow2.f32 %v6793_v54 }
 0x5b6   : > { %v7390_v60 = vpop.eup %7389  ;;  %6569 = vst.msk [vmem:[%s15916_s16 + $0x98] sm:$0xff] %vm6549_vm0, %v6536_v13  ;;  %v6447_v11 = vadd.f32 1.0, %v7388_v12  ;;  %7407 = vpow2.f32 %v6796_v37 }
 0x5b7   : > { %v7392_v28 = vpop.eup %7391  ;;  %6567 = vst.msk [vmem:[%s15916_s16 + $0x88] sm:$0xff] %vm6549_vm0, %v6534_v1  ;;  %v6445_v52 = vadd.f32 1.0, %v7390_v60  ;;  %7409 = vpow2.f32 %v6794_v14 }
 0x5b8   : > { %v7394_v19 = vpop.eup %7393  ;;  %7411 = vrcp.f32 %v6447_v11  ;;  %v6448_v9 = vadd.f32 1.0, %v7392_v28 }
 0x5b9   : > { %7413 = vrcp.f32 %v6445_v52  ;;  %v6446_v20 = vadd.f32 1.0, %v7394_v19 }
 0x5ba   : > { %v7396_v23 = vpop.eup %7395  ;;  %7415 = vrcp.f32 %v6448_v9 }
 0x5bb   : > { %v7398_v2 = vpop.eup %7397  ;;  %v6539_v7 = vmul.f32 %v7396_v23, %v16022_v51  ;;  %7417 = vrcp.f32 %v6446_v20 }
 0x5bc   : > { %v7400_v49 = vpop.eup %7399  ;;  %v6537_v56 = vmul.f32 %v7398_v2, %v16026_v10 }
 0x5bd   : > { %v7402_v33 = vpop.eup %7401  ;;  %6572 = vst.msk [vmem:[%s15916_s16 + $0xb0] sm:$0xff] %vm6549_vm0, %v6539_v7  ;;  %v6540_v36 = vmul.f32 %v7400_v49, %v16031_v8 }
 0x5be   : > { %v7404_v24 = vpop.eup %7403  ;;  %6570 = vst.msk [vmem:[%s15916_s16 + $0xa0] sm:$0xff] %vm6549_vm0, %v6537_v56  ;;  %v6538_v5 = vmul.f32 %v7402_v33, %v16035_v17 }
 0x5bf   : > { %v7406_v63 = vpop.eup %7405  ;;  %6573 = vst.msk [vmem:[%s15916_s16 + $0xb8] sm:$0xff] %vm6549_vm0, %v6540_v36  ;;  %v6451_v58 = vadd.f32 1.0, %v7404_v24 }
 0x5c0   : > { %v7408_v6 = vpop.eup %7407  ;;  %6571 = vst.msk [vmem:[%s15916_s16 + $0xa8] sm:$0xff] %vm6549_vm0, %v6538_v5  ;;  %v6449_v51 = vadd.f32 1.0, %v7406_v63 }
 0x5c1   : > { %v7410_v10 = vpop.eup %7409  ;;  %7419 = vrcp.f32 %v6451_v58  ;;  %v6452_v34 = vadd.f32 1.0, %v7408_v6 }
 0x5c2   : > { %v7412_v8 = vpop.eup %7411  ;;  %7421 = vrcp.f32 %v6449_v51  ;;  %v6450_v22 = vadd.f32 1.0, %v7410_v10 }
 0x5c3   : > { %v7414_v46 = vpop.eup %7413  ;;  %v6543_v17 = vmul.f32 %v7412_v8, %v16046_v26  ;;  %7423 = vrcp.f32 %v6452_v34 }
 0x5c4   : > { %v7416_v42 = vpop.eup %7415  ;;  %v6541_v30 = vmul.f32 %v7414_v46, %v16050_v0  ;;  %7425 = vrcp.f32 %v6450_v22 }
 0x5c5   : > { %v7418_v21 = vpop.eup %7417  ;;  %6576 = vst.msk [vmem:[%s15916_s16 + $0xd0] sm:$0xff] %vm6549_vm0, %v6543_v17  ;;  %v6544_v25 = vmul.f32 %v7416_v42, %v16056_v55 }
 0x5c6   : > { %6574 = vst.msk [vmem:[%s15916_s16 + $0xc0] sm:$0xff] %vm6549_vm0, %v6541_v30  ;;  %v6542_v35 = vmul.f32 %v7418_v21, %v16061_v18 }
 0x5c7   : > { %6577 = vst.msk [vmem:[%s15916_s16 + $0xd8] sm:$0xff] %vm6549_vm0, %v6544_v25 }
 0x5c8   : > { %6575 = vst.msk [vmem:[%s15916_s16 + $0xc8] sm:$0xff] %vm6549_vm0, %v6542_v35 }
 0x5cb   : > { %v7420_v26 = vpop.eup %7419 }
 0x5cc   : > { %v7422_v61 = vpop.eup %7421  ;;  %v6547_v0 = vmul.f32 %v7420_v26, %v16082_v41 }
 0x5cd   : > { %v7424_v57 = vpop.eup %7423  ;;  %v6545_v50 = vmul.f32 %v7422_v61, %v16086_v39 }
 0x5ce   : > { %v7426_v4 = vpop.eup %7425  ;;  %6580 = vst.msk [vmem:[%s15916_s16 + $0xf0] sm:$0xff] %vm6549_vm0, %v6547_v0  ;;  %v6548_v55 = vmul.f32 %v7424_v57, %v16091_v43 }
 0x5cf   : > { %6578 = vst.msk [vmem:[%s15916_s16 + $0xe0] sm:$0xff] %vm6549_vm0, %v6545_v50  ;;  %v6546_v18 = vmul.f32 %v7426_v4, %v16096_v45 }
 0x5d0   : > { %6581 = vst.msk [vmem:[%s15916_s16 + $0xf8] sm:$0xff] %vm6549_vm0, %v6548_v55 }
 0x5d1   : > { %6579 = vst.msk [vmem:[%s15916_s16 + $0xe8] sm:$0xff] %vm6549_vm0, %v6546_v18 }
 0x5d2 PF: > { %s18_s27 = sadd.s32 1, %s7507_s27  }
 0x5d3   : > { %p15_p4 = scmp.ge.s32.totalorder %s18_s27, 4  }
 0x5d5   :  { %17 = sbr.rel (!%p15_p4) target bundleno = 1 (0x1), region = 85 }

</bundles_post_ra>
